<compile_context>
chip_gen: v7x
topology: tpu7x:2x2x1
jax: 0.10.0
libtpu: 0.0.40
codegen_flags: <defaults>
</compile_context>

<pallas_src>
import functools

import jax
import jax.numpy as jnp
from jax import lax
from jax.experimental import pallas as pl
from jax.experimental.pallas import tpu as pltpu

LEAKY_SLOPE = 0.1
BN_EPS = 1e-5
HIDDEN_LAYER = [8, 16, 32, 32]
FC_LAYER = [HIDDEN_LAYER[3], 16]      # fc_layer[0] must equal hidden_layer[3]
PAD = 128                             # lane-aligned halo width of shift buffer


# ----------------------------------------------------------------------------
# Fused whole-network kernel (one grid step == one image)
# ----------------------------------------------------------------------------
def _fused_kernel(x_ref,
                  prew_ref, preb_ref,
                  s11_ref, t11_ref, w11_ref, b11_ref,
                  s12_ref, t12_ref, w12_ref, b12_ref,
                  s21_ref, t21_ref, w21_ref, b21_ref,
                  s22_ref, t22_ref, w22_ref, b22_ref,
                  s31_ref, t31_ref, w31_ref, b31_ref,
                  s32_ref, t32_ref, w32_ref, b32_ref,
                  sel1_ref, sel2_ref,
                  m1_ref, m2_ref, m3_ref,
                  fw1_ref, fb1_ref, fw2_ref, fb2_ref,
                  o_ref,
                  sbuf_ref, patches_ref,
                  *, row_w):
    sbuf_w = sbuf_ref.shape[1]

    def stage(x):
        # Stage a (C, S) activation into the halo'ed flat buffer so that
        # sbuf[:, PAD + p] == x[:, p] and out-of-range flat offsets read zero.
        # Only the halo ring (left pad + tail after the image) is zeroed.
        c, s = x.shape
        sbuf_ref[0:c, 0:PAD] = jnp.zeros((c, PAD), jnp.float32)
        rb = ((PAD + s) // PAD) * PAD                 # aligned start of tail
        zw = min(2 * PAD, sbuf_w - rb)
        sbuf_ref[0:c, rb:rb + zw] = jnp.zeros((c, zw), jnp.float32)
        sbuf_ref[0:c, PAD:PAD + s] = x

    def window(c, s, off):
        # Flat spatial shift by `off` positions (zero outside the image).
        return sbuf_ref[0:c, PAD + off:PAD + off + s]

    def conv3x3(x, w_ref, b_ref, scale_ref, shift_ref, masks_ref, rw, slope):
        # BN(eval) -> 3x3 conv (stride 1, pad 1) as ONE im2col matmul -> bias
        # -> (Leaky)ReLU.  x: (Cin, S) spatial-on-lanes.
        cin, s = x.shape
        if scale_ref is not None:
            x = x * scale_ref[...] + shift_ref[...]   # per-channel affine BN
        mask_l = masks_ref[0:1, :]                    # 0 where x-coord == 0
        mask_r = masks_ref[1:2, :]                    # 0 where x-coord == rw-1
        stage(x)
        t = 0
        for dy in (-1, 0, 1):
            for dx in (-1, 0, 1):
                off = dy * rw + dx
                sh = x if off == 0 else window(cin, s, off)
                if dx == -1:
                    sh = sh * mask_l                  # kill row wrap-around
                elif dx == 1:
                    sh = sh * mask_r
                patches_ref[t * cin:(t + 1) * cin, 0:s] = sh
                t += 1
        p = patches_ref[0:9 * cin, 0:s]               # (9*Cin, S) im2col
        y = jnp.dot(w_ref[...], p, preferred_element_type=jnp.float32)
        y = y + b_ref[...]                            # (Cout, 1) bias
        if slope == 0.0:
            return jnp.maximum(y, 0.0)
        return jnp.where(y >= 0, y, slope * y)

    def maxpool2x2(x, sel_ref, rw):
        # 2x2 stride-2 max pool: shifted maxima, then an exact 0/1 selection
        # matmul compacting the even (y, x) window corners.
        c, s = x.shape
        stage(x)
        m = x
        for off in (1, rw, rw + 1):
            m = jnp.maximum(m, window(c, s, off))
        return jnp.dot(m, sel_ref[...], preferred_element_type=jnp.float32)

    w1, w2, w3 = row_w, row_w // 2, row_w // 4

    a = x_ref[0]                                                  # (Cin_pad, H*W)
    a = conv3x3(a, prew_ref, preb_ref, None, None, m1_ref, w1, 0.0)      # ReLU
    a = conv3x3(a, w11_ref, b11_ref, s11_ref, t11_ref, m1_ref, w1, LEAKY_SLOPE)
    a = conv3x3(a, w12_ref, b12_ref, s12_ref, t12_ref, m1_ref, w1, LEAKY_SLOPE)
    a = maxpool2x2(a, sel1_ref, w1)
    a = conv3x3(a, w21_ref, b21_ref, s21_ref, t21_ref, m2_ref, w2, LEAKY_SLOPE)
    a = conv3x3(a, w22_ref, b22_ref, s22_ref, t22_ref, m2_ref, w2, LEAKY_SLOPE)
    a = maxpool2x2(a, sel2_ref, w2)
    a = conv3x3(a, w31_ref, b31_ref, s31_ref, t31_ref, m3_ref, w3, LEAKY_SLOPE)
    a = conv3x3(a, w32_ref, b32_ref, s32_ref, t32_ref, m3_ref, w3, LEAKY_SLOPE)

    # Head: AdaptiveAvgPool2d((1,1)) -> Linear(32,16) -> LeakyReLU -> Linear(16,1)
    c, s = a.shape
    h = jnp.sum(a, axis=1, keepdims=True) * (1.0 / float(s))             # (C, 1)
    z = jnp.sum(fw1_ref[...] * h, axis=0, keepdims=True) + fb1_ref[...]  # (1, 16)
    z = jnp.where(z >= 0, z, LEAKY_SLOPE * z)
    y = jnp.sum(z * fw2_ref[...], axis=1, keepdims=True) + fb2_ref[...]  # (1, 1)
    o_ref[0] = jnp.broadcast_to(y, o_ref.shape[1:]).astype(o_ref.dtype)


# ----------------------------------------------------------------------------
# Wrapper: parameter preprocessing + single pallas_call
# ----------------------------------------------------------------------------
@jax.jit
def shallownet64_forward(params, x_nchw):
    n, c_in, h, w = x_nchw.shape
    assert h % 4 == 0 and w % 4 == 0 and (w + 1) <= PAD
    s = h * w
    cp = ((c_in + 7) // 8) * 8                    # pad input channels to 8
    c_max = max(cp, max(HIDDEN_LAYER))

    x = x_nchw.astype(jnp.float32).reshape(n, c_in, s)
    if cp != c_in:
        x = jnp.concatenate(
            [x, jnp.zeros((n, cp - c_in, s), jnp.float32)], axis=1)

    def w_mat(wconv, cin_pad=None):
        # HWIO (3,3,ci,co) -> (co, 9*ci); column block t*ci..(t+1)*ci holds tap
        # t = (dy+1)*3 + (dx+1), matching the kernel's im2col row blocks.
        if cin_pad is not None and cin_pad != wconv.shape[2]:
            wconv = jnp.pad(
                wconv, ((0, 0), (0, 0), (0, cin_pad - wconv.shape[2]), (0, 0)))
        co = wconv.shape[-1]
        return jnp.transpose(wconv, (3, 0, 1, 2)).reshape(co, -1)

    def colv(v):
        return jnp.asarray(v, jnp.float32).reshape(-1, 1)

    def sel_matrix(hh, ww):
        # (hh*ww, hh*ww//4) 0/1 matrix selecting the top-left element of each
        # 2x2 window in flat row-major indexing (exact pool compaction).
        ho, wo = hh // 2, ww // 2
        q = jnp.arange(ho * wo)
        src = 2 * (q // wo) * ww + 2 * (q % wo)
        p = jnp.arange(hh * ww)
        return (p[:, None] == src[None, :]).astype(jnp.float32)

    def edge_masks(hh, ww):
        xcoord = jnp.arange(hh * ww) % ww
        return jnp.stack([(xcoord != 0).astype(jnp.float32),
                          (xcoord != (ww - 1)).astype(jnp.float32)], axis=0)

    pre = params['preconv']
    plist = [w_mat(pre['w'], cin_pad=cp), colv(pre['b'])]
    for name in ('conv11', 'conv12', 'conv21', 'conv22', 'conv31', 'conv32'):
        p = params[name]
        plist += [colv(p['bn_scale']), colv(p['bn_shift']),
                  w_mat(p['w']), colv(p['b'])]
    plist += [sel_matrix(h, w), sel_matrix(h // 2, w // 2)]
    plist += [edge_masks(h, w), edge_masks(h // 2, w // 2),
              edge_masks(h // 4, w // 4)]
    fw1, fw2 = params['fc_ws']
    fb1, fb2 = params['fc_bs']
    plist += [fw1.astype(jnp.float32),
              fb1.reshape(1, -1).astype(jnp.float32),
              fw2.reshape(1, -1).astype(jnp.float32),
              fb2.reshape(1, 1).astype(jnp.float32)]

    in_specs = [pl.BlockSpec((1, cp, s), lambda i: (i, 0, 0))]
    in_specs += [pl.BlockSpec(a.shape, lambda i: (0, 0)) for a in plist]

    out = pl.pallas_call(
        functools.partial(_fused_kernel, row_w=w),
        out_shape=jax.ShapeDtypeStruct((n, 8, 128), jnp.float32),
        grid=(n,),
        in_specs=in_specs,
        out_specs=pl.BlockSpec((1, 8, 128), lambda i: (i, 0, 0)),
        scratch_shapes=[
            pltpu.VMEM((c_max, 2 * PAD + s), jnp.float32),   # halo/shift buffer
            pltpu.VMEM((9 * c_max, s), jnp.float32),         # im2col patches
        ],
        compiler_params=pltpu.CompilerParams(
            dimension_semantics=("parallel",),               # v7x: 2 TCs
            vmem_limit_bytes=32 * 1024 * 1024),
    )(x, *plist)
    return out[:, 0, 0:1]                                    # (N, 1)


# ----------------------------------------------------------------------------
# Parameters (deterministic init)
# ----------------------------------------------------------------------------
def init_params(key, in_channels=3):
    hl = HIDDEN_LAYER
    params = {}

    def conv_init(k, cin, cout):
        kw, kb = jax.random.split(k)
        w = jax.random.normal(kw, (3, 3, cin, cout), jnp.float32) * jnp.sqrt(
            2.0 / (9 * cin))
        b = jax.random.normal(kb, (cout,), jnp.float32) * 0.02
        return {'w': w, 'b': b}

    def bn_fold(cin):
        gamma = jnp.ones((cin,), jnp.float32)
        beta = jnp.zeros((cin,), jnp.float32)
        running_mean = jnp.zeros((cin,), jnp.float32)
        running_var = jnp.ones((cin,), jnp.float32)
        scale = gamma / jnp.sqrt(running_var + BN_EPS)
        shift = beta - running_mean * scale
        return scale.reshape(1, cin), shift.reshape(1, cin)

    keys = jax.random.split(key, 16)
    params['preconv'] = conv_init(keys[0], in_channels, hl[0])

    layer_defs = [('conv11', hl[0], hl[1]), ('conv12', hl[1], hl[1]),
                  ('conv21', hl[1], hl[2]), ('conv22', hl[2], hl[2]),
                  ('conv31', hl[2], hl[3]), ('conv32', hl[3], hl[3])]
    for i, (name, cin, cout) in enumerate(layer_defs):
        p = conv_init(keys[i + 1], cin, cout)
        sc, sh = bn_fold(cin)
        p['bn_scale'] = sc
        p['bn_shift'] = sh
        params[name] = p

    dims = FC_LAYER + [1]
    fc_ws, fc_bs = [], []
    for i in range(len(dims) - 1):
        kw, kb = jax.random.split(keys[8 + i])
        fc_ws.append(jax.random.normal(kw, (dims[i], dims[i + 1]),
                                       jnp.float32) * jnp.sqrt(2.0 / dims[i]))
        fc_bs.append(jax.random.normal(kb, (dims[i + 1],), jnp.float32) * 0.02)
    params['fc_ws'] = fc_ws
    params['fc_bs'] = fc_bs
    return params


# ----------------------------------------------------------------------------
# Pure-JAX reference (for the correctness check only)
# ----------------------------------------------------------------------------
def reference_forward(params, x_nchw):
    x = jnp.transpose(x_nchw, (0, 2, 3, 1)).astype(jnp.float32)

    def conv(x, w, b):
        y = lax.conv_general_dilated(
            x, w, window_strides=(1, 1), padding='SAME',
            dimension_numbers=('NHWC', 'HWIO', 'NHWC'),
            precision=lax.Precision.HIGHEST)
        return y + b

    x = jnp.maximum(conv(x, params['preconv']['w'], params['preconv']['b']), 0.0)

    def block(x, name):
        p = params[name]
        xbn = x * p['bn_scale'] + p['bn_shift']
        y = conv(xbn, p['w'], p['b'])
        return jnp.where(y >= 0, y, LEAKY_SLOPE * y)

    def maxpool(x):
        N, H, W, C = x.shape
        return x.reshape(N, H // 2, 2, W // 2, 2, C).max(axis=(2, 4))

    x = block(x, 'conv11')
    x = block(x, 'conv12')
    x = maxpool(x)
    x = block(x, 'conv21')
    x = block(x, 'conv22')
    x = maxpool(x)
    x = block(x, 'conv31')
    x = block(x, 'conv32')

    h = x.mean(axis=(1, 2))                                        # (N, C)
    fc_ws, fc_bs = params['fc_ws'], params['fc_bs']
    for w, b in zip(fc_ws[:-1], fc_bs[:-1]):
        h = h @ w + b
        h = jnp.where(h >= 0, h, LEAKY_SLOPE * h)
    return h @ fc_ws[-1] + fc_bs[-1]


if __name__ == "__main__":
    key = jax.random.PRNGKey(0)
    pkey, xkey = jax.random.split(key)
    params = init_params(pkey, in_channels=3)

    # PyTorch-style NCHW input; spatial 32 keeps all stages 2x-poolable.
    x = jax.random.normal(xkey, (2, 3, 32, 32), jnp.float32)

    out = shallownet64_forward(params, x)
    out = jax.block_until_ready(out)
    assert out.shape == (2, 1), out.shape

    ref = reference_forward(params, x)
    err = float(jnp.max(jnp.abs(out - ref)))
    tol = 1e-2 * (1.0 + float(jnp.max(jnp.abs(ref))))
    if not err < tol:
        raise AssertionError(f"Pallas/reference mismatch: max abs err {err}")

    print("KERNEL_OK")
</pallas_src>

<mosaic_0001>
module attributes {stable_mosaic.version = 11 : i64} {
  func.func @_fused_kernel(%arg0: i32, %arg1: memref<1x8x1024xf32, #tpu.memory_space<vmem>>, %arg2: memref<8x72xf32, #tpu.memory_space<vmem>>, %arg3: memref<8x1xf32, #tpu.memory_space<vmem>>, %arg4: memref<8x1xf32, #tpu.memory_space<vmem>>, %arg5: memref<8x1xf32, #tpu.memory_space<vmem>>, %arg6: memref<16x72xf32, #tpu.memory_space<vmem>>, %arg7: memref<16x1xf32, #tpu.memory_space<vmem>>, %arg8: memref<16x1xf32, #tpu.memory_space<vmem>>, %arg9: memref<16x1xf32, #tpu.memory_space<vmem>>, %arg10: memref<16x144xf32, #tpu.memory_space<vmem>>, %arg11: memref<16x1xf32, #tpu.memory_space<vmem>>, %arg12: memref<16x1xf32, #tpu.memory_space<vmem>>, %arg13: memref<16x1xf32, #tpu.memory_space<vmem>>, %arg14: memref<32x144xf32, #tpu.memory_space<vmem>>, %arg15: memref<32x1xf32, #tpu.memory_space<vmem>>, %arg16: memref<32x1xf32, #tpu.memory_space<vmem>>, %arg17: memref<32x1xf32, #tpu.memory_space<vmem>>, %arg18: memref<32x288xf32, #tpu.memory_space<vmem>>, %arg19: memref<32x1xf32, #tpu.memory_space<vmem>>, %arg20: memref<32x1xf32, #tpu.memory_space<vmem>>, %arg21: memref<32x1xf32, #tpu.memory_space<vmem>>, %arg22: memref<32x288xf32, #tpu.memory_space<vmem>>, %arg23: memref<32x1xf32, #tpu.memory_space<vmem>>, %arg24: memref<32x1xf32, #tpu.memory_space<vmem>>, %arg25: memref<32x1xf32, #tpu.memory_space<vmem>>, %arg26: memref<32x288xf32, #tpu.memory_space<vmem>>, %arg27: memref<32x1xf32, #tpu.memory_space<vmem>>, %arg28: memref<1024x256xf32, #tpu.memory_space<vmem>>, %arg29: memref<256x64xf32, #tpu.memory_space<vmem>>, %arg30: memref<2x1024xf32, #tpu.memory_space<vmem>>, %arg31: memref<2x256xf32, #tpu.memory_space<vmem>>, %arg32: memref<2x64xf32, #tpu.memory_space<vmem>>, %arg33: memref<32x16xf32, #tpu.memory_space<vmem>>, %arg34: memref<1x16xf32, #tpu.memory_space<vmem>>, %arg35: memref<1x16xf32, #tpu.memory_space<vmem>>, %arg36: memref<1x1xf32, #tpu.memory_space<vmem>>, %arg37: memref<1x8x128xf32, #tpu.memory_space<vmem>>, %arg38: memref<32x1280xf32, #tpu.memory_space<vmem>>, %arg39: memref<288x1024xf32, #tpu.memory_space<vmem>>) attributes {dimension_semantics = [#tpu.dimension_semantics<parallel>], iteration_bounds = array<i64: 2>, scalar_prefetch = 0 : i64, scratch_operands = 2 : i64, tpu.core_type = #tpu.core_type<tc>, window_params = [{transform_indices = @transform_0, window_bounds = array<i64: 1, 8, 1024>}, {pipeline_mode = #tpu.pipeline_mode<synchronous>, transform_indices = @transform_1, window_bounds = array<i64: 8, 72>}, {pipeline_mode = #tpu.pipeline_mode<synchronous>, transform_indices = @transform_2, window_bounds = array<i64: 8, 1>}, {pipeline_mode = #tpu.pipeline_mode<synchronous>, transform_indices = @transform_3, window_bounds = array<i64: 8, 1>}, {pipeline_mode = #tpu.pipeline_mode<synchronous>, transform_indices = @transform_4, window_bounds = array<i64: 8, 1>}, {pipeline_mode = #tpu.pipeline_mode<synchronous>, transform_indices = @transform_5, window_bounds = array<i64: 16, 72>}, {pipeline_mode = #tpu.pipeline_mode<synchronous>, transform_indices = @transform_6, window_bounds = array<i64: 16, 1>}, {pipeline_mode = #tpu.pipeline_mode<synchronous>, transform_indices = @transform_7, window_bounds = array<i64: 16, 1>}, {pipeline_mode = #tpu.pipeline_mode<synchronous>, transform_indices = @transform_8, window_bounds = array<i64: 16, 1>}, {pipeline_mode = #tpu.pipeline_mode<synchronous>, transform_indices = @transform_9, window_bounds = array<i64: 16, 144>}, {pipeline_mode = #tpu.pipeline_mode<synchronous>, transform_indices = @transform_10, window_bounds = array<i64: 16, 1>}, {pipeline_mode = #tpu.pipeline_mode<synchronous>, transform_indices = @transform_11, window_bounds = array<i64: 16, 1>}, {pipeline_mode = #tpu.pipeline_mode<synchronous>, transform_indices = @transform_12, window_bounds = array<i64: 16, 1>}, {pipeline_mode = #tpu.pipeline_mode<synchronous>, transform_indices = @transform_13, window_bounds = array<i64: 32, 144>}, {pipeline_mode = #tpu.pipeline_mode<synchronous>, transform_indices = @transform_14, window_bounds = array<i64: 32, 1>}, {pipeline_mode = #tpu.pipeline_mode<synchronous>, transform_indices = @transform_15, window_bounds = array<i64: 32, 1>}, {pipeline_mode = #tpu.pipeline_mode<synchronous>, transform_indices = @transform_16, window_bounds = array<i64: 32, 1>}, {pipeline_mode = #tpu.pipeline_mode<synchronous>, transform_indices = @transform_17, window_bounds = array<i64: 32, 288>}, {pipeline_mode = #tpu.pipeline_mode<synchronous>, transform_indices = @transform_18, window_bounds = array<i64: 32, 1>}, {pipeline_mode = #tpu.pipeline_mode<synchronous>, transform_indices = @transform_19, window_bounds = array<i64: 32, 1>}, {pipeline_mode = #tpu.pipeline_mode<synchronous>, transform_indices = @transform_20, window_bounds = array<i64: 32, 1>}, {pipeline_mode = #tpu.pipeline_mode<synchronous>, transform_indices = @transform_21, window_bounds = array<i64: 32, 288>}, {pipeline_mode = #tpu.pipeline_mode<synchronous>, transform_indices = @transform_22, window_bounds = array<i64: 32, 1>}, {pipeline_mode = #tpu.pipeline_mode<synchronous>, transform_indices = @transform_23, window_bounds = array<i64: 32, 1>}, {pipeline_mode = #tpu.pipeline_mode<synchronous>, transform_indices = @transform_24, window_bounds = array<i64: 32, 1>}, {pipeline_mode = #tpu.pipeline_mode<synchronous>, transform_indices = @transform_25, window_bounds = array<i64: 32, 288>}, {pipeline_mode = #tpu.pipeline_mode<synchronous>, transform_indices = @transform_26, window_bounds = array<i64: 32, 1>}, {pipeline_mode = #tpu.pipeline_mode<synchronous>, transform_indices = @transform_27, window_bounds = array<i64: 1024, 256>}, {pipeline_mode = #tpu.pipeline_mode<synchronous>, transform_indices = @transform_28, window_bounds = array<i64: 256, 64>}, {pipeline_mode = #tpu.pipeline_mode<synchronous>, transform_indices = @transform_29, window_bounds = array<i64: 2, 1024>}, {pipeline_mode = #tpu.pipeline_mode<synchronous>, transform_indices = @transform_30, window_bounds = array<i64: 2, 256>}, {pipeline_mode = #tpu.pipeline_mode<synchronous>, transform_indices = @transform_31, window_bounds = array<i64: 2, 64>}, {pipeline_mode = #tpu.pipeline_mode<synchronous>, transform_indices = @transform_32, window_bounds = array<i64: 32, 16>}, {pipeline_mode = #tpu.pipeline_mode<synchronous>, transform_indices = @transform_33, window_bounds = array<i64: 1, 16>}, {pipeline_mode = #tpu.pipeline_mode<synchronous>, transform_indices = @transform_34, window_bounds = array<i64: 1, 16>}, {pipeline_mode = #tpu.pipeline_mode<synchronous>, transform_indices = @transform_35, window_bounds = array<i64: 1, 1>}, {transform_indices = @transform_36, window_bounds = array<i64: 1, 8, 128>}]} {
    %c0 = arith.constant 0 : index
    %c0_0 = arith.constant 0 : index
    %c0_1 = arith.constant 0 : index
    %0 = vector.load %arg1[%c0, %c0_0, %c0_1] : memref<1x8x1024xf32, #tpu.memory_space<vmem>>, vector<1x8x1024xf32>
    %1 = vector.shape_cast %0 : vector<1x8x1024xf32> to vector<8x1024xf32>
    %c0_2 = arith.constant 0 : index
    %c0_3 = arith.constant 0 : index
    %2 = vector.load %arg30[%c0_2, %c0_3] : memref<2x1024xf32, #tpu.memory_space<vmem>>, vector<1x1024xf32>
    %c1 = arith.constant 1 : index
    %c0_4 = arith.constant 0 : index
    %3 = vector.load %arg30[%c1, %c0_4] : memref<2x1024xf32, #tpu.memory_space<vmem>>, vector<1x1024xf32>
    %cst = arith.constant 0.000000e+00 : f32
    %4 = vector.broadcast %cst : f32 to vector<8x128xf32>
    %c0_5 = arith.constant 0 : index
    %c0_6 = arith.constant 0 : index
    %5 = vector.load %arg38[%c0_5, %c0_6] : memref<32x1280xf32, #tpu.memory_space<vmem>>, vector<8x128xf32>
    tpu.vector_store %arg38[%c0_5, %c0_6], %4 {strides = array<i32>} : memref<32x1280xf32, #tpu.memory_space<vmem>>, vector<8x128xf32>,
    %cst_7 = arith.constant 0.000000e+00 : f32
    %6 = vector.broadcast %cst_7 : f32 to vector<8x128xf32>
    %c0_8 = arith.constant 0 : index
    %c1152 = arith.constant 1152 : index
    %7 = vector.load %arg38[%c0_8, %c1152] : memref<32x1280xf32, #tpu.memory_space<vmem>>, vector<8x128xf32>
    tpu.vector_store %arg38[%c0_8, %c1152], %6 {strides = array<i32>} : memref<32x1280xf32, #tpu.memory_space<vmem>>, vector<8x128xf32>,
    %c0_9 = arith.constant 0 : index
    %c128 = arith.constant 128 : index
    %8 = vector.load %arg38[%c0_9, %c128] : memref<32x1280xf32, #tpu.memory_space<vmem>>, vector<8x1024xf32>
    tpu.vector_store %arg38[%c0_9, %c128], %1 {strides = array<i32>} : memref<32x1280xf32, #tpu.memory_space<vmem>>, vector<8x1024xf32>,
    %c0_10 = arith.constant 0 : index
    %c95 = arith.constant 95 : index
    %9 = vector.load %arg38[%c0_10, %c95] : memref<32x1280xf32, #tpu.memory_space<vmem>>, vector<8x1024xf32>
    %10 = vector.broadcast %2 : vector<1x1024xf32> to vector<8x1024xf32>
    %11 = arith.mulf %9, %10 : vector<8x1024xf32>
    %c0_11 = arith.constant 0 : index
    %c0_12 = arith.constant 0 : index
    %12 = vector.load %arg39[%c0_11, %c0_12] : memref<288x1024xf32, #tpu.memory_space<vmem>>, vector<8x1024xf32>
    tpu.vector_store %arg39[%c0_11, %c0_12], %11 {strides = array<i32>} : memref<288x1024xf32, #tpu.memory_space<vmem>>, vector<8x1024xf32>,
    %c0_13 = arith.constant 0 : index
    %c96 = arith.constant 96 : index
    %13 = vector.load %arg38[%c0_13, %c96] : memref<32x1280xf32, #tpu.memory_space<vmem>>, vector<8x1024xf32>
    %c8 = arith.constant 8 : index
    %c0_14 = arith.constant 0 : index
    %14 = vector.load %arg39[%c8, %c0_14] : memref<288x1024xf32, #tpu.memory_space<vmem>>, vector<8x1024xf32>
    tpu.vector_store %arg39[%c8, %c0_14], %13 {strides = array<i32>} : memref<288x1024xf32, #tpu.memory_space<vmem>>, vector<8x1024xf32>,
    %c0_15 = arith.constant 0 : index
    %c97 = arith.constant 97 : index
    %15 = vector.load %arg38[%c0_15, %c97] : memref<32x1280xf32, #tpu.memory_space<vmem>>, vector<8x1024xf32>
    %16 = vector.broadcast %3 : vector<1x1024xf32> to vector<8x1024xf32>
    %17 = arith.mulf %15, %16 : vector<8x1024xf32>
    %c16 = arith.constant 16 : index
    %c0_16 = arith.constant 0 : index
    %18 = vector.load %arg39[%c16, %c0_16] : memref<288x1024xf32, #tpu.memory_space<vmem>>, vector<8x1024xf32>
    tpu.vector_store %arg39[%c16, %c0_16], %17 {strides = array<i32>} : memref<288x1024xf32, #tpu.memory_space<vmem>>, vector<8x1024xf32>,
    %c0_17 = arith.constant 0 : index
    %c127 = arith.constant 127 : index
    %19 = vector.load %arg38[%c0_17, %c127] : memref<32x1280xf32, #tpu.memory_space<vmem>>, vector<8x1024xf32>
    %20 = vector.broadcast %2 : vector<1x1024xf32> to vector<8x1024xf32>
    %21 = arith.mulf %19, %20 : vector<8x1024xf32>
    %c24 = arith.constant 24 : index
    %c0_18 = arith.constant 0 : index
    %22 = vector.load %arg39[%c24, %c0_18] : memref<288x1024xf32, #tpu.memory_space<vmem>>, vector<8x1024xf32>
    tpu.vector_store %arg39[%c24, %c0_18], %21 {strides = array<i32>} : memref<288x1024xf32, #tpu.memory_space<vmem>>, vector<8x1024xf32>,
    %c32 = arith.constant 32 : index
    %c0_19 = arith.constant 0 : index
    %23 = vector.load %arg39[%c32, %c0_19] : memref<288x1024xf32, #tpu.memory_space<vmem>>, vector<8x1024xf32>
    tpu.vector_store %arg39[%c32, %c0_19], %1 {strides = array<i32>} : memref<288x1024xf32, #tpu.memory_space<vmem>>, vector<8x1024xf32>,
    %c0_20 = arith.constant 0 : index
    %c129 = arith.constant 129 : index
    %24 = vector.load %arg38[%c0_20, %c129] : memref<32x1280xf32, #tpu.memory_space<vmem>>, vector<8x1024xf32>
    %25 = vector.broadcast %3 : vector<1x1024xf32> to vector<8x1024xf32>
    %26 = arith.mulf %24, %25 : vector<8x1024xf32>
    %c40 = arith.constant 40 : index
    %c0_21 = arith.constant 0 : index
    %27 = vector.load %arg39[%c40, %c0_21] : memref<288x1024xf32, #tpu.memory_space<vmem>>, vector<8x1024xf32>
    tpu.vector_store %arg39[%c40, %c0_21], %26 {strides = array<i32>} : memref<288x1024xf32, #tpu.memory_space<vmem>>, vector<8x1024xf32>,
    %c0_22 = arith.constant 0 : index
    %c159 = arith.constant 159 : index
    %28 = vector.load %arg38[%c0_22, %c159] : memref<32x1280xf32, #tpu.memory_space<vmem>>, vector<8x1024xf32>
    %29 = vector.broadcast %2 : vector<1x1024xf32> to vector<8x1024xf32>
    %30 = arith.mulf %28, %29 : vector<8x1024xf32>
    %c48 = arith.constant 48 : index
    %c0_23 = arith.constant 0 : index
    %31 = vector.load %arg39[%c48, %c0_23] : memref<288x1024xf32, #tpu.memory_space<vmem>>, vector<8x1024xf32>
    tpu.vector_store %arg39[%c48, %c0_23], %30 {strides = array<i32>} : memref<288x1024xf32, #tpu.memory_space<vmem>>, vector<8x1024xf32>,
    %c0_24 = arith.constant 0 : index
    %c160 = arith.constant 160 : index
    %32 = vector.load %arg38[%c0_24, %c160] : memref<32x1280xf32, #tpu.memory_space<vmem>>, vector<8x1024xf32>
    %c56 = arith.constant 56 : index
    %c0_25 = arith.constant 0 : index
    %33 = vector.load %arg39[%c56, %c0_25] : memref<288x1024xf32, #tpu.memory_space<vmem>>, vector<8x1024xf32>
    tpu.vector_store %arg39[%c56, %c0_25], %32 {strides = array<i32>} : memref<288x1024xf32, #tpu.memory_space<vmem>>, vector<8x1024xf32>,
    %c0_26 = arith.constant 0 : index
    %c161 = arith.constant 161 : index
    %34 = vector.load %arg38[%c0_26, %c161] : memref<32x1280xf32, #tpu.memory_space<vmem>>, vector<8x1024xf32>
    %35 = vector.broadcast %3 : vector<1x1024xf32> to vector<8x1024xf32>
    %36 = arith.mulf %34, %35 : vector<8x1024xf32>
    %c64 = arith.constant 64 : index
    %c0_27 = arith.constant 0 : index
    %37 = vector.load %arg39[%c64, %c0_27] : memref<288x1024xf32, #tpu.memory_space<vmem>>, vector<8x1024xf32>
    tpu.vector_store %arg39[%c64, %c0_27], %36 {strides = array<i32>} : memref<288x1024xf32, #tpu.memory_space<vmem>>, vector<8x1024xf32>,
    %c0_28 = arith.constant 0 : index
    %c0_29 = arith.constant 0 : index
    %38 = vector.load %arg39[%c0_28, %c0_29] : memref<288x1024xf32, #tpu.memory_space<vmem>>, vector<72x1024xf32>
    %c0_30 = arith.constant 0 : index
    %c0_31 = arith.constant 0 : index
    %39 = vector.load %arg2[%c0_30, %c0_31] : memref<8x72xf32, #tpu.memory_space<vmem>>, vector<8x72xf32>
    %cst_32 = arith.constant dense<0.000000e+00> : vector<8x1024xf32>
    %40 = tpu.matmul %39, %38, %cst_32 {dimension_numbers = #tpu.dot_dimension_numbers<[1], [0], [0], [1], [0, 0, 1, 1], [], []>} : vector<8x72xf32>, vector<72x1024xf32>, vector<8x1024xf32> -> vector<8x1024xf32>
    %c0_33 = arith.constant 0 : index
    %c0_34 = arith.constant 0 : index
    %41 = vector.load %arg3[%c0_33, %c0_34] : memref<8x1xf32, #tpu.memory_space<vmem>>, vector<8x1xf32>
    %42 = vector.broadcast %41 : vector<8x1xf32> to vector<8x1024xf32>
    %43 = arith.addf %40, %42 : vector<8x1024xf32>
    %cst_35 = arith.constant 0.000000e+00 : f32
    %44 = vector.broadcast %cst_35 : f32 to vector<8x1024xf32>
    %45 = arith.maximumf %43, %44 : vector<8x1024xf32>
    %c0_36 = arith.constant 0 : index
    %c0_37 = arith.constant 0 : index
    %46 = vector.load %arg4[%c0_36, %c0_37] : memref<8x1xf32, #tpu.memory_space<vmem>>, vector<8x1xf32>
    %47 = vector.broadcast %46 : vector<8x1xf32> to vector<8x1024xf32>
    %48 = arith.mulf %45, %47 : vector<8x1024xf32>
    %c0_38 = arith.constant 0 : index
    %c0_39 = arith.constant 0 : index
    %49 = vector.load %arg5[%c0_38, %c0_39] : memref<8x1xf32, #tpu.memory_space<vmem>>, vector<8x1xf32>
    %50 = vector.broadcast %49 : vector<8x1xf32> to vector<8x1024xf32>
    %51 = arith.addf %48, %50 : vector<8x1024xf32>
    %c0_40 = arith.constant 0 : index
    %c0_41 = arith.constant 0 : index
    %52 = vector.load %arg30[%c0_40, %c0_41] : memref<2x1024xf32, #tpu.memory_space<vmem>>, vector<1x1024xf32>
    %c1_42 = arith.constant 1 : index
    %c0_43 = arith.constant 0 : index
    %53 = vector.load %arg30[%c1_42, %c0_43] : memref<2x1024xf32, #tpu.memory_space<vmem>>, vector<1x1024xf32>
    %cst_44 = arith.constant 0.000000e+00 : f32
    %54 = vector.broadcast %cst_44 : f32 to vector<8x128xf32>
    %c0_45 = arith.constant 0 : index
    %c0_46 = arith.constant 0 : index
    %55 = vector.load %arg38[%c0_45, %c0_46] : memref<32x1280xf32, #tpu.memory_space<vmem>>, vector<8x128xf32>
    tpu.vector_store %arg38[%c0_45, %c0_46], %54 {strides = array<i32>} : memref<32x1280xf32, #tpu.memory_space<vmem>>, vector<8x128xf32>,
    %cst_47 = arith.constant 0.000000e+00 : f32
    %56 = vector.broadcast %cst_47 : f32 to vector<8x128xf32>
    %c0_48 = arith.constant 0 : index
    %c1152_49 = arith.constant 1152 : index
    %57 = vector.load %arg38[%c0_48, %c1152_49] : memref<32x1280xf32, #tpu.memory_space<vmem>>, vector<8x128xf32>
    tpu.vector_store %arg38[%c0_48, %c1152_49], %56 {strides = array<i32>} : memref<32x1280xf32, #tpu.memory_space<vmem>>, vector<8x128xf32>,
    %c0_50 = arith.constant 0 : index
    %c128_51 = arith.constant 128 : index
    %58 = vector.load %arg38[%c0_50, %c128_51] : memref<32x1280xf32, #tpu.memory_space<vmem>>, vector<8x1024xf32>
    tpu.vector_store %arg38[%c0_50, %c128_51], %51 {strides = array<i32>} : memref<32x1280xf32, #tpu.memory_space<vmem>>, vector<8x1024xf32>,
    %c0_52 = arith.constant 0 : index
    %c95_53 = arith.constant 95 : index
    %59 = vector.load %arg38[%c0_52, %c95_53] : memref<32x1280xf32, #tpu.memory_space<vmem>>, vector<8x1024xf32>
    %60 = vector.broadcast %52 : vector<1x1024xf32> to vector<8x1024xf32>
    %61 = arith.mulf %59, %60 : vector<8x1024xf32>
    %c0_54 = arith.constant 0 : index
    %c0_55 = arith.constant 0 : index
    %62 = vector.load %arg39[%c0_54, %c0_55] : memref<288x1024xf32, #tpu.memory_space<vmem>>, vector<8x1024xf32>
    tpu.vector_store %arg39[%c0_54, %c0_55], %61 {strides = array<i32>} : memref<288x1024xf32, #tpu.memory_space<vmem>>, vector<8x1024xf32>,
    %c0_56 = arith.constant 0 : index
    %c96_57 = arith.constant 96 : index
    %63 = vector.load %arg38[%c0_56, %c96_57] : memref<32x1280xf32, #tpu.memory_space<vmem>>, vector<8x1024xf32>
    %c8_58 = arith.constant 8 : index
    %c0_59 = arith.constant 0 : index
    %64 = vector.load %arg39[%c8_58, %c0_59] : memref<288x1024xf32, #tpu.memory_space<vmem>>, vector<8x1024xf32>
    tpu.vector_store %arg39[%c8_58, %c0_59], %63 {strides = array<i32>} : memref<288x1024xf32, #tpu.memory_space<vmem>>, vector<8x1024xf32>,
    %c0_60 = arith.constant 0 : index
    %c97_61 = arith.constant 97 : index
    %65 = vector.load %arg38[%c0_60, %c97_61] : memref<32x1280xf32, #tpu.memory_space<vmem>>, vector<8x1024xf32>
    %66 = vector.broadcast %53 : vector<1x1024xf32> to vector<8x1024xf32>
    %67 = arith.mulf %65, %66 : vector<8x1024xf32>
    %c16_62 = arith.constant 16 : index
    %c0_63 = arith.constant 0 : index
    %68 = vector.load %arg39[%c16_62, %c0_63] : memref<288x1024xf32, #tpu.memory_space<vmem>>, vector<8x1024xf32>
    tpu.vector_store %arg39[%c16_62, %c0_63], %67 {strides = array<i32>} : memref<288x1024xf32, #tpu.memory_space<vmem>>, vector<8x1024xf32>,
    %c0_64 = arith.constant 0 : index
    %c127_65 = arith.constant 127 : index
    %69 = vector.load %arg38[%c0_64, %c127_65] : memref<32x1280xf32, #tpu.memory_space<vmem>>, vector<8x1024xf32>
    %70 = vector.broadcast %52 : vector<1x1024xf32> to vector<8x1024xf32>
    %71 = arith.mulf %69, %70 : vector<8x1024xf32>
    %c24_66 = arith.constant 24 : index
    %c0_67 = arith.constant 0 : index
    %72 = vector.load %arg39[%c24_66, %c0_67] : memref<288x1024xf32, #tpu.memory_space<vmem>>, vector<8x1024xf32>
    tpu.vector_store %arg39[%c24_66, %c0_67], %71 {strides = array<i32>} : memref<288x1024xf32, #tpu.memory_space<vmem>>, vector<8x1024xf32>,
    %c32_68 = arith.constant 32 : index
    %c0_69 = arith.constant 0 : index
    %73 = vector.load %arg39[%c32_68, %c0_69] : memref<288x1024xf32, #tpu.memory_space<vmem>>, vector<8x1024xf32>
    tpu.vector_store %arg39[%c32_68, %c0_69], %51 {strides = array<i32>} : memref<288x1024xf32, #tpu.memory_space<vmem>>, vector<8x1024xf32>,
    %c0_70 = arith.constant 0 : index
    %c129_71 = arith.constant 129 : index
    %74 = vector.load %arg38[%c0_70, %c129_71] : memref<32x1280xf32, #tpu.memory_space<vmem>>, vector<8x1024xf32>
    %75 = vector.broadcast %53 : vector<1x1024xf32> to vector<8x1024xf32>
    %76 = arith.mulf %74, %75 : vector<8x1024xf32>
    %c40_72 = arith.constant 40 : index
    %c0_73 = arith.constant 0 : index
    %77 = vector.load %arg39[%c40_72, %c0_73] : memref<288x1024xf32, #tpu.memory_space<vmem>>, vector<8x1024xf32>
    tpu.vector_store %arg39[%c40_72, %c0_73], %76 {strides = array<i32>} : memref<288x1024xf32, #tpu.memory_space<vmem>>, vector<8x1024xf32>,
    %c0_74 = arith.constant 0 : index
    %c159_75 = arith.constant 159 : index
    %78 = vector.load %arg38[%c0_74, %c159_75] : memref<32x1280xf32, #tpu.memory_space<vmem>>, vector<8x1024xf32>
    %79 = vector.broadcast %52 : vector<1x1024xf32> to vector<8x1024xf32>
    %80 = arith.mulf %78, %79 : vector<8x1024xf32>
    %c48_76 = arith.constant 48 : index
    %c0_77 = arith.constant 0 : index
    %81 = vector.load %arg39[%c48_76, %c0_77] : memref<288x1024xf32, #tpu.memory_space<vmem>>, vector<8x1024xf32>
    tpu.vector_store %arg39[%c48_76, %c0_77], %80 {strides = array<i32>} : memref<288x1024xf32, #tpu.memory_space<vmem>>, vector<8x1024xf32>,
    %c0_78 = arith.constant 0 : index
    %c160_79 = arith.constant 160 : index
    %82 = vector.load %arg38[%c0_78, %c160_79] : memref<32x1280xf32, #tpu.memory_space<vmem>>, vector<8x1024xf32>
    %c56_80 = arith.constant 56 : index
    %c0_81 = arith.constant 0 : index
    %83 = vector.load %arg39[%c56_80, %c0_81] : memref<288x1024xf32, #tpu.memory_space<vmem>>, vector<8x1024xf32>
    tpu.vector_store %arg39[%c56_80, %c0_81], %82 {strides = array<i32>} : memref<288x1024xf32, #tpu.memory_space<vmem>>, vector<8x1024xf32>,
    %c0_82 = arith.constant 0 : index
    %c161_83 = arith.constant 161 : index
    %84 = vector.load %arg38[%c0_82, %c161_83] : memref<32x1280xf32, #tpu.memory_space<vmem>>, vector<8x1024xf32>
    %85 = vector.broadcast %53 : vector<1x1024xf32> to vector<8x1024xf32>
    %86 = arith.mulf %84, %85 : vector<8x1024xf32>
    %c64_84 = arith.constant 64 : index
    %c0_85 = arith.constant 0 : index
    %87 = vector.load %arg39[%c64_84, %c0_85] : memref<288x1024xf32, #tpu.memory_space<vmem>>, vector<8x1024xf32>
    tpu.vector_store %arg39[%c64_84, %c0_85], %86 {strides = array<i32>} : memref<288x1024xf32, #tpu.memory_space<vmem>>, vector<8x1024xf32>,
    %c0_86 = arith.constant 0 : index
    %c0_87 = arith.constant 0 : index
    %88 = vector.load %arg39[%c0_86, %c0_87] : memref<288x1024xf32, #tpu.memory_space<vmem>>, vector<72x1024xf32>
    %c0_88 = arith.constant 0 : index
    %c0_89 = arith.constant 0 : index
    %89 = vector.load %arg6[%c0_88, %c0_89] : memref<16x72xf32, #tpu.memory_space<vmem>>, vector<16x72xf32>
    %cst_90 = arith.constant dense<0.000000e+00> : vector<16x1024xf32>
    %90 = tpu.matmul %89, %88, %cst_90 {dimension_numbers = #tpu.dot_dimension_numbers<[1], [0], [0], [1], [0, 0, 1, 1], [], []>} : vector<16x72xf32>, vector<72x1024xf32>, vector<16x1024xf32> -> vector<16x1024xf32>
    %c0_91 = arith.constant 0 : index
    %c0_92 = arith.constant 0 : index
    %91 = vector.load %arg7[%c0_91, %c0_92] : memref<16x1xf32, #tpu.memory_space<vmem>>, vector<16x1xf32>
    %92 = vector.broadcast %91 : vector<16x1xf32> to vector<16x1024xf32>
    %93 = arith.addf %90, %92 : vector<16x1024xf32>
    %cst_93 = arith.constant 0.000000e+00 : f32
    %94 = vector.broadcast %cst_93 : f32 to vector<16x1024xf32>
    %95 = arith.cmpf oge, %93, %94 : vector<16x1024xf32>
    %cst_94 = arith.constant 1.000000e-01 : f32
    %96 = vector.broadcast %cst_94 : f32 to vector<16x1024xf32>
    %97 = arith.mulf %96, %93 : vector<16x1024xf32>
    %98 = arith.select %95, %93, %97 : vector<16x1024xi1>, vector<16x1024xf32>
    %c0_95 = arith.constant 0 : index
    %c0_96 = arith.constant 0 : index
    %99 = vector.load %arg8[%c0_95, %c0_96] : memref<16x1xf32, #tpu.memory_space<vmem>>, vector<16x1xf32>
    %100 = vector.broadcast %99 : vector<16x1xf32> to vector<16x1024xf32>
    %101 = arith.mulf %98, %100 : vector<16x1024xf32>
    %c0_97 = arith.constant 0 : index
    %c0_98 = arith.constant 0 : index
    %102 = vector.load %arg9[%c0_97, %c0_98] : memref<16x1xf32, #tpu.memory_space<vmem>>, vector<16x1xf32>
    %103 = vector.broadcast %102 : vector<16x1xf32> to vector<16x1024xf32>
    %104 = arith.addf %101, %103 : vector<16x1024xf32>
    %c0_99 = arith.constant 0 : index
    %c0_100 = arith.constant 0 : index
    %105 = vector.load %arg30[%c0_99, %c0_100] : memref<2x1024xf32, #tpu.memory_space<vmem>>, vector<1x1024xf32>
    %c1_101 = arith.constant 1 : index
    %c0_102 = arith.constant 0 : index
    %106 = vector.load %arg30[%c1_101, %c0_102] : memref<2x1024xf32, #tpu.memory_space<vmem>>, vector<1x1024xf32>
    %cst_103 = arith.constant 0.000000e+00 : f32
    %107 = vector.broadcast %cst_103 : f32 to vector<16x128xf32>
    %c0_104 = arith.constant 0 : index
    %c0_105 = arith.constant 0 : index
    %108 = vector.load %arg38[%c0_104, %c0_105] : memref<32x1280xf32, #tpu.memory_space<vmem>>, vector<16x128xf32>
    tpu.vector_store %arg38[%c0_104, %c0_105], %107 {strides = array<i32>} : memref<32x1280xf32, #tpu.memory_space<vmem>>, vector<16x128xf32>,
    %cst_106 = arith.constant 0.000000e+00 : f32
    %109 = vector.broadcast %cst_106 : f32 to vector<16x128xf32>
    %c0_107 = arith.constant 0 : index
    %c1152_108 = arith.constant 1152 : index
    %110 = vector.load %arg38[%c0_107, %c1152_108] : memref<32x1280xf32, #tpu.memory_space<vmem>>, vector<16x128xf32>
    tpu.vector_store %arg38[%c0_107, %c1152_108], %109 {strides = array<i32>} : memref<32x1280xf32, #tpu.memory_space<vmem>>, vector<16x128xf32>,
    %c0_109 = arith.constant 0 : index
    %c128_110 = arith.constant 128 : index
    %111 = vector.load %arg38[%c0_109, %c128_110] : memref<32x1280xf32, #tpu.memory_space<vmem>>, vector<16x1024xf32>
    tpu.vector_store %arg38[%c0_109, %c128_110], %104 {strides = array<i32>} : memref<32x1280xf32, #tpu.memory_space<vmem>>, vector<16x1024xf32>,
    %c0_111 = arith.constant 0 : index
    %c95_112 = arith.constant 95 : index
    %112 = vector.load %arg38[%c0_111, %c95_112] : memref<32x1280xf32, #tpu.memory_space<vmem>>, vector<16x1024xf32>
    %113 = vector.broadcast %105 : vector<1x1024xf32> to vector<16x1024xf32>
    %114 = arith.mulf %112, %113 : vector<16x1024xf32>
    %c0_113 = arith.constant 0 : index
    %c0_114 = arith.constant 0 : index
    %115 = vector.load %arg39[%c0_113, %c0_114] : memref<288x1024xf32, #tpu.memory_space<vmem>>, vector<16x1024xf32>
    tpu.vector_store %arg39[%c0_113, %c0_114], %114 {strides = array<i32>} : memref<288x1024xf32, #tpu.memory_space<vmem>>, vector<16x1024xf32>,
    %c0_115 = arith.constant 0 : index
    %c96_116 = arith.constant 96 : index
    %116 = vector.load %arg38[%c0_115, %c96_116] : memref<32x1280xf32, #tpu.memory_space<vmem>>, vector<16x1024xf32>
    %c16_117 = arith.constant 16 : index
    %c0_118 = arith.constant 0 : index
    %117 = vector.load %arg39[%c16_117, %c0_118] : memref<288x1024xf32, #tpu.memory_space<vmem>>, vector<16x1024xf32>
    tpu.vector_store %arg39[%c16_117, %c0_118], %116 {strides = array<i32>} : memref<288x1024xf32, #tpu.memory_space<vmem>>, vector<16x1024xf32>,
    %c0_119 = arith.constant 0 : index
    %c97_120 = arith.constant 97 : index
    %118 = vector.load %arg38[%c0_119, %c97_120] : memref<32x1280xf32, #tpu.memory_space<vmem>>, vector<16x1024xf32>
    %119 = vector.broadcast %106 : vector<1x1024xf32> to vector<16x1024xf32>
    %120 = arith.mulf %118, %119 : vector<16x1024xf32>
    %c32_121 = arith.constant 32 : index
    %c0_122 = arith.constant 0 : index
    %121 = vector.load %arg39[%c32_121, %c0_122] : memref<288x1024xf32, #tpu.memory_space<vmem>>, vector<16x1024xf32>
    tpu.vector_store %arg39[%c32_121, %c0_122], %120 {strides = array<i32>} : memref<288x1024xf32, #tpu.memory_space<vmem>>, vector<16x1024xf32>,
    %c0_123 = arith.constant 0 : index
    %c127_124 = arith.constant 127 : index
    %122 = vector.load %arg38[%c0_123, %c127_124] : memref<32x1280xf32, #tpu.memory_space<vmem>>, vector<16x1024xf32>
    %123 = vector.broadcast %105 : vector<1x1024xf32> to vector<16x1024xf32>
    %124 = arith.mulf %122, %123 : vector<16x1024xf32>
    %c48_125 = arith.constant 48 : index
    %c0_126 = arith.constant 0 : index
    %125 = vector.load %arg39[%c48_125, %c0_126] : memref<288x1024xf32, #tpu.memory_space<vmem>>, vector<16x1024xf32>
    tpu.vector_store %arg39[%c48_125, %c0_126], %124 {strides = array<i32>} : memref<288x1024xf32, #tpu.memory_space<vmem>>, vector<16x1024xf32>,
    %c64_127 = arith.constant 64 : index
    %c0_128 = arith.constant 0 : index
    %126 = vector.load %arg39[%c64_127, %c0_128] : memref<288x1024xf32, #tpu.memory_space<vmem>>, vector<16x1024xf32>
    tpu.vector_store %arg39[%c64_127, %c0_128], %104 {strides = array<i32>} : memref<288x1024xf32, #tpu.memory_space<vmem>>, vector<16x1024xf32>,
    %c0_129 = arith.constant 0 : index
    %c129_130 = arith.constant 129 : index
    %127 = vector.load %arg38[%c0_129, %c129_130] : memref<32x1280xf32, #tpu.memory_space<vmem>>, vector<16x1024xf32>
    %128 = vector.broadcast %106 : vector<1x1024xf32> to vector<16x1024xf32>
    %129 = arith.mulf %127, %128 : vector<16x1024xf32>
    %c80 = arith.constant 80 : index
    %c0_131 = arith.constant 0 : index
    %130 = vector.load %arg39[%c80, %c0_131] : memref<288x1024xf32, #tpu.memory_space<vmem>>, vector<16x1024xf32>
    tpu.vector_store %arg39[%c80, %c0_131], %129 {strides = array<i32>} : memref<288x1024xf32, #tpu.memory_space<vmem>>, vector<16x1024xf32>,
    %c0_132 = arith.constant 0 : index
    %c159_133 = arith.constant 159 : index
    %131 = vector.load %arg38[%c0_132, %c159_133] : memref<32x1280xf32, #tpu.memory_space<vmem>>, vector<16x1024xf32>
    %132 = vector.broadcast %105 : vector<1x1024xf32> to vector<16x1024xf32>
    %133 = arith.mulf %131, %132 : vector<16x1024xf32>
    %c96_134 = arith.constant 96 : index
    %c0_135 = arith.constant 0 : index
    %134 = vector.load %arg39[%c96_134, %c0_135] : memref<288x1024xf32, #tpu.memory_space<vmem>>, vector<16x1024xf32>
    tpu.vector_store %arg39[%c96_134, %c0_135], %133 {strides = array<i32>} : memref<288x1024xf32, #tpu.memory_space<vmem>>, vector<16x1024xf32>,
    %c0_136 = arith.constant 0 : index
    %c160_137 = arith.constant 160 : index
    %135 = vector.load %arg38[%c0_136, %c160_137] : memref<32x1280xf32, #tpu.memory_space<vmem>>, vector<16x1024xf32>
    %c112 = arith.constant 112 : index
    %c0_138 = arith.constant 0 : index
    %136 = vector.load %arg39[%c112, %c0_138] : memref<288x1024xf32, #tpu.memory_space<vmem>>, vector<16x1024xf32>
    tpu.vector_store %arg39[%c112, %c0_138], %135 {strides = array<i32>} : memref<288x1024xf32, #tpu.memory_space<vmem>>, vector<16x1024xf32>,
    %c0_139 = arith.constant 0 : index
    %c161_140 = arith.constant 161 : index
    %137 = vector.load %arg38[%c0_139, %c161_140] : memref<32x1280xf32, #tpu.memory_space<vmem>>, vector<16x1024xf32>
    %138 = vector.broadcast %106 : vector<1x1024xf32> to vector<16x1024xf32>
    %139 = arith.mulf %137, %138 : vector<16x1024xf32>
    %c128_141 = arith.constant 128 : index
    %c0_142 = arith.constant 0 : index
    %140 = vector.load %arg39[%c128_141, %c0_142] : memref<288x1024xf32, #tpu.memory_space<vmem>>, vector<16x1024xf32>
    tpu.vector_store %arg39[%c128_141, %c0_142], %139 {strides = array<i32>} : memref<288x1024xf32, #tpu.memory_space<vmem>>, vector<16x1024xf32>,
    %c0_143 = arith.constant 0 : index
    %c0_144 = arith.constant 0 : index
    %141 = vector.load %arg39[%c0_143, %c0_144] : memref<288x1024xf32, #tpu.memory_space<vmem>>, vector<144x1024xf32>
    %c0_145 = arith.constant 0 : index
    %c0_146 = arith.constant 0 : index
    %142 = vector.load %arg10[%c0_145, %c0_146] : memref<16x144xf32, #tpu.memory_space<vmem>>, vector<16x144xf32>
    %cst_147 = arith.constant dense<0.000000e+00> : vector<16x1024xf32>
    %143 = tpu.matmul %142, %141, %cst_147 {dimension_numbers = #tpu.dot_dimension_numbers<[1], [0], [0], [1], [0, 0, 1, 1], [], []>} : vector<16x144xf32>, vector<144x1024xf32>, vector<16x1024xf32> -> vector<16x1024xf32>
    %c0_148 = arith.constant 0 : index
    %c0_149 = arith.constant 0 : index
    %144 = vector.load %arg11[%c0_148, %c0_149] : memref<16x1xf32, #tpu.memory_space<vmem>>, vector<16x1xf32>
    %145 = vector.broadcast %144 : vector<16x1xf32> to vector<16x1024xf32>
    %146 = arith.addf %143, %145 : vector<16x1024xf32>
    %cst_150 = arith.constant 0.000000e+00 : f32
    %147 = vector.broadcast %cst_150 : f32 to vector<16x1024xf32>
    %148 = arith.cmpf oge, %146, %147 : vector<16x1024xf32>
    %cst_151 = arith.constant 1.000000e-01 : f32
    %149 = vector.broadcast %cst_151 : f32 to vector<16x1024xf32>
    %150 = arith.mulf %149, %146 : vector<16x1024xf32>
    %151 = arith.select %148, %146, %150 : vector<16x1024xi1>, vector<16x1024xf32>
    %cst_152 = arith.constant 0.000000e+00 : f32
    %152 = vector.broadcast %cst_152 : f32 to vector<16x128xf32>
    %c0_153 = arith.constant 0 : index
    %c0_154 = arith.constant 0 : index
    %153 = vector.load %arg38[%c0_153, %c0_154] : memref<32x1280xf32, #tpu.memory_space<vmem>>, vector<16x128xf32>
    tpu.vector_store %arg38[%c0_153, %c0_154], %152 {strides = array<i32>} : memref<32x1280xf32, #tpu.memory_space<vmem>>, vector<16x128xf32>,
    %cst_155 = arith.constant 0.000000e+00 : f32
    %154 = vector.broadcast %cst_155 : f32 to vector<16x128xf32>
    %c0_156 = arith.constant 0 : index
    %c1152_157 = arith.constant 1152 : index
    %155 = vector.load %arg38[%c0_156, %c1152_157] : memref<32x1280xf32, #tpu.memory_space<vmem>>, vector<16x128xf32>
    tpu.vector_store %arg38[%c0_156, %c1152_157], %154 {strides = array<i32>} : memref<32x1280xf32, #tpu.memory_space<vmem>>, vector<16x128xf32>,
    %c0_158 = arith.constant 0 : index
    %c128_159 = arith.constant 128 : index
    %156 = vector.load %arg38[%c0_158, %c128_159] : memref<32x1280xf32, #tpu.memory_space<vmem>>, vector<16x1024xf32>
    tpu.vector_store %arg38[%c0_158, %c128_159], %151 {strides = array<i32>} : memref<32x1280xf32, #tpu.memory_space<vmem>>, vector<16x1024xf32>,
    %c0_160 = arith.constant 0 : index
    %c129_161 = arith.constant 129 : index
    %157 = vector.load %arg38[%c0_160, %c129_161] : memref<32x1280xf32, #tpu.memory_space<vmem>>, vector<16x1024xf32>
    %158 = arith.maximumf %151, %157 : vector<16x1024xf32>
    %c0_162 = arith.constant 0 : index
    %c160_163 = arith.constant 160 : index
    %159 = vector.load %arg38[%c0_162, %c160_163] : memref<32x1280xf32, #tpu.memory_space<vmem>>, vector<16x1024xf32>
    %160 = arith.maximumf %158, %159 : vector<16x1024xf32>
    %c0_164 = arith.constant 0 : index
    %c161_165 = arith.constant 161 : index
    %161 = vector.load %arg38[%c0_164, %c161_165] : memref<32x1280xf32, #tpu.memory_space<vmem>>, vector<16x1024xf32>
    %162 = arith.maximumf %160, %161 : vector<16x1024xf32>
    %c0_166 = arith.constant 0 : index
    %c0_167 = arith.constant 0 : index
    %163 = vector.load %arg28[%c0_166, %c0_167] : memref<1024x256xf32, #tpu.memory_space<vmem>>, vector<1024x256xf32>
    %cst_168 = arith.constant dense<0.000000e+00> : vector<16x256xf32>
    %164 = tpu.matmul %162, %163, %cst_168 {dimension_numbers = #tpu.dot_dimension_numbers<[1], [0], [0], [1], [0, 0, 1, 1], [], []>} : vector<16x1024xf32>, vector<1024x256xf32>, vector<16x256xf32> -> vector<16x256xf32>
    %c0_169 = arith.constant 0 : index
    %c0_170 = arith.constant 0 : index
    %165 = vector.load %arg12[%c0_169, %c0_170] : memref<16x1xf32, #tpu.memory_space<vmem>>, vector<16x1xf32>
    %166 = vector.broadcast %165 : vector<16x1xf32> to vector<16x256xf32>
    %167 = arith.mulf %164, %166 : vector<16x256xf32>
    %c0_171 = arith.constant 0 : index
    %c0_172 = arith.constant 0 : index
    %168 = vector.load %arg13[%c0_171, %c0_172] : memref<16x1xf32, #tpu.memory_space<vmem>>, vector<16x1xf32>
    %169 = vector.broadcast %168 : vector<16x1xf32> to vector<16x256xf32>
    %170 = arith.addf %167, %169 : vector<16x256xf32>
    %c0_173 = arith.constant 0 : index
    %c0_174 = arith.constant 0 : index
    %171 = vector.load %arg31[%c0_173, %c0_174] : memref<2x256xf32, #tpu.memory_space<vmem>>, vector<1x256xf32>
    %c1_175 = arith.constant 1 : index
    %c0_176 = arith.constant 0 : index
    %172 = vector.load %arg31[%c1_175, %c0_176] : memref<2x256xf32, #tpu.memory_space<vmem>>, vector<1x256xf32>
    %cst_177 = arith.constant 0.000000e+00 : f32
    %173 = vector.broadcast %cst_177 : f32 to vector<16x128xf32>
    %c0_178 = arith.constant 0 : index
    %c0_179 = arith.constant 0 : index
    %174 = vector.load %arg38[%c0_178, %c0_179] : memref<32x1280xf32, #tpu.memory_space<vmem>>, vector<16x128xf32>
    tpu.vector_store %arg38[%c0_178, %c0_179], %173 {strides = array<i32>} : memref<32x1280xf32, #tpu.memory_space<vmem>>, vector<16x128xf32>,
    %cst_180 = arith.constant 0.000000e+00 : f32
    %175 = vector.broadcast %cst_180 : f32 to vector<16x256xf32>
    %c0_181 = arith.constant 0 : index
    %c384 = arith.constant 384 : index
    %176 = vector.load %arg38[%c0_181, %c384] : memref<32x1280xf32, #tpu.memory_space<vmem>>, vector<16x256xf32>
    tpu.vector_store %arg38[%c0_181, %c384], %175 {strides = array<i32>} : memref<32x1280xf32, #tpu.memory_space<vmem>>, vector<16x256xf32>,
    %c0_182 = arith.constant 0 : index
    %c128_183 = arith.constant 128 : index
    %177 = vector.load %arg38[%c0_182, %c128_183] : memref<32x1280xf32, #tpu.memory_space<vmem>>, vector<16x256xf32>
    tpu.vector_store %arg38[%c0_182, %c128_183], %170 {strides = array<i32>} : memref<32x1280xf32, #tpu.memory_space<vmem>>, vector<16x256xf32>,
    %c0_184 = arith.constant 0 : index
    %c111 = arith.constant 111 : index
    %178 = vector.load %arg38[%c0_184, %c111] : memref<32x1280xf32, #tpu.memory_space<vmem>>, vector<16x256xf32>
    %179 = vector.broadcast %171 : vector<1x256xf32> to vector<16x256xf32>
    %180 = arith.mulf %178, %179 : vector<16x256xf32>
    %c0_185 = arith.constant 0 : index
    %c0_186 = arith.constant 0 : index
    %181 = vector.load %arg39[%c0_185, %c0_186] : memref<288x1024xf32, #tpu.memory_space<vmem>>, vector<16x256xf32>
    tpu.vector_store %arg39[%c0_185, %c0_186], %180 {strides = array<i32>} : memref<288x1024xf32, #tpu.memory_space<vmem>>, vector<16x256xf32>,
    %c0_187 = arith.constant 0 : index
    %c112_188 = arith.constant 112 : index
    %182 = vector.load %arg38[%c0_187, %c112_188] : memref<32x1280xf32, #tpu.memory_space<vmem>>, vector<16x256xf32>
    %c16_189 = arith.constant 16 : index
    %c0_190 = arith.constant 0 : index
    %183 = vector.load %arg39[%c16_189, %c0_190] : memref<288x1024xf32, #tpu.memory_space<vmem>>, vector<16x256xf32>
    tpu.vector_store %arg39[%c16_189, %c0_190], %182 {strides = array<i32>} : memref<288x1024xf32, #tpu.memory_space<vmem>>, vector<16x256xf32>,
    %c0_191 = arith.constant 0 : index
    %c113 = arith.constant 113 : index
    %184 = vector.load %arg38[%c0_191, %c113] : memref<32x1280xf32, #tpu.memory_space<vmem>>, vector<16x256xf32>
    %185 = vector.broadcast %172 : vector<1x256xf32> to vector<16x256xf32>
    %186 = arith.mulf %184, %185 : vector<16x256xf32>
    %c32_192 = arith.constant 32 : index
    %c0_193 = arith.constant 0 : index
    %187 = vector.load %arg39[%c32_192, %c0_193] : memref<288x1024xf32, #tpu.memory_space<vmem>>, vector<16x256xf32>
    tpu.vector_store %arg39[%c32_192, %c0_193], %186 {strides = array<i32>} : memref<288x1024xf32, #tpu.memory_space<vmem>>, vector<16x256xf32>,
    %c0_194 = arith.constant 0 : index
    %c127_195 = arith.constant 127 : index
    %188 = vector.load %arg38[%c0_194, %c127_195] : memref<32x1280xf32, #tpu.memory_space<vmem>>, vector<16x256xf32>
    %189 = vector.broadcast %171 : vector<1x256xf32> to vector<16x256xf32>
    %190 = arith.mulf %188, %189 : vector<16x256xf32>
    %c48_196 = arith.constant 48 : index
    %c0_197 = arith.constant 0 : index
    %191 = vector.load %arg39[%c48_196, %c0_197] : memref<288x1024xf32, #tpu.memory_space<vmem>>, vector<16x256xf32>
    tpu.vector_store %arg39[%c48_196, %c0_197], %190 {strides = array<i32>} : memref<288x1024xf32, #tpu.memory_space<vmem>>, vector<16x256xf32>,
    %c64_198 = arith.constant 64 : index
    %c0_199 = arith.constant 0 : index
    %192 = vector.load %arg39[%c64_198, %c0_199] : memref<288x1024xf32, #tpu.memory_space<vmem>>, vector<16x256xf32>
    tpu.vector_store %arg39[%c64_198, %c0_199], %170 {strides = array<i32>} : memref<288x1024xf32, #tpu.memory_space<vmem>>, vector<16x256xf32>,
    %c0_200 = arith.constant 0 : index
    %c129_201 = arith.constant 129 : index
    %193 = vector.load %arg38[%c0_200, %c129_201] : memref<32x1280xf32, #tpu.memory_space<vmem>>, vector<16x256xf32>
    %194 = vector.broadcast %172 : vector<1x256xf32> to vector<16x256xf32>
    %195 = arith.mulf %193, %194 : vector<16x256xf32>
    %c80_202 = arith.constant 80 : index
    %c0_203 = arith.constant 0 : index
    %196 = vector.load %arg39[%c80_202, %c0_203] : memref<288x1024xf32, #tpu.memory_space<vmem>>, vector<16x256xf32>
    tpu.vector_store %arg39[%c80_202, %c0_203], %195 {strides = array<i32>} : memref<288x1024xf32, #tpu.memory_space<vmem>>, vector<16x256xf32>,
    %c0_204 = arith.constant 0 : index
    %c143 = arith.constant 143 : index
    %197 = vector.load %arg38[%c0_204, %c143] : memref<32x1280xf32, #tpu.memory_space<vmem>>, vector<16x256xf32>
    %198 = vector.broadcast %171 : vector<1x256xf32> to vector<16x256xf32>
    %199 = arith.mulf %197, %198 : vector<16x256xf32>
    %c96_205 = arith.constant 96 : index
    %c0_206 = arith.constant 0 : index
    %200 = vector.load %arg39[%c96_205, %c0_206] : memref<288x1024xf32, #tpu.memory_space<vmem>>, vector<16x256xf32>
    tpu.vector_store %arg39[%c96_205, %c0_206], %199 {strides = array<i32>} : memref<288x1024xf32, #tpu.memory_space<vmem>>, vector<16x256xf32>,
    %c0_207 = arith.constant 0 : index
    %c144 = arith.constant 144 : index
    %201 = vector.load %arg38[%c0_207, %c144] : memref<32x1280xf32, #tpu.memory_space<vmem>>, vector<16x256xf32>
    %c112_208 = arith.constant 112 : index
    %c0_209 = arith.constant 0 : index
    %202 = vector.load %arg39[%c112_208, %c0_209] : memref<288x1024xf32, #tpu.memory_space<vmem>>, vector<16x256xf32>
    tpu.vector_store %arg39[%c112_208, %c0_209], %201 {strides = array<i32>} : memref<288x1024xf32, #tpu.memory_space<vmem>>, vector<16x256xf32>,
    %c0_210 = arith.constant 0 : index
    %c145 = arith.constant 145 : index
    %203 = vector.load %arg38[%c0_210, %c145] : memref<32x1280xf32, #tpu.memory_space<vmem>>, vector<16x256xf32>
    %204 = vector.broadcast %172 : vector<1x256xf32> to vector<16x256xf32>
    %205 = arith.mulf %203, %204 : vector<16x256xf32>
    %c128_211 = arith.constant 128 : index
    %c0_212 = arith.constant 0 : index
    %206 = vector.load %arg39[%c128_211, %c0_212] : memref<288x1024xf32, #tpu.memory_space<vmem>>, vector<16x256xf32>
    tpu.vector_store %arg39[%c128_211, %c0_212], %205 {strides = array<i32>} : memref<288x1024xf32, #tpu.memory_space<vmem>>, vector<16x256xf32>,
    %c0_213 = arith.constant 0 : index
    %c0_214 = arith.constant 0 : index
    %207 = vector.load %arg39[%c0_213, %c0_214] : memref<288x1024xf32, #tpu.memory_space<vmem>>, vector<144x256xf32>
    %c0_215 = arith.constant 0 : index
    %c0_216 = arith.constant 0 : index
    %208 = vector.load %arg14[%c0_215, %c0_216] : memref<32x144xf32, #tpu.memory_space<vmem>>, vector<32x144xf32>
    %cst_217 = arith.constant dense<0.000000e+00> : vector<32x256xf32>
    %209 = tpu.matmul %208, %207, %cst_217 {dimension_numbers = #tpu.dot_dimension_numbers<[1], [0], [0], [1], [0, 0, 1, 1], [], []>} : vector<32x144xf32>, vector<144x256xf32>, vector<32x256xf32> -> vector<32x256xf32>
    %c0_218 = arith.constant 0 : index
    %c0_219 = arith.constant 0 : index
    %210 = vector.load %arg15[%c0_218, %c0_219] : memref<32x1xf32, #tpu.memory_space<vmem>>, vector<32x1xf32>
    %211 = vector.broadcast %210 : vector<32x1xf32> to vector<32x256xf32>
    %212 = arith.addf %209, %211 : vector<32x256xf32>
    %cst_220 = arith.constant 0.000000e+00 : f32
    %213 = vector.broadcast %cst_220 : f32 to vector<32x256xf32>
    %214 = arith.cmpf oge, %212, %213 : vector<32x256xf32>
    %cst_221 = arith.constant 1.000000e-01 : f32
    %215 = vector.broadcast %cst_221 : f32 to vector<32x256xf32>
    %216 = arith.mulf %215, %212 : vector<32x256xf32>
    %217 = arith.select %214, %212, %216 : vector<32x256xi1>, vector<32x256xf32>
    %c0_222 = arith.constant 0 : index
    %c0_223 = arith.constant 0 : index
    %218 = vector.load %arg16[%c0_222, %c0_223] : memref<32x1xf32, #tpu.memory_space<vmem>>, vector<32x1xf32>
    %219 = vector.broadcast %218 : vector<32x1xf32> to vector<32x256xf32>
    %220 = arith.mulf %217, %219 : vector<32x256xf32>
    %c0_224 = arith.constant 0 : index
    %c0_225 = arith.constant 0 : index
    %221 = vector.load %arg17[%c0_224, %c0_225] : memref<32x1xf32, #tpu.memory_space<vmem>>, vector<32x1xf32>
    %222 = vector.broadcast %221 : vector<32x1xf32> to vector<32x256xf32>
    %223 = arith.addf %220, %222 : vector<32x256xf32>
    %c0_226 = arith.constant 0 : index
    %c0_227 = arith.constant 0 : index
    %224 = vector.load %arg31[%c0_226, %c0_227] : memref<2x256xf32, #tpu.memory_space<vmem>>, vector<1x256xf32>
    %c1_228 = arith.constant 1 : index
    %c0_229 = arith.constant 0 : index
    %225 = vector.load %arg31[%c1_228, %c0_229] : memref<2x256xf32, #tpu.memory_space<vmem>>, vector<1x256xf32>
    %cst_230 = arith.constant 0.000000e+00 : f32
    %226 = vector.broadcast %cst_230 : f32 to vector<32x128xf32>
    %c0_231 = arith.constant 0 : index
    %c0_232 = arith.constant 0 : index
    %227 = vector.load %arg38[%c0_231, %c0_232] : memref<32x1280xf32, #tpu.memory_space<vmem>>, vector<32x128xf32>
    tpu.vector_store %arg38[%c0_231, %c0_232], %226 {strides = array<i32>} : memref<32x1280xf32, #tpu.memory_space<vmem>>, vector<32x128xf32>,
    %cst_233 = arith.constant 0.000000e+00 : f32
    %228 = vector.broadcast %cst_233 : f32 to vector<32x256xf32>
    %c0_234 = arith.constant 0 : index
    %c384_235 = arith.constant 384 : index
    %229 = vector.load %arg38[%c0_234, %c384_235] : memref<32x1280xf32, #tpu.memory_space<vmem>>, vector<32x256xf32>
    tpu.vector_store %arg38[%c0_234, %c384_235], %228 {strides = array<i32>} : memref<32x1280xf32, #tpu.memory_space<vmem>>, vector<32x256xf32>,
    %c0_236 = arith.constant 0 : index
    %c128_237 = arith.constant 128 : index
    %230 = vector.load %arg38[%c0_236, %c128_237] : memref<32x1280xf32, #tpu.memory_space<vmem>>, vector<32x256xf32>
    tpu.vector_store %arg38[%c0_236, %c128_237], %223 {strides = array<i32>} : memref<32x1280xf32, #tpu.memory_space<vmem>>, vector<32x256xf32>,
    %c0_238 = arith.constant 0 : index
    %c111_239 = arith.constant 111 : index
    %231 = vector.load %arg38[%c0_238, %c111_239] : memref<32x1280xf32, #tpu.memory_space<vmem>>, vector<32x256xf32>
    %232 = vector.broadcast %224 : vector<1x256xf32> to vector<32x256xf32>
    %233 = arith.mulf %231, %232 : vector<32x256xf32>
    %c0_240 = arith.constant 0 : index
    %c0_241 = arith.constant 0 : index
    %234 = vector.load %arg39[%c0_240, %c0_241] : memref<288x1024xf32, #tpu.memory_space<vmem>>, vector<32x256xf32>
    tpu.vector_store %arg39[%c0_240, %c0_241], %233 {strides = array<i32>} : memref<288x1024xf32, #tpu.memory_space<vmem>>, vector<32x256xf32>,
    %c0_242 = arith.constant 0 : index
    %c112_243 = arith.constant 112 : index
    %235 = vector.load %arg38[%c0_242, %c112_243] : memref<32x1280xf32, #tpu.memory_space<vmem>>, vector<32x256xf32>
    %c32_244 = arith.constant 32 : index
    %c0_245 = arith.constant 0 : index
    %236 = vector.load %arg39[%c32_244, %c0_245] : memref<288x1024xf32, #tpu.memory_space<vmem>>, vector<32x256xf32>
    tpu.vector_store %arg39[%c32_244, %c0_245], %235 {strides = array<i32>} : memref<288x1024xf32, #tpu.memory_space<vmem>>, vector<32x256xf32>,
    %c0_246 = arith.constant 0 : index
    %c113_247 = arith.constant 113 : index
    %237 = vector.load %arg38[%c0_246, %c113_247] : memref<32x1280xf32, #tpu.memory_space<vmem>>, vector<32x256xf32>
    %238 = vector.broadcast %225 : vector<1x256xf32> to vector<32x256xf32>
    %239 = arith.mulf %237, %238 : vector<32x256xf32>
    %c64_248 = arith.constant 64 : index
    %c0_249 = arith.constant 0 : index
    %240 = vector.load %arg39[%c64_248, %c0_249] : memref<288x1024xf32, #tpu.memory_space<vmem>>, vector<32x256xf32>
    tpu.vector_store %arg39[%c64_248, %c0_249], %239 {strides = array<i32>} : memref<288x1024xf32, #tpu.memory_space<vmem>>, vector<32x256xf32>,
    %c0_250 = arith.constant 0 : index
    %c127_251 = arith.constant 127 : index
    %241 = vector.load %arg38[%c0_250, %c127_251] : memref<32x1280xf32, #tpu.memory_space<vmem>>, vector<32x256xf32>
    %242 = vector.broadcast %224 : vector<1x256xf32> to vector<32x256xf32>
    %243 = arith.mulf %241, %242 : vector<32x256xf32>
    %c96_252 = arith.constant 96 : index
    %c0_253 = arith.constant 0 : index
    %244 = vector.load %arg39[%c96_252, %c0_253] : memref<288x1024xf32, #tpu.memory_space<vmem>>, vector<32x256xf32>
    tpu.vector_store %arg39[%c96_252, %c0_253], %243 {strides = array<i32>} : memref<288x1024xf32, #tpu.memory_space<vmem>>, vector<32x256xf32>,
    %c128_254 = arith.constant 128 : index
    %c0_255 = arith.constant 0 : index
    %245 = vector.load %arg39[%c128_254, %c0_255] : memref<288x1024xf32, #tpu.memory_space<vmem>>, vector<32x256xf32>
    tpu.vector_store %arg39[%c128_254, %c0_255], %223 {strides = array<i32>} : memref<288x1024xf32, #tpu.memory_space<vmem>>, vector<32x256xf32>,
    %c0_256 = arith.constant 0 : index
    %c129_257 = arith.constant 129 : index
    %246 = vector.load %arg38[%c0_256, %c129_257] : memref<32x1280xf32, #tpu.memory_space<vmem>>, vector<32x256xf32>
    %247 = vector.broadcast %225 : vector<1x256xf32> to vector<32x256xf32>
    %248 = arith.mulf %246, %247 : vector<32x256xf32>
    %c160_258 = arith.constant 160 : index
    %c0_259 = arith.constant 0 : index
    %249 = vector.load %arg39[%c160_258, %c0_259] : memref<288x1024xf32, #tpu.memory_space<vmem>>, vector<32x256xf32>
    tpu.vector_store %arg39[%c160_258, %c0_259], %248 {strides = array<i32>} : memref<288x1024xf32, #tpu.memory_space<vmem>>, vector<32x256xf32>,
    %c0_260 = arith.constant 0 : index
    %c143_261 = arith.constant 143 : index
    %250 = vector.load %arg38[%c0_260, %c143_261] : memref<32x1280xf32, #tpu.memory_space<vmem>>, vector<32x256xf32>
    %251 = vector.broadcast %224 : vector<1x256xf32> to vector<32x256xf32>
    %252 = arith.mulf %250, %251 : vector<32x256xf32>
    %c192 = arith.constant 192 : index
    %c0_262 = arith.constant 0 : index
    %253 = vector.load %arg39[%c192, %c0_262] : memref<288x1024xf32, #tpu.memory_space<vmem>>, vector<32x256xf32>
    tpu.vector_store %arg39[%c192, %c0_262], %252 {strides = array<i32>} : memref<288x1024xf32, #tpu.memory_space<vmem>>, vector<32x256xf32>,
    %c0_263 = arith.constant 0 : index
    %c144_264 = arith.constant 144 : index
    %254 = vector.load %arg38[%c0_263, %c144_264] : memref<32x1280xf32, #tpu.memory_space<vmem>>, vector<32x256xf32>
    %c224 = arith.constant 224 : index
    %c0_265 = arith.constant 0 : index
    %255 = vector.load %arg39[%c224, %c0_265] : memref<288x1024xf32, #tpu.memory_space<vmem>>, vector<32x256xf32>
    tpu.vector_store %arg39[%c224, %c0_265], %254 {strides = array<i32>} : memref<288x1024xf32, #tpu.memory_space<vmem>>, vector<32x256xf32>,
    %c0_266 = arith.constant 0 : index
    %c145_267 = arith.constant 145 : index
    %256 = vector.load %arg38[%c0_266, %c145_267] : memref<32x1280xf32, #tpu.memory_space<vmem>>, vector<32x256xf32>
    %257 = vector.broadcast %225 : vector<1x256xf32> to vector<32x256xf32>
    %258 = arith.mulf %256, %257 : vector<32x256xf32>
    %c256 = arith.constant 256 : index
    %c0_268 = arith.constant 0 : index
    %259 = vector.load %arg39[%c256, %c0_268] : memref<288x1024xf32, #tpu.memory_space<vmem>>, vector<32x256xf32>
    tpu.vector_store %arg39[%c256, %c0_268], %258 {strides = array<i32>} : memref<288x1024xf32, #tpu.memory_space<vmem>>, vector<32x256xf32>,
    %c0_269 = arith.constant 0 : index
    %c0_270 = arith.constant 0 : index
    %260 = vector.load %arg39[%c0_269, %c0_270] : memref<288x1024xf32, #tpu.memory_space<vmem>>, vector<288x256xf32>
    %c0_271 = arith.constant 0 : index
    %c0_272 = arith.constant 0 : index
    %261 = vector.load %arg18[%c0_271, %c0_272] : memref<32x288xf32, #tpu.memory_space<vmem>>, vector<32x288xf32>
    %cst_273 = arith.constant dense<0.000000e+00> : vector<32x256xf32>
    %262 = tpu.matmul %261, %260, %cst_273 {dimension_numbers = #tpu.dot_dimension_numbers<[1], [0], [0], [1], [0, 0, 1, 1], [], []>} : vector<32x288xf32>, vector<288x256xf32>, vector<32x256xf32> -> vector<32x256xf32>
    %c0_274 = arith.constant 0 : index
    %c0_275 = arith.constant 0 : index
    %263 = vector.load %arg19[%c0_274, %c0_275] : memref<32x1xf32, #tpu.memory_space<vmem>>, vector<32x1xf32>
    %264 = vector.broadcast %263 : vector<32x1xf32> to vector<32x256xf32>
    %265 = arith.addf %262, %264 : vector<32x256xf32>
    %cst_276 = arith.constant 0.000000e+00 : f32
    %266 = vector.broadcast %cst_276 : f32 to vector<32x256xf32>
    %267 = arith.cmpf oge, %265, %266 : vector<32x256xf32>
    %cst_277 = arith.constant 1.000000e-01 : f32
    %268 = vector.broadcast %cst_277 : f32 to vector<32x256xf32>
    %269 = arith.mulf %268, %265 : vector<32x256xf32>
    %270 = arith.select %267, %265, %269 : vector<32x256xi1>, vector<32x256xf32>
    %cst_278 = arith.constant 0.000000e+00 : f32
    %271 = vector.broadcast %cst_278 : f32 to vector<32x128xf32>
    %c0_279 = arith.constant 0 : index
    %c0_280 = arith.constant 0 : index
    %272 = vector.load %arg38[%c0_279, %c0_280] : memref<32x1280xf32, #tpu.memory_space<vmem>>, vector<32x128xf32>
    tpu.vector_store %arg38[%c0_279, %c0_280], %271 {strides = array<i32>} : memref<32x1280xf32, #tpu.memory_space<vmem>>, vector<32x128xf32>,
    %cst_281 = arith.constant 0.000000e+00 : f32
    %273 = vector.broadcast %cst_281 : f32 to vector<32x256xf32>
    %c0_282 = arith.constant 0 : index
    %c384_283 = arith.constant 384 : index
    %274 = vector.load %arg38[%c0_282, %c384_283] : memref<32x1280xf32, #tpu.memory_space<vmem>>, vector<32x256xf32>
    tpu.vector_store %arg38[%c0_282, %c384_283], %273 {strides = array<i32>} : memref<32x1280xf32, #tpu.memory_space<vmem>>, vector<32x256xf32>,
    %c0_284 = arith.constant 0 : index
    %c128_285 = arith.constant 128 : index
    %275 = vector.load %arg38[%c0_284, %c128_285] : memref<32x1280xf32, #tpu.memory_space<vmem>>, vector<32x256xf32>
    tpu.vector_store %arg38[%c0_284, %c128_285], %270 {strides = array<i32>} : memref<32x1280xf32, #tpu.memory_space<vmem>>, vector<32x256xf32>,
    %c0_286 = arith.constant 0 : index
    %c129_287 = arith.constant 129 : index
    %276 = vector.load %arg38[%c0_286, %c129_287] : memref<32x1280xf32, #tpu.memory_space<vmem>>, vector<32x256xf32>
    %277 = arith.maximumf %270, %276 : vector<32x256xf32>
    %c0_288 = arith.constant 0 : index
    %c144_289 = arith.constant 144 : index
    %278 = vector.load %arg38[%c0_288, %c144_289] : memref<32x1280xf32, #tpu.memory_space<vmem>>, vector<32x256xf32>
    %279 = arith.maximumf %277, %278 : vector<32x256xf32>
    %c0_290 = arith.constant 0 : index
    %c145_291 = arith.constant 145 : index
    %280 = vector.load %arg38[%c0_290, %c145_291] : memref<32x1280xf32, #tpu.memory_space<vmem>>, vector<32x256xf32>
    %281 = arith.maximumf %279, %280 : vector<32x256xf32>
    %c0_292 = arith.constant 0 : index
    %c0_293 = arith.constant 0 : index
    %282 = vector.load %arg29[%c0_292, %c0_293] : memref<256x64xf32, #tpu.memory_space<vmem>>, vector<256x64xf32>
    %cst_294 = arith.constant dense<0.000000e+00> : vector<32x64xf32>
    %283 = tpu.matmul %281, %282, %cst_294 {dimension_numbers = #tpu.dot_dimension_numbers<[1], [0], [0], [1], [0, 0, 1, 1], [], []>} : vector<32x256xf32>, vector<256x64xf32>, vector<32x64xf32> -> vector<32x64xf32>
    %c0_295 = arith.constant 0 : index
    %c0_296 = arith.constant 0 : index
    %284 = vector.load %arg20[%c0_295, %c0_296] : memref<32x1xf32, #tpu.memory_space<vmem>>, vector<32x1xf32>
    %285 = vector.broadcast %284 : vector<32x1xf32> to vector<32x64xf32>
    %286 = arith.mulf %283, %285 : vector<32x64xf32>
    %c0_297 = arith.constant 0 : index
    %c0_298 = arith.constant 0 : index
    %287 = vector.load %arg21[%c0_297, %c0_298] : memref<32x1xf32, #tpu.memory_space<vmem>>, vector<32x1xf32>
    %288 = vector.broadcast %287 : vector<32x1xf32> to vector<32x64xf32>
    %289 = arith.addf %286, %288 : vector<32x64xf32>
    %c0_299 = arith.constant 0 : index
    %c0_300 = arith.constant 0 : index
    %290 = vector.load %arg32[%c0_299, %c0_300] : memref<2x64xf32, #tpu.memory_space<vmem>>, vector<1x64xf32>
    %c1_301 = arith.constant 1 : index
    %c0_302 = arith.constant 0 : index
    %291 = vector.load %arg32[%c1_301, %c0_302] : memref<2x64xf32, #tpu.memory_space<vmem>>, vector<1x64xf32>
    %cst_303 = arith.constant 0.000000e+00 : f32
    %292 = vector.broadcast %cst_303 : f32 to vector<32x128xf32>
    %c0_304 = arith.constant 0 : index
    %c0_305 = arith.constant 0 : index
    %293 = vector.load %arg38[%c0_304, %c0_305] : memref<32x1280xf32, #tpu.memory_space<vmem>>, vector<32x128xf32>
    tpu.vector_store %arg38[%c0_304, %c0_305], %292 {strides = array<i32>} : memref<32x1280xf32, #tpu.memory_space<vmem>>, vector<32x128xf32>,
    %cst_306 = arith.constant 0.000000e+00 : f32
    %294 = vector.broadcast %cst_306 : f32 to vector<32x256xf32>
    %c0_307 = arith.constant 0 : index
    %c128_308 = arith.constant 128 : index
    %295 = vector.load %arg38[%c0_307, %c128_308] : memref<32x1280xf32, #tpu.memory_space<vmem>>, vector<32x256xf32>
    tpu.vector_store %arg38[%c0_307, %c128_308], %294 {strides = array<i32>} : memref<32x1280xf32, #tpu.memory_space<vmem>>, vector<32x256xf32>,
    %c0_309 = arith.constant 0 : index
    %c128_310 = arith.constant 128 : index
    %296 = vector.load %arg38[%c0_309, %c128_310] : memref<32x1280xf32, #tpu.memory_space<vmem>>, vector<32x64xf32>
    tpu.vector_store %arg38[%c0_309, %c128_310], %289 {strides = array<i32>} : memref<32x1280xf32, #tpu.memory_space<vmem>>, vector<32x64xf32>,
    %c0_311 = arith.constant 0 : index
    %c119 = arith.constant 119 : index
    %297 = vector.load %arg38[%c0_311, %c119] : memref<32x1280xf32, #tpu.memory_space<vmem>>, vector<32x64xf32>
    %298 = vector.broadcast %290 : vector<1x64xf32> to vector<32x64xf32>
    %299 = arith.mulf %297, %298 : vector<32x64xf32>
    %c0_312 = arith.constant 0 : index
    %c0_313 = arith.constant 0 : index
    %300 = vector.load %arg39[%c0_312, %c0_313] : memref<288x1024xf32, #tpu.memory_space<vmem>>, vector<32x64xf32>
    tpu.vector_store %arg39[%c0_312, %c0_313], %299 {strides = array<i32>} : memref<288x1024xf32, #tpu.memory_space<vmem>>, vector<32x64xf32>,
    %c0_314 = arith.constant 0 : index
    %c120 = arith.constant 120 : index
    %301 = vector.load %arg38[%c0_314, %c120] : memref<32x1280xf32, #tpu.memory_space<vmem>>, vector<32x64xf32>
    %c32_315 = arith.constant 32 : index
    %c0_316 = arith.constant 0 : index
    %302 = vector.load %arg39[%c32_315, %c0_316] : memref<288x1024xf32, #tpu.memory_space<vmem>>, vector<32x64xf32>
    tpu.vector_store %arg39[%c32_315, %c0_316], %301 {strides = array<i32>} : memref<288x1024xf32, #tpu.memory_space<vmem>>, vector<32x64xf32>,
    %c0_317 = arith.constant 0 : index
    %c121 = arith.constant 121 : index
    %303 = vector.load %arg38[%c0_317, %c121] : memref<32x1280xf32, #tpu.memory_space<vmem>>, vector<32x64xf32>
    %304 = vector.broadcast %291 : vector<1x64xf32> to vector<32x64xf32>
    %305 = arith.mulf %303, %304 : vector<32x64xf32>
    %c64_318 = arith.constant 64 : index
    %c0_319 = arith.constant 0 : index
    %306 = vector.load %arg39[%c64_318, %c0_319] : memref<288x1024xf32, #tpu.memory_space<vmem>>, vector<32x64xf32>
    tpu.vector_store %arg39[%c64_318, %c0_319], %305 {strides = array<i32>} : memref<288x1024xf32, #tpu.memory_space<vmem>>, vector<32x64xf32>,
    %c0_320 = arith.constant 0 : index
    %c127_321 = arith.constant 127 : index
    %307 = vector.load %arg38[%c0_320, %c127_321] : memref<32x1280xf32, #tpu.memory_space<vmem>>, vector<32x64xf32>
    %308 = vector.broadcast %290 : vector<1x64xf32> to vector<32x64xf32>
    %309 = arith.mulf %307, %308 : vector<32x64xf32>
    %c96_322 = arith.constant 96 : index
    %c0_323 = arith.constant 0 : index
    %310 = vector.load %arg39[%c96_322, %c0_323] : memref<288x1024xf32, #tpu.memory_space<vmem>>, vector<32x64xf32>
    tpu.vector_store %arg39[%c96_322, %c0_323], %309 {strides = array<i32>} : memref<288x1024xf32, #tpu.memory_space<vmem>>, vector<32x64xf32>,
    %c128_324 = arith.constant 128 : index
    %c0_325 = arith.constant 0 : index
    %311 = vector.load %arg39[%c128_324, %c0_325] : memref<288x1024xf32, #tpu.memory_space<vmem>>, vector<32x64xf32>
    tpu.vector_store %arg39[%c128_324, %c0_325], %289 {strides = array<i32>} : memref<288x1024xf32, #tpu.memory_space<vmem>>, vector<32x64xf32>,
    %c0_326 = arith.constant 0 : index
    %c129_327 = arith.constant 129 : index
    %312 = vector.load %arg38[%c0_326, %c129_327] : memref<32x1280xf32, #tpu.memory_space<vmem>>, vector<32x64xf32>
    %313 = vector.broadcast %291 : vector<1x64xf32> to vector<32x64xf32>
    %314 = arith.mulf %312, %313 : vector<32x64xf32>
    %c160_328 = arith.constant 160 : index
    %c0_329 = arith.constant 0 : index
    %315 = vector.load %arg39[%c160_328, %c0_329] : memref<288x1024xf32, #tpu.memory_space<vmem>>, vector<32x64xf32>
    tpu.vector_store %arg39[%c160_328, %c0_329], %314 {strides = array<i32>} : memref<288x1024xf32, #tpu.memory_space<vmem>>, vector<32x64xf32>,
    %c0_330 = arith.constant 0 : index
    %c135 = arith.constant 135 : index
    %316 = vector.load %arg38[%c0_330, %c135] : memref<32x1280xf32, #tpu.memory_space<vmem>>, vector<32x64xf32>
    %317 = vector.broadcast %290 : vector<1x64xf32> to vector<32x64xf32>
    %318 = arith.mulf %316, %317 : vector<32x64xf32>
    %c192_331 = arith.constant 192 : index
    %c0_332 = arith.constant 0 : index
    %319 = vector.load %arg39[%c192_331, %c0_332] : memref<288x1024xf32, #tpu.memory_space<vmem>>, vector<32x64xf32>
    tpu.vector_store %arg39[%c192_331, %c0_332], %318 {strides = array<i32>} : memref<288x1024xf32, #tpu.memory_space<vmem>>, vector<32x64xf32>,
    %c0_333 = arith.constant 0 : index
    %c136 = arith.constant 136 : index
    %320 = vector.load %arg38[%c0_333, %c136] : memref<32x1280xf32, #tpu.memory_space<vmem>>, vector<32x64xf32>
    %c224_334 = arith.constant 224 : index
    %c0_335 = arith.constant 0 : index
    %321 = vector.load %arg39[%c224_334, %c0_335] : memref<288x1024xf32, #tpu.memory_space<vmem>>, vector<32x64xf32>
    tpu.vector_store %arg39[%c224_334, %c0_335], %320 {strides = array<i32>} : memref<288x1024xf32, #tpu.memory_space<vmem>>, vector<32x64xf32>,
    %c0_336 = arith.constant 0 : index
    %c137 = arith.constant 137 : index
    %322 = vector.load %arg38[%c0_336, %c137] : memref<32x1280xf32, #tpu.memory_space<vmem>>, vector<32x64xf32>
    %323 = vector.broadcast %291 : vector<1x64xf32> to vector<32x64xf32>
    %324 = arith.mulf %322, %323 : vector<32x64xf32>
    %c256_337 = arith.constant 256 : index
    %c0_338 = arith.constant 0 : index
    %325 = vector.load %arg39[%c256_337, %c0_338] : memref<288x1024xf32, #tpu.memory_space<vmem>>, vector<32x64xf32>
    tpu.vector_store %arg39[%c256_337, %c0_338], %324 {strides = array<i32>} : memref<288x1024xf32, #tpu.memory_space<vmem>>, vector<32x64xf32>,
    %c0_339 = arith.constant 0 : index
    %c0_340 = arith.constant 0 : index
    %326 = vector.load %arg39[%c0_339, %c0_340] : memref<288x1024xf32, #tpu.memory_space<vmem>>, vector<288x64xf32>
    %c0_341 = arith.constant 0 : index
    %c0_342 = arith.constant 0 : index
    %327 = vector.load %arg22[%c0_341, %c0_342] : memref<32x288xf32, #tpu.memory_space<vmem>>, vector<32x288xf32>
    %cst_343 = arith.constant dense<0.000000e+00> : vector<32x64xf32>
    %328 = tpu.matmul %327, %326, %cst_343 {dimension_numbers = #tpu.dot_dimension_numbers<[1], [0], [0], [1], [0, 0, 1, 1], [], []>} : vector<32x288xf32>, vector<288x64xf32>, vector<32x64xf32> -> vector<32x64xf32>
    %c0_344 = arith.constant 0 : index
    %c0_345 = arith.constant 0 : index
    %329 = vector.load %arg23[%c0_344, %c0_345] : memref<32x1xf32, #tpu.memory_space<vmem>>, vector<32x1xf32>
    %330 = vector.broadcast %329 : vector<32x1xf32> to vector<32x64xf32>
    %331 = arith.addf %328, %330 : vector<32x64xf32>
    %cst_346 = arith.constant 0.000000e+00 : f32
    %332 = vector.broadcast %cst_346 : f32 to vector<32x64xf32>
    %333 = arith.cmpf oge, %331, %332 : vector<32x64xf32>
    %cst_347 = arith.constant 1.000000e-01 : f32
    %334 = vector.broadcast %cst_347 : f32 to vector<32x64xf32>
    %335 = arith.mulf %334, %331 : vector<32x64xf32>
    %336 = arith.select %333, %331, %335 : vector<32x64xi1>, vector<32x64xf32>
    %c0_348 = arith.constant 0 : index
    %c0_349 = arith.constant 0 : index
    %337 = vector.load %arg24[%c0_348, %c0_349] : memref<32x1xf32, #tpu.memory_space<vmem>>, vector<32x1xf32>
    %338 = vector.broadcast %337 : vector<32x1xf32> to vector<32x64xf32>
    %339 = arith.mulf %336, %338 : vector<32x64xf32>
    %c0_350 = arith.constant 0 : index
    %c0_351 = arith.constant 0 : index
    %340 = vector.load %arg25[%c0_350, %c0_351] : memref<32x1xf32, #tpu.memory_space<vmem>>, vector<32x1xf32>
    %341 = vector.broadcast %340 : vector<32x1xf32> to vector<32x64xf32>
    %342 = arith.addf %339, %341 : vector<32x64xf32>
    %c0_352 = arith.constant 0 : index
    %c0_353 = arith.constant 0 : index
    %343 = vector.load %arg32[%c0_352, %c0_353] : memref<2x64xf32, #tpu.memory_space<vmem>>, vector<1x64xf32>
    %c1_354 = arith.constant 1 : index
    %c0_355 = arith.constant 0 : index
    %344 = vector.load %arg32[%c1_354, %c0_355] : memref<2x64xf32, #tpu.memory_space<vmem>>, vector<1x64xf32>
    %cst_356 = arith.constant 0.000000e+00 : f32
    %345 = vector.broadcast %cst_356 : f32 to vector<32x128xf32>
    %c0_357 = arith.constant 0 : index
    %c0_358 = arith.constant 0 : index
    %346 = vector.load %arg38[%c0_357, %c0_358] : memref<32x1280xf32, #tpu.memory_space<vmem>>, vector<32x128xf32>
    tpu.vector_store %arg38[%c0_357, %c0_358], %345 {strides = array<i32>} : memref<32x1280xf32, #tpu.memory_space<vmem>>, vector<32x128xf32>,
    %cst_359 = arith.constant 0.000000e+00 : f32
    %347 = vector.broadcast %cst_359 : f32 to vector<32x256xf32>
    %c0_360 = arith.constant 0 : index
    %c128_361 = arith.constant 128 : index
    %348 = vector.load %arg38[%c0_360, %c128_361] : memref<32x1280xf32, #tpu.memory_space<vmem>>, vector<32x256xf32>
    tpu.vector_store %arg38[%c0_360, %c128_361], %347 {strides = array<i32>} : memref<32x1280xf32, #tpu.memory_space<vmem>>, vector<32x256xf32>,
    %c0_362 = arith.constant 0 : index
    %c128_363 = arith.constant 128 : index
    %349 = vector.load %arg38[%c0_362, %c128_363] : memref<32x1280xf32, #tpu.memory_space<vmem>>, vector<32x64xf32>
    tpu.vector_store %arg38[%c0_362, %c128_363], %342 {strides = array<i32>} : memref<32x1280xf32, #tpu.memory_space<vmem>>, vector<32x64xf32>,
    %c0_364 = arith.constant 0 : index
    %c119_365 = arith.constant 119 : index
    %350 = vector.load %arg38[%c0_364, %c119_365] : memref<32x1280xf32, #tpu.memory_space<vmem>>, vector<32x64xf32>
    %351 = vector.broadcast %343 : vector<1x64xf32> to vector<32x64xf32>
    %352 = arith.mulf %350, %351 : vector<32x64xf32>
    %c0_366 = arith.constant 0 : index
    %c0_367 = arith.constant 0 : index
    %353 = vector.load %arg39[%c0_366, %c0_367] : memref<288x1024xf32, #tpu.memory_space<vmem>>, vector<32x64xf32>
    tpu.vector_store %arg39[%c0_366, %c0_367], %352 {strides = array<i32>} : memref<288x1024xf32, #tpu.memory_space<vmem>>, vector<32x64xf32>,
    %c0_368 = arith.constant 0 : index
    %c120_369 = arith.constant 120 : index
    %354 = vector.load %arg38[%c0_368, %c120_369] : memref<32x1280xf32, #tpu.memory_space<vmem>>, vector<32x64xf32>
    %c32_370 = arith.constant 32 : index
    %c0_371 = arith.constant 0 : index
    %355 = vector.load %arg39[%c32_370, %c0_371] : memref<288x1024xf32, #tpu.memory_space<vmem>>, vector<32x64xf32>
    tpu.vector_store %arg39[%c32_370, %c0_371], %354 {strides = array<i32>} : memref<288x1024xf32, #tpu.memory_space<vmem>>, vector<32x64xf32>,
    %c0_372 = arith.constant 0 : index
    %c121_373 = arith.constant 121 : index
    %356 = vector.load %arg38[%c0_372, %c121_373] : memref<32x1280xf32, #tpu.memory_space<vmem>>, vector<32x64xf32>
    %357 = vector.broadcast %344 : vector<1x64xf32> to vector<32x64xf32>
    %358 = arith.mulf %356, %357 : vector<32x64xf32>
    %c64_374 = arith.constant 64 : index
    %c0_375 = arith.constant 0 : index
    %359 = vector.load %arg39[%c64_374, %c0_375] : memref<288x1024xf32, #tpu.memory_space<vmem>>, vector<32x64xf32>
    tpu.vector_store %arg39[%c64_374, %c0_375], %358 {strides = array<i32>} : memref<288x1024xf32, #tpu.memory_space<vmem>>, vector<32x64xf32>,
    %c0_376 = arith.constant 0 : index
    %c127_377 = arith.constant 127 : index
    %360 = vector.load %arg38[%c0_376, %c127_377] : memref<32x1280xf32, #tpu.memory_space<vmem>>, vector<32x64xf32>
    %361 = vector.broadcast %343 : vector<1x64xf32> to vector<32x64xf32>
    %362 = arith.mulf %360, %361 : vector<32x64xf32>
    %c96_378 = arith.constant 96 : index
    %c0_379 = arith.constant 0 : index
    %363 = vector.load %arg39[%c96_378, %c0_379] : memref<288x1024xf32, #tpu.memory_space<vmem>>, vector<32x64xf32>
    tpu.vector_store %arg39[%c96_378, %c0_379], %362 {strides = array<i32>} : memref<288x1024xf32, #tpu.memory_space<vmem>>, vector<32x64xf32>,
    %c128_380 = arith.constant 128 : index
    %c0_381 = arith.constant 0 : index
    %364 = vector.load %arg39[%c128_380, %c0_381] : memref<288x1024xf32, #tpu.memory_space<vmem>>, vector<32x64xf32>
    tpu.vector_store %arg39[%c128_380, %c0_381], %342 {strides = array<i32>} : memref<288x1024xf32, #tpu.memory_space<vmem>>, vector<32x64xf32>,
    %c0_382 = arith.constant 0 : index
    %c129_383 = arith.constant 129 : index
    %365 = vector.load %arg38[%c0_382, %c129_383] : memref<32x1280xf32, #tpu.memory_space<vmem>>, vector<32x64xf32>
    %366 = vector.broadcast %344 : vector<1x64xf32> to vector<32x64xf32>
    %367 = arith.mulf %365, %366 : vector<32x64xf32>
    %c160_384 = arith.constant 160 : index
    %c0_385 = arith.constant 0 : index
    %368 = vector.load %arg39[%c160_384, %c0_385] : memref<288x1024xf32, #tpu.memory_space<vmem>>, vector<32x64xf32>
    tpu.vector_store %arg39[%c160_384, %c0_385], %367 {strides = array<i32>} : memref<288x1024xf32, #tpu.memory_space<vmem>>, vector<32x64xf32>,
    %c0_386 = arith.constant 0 : index
    %c135_387 = arith.constant 135 : index
    %369 = vector.load %arg38[%c0_386, %c135_387] : memref<32x1280xf32, #tpu.memory_space<vmem>>, vector<32x64xf32>
    %370 = vector.broadcast %343 : vector<1x64xf32> to vector<32x64xf32>
    %371 = arith.mulf %369, %370 : vector<32x64xf32>
    %c192_388 = arith.constant 192 : index
    %c0_389 = arith.constant 0 : index
    %372 = vector.load %arg39[%c192_388, %c0_389] : memref<288x1024xf32, #tpu.memory_space<vmem>>, vector<32x64xf32>
    tpu.vector_store %arg39[%c192_388, %c0_389], %371 {strides = array<i32>} : memref<288x1024xf32, #tpu.memory_space<vmem>>, vector<32x64xf32>,
    %c0_390 = arith.constant 0 : index
    %c136_391 = arith.constant 136 : index
    %373 = vector.load %arg38[%c0_390, %c136_391] : memref<32x1280xf32, #tpu.memory_space<vmem>>, vector<32x64xf32>
    %c224_392 = arith.constant 224 : index
    %c0_393 = arith.constant 0 : index
    %374 = vector.load %arg39[%c224_392, %c0_393] : memref<288x1024xf32, #tpu.memory_space<vmem>>, vector<32x64xf32>
    tpu.vector_store %arg39[%c224_392, %c0_393], %373 {strides = array<i32>} : memref<288x1024xf32, #tpu.memory_space<vmem>>, vector<32x64xf32>,
    %c0_394 = arith.constant 0 : index
    %c137_395 = arith.constant 137 : index
    %375 = vector.load %arg38[%c0_394, %c137_395] : memref<32x1280xf32, #tpu.memory_space<vmem>>, vector<32x64xf32>
    %376 = vector.broadcast %344 : vector<1x64xf32> to vector<32x64xf32>
    %377 = arith.mulf %375, %376 : vector<32x64xf32>
    %c256_396 = arith.constant 256 : index
    %c0_397 = arith.constant 0 : index
    %378 = vector.load %arg39[%c256_396, %c0_397] : memref<288x1024xf32, #tpu.memory_space<vmem>>, vector<32x64xf32>
    tpu.vector_store %arg39[%c256_396, %c0_397], %377 {strides = array<i32>} : memref<288x1024xf32, #tpu.memory_space<vmem>>, vector<32x64xf32>,
    %c0_398 = arith.constant 0 : index
    %c0_399 = arith.constant 0 : index
    %379 = vector.load %arg39[%c0_398, %c0_399] : memref<288x1024xf32, #tpu.memory_space<vmem>>, vector<288x64xf32>
    %c0_400 = arith.constant 0 : index
    %c0_401 = arith.constant 0 : index
    %380 = vector.load %arg26[%c0_400, %c0_401] : memref<32x288xf32, #tpu.memory_space<vmem>>, vector<32x288xf32>
    %cst_402 = arith.constant dense<0.000000e+00> : vector<32x64xf32>
    %381 = tpu.matmul %380, %379, %cst_402 {dimension_numbers = #tpu.dot_dimension_numbers<[1], [0], [0], [1], [0, 0, 1, 1], [], []>} : vector<32x288xf32>, vector<288x64xf32>, vector<32x64xf32> -> vector<32x64xf32>
    %c0_403 = arith.constant 0 : index
    %c0_404 = arith.constant 0 : index
    %382 = vector.load %arg27[%c0_403, %c0_404] : memref<32x1xf32, #tpu.memory_space<vmem>>, vector<32x1xf32>
    %383 = vector.broadcast %382 : vector<32x1xf32> to vector<32x64xf32>
    %384 = arith.addf %381, %383 : vector<32x64xf32>
    %cst_405 = arith.constant 0.000000e+00 : f32
    %385 = vector.broadcast %cst_405 : f32 to vector<32x64xf32>
    %386 = arith.cmpf oge, %384, %385 : vector<32x64xf32>
    %cst_406 = arith.constant 1.000000e-01 : f32
    %387 = vector.broadcast %cst_406 : f32 to vector<32x64xf32>
    %388 = arith.mulf %387, %384 : vector<32x64xf32>
    %389 = arith.select %386, %384, %388 : vector<32x64xi1>, vector<32x64xf32>
    %cst_407 = arith.constant dense<0.000000e+00> : vector<32xf32>
    %390 = vector.multi_reduction <add>, %389, %cst_407 [1] : vector<32x64xf32> to vector<32xf32>
    %391 = vector.shape_cast %390 : vector<32xf32> to vector<32x1xf32>
    %cst_408 = arith.constant 1.562500e-02 : f32
    %392 = vector.broadcast %cst_408 : f32 to vector<32x1xf32>
    %393 = arith.mulf %391, %392 : vector<32x1xf32>
    %c0_409 = arith.constant 0 : index
    %c0_410 = arith.constant 0 : index
    %394 = vector.load %arg33[%c0_409, %c0_410] : memref<32x16xf32, #tpu.memory_space<vmem>>, vector<32x16xf32>
    %395 = vector.broadcast %393 : vector<32x1xf32> to vector<32x16xf32>
    %396 = arith.mulf %394, %395 : vector<32x16xf32>
    %cst_411 = arith.constant dense<0.000000e+00> : vector<16xf32>
    %397 = vector.multi_reduction <add>, %396, %cst_411 [0] : vector<32x16xf32> to vector<16xf32>
    %398 = vector.shape_cast %397 : vector<16xf32> to vector<1x16xf32>
    %c0_412 = arith.constant 0 : index
    %c0_413 = arith.constant 0 : index
    %399 = vector.load %arg34[%c0_412, %c0_413] : memref<1x16xf32, #tpu.memory_space<vmem>>, vector<1x16xf32>
    %400 = arith.addf %398, %399 : vector<1x16xf32>
    %cst_414 = arith.constant 0.000000e+00 : f32
    %401 = vector.broadcast %cst_414 : f32 to vector<1x16xf32>
    %402 = arith.cmpf oge, %400, %401 : vector<1x16xf32>
    %cst_415 = arith.constant 1.000000e-01 : f32
    %403 = vector.broadcast %cst_415 : f32 to vector<1x16xf32>
    %404 = arith.mulf %403, %400 : vector<1x16xf32>
    %405 = arith.select %402, %400, %404 : vector<1x16xi1>, vector<1x16xf32>
    %c0_416 = arith.constant 0 : index
    %c0_417 = arith.constant 0 : index
    %406 = vector.load %arg35[%c0_416, %c0_417] : memref<1x16xf32, #tpu.memory_space<vmem>>, vector<1x16xf32>
    %407 = arith.mulf %405, %406 : vector<1x16xf32>
    %cst_418 = arith.constant dense<0.000000e+00> : vector<1xf32>
    %408 = vector.multi_reduction <add>, %407, %cst_418 [1] : vector<1x16xf32> to vector<1xf32>
    %409 = vector.shape_cast %408 : vector<1xf32> to vector<1x1xf32>
    %c0_419 = arith.constant 0 : index
    %c0_420 = arith.constant 0 : index
    %410 = vector.load %arg36[%c0_419, %c0_420] : memref<1x1xf32, #tpu.memory_space<vmem>>, vector<1x1xf32>
    %411 = arith.addf %409, %410 : vector<1x1xf32>
    %412 = vector.shape_cast %411 : vector<1x1xf32> to vector<1x1xf32>
    %413 = vector.broadcast %412 : vector<1x1xf32> to vector<8x128xf32>
    %c0_421 = arith.constant 0 : index
    %c0_422 = arith.constant 0 : index
    %c0_423 = arith.constant 0 : index
    %414 = vector.load %arg37[%c0_421, %c0_422, %c0_423] : memref<1x8x128xf32, #tpu.memory_space<vmem>>, vector<1x8x128xf32>
    %415 = vector.shape_cast %414 : vector<1x8x128xf32> to vector<8x128xf32>
    %416 = vector.shape_cast %413 : vector<8x128xf32> to vector<1x8x128xf32>
    tpu.vector_store %arg37[%c0_421, %c0_422, %c0_423], %416 {strides = array<i32>} : memref<1x8x128xf32, #tpu.memory_space<vmem>>, vector<1x8x128xf32>,
    return
  }
  func.func @transform_0(%arg0: i32) -> (i32, i32, i32) {
    %c0_i32 = arith.constant 0 : i32
    %c0_i32_0 = arith.constant 0 : i32
    %c0_i32_1 = arith.constant 0 : i32
    return %arg0, %c0_i32, %c0_i32_0 : i32, i32, i32
  }
  func.func @transform_1(%arg0: i32) -> (i32, i32) {
    %c0_i32 = arith.constant 0 : i32
    %c0_i32_0 = arith.constant 0 : i32
    %c0_i32_1 = arith.constant 0 : i32
    return %c0_i32, %c0_i32_0 : i32, i32
  }
  func.func @transform_2(%arg0: i32) -> (i32, i32) {
    %c0_i32 = arith.constant 0 : i32
    %c0_i32_0 = arith.constant 0 : i32
    %c0_i32_1 = arith.constant 0 : i32
    return %c0_i32, %c0_i32_0 : i32, i32
  }
  func.func @transform_3(%arg0: i32) -> (i32, i32) {
    %c0_i32 = arith.constant 0 : i32
    %c0_i32_0 = arith.constant 0 : i32
    %c0_i32_1 = arith.constant 0 : i32
    return %c0_i32, %c0_i32_0 : i32, i32
  }
  func.func @transform_4(%arg0: i32) -> (i32, i32) {
    %c0_i32 = arith.constant 0 : i32
    %c0_i32_0 = arith.constant 0 : i32
    %c0_i32_1 = arith.constant 0 : i32
    return %c0_i32, %c0_i32_0 : i32, i32
  }
  func.func @transform_5(%arg0: i32) -> (i32, i32) {
    %c0_i32 = arith.constant 0 : i32
    %c0_i32_0 = arith.constant 0 : i32
    %c0_i32_1 = arith.constant 0 : i32
    return %c0_i32, %c0_i32_0 : i32, i32
  }
  func.func @transform_6(%arg0: i32) -> (i32, i32) {
    %c0_i32 = arith.constant 0 : i32
    %c0_i32_0 = arith.constant 0 : i32
    %c0_i32_1 = arith.constant 0 : i32
    return %c0_i32, %c0_i32_0 : i32, i32
  }
  func.func @transform_7(%arg0: i32) -> (i32, i32) {
    %c0_i32 = arith.constant 0 : i32
    %c0_i32_0 = arith.constant 0 : i32
    %c0_i32_1 = arith.constant 0 : i32
    return %c0_i32, %c0_i32_0 : i32, i32
  }
  func.func @transform_8(%arg0: i32) -> (i32, i32) {
    %c0_i32 = arith.constant 0 : i32
    %c0_i32_0 = arith.constant 0 : i32
    %c0_i32_1 = arith.constant 0 : i32
    return %c0_i32, %c0_i32_0 : i32, i32
  }
  func.func @transform_9(%arg0: i32) -> (i32, i32) {
    %c0_i32 = arith.constant 0 : i32
    %c0_i32_0 = arith.constant 0 : i32
    %c0_i32_1 = arith.constant 0 : i32
    return %c0_i32, %c0_i32_0 : i32, i32
  }
  func.func @transform_10(%arg0: i32) -> (i32, i32) {
    %c0_i32 = arith.constant 0 : i32
    %c0_i32_0 = arith.constant 0 : i32
    %c0_i32_1 = arith.constant 0 : i32
    return %c0_i32, %c0_i32_0 : i32, i32
  }
  func.func @transform_11(%arg0: i32) -> (i32, i32) {
    %c0_i32 = arith.constant 0 : i32
    %c0_i32_0 = arith.constant 0 : i32
    %c0_i32_1 = arith.constant 0 : i32
    return %c0_i32, %c0_i32_0 : i32, i32
  }
  func.func @transform_12(%arg0: i32) -> (i32, i32) {
    %c0_i32 = arith.constant 0 : i32
    %c0_i32_0 = arith.constant 0 : i32
    %c0_i32_1 = arith.constant 0 : i32
    return %c0_i32, %c0_i32_0 : i32, i32
  }
  func.func @transform_13(%arg0: i32) -> (i32, i32) {
    %c0_i32 = arith.constant 0 : i32
    %c0_i32_0 = arith.constant 0 : i32
    %c0_i32_1 = arith.constant 0 : i32
    return %c0_i32, %c0_i32_0 : i32, i32
  }
  func.func @transform_14(%arg0: i32) -> (i32, i32) {
    %c0_i32 = arith.constant 0 : i32
    %c0_i32_0 = arith.constant 0 : i32
    %c0_i32_1 = arith.constant 0 : i32
    return %c0_i32, %c0_i32_0 : i32, i32
  }
  func.func @transform_15(%arg0: i32) -> (i32, i32) {
    %c0_i32 = arith.constant 0 : i32
    %c0_i32_0 = arith.constant 0 : i32
    %c0_i32_1 = arith.constant 0 : i32
    return %c0_i32, %c0_i32_0 : i32, i32
  }
  func.func @transform_16(%arg0: i32) -> (i32, i32) {
    %c0_i32 = arith.constant 0 : i32
    %c0_i32_0 = arith.constant 0 : i32
    %c0_i32_1 = arith.constant 0 : i32
    return %c0_i32, %c0_i32_0 : i32, i32
  }
  func.func @transform_17(%arg0: i32) -> (i32, i32) {
    %c0_i32 = arith.constant 0 : i32
    %c0_i32_0 = arith.constant 0 : i32
    %c0_i32_1 = arith.constant 0 : i32
    return %c0_i32, %c0_i32_0 : i32, i32
  }
  func.func @transform_18(%arg0: i32) -> (i32, i32) {
    %c0_i32 = arith.constant 0 : i32
    %c0_i32_0 = arith.constant 0 : i32
    %c0_i32_1 = arith.constant 0 : i32
    return %c0_i32, %c0_i32_0 : i32, i32
  }
  func.func @transform_19(%arg0: i32) -> (i32, i32) {
    %c0_i32 = arith.constant 0 : i32
    %c0_i32_0 = arith.constant 0 : i32
    %c0_i32_1 = arith.constant 0 : i32
    return %c0_i32, %c0_i32_0 : i32, i32
  }
  func.func @transform_20(%arg0: i32) -> (i32, i32) {
    %c0_i32 = arith.constant 0 : i32
    %c0_i32_0 = arith.constant 0 : i32
    %c0_i32_1 = arith.constant 0 : i32
    return %c0_i32, %c0_i32_0 : i32, i32
  }
  func.func @transform_21(%arg0: i32) -> (i32, i32) {
    %c0_i32 = arith.constant 0 : i32
    %c0_i32_0 = arith.constant 0 : i32
    %c0_i32_1 = arith.constant 0 : i32
    return %c0_i32, %c0_i32_0 : i32, i32
  }
  func.func @transform_22(%arg0: i32) -> (i32, i32) {
    %c0_i32 = arith.constant 0 : i32
    %c0_i32_0 = arith.constant 0 : i32
    %c0_i32_1 = arith.constant 0 : i32
    return %c0_i32, %c0_i32_0 : i32, i32
  }
  func.func @transform_23(%arg0: i32) -> (i32, i32) {
    %c0_i32 = arith.constant 0 : i32
    %c0_i32_0 = arith.constant 0 : i32
    %c0_i32_1 = arith.constant 0 : i32
    return %c0_i32, %c0_i32_0 : i32, i32
  }
  func.func @transform_24(%arg0: i32) -> (i32, i32) {
    %c0_i32 = arith.constant 0 : i32
    %c0_i32_0 = arith.constant 0 : i32
    %c0_i32_1 = arith.constant 0 : i32
    return %c0_i32, %c0_i32_0 : i32, i32
  }
  func.func @transform_25(%arg0: i32) -> (i32, i32) {
    %c0_i32 = arith.constant 0 : i32
    %c0_i32_0 = arith.constant 0 : i32
    %c0_i32_1 = arith.constant 0 : i32
    return %c0_i32, %c0_i32_0 : i32, i32
  }
  func.func @transform_26(%arg0: i32) -> (i32, i32) {
    %c0_i32 = arith.constant 0 : i32
    %c0_i32_0 = arith.constant 0 : i32
    %c0_i32_1 = arith.constant 0 : i32
    return %c0_i32, %c0_i32_0 : i32, i32
  }
  func.func @transform_27(%arg0: i32) -> (i32, i32) {
    %c0_i32 = arith.constant 0 : i32
    %c0_i32_0 = arith.constant 0 : i32
    %c0_i32_1 = arith.constant 0 : i32
    return %c0_i32, %c0_i32_0 : i32, i32
  }
  func.func @transform_28(%arg0: i32) -> (i32, i32) {
    %c0_i32 = arith.constant 0 : i32
    %c0_i32_0 = arith.constant 0 : i32
    %c0_i32_1 = arith.constant 0 : i32
    return %c0_i32, %c0_i32_0 : i32, i32
  }
  func.func @transform_29(%arg0: i32) -> (i32, i32) {
    %c0_i32 = arith.constant 0 : i32
    %c0_i32_0 = arith.constant 0 : i32
    %c0_i32_1 = arith.constant 0 : i32
    return %c0_i32, %c0_i32_0 : i32, i32
  }
  func.func @transform_30(%arg0: i32) -> (i32, i32) {
    %c0_i32 = arith.constant 0 : i32
    %c0_i32_0 = arith.constant 0 : i32
    %c0_i32_1 = arith.constant 0 : i32
    return %c0_i32, %c0_i32_0 : i32, i32
  }
  func.func @transform_31(%arg0: i32) -> (i32, i32) {
    %c0_i32 = arith.constant 0 : i32
    %c0_i32_0 = arith.constant 0 : i32
    %c0_i32_1 = arith.constant 0 : i32
    return %c0_i32, %c0_i32_0 : i32, i32
  }
  func.func @transform_32(%arg0: i32) -> (i32, i32) {
    %c0_i32 = arith.constant 0 : i32
    %c0_i32_0 = arith.constant 0 : i32
    %c0_i32_1 = arith.constant 0 : i32
    return %c0_i32, %c0_i32_0 : i32, i32
  }
  func.func @transform_33(%arg0: i32) -> (i32, i32) {
    %c0_i32 = arith.constant 0 : i32
    %c0_i32_0 = arith.constant 0 : i32
    %c0_i32_1 = arith.constant 0 : i32
    return %c0_i32, %c0_i32_0 : i32, i32
  }
  func.func @transform_34(%arg0: i32) -> (i32, i32) {
    %c0_i32 = arith.constant 0 : i32
    %c0_i32_0 = arith.constant 0 : i32
    %c0_i32_1 = arith.constant 0 : i32
    return %c0_i32, %c0_i32_0 : i32, i32
  }
  func.func @transform_35(%arg0: i32) -> (i32, i32) {
    %c0_i32 = arith.constant 0 : i32
    %c0_i32_0 = arith.constant 0 : i32
    %c0_i32_1 = arith.constant 0 : i32
    return %c0_i32, %c0_i32_0 : i32, i32
  }
  func.func @transform_36(%arg0: i32) -> (i32, i32, i32) {
    %c0_i32 = arith.constant 0 : i32
    %c0_i32_0 = arith.constant 0 : i32
    %c0_i32_1 = arith.constant 0 : i32
    return %arg0, %c0_i32, %c0_i32_0 : i32, i32, i32
  }
}

</mosaic_0001>

<bundles_post_ra>
// kernel: shallownet64_forward.1
= control target key start
LH: loop header
LB: loop body
LE: loop exit
PB: predicated region body
PF: predicated region fallthrough
CT: control target
= control target key end

     0   :  { %s11349_s6 = smov 1   ;;  %s11350_s10 = smov 2   ;;  %s16268_s0 = inlined_call_operand.smem [shape: u32[37], index: -1, kind: input, shape index: {}] }
   0x1   :  { %s11415_s5 = sld [smem:[%s16268_s0]]   ;;  %s11351_s14 = smov 3  }
   0x2   :  { %s11420_s9 = sld [smem:[%s16268_s0 + %s11349_s6]]   ;;  %s11352_s18 = smov 4  }
   0x3   :  { %s11425_s13 = sld [smem:[%s16268_s0 + %s11350_s10]]   ;;  %s11353_s22 = smov 5  }
   0x4   :  { %s11430_s17 = sld [smem:[%s16268_s0 + %s11351_s14]]   ;;  %s11354_s26 = smov 6  }
   0x5   :  { %s11435_s21 = sld [smem:[%s16268_s0 + %s11352_s18]]   ;;  %s11355_s30 = smov 7  }
   0x6   :  { %s11440_s25 = sld [smem:[%s16268_s0 + %s11353_s22]]   ;;  %s11356_s4 = smov 8  }
   0x7   :  { %16334 = sst [smem:[#allocation5_spill]] %s11415_s5  ;;  %s11357_s10 = smov 9  }
   0x8   :  { %16335 = sst [smem:[#allocation6_spill]] %s11420_s9  ;;  %s11358_s15 = smov 10  }
   0x9   :  { %16336 = sst [smem:[#allocation7_spill]] %s11425_s13  ;;  %s11359_s20 = smov 11  }
   0xa   :  { %s11445_s29 = sld [smem:[%s16268_s0 + %s11354_s26]]   ;;  %s11360_s26 = smov 12  }
   0xb   :  { %s11450_s3 = sld [smem:[%s16268_s0 + %s11355_s30]]   ;;  %s11361_s1 = smov 13  }
   0xc   :  { %s11455_s8 = sld [smem:[%s16268_s0 + %s11356_s4]]   ;;  %s11362_s7 = smov 14  }
   0xd   :  { %s11460_s14 = sld [smem:[%s16268_s0 + %s11357_s10]]   ;;  %s11364_s22 = smov 16  }
   0xe   :  { %s11465_s19 = sld [smem:[%s16268_s0 + %s11358_s15]]   ;;  %s11363_s15 = smov 15  }
   0xf   :  { %s11470_s24 = sld [smem:[%s16268_s0 + %s11359_s20]]   ;;  %s11365_s28 = smov 17  }
  0x10   :  { %s11475_s30 = sld [smem:[%s16268_s0 + %s11360_s26]]   ;;  %s11384_s23 = smov 36  }
  0x11   :  { %16337 = sst [smem:[#allocation8_spill]] %s11450_s3 }
  0x12   :  { %16338 = sst [smem:[#allocation9_spill]] %s11455_s8 }
  0x13   :  { %s11480_s6 = sld [smem:[%s16268_s0 + %s11361_s1]]  }
  0x14   :  { %s11485_s12 = sld [smem:[%s16268_s0 + %s11362_s7]]   ;;  %s11366_s7 = smov 18  }
  0x15   :  { %s11490_s20 = sld [smem:[%s16268_s0 + %s11363_s15]]   ;;  %s11367_s15 = smov 19  }
  0x16   :  { %16339 = sst [smem:[#allocation10_spill]] %s11475_s30 }
  0x17   :  { %s11495_s27 = sld [smem:[%s16268_s0 + %s11364_s22]]   ;;  %s11368_s22 = smov 20  }
  0x18   :  { %s11500_s4 = sld [smem:[%s16268_s0 + %s11365_s28]]   ;;  %s11369_s28 = smov 21  }
  0x19   :  { %16340 = sst [smem:[#allocation11_spill]] %s11480_s6 }
  0x1a   :  { %16341 = sst [smem:[#allocation12_spill]] %s11485_s12 }
  0x1b   :  { %16342 = sst [smem:[#allocation13_spill]] %s11490_s20 }
  0x1c   :  { %s11505_s6 = sld [smem:[%s16268_s0 + %s11366_s7]]   ;;  %s11370_s7 = smov 22  }
  0x1d   :  { %16343 = sst [smem:[#allocation14_spill]] %s11495_s27 }
  0x1e   :  { %16344 = sst [smem:[#allocation15_spill]] %s11500_s4 }
  0x1f   :  { %s11510_s20 = sld [smem:[%s16268_s0 + %s11367_s15]]   ;;  %s11371_s15 = smov 23  }
  0x20   :  { %s11515_s27 = sld [smem:[%s16268_s0 + %s11368_s22]]   ;;  %s11372_s22 = smov 24  }
  0x21   :  { %s11520_s4 = sld [smem:[%s16268_s0 + %s11369_s28]]   ;;  %s11373_s28 = smov 25  }
  0x22   :  { %16345 = sst [smem:[#allocation16_spill]] %s11505_s6 }
  0x23   :  { %s11525_s6 = sld [smem:[%s16268_s0 + %s11370_s7]]   ;;  %s11374_s7 = smov 26  }
  0x25   :  { %16346 = sst [smem:[#allocation17_spill]] %s11510_s20 }
  0x26   :  { %16347 = sst [smem:[#allocation18_spill]] %s11515_s27 }
  0x27   :  { %16348 = sst [smem:[#allocation19_spill]] %s11520_s4 }
  0x28   :  { %s11530_s20 = sld [smem:[%s16268_s0 + %s11371_s15]]   ;;  %s11375_s15 = smov 27  }
  0x29   :  { %16349 = sst [smem:[#allocation20_spill]] %s11525_s6 }
  0x2a   :  { %s11535_s27 = sld [smem:[%s16268_s0 + %s11372_s22]]   ;;  %s11376_s22 = smov 28  }
  0x2b   :  { %s11540_s4 = sld [smem:[%s16268_s0 + %s11373_s28]]   ;;  %s11377_s28 = smov 29  }
  0x2c   :  { %s11545_s6 = sld [smem:[%s16268_s0 + %s11374_s7]]   ;;  %s11378_s7 = smov 30  }
  0x2e   :  { %16350 = sst [smem:[#allocation21_spill]] %s11530_s20 }
  0x2f   :  { %s11550_s20 = sld [smem:[%s16268_s0 + %s11375_s15]]   ;;  %s11379_s15 = smov 31  }
  0x30   :  { %16351 = sst [smem:[#allocation22_spill]] %s11535_s27 }
  0x31   :  { %16352 = sst [smem:[#allocation23_spill]] %s11540_s4 }
  0x32   :  { %16353 = sst [smem:[#allocation24_spill]] %s11545_s6 }
  0x33   :  { %s11555_s27 = sld [smem:[%s16268_s0 + %s11376_s22]]   ;;  %s11380_s22 = smov 32  }
  0x34   :  { %s11560_s4 = sld [smem:[%s16268_s0 + %s11377_s28]]   ;;  %s11381_s28 = smov 33  }
  0x35   :  { %s11565_s6 = sld [smem:[%s16268_s0 + %s11378_s7]]   ;;  %s11382_s7 = smov 34  }
  0x36   :  { %s11570_s12 = sld [smem:[%s16268_s0 + %s11379_s15]]   ;;  %s11383_s15 = smov 35  }
  0x37   :  { %s11580_s30 = sld [smem:[%s16268_s0 + %s11381_s28]]   ;;  %s11595_s28 = smov 0  }
  0x39   :  { %16354 = sst [smem:[#allocation25_spill]] %s11555_s27 }
  0x3a   :  { %16355 = sst [smem:[#allocation26_spill]] %s11560_s4 }
  0x3b   :  { %16356 = sst [smem:[#allocation27_spill]] %s11565_s6 }
  0x3c   :  { %16357 = sst [smem:[#allocation28_spill]] %s11570_s12 }
  0x3d   :  { %s11575_s27 = sld [smem:[%s16268_s0 + %s11380_s22]]  }
  0x3e   :  { %s11585_s6 = sld [smem:[%s16268_s0 + %s11382_s7]]  }
  0x3f   :  { %s9984_s12 = sld [smem:[%s16268_s0 + %s11383_s15]]  }
  0x43   :  { %16358 = sst [smem:[#allocation29_spill]] %s11575_s27 }
  0x44   :  { %s11593_s27 = sld [smem:[%s16268_s0 + %s11384_s23]]  }
  0x45   :  { %v78_v0 = vstv %s9984_s12 }
  0x46   :  { %79 = vst [vmem:[#allocation4] sm:$0x1] %v78_v0 }
  0x47 LB: > { %s16359_s8 = sld [smem:[#allocation9_spill]]  ;;  %s16360_s4 = sld [smem:[#allocation26_spill]]  ;;  %s11347_s28 = sphi %s11595_s28, %s85_s28  }
  0x48   : > { %s16361_s3 = sld [smem:[#allocation8_spill]]  ;;  %s9986_s1 = sadd.s32 4294967295, %s11347_s28  }
  0x49   : > { %p9990_p0 = scmp.ge.s32.totalorder %s11347_s28, 1  ;;  %p1001_p1 = scmp.lt.s32.totalorder %s11347_s28, 3 }
  0x4b   : > { %p1002_p2 = pnand %p9990_p0, %p1001_p1 }
  0x4d   : > { %1005 = sbr.rel (%p1002_p2) target bundleno = 4692 (0x1254), region = 164 }
  0x54   : > { %v1130_v1 = vlaneseq  ;;  %v11385_v3 = vmov 0.0   ;;  %v11613_v4 = vld [vmem:[%s16360_s4] ss:$2 sm:$0xff]  ;;  %v11625_v8 = vld [vmem:[%s16360_s4 + $0x1] ss:$2 sm:$0xff]  ;;  %s11386_s0 = smov 95  }
  0x55   : > { %8182 = vst [vmem:[#allocation2 + $0xc0] sm:$0xff] %v11385_v3  ;;  %2075 = vmatprep.mubr.f32.mxu0 %v11385_v3  ;;  %2146 = vmatprep.mubr.f32.mxu1 %v11385_v3  ;;  %8542 = vst [vmem:[#allocation2 + $0x58] sm:$0xff] %v11385_v3  ;;  %s11387_s12 = smov 97   ;;  %s16312_s2 = smov 127   ;;  %vm1178_vm0 = vcmask 777216   ;;  %vm1375_vm1 = vcmask 793600  }
  0x56   : > { %v11603_v2 = vshrl.u32 %v1130_v1, 7  ;;  %8540 = vst [vmem:[#allocation2 + $0x8] sm:$0xff] %v11385_v3  ;;  %8544 = vst [vmem:[#allocation2 + $0xa8] sm:$0xff] %v11385_v3  ;;  %s16308_s7 = smov 1   ;;  %s11390_s10 = smov 31   ;;  %vm1478_vm2 = vcmask 1039360  }
  0x57   : > { %8546 = vst [vmem:[#allocation2 + $0xf8] sm:$0xff] %v11385_v3  ;;  %s11391_s11 = smov 33   ;;  %s16364_s5 = sld [smem:[#allocation5_spill]]  ;;  %vm1531_vm3 = vcmask 7168   ;;  %vm1428_vm4 = vcmask 252928   ;;  %vm1231_vm5 = vcmask 269312  }
  0x58   : > { %v11616_v5 = vsub.s32 2, %v11603_v2  ;;  %v11619_v6 = vsub.s32 0, %v11603_v2  ;;  %v11622_v7 = vsub.s32 1, %v11603_v2  ;;  %v11650_v15 = vsub.s32 4, %v11603_v2  ;;  %p1090_p3 = scmp.lt.s32.totalorder %s9986_s1, 1  ;;  %s11392_s18 = smov 32  }
  0x59   : > { %v11653_v16 = vsub.s32 3, %v11603_v2  ;;  %v11674_v21 = vsub.s32 5, %v11603_v2  ;;  %v11681_v23 = vsub.s32 6, %v11603_v2  ;;  %v11708_v27 = vsub.s32 7, %v11603_v2  ;;  %s11393_s23 = smov 96   ;;  %s16365_s13 = sld [smem:[#allocation7_spill]] }
  0x5a   : > { %16362 = vst [vmem:[#allocation30_spill] sm:$0xff] %v11619_v6  ;;  %16363 = vst [vmem:[#allocation31_spill] sm:$0xff] %v11622_v7  ;;  %v1141_v9 = vrot.slane %v11613_v4, %v11616_v5  ;;  %v1133_v10 = vrot.slane %v11613_v4, %v11619_v6  ;;  %v1330_v11 = vrot.slane %v11625_v8, %v11619_v6  ;;  %s16431_s1 = smov (!%p1090_p3, %s9986_s1), 1  ;;  %vm1292_vm6 = vcmask 261120   ;;  %s16366_s9 = sld [smem:[#allocation6_spill]] }
  0x5b   : > { %v1137_v12 = vrot.slane %v11613_v4, %v11622_v7  ;;  %v1338_v13 = vrot.slane %v11625_v8, %v11616_v5  ;;  %v1334_v14 = vrot.slane %v11625_v8, %v11622_v7  ;;  %v1149_v17 = vrot.slane %v11613_v4, %v11650_v15  ;;  %s10041_s15 = sshll.u32 %s16431_s1, 6  ;;  %s16397_s22 = sld [smem:[#allocation10_spill]] }
  0x5c   : > { %1166 = vrot.lane.b32.xlu1 %v1141_v9, %s11386_s0  ;;  %1162 = vrot.lane.b32.xlu0 %v1133_v10, %s11386_s0  ;;  %v1145_v18 = vrot.slane %v11613_v4, %v11653_v16  ;;  %v1342_v19 = vrot.slane %v11625_v8, %v11653_v16  ;;  %v1346_v20 = vrot.slane %v11625_v8, %v11650_v15  ;;  %vm1802_vm7 = vcmask 785408   ;;  %s16398_s26 = sld [smem:[#allocation27_spill]] }
  0x5d   : > { %v1153_v22 = vrot.slane %v11613_v4, %v11674_v21  ;;  %v1157_v24 = vrot.slane %v11613_v4, %v11681_v23  ;;  %v1350_v25 = vrot.slane %v11625_v8, %v11674_v21  ;;  %v1354_v26 = vrot.slane %v11625_v8, %v11681_v23  ;;  %s11728_s16 = scalar_lea.vmem %s16364_s5, %s10041_s15  ;;  %s16300_s15 = smov 16  }
  0x5e   : > { %v1161_v28 = vrot.slane %v11613_v4, %v11708_v27  ;;  %v1358_v29 = vrot.slane %v11625_v8, %v11708_v27  ;;  %v11733_v30 = vld [vmem:[%s11728_s16] sm:$0xff]  ;;  %v11736_v31 = vld [vmem:[%s11728_s16 + $0x8] sm:$0xff]  ;;  %v11774_v60 = vld [vmem:[%s11728_s16 + $0x10] sm:$0xff]  ;;  %vm2007_vm8 = vcmask 588800   ;;  %s16414_s5 = sld [smem:[#allocation28_spill]] }
  0x60   : > { %1359 = vrot.lane.b32.xlu1 %v1330_v11, %s11387_s12  ;;  %1164 = vrot.lane.b32.xlu0 %v1137_v12, %s11386_s0 }
  0x64   : > { %1363 = vrot.lane.b32.xlu1 %v1338_v13, %s11387_s12  ;;  %1361 = vrot.lane.b32.xlu0 %v1334_v14, %s11387_s12 }
  0x68   : > { %1464 = vrot.lane.b32.xlu1 %v1137_v12, %s16312_s2  ;;  %1462 = vrot.lane.b32.xlu0 %v1133_v10, %s16312_s2 }
  0x6c   : > { %1573 = vrot.lane.b32.xlu1 %v1330_v11, %s16308_s7  ;;  %1466 = vrot.lane.b32.xlu0 %v1141_v9, %s16312_s2 }
  0x70   : > { %1577 = vrot.lane.b32.xlu1 %v1338_v13, %s16308_s7  ;;  %1575 = vrot.lane.b32.xlu0 %v1334_v14, %s16308_s7 }
  0x74   : > { %1170 = vrot.lane.b32.xlu1 %v1149_v17, %s11386_s0  ;;  %1168 = vrot.lane.b32.xlu0 %v1145_v18, %s11386_s0 }
  0x78   : > { %1676 = vrot.lane.b32.xlu1 %v1137_v12, %s11390_s10  ;;  %1674 = vrot.lane.b32.xlu0 %v1133_v10, %s11390_s10 }
  0x7c   : > { %1365 = vrot.lane.b32.xlu1 %v1342_v19, %s11387_s12  ;;  %1678 = vrot.lane.b32.xlu0 %v1141_v9, %s11390_s10 }
  0x80   : > { %1468 = vrot.lane.b32.xlu1 %v1145_v18, %s16312_s2  ;;  %1367 = vrot.lane.b32.xlu0 %v1346_v20, %s11387_s12 }
  0x84   : > { %1579 = vrot.lane.b32.xlu1 %v1342_v19, %s16308_s7  ;;  %1470 = vrot.lane.b32.xlu0 %v1149_v17, %s16312_s2 }
  0x88   : > { %1172 = vrot.lane.b32.xlu1 %v1153_v22, %s11386_s0  ;;  %1581 = vrot.lane.b32.xlu0 %v1346_v20, %s16308_s7 }
  0x8c   : > { %1174 = vrot.lane.b32.xlu0 %v1157_v24, %s11386_s0  ;;  %1836 = vrot.lane.b32.xlu1 %v1330_v11, %s11391_s11  ;;  %v11790_v11 = vld [vmem:[%s11728_s16 + $0x18] sm:$0xff] }
  0x90   : > { %1838 = vrot.lane.b32.xlu0 %v1334_v14, %s11391_s11  ;;  %1840 = vrot.lane.b32.xlu1 %v1338_v13, %s11391_s11 }
  0x94   : > { %1680 = vrot.lane.b32.xlu0 %v1145_v18, %s11390_s10  ;;  %1682 = vrot.lane.b32.xlu1 %v1149_v17, %s11390_s10 }
  0x98   : > { %1369 = vrot.lane.b32.xlu0 %v1350_v25, %s11387_s12  ;;  %1371 = vrot.lane.b32.xlu1 %v1354_v26, %s11387_s12 }
  0x9c   : > { %1472 = vrot.lane.b32.xlu0 %v1153_v22, %s16312_s2  ;;  %1474 = vrot.lane.b32.xlu1 %v1157_v24, %s16312_s2 }
  0xa0   : > { %1583 = vrot.lane.b32.xlu0 %v1350_v25, %s16308_s7  ;;  %1585 = vrot.lane.b32.xlu1 %v1354_v26, %s16308_s7 }
  0xa4   : > { %1842 = vrot.lane.b32.xlu0 %v1342_v19, %s11391_s11  ;;  %1844 = vrot.lane.b32.xlu1 %v1346_v20, %s11391_s11 }
  0xa8   : > { %1684 = vrot.lane.b32.xlu0 %v1153_v22, %s11390_s10  ;;  %1686 = vrot.lane.b32.xlu1 %v1157_v24, %s11390_s10 }
  0xac   : > { %1846 = vrot.lane.b32.xlu0 %v1350_v25, %s11391_s11  ;;  %1848 = vrot.lane.b32.xlu1 %v1354_v26, %s11391_s11 }
  0xb0   : > { %1176 = vrot.lane.b32.xlu0 %v1161_v28, %s11386_s0  ;;  %1373 = vrot.lane.b32.xlu1 %v1358_v29, %s11387_s12 }
  0xb4   : > { %1476 = vrot.lane.b32.xlu0 %v1161_v28, %s16312_s2  ;;  %1587 = vrot.lane.b32.xlu1 %v1358_v29, %s16308_s7 }
  0xb8   : > { %1688 = vrot.lane.b32.xlu0 %v1161_v28, %s11390_s10  ;;  %1850 = vrot.lane.b32.xlu1 %v1358_v29, %s11391_s11 }
  0xbc   : > { %1276 = vrot.lane.b32.xlu0 %v11733_v30, %s11392_s18  ;;  %1278 = vrot.lane.b32.xlu1 %v11736_v31, %s11392_s18 }
  0xc0   : > { %1274 = vrot.lane.b32.xlu1 %v11385_v3, %s11392_s18 }
  0xce   : > { %v1167_v32 = vpop.permute.xlu1 %1166  ;;  %v1163_v33 = vpop.permute.xlu0 %1162 }
  0xcf   : > { %v1195_v34 = vmul.f32 0.0, %v1163_v33 }
  0xd1   : > { %1213 = vrot.lane.b32.xlu0 %v1195_v34, %s11391_s11 }
  0xd2   : > { %v1360_v35 = vpop.permute.xlu1 %1359  ;;  %v1165_v36 = vpop.permute.xlu0 %1164 }
  0xd3   : > { %v1392_v37 = vmul.f32 0.0, %v1360_v35  ;;  %v1179_v38 = vsel %vm1178_vm0, %v1163_v33, %v1165_v36  ;;  %v1180_v47 = vsel %vm1178_vm0, %v1165_v36, %v1167_v32 }
  0xd4   : > { %v1196_v41 = vmul.f32 %v1179_v38, %v11733_v30  ;;  %v1197_v51 = vmul.f32 %v1180_v47, %v11736_v31 }
  0xd5   : > { %1410 = vrot.lane.b32.xlu0 %v1392_v37, %s11390_s10 }
  0xd6   : > { %v11747_v39 = vpop.permute.xlu1 %1363  ;;  %v1362_v40 = vpop.permute.xlu0 %1361 }
  0xd7   : > { %v1376_v42 = vsel %vm1375_vm1, %v1360_v35, %v1362_v40  ;;  %v1377_v53 = vsel %vm1375_vm1, %v1362_v40, %v11747_v39 }
  0xd8   : > { %v1393_v46 = vmul.f32 %v1376_v42, %v11733_v30  ;;  %v1394_v57 = vmul.f32 %v1377_v53, %v11736_v31 }
  0xd9   : > { %1215 = vrot.lane.b32.xlu0 %v1196_v41, %s11391_s11 }
  0xda   : > { %v1465_v43 = vpop.permute.xlu1 %1464  ;;  %v1463_v44 = vpop.permute.xlu0 %1462 }
  0xdb   : > { %v1495_v45 = vmul.f32 0.0, %v1463_v44  ;;  %v1479_v48 = vsel %vm1478_vm2, %v1463_v44, %v1465_v43 }
  0xdc   : > { %v1496_v52 = vmul.f32 %v1479_v48, %v11733_v30 }
  0xdd   : > { %1513 = vrot.lane.b32.xlu1 %v1495_v45, %s16308_s7  ;;  %1412 = vrot.lane.b32.xlu0 %v1393_v46, %s11390_s10  ;;  %v11841_v45 = vld [vmem:[%s11728_s16 + $0x20] sm:$0xff] }
  0xde   : > { %v1574_v49 = vpop.permute.xlu1 %1573  ;;  %v11757_v50 = vpop.permute.xlu0 %1466 }
  0xdf   : > { %v1480_v58 = vsel %vm1478_vm2, %v1465_v43, %v11757_v50  ;;  %v1605_v18 = vmul.f32 %v1574_v49, %v11733_v30 }
  0xe0   : > { %v1497_v1 = vmul.f32 %v1480_v58, %v11736_v31 }
  0xe1   : > { %1217 = vrot.lane.b32.xlu1 %v1197_v51, %s11391_s11  ;;  %1515 = vrot.lane.b32.xlu0 %v1496_v52, %s16308_s7 }
  0xe2   : > { %v11765_v54 = vpop.permute.xlu1 %1577  ;;  %v1576_v55 = vpop.permute.xlu0 %1575 }
  0xe3   : > { %v1589_v56 = vsel %vm1531_vm3, %v1574_v49, %v1576_v55  ;;  %v1590_v61 = vsel %vm1531_vm3, %v1576_v55, %v11765_v54 }
  0xe4   : > { %v1606_v59 = vmul.f32 %v1589_v56, %v11736_v31  ;;  %v1607_v4 = vmul.f32 %v1590_v61, %v11774_v60 }
  0xe5   : > { %1414 = vrot.lane.b32.xlu1 %v1394_v57, %s11390_s10 }
  0xe6   : > { %v11778_v62 = vpop.permute.xlu1 %1170  ;;  %v1169_v63 = vpop.permute.xlu0 %1168  ;;  %1625 = vrot.lane.b32.xlu0 %v1606_v59, %s16312_s2 }
  0xe7   : > { %v1181_v0 = vsel %vm1178_vm0, %v1167_v32, %v1169_v63  ;;  %v1182_v8 = vsel %vm1178_vm0, %v1169_v63, %v11778_v62 }
  0xe8   : > { %v1198_v2 = vmul.f32 %v1181_v0, %v11774_v60  ;;  %v1199_v12 = vmul.f32 %v1182_v8, %v11790_v11 }
  0xe9   : > { %1517 = vrot.lane.b32.xlu1 %v1497_v1, %s16308_s7 }
  0xea   : > { %v1677_v9 = vpop.permute.xlu1 %1676  ;;  %v1675_v10 = vpop.permute.xlu0 %1674  ;;  %1219 = vrot.lane.b32.xlu0 %v1198_v2, %s11391_s11 }
  0xeb   : > { %v1690_v19 = vsel %vm1428_vm4, %v1675_v10, %v1677_v9  ;;  %v1706_v48 = vmul.f32 %v1675_v10, %v11733_v30 }
  0xec   : > { %v1707_v25 = vmul.f32 %v1690_v19, %v11736_v31 }
  0xed   : > { %1627 = vrot.lane.b32.xlu1 %v1607_v4, %s16312_s2 }
  0xee   : > { %v1366_v13 = vpop.permute.xlu1 %1365  ;;  %v11794_v14 = vpop.permute.xlu0 %1678  ;;  %1280 = vrot.lane.b32.xlu0 %v11774_v60, %s11392_s18 }
  0xef   : > { %v1691_v17 = vsel %vm1428_vm4, %v1677_v9, %v11794_v14  ;;  %v1378_v35 = vsel %vm1375_vm1, %v11747_v39, %v1366_v13 }
  0xf0   : > { %v1708_v24 = vmul.f32 %v1691_v17, %v11774_v60  ;;  %v1395_v40 = vmul.f32 %v1378_v35, %v11774_v60 }
  0xf1   : > { %1221 = vrot.lane.b32.xlu1 %v1199_v12, %s11391_s11 }
  0xf2   : > { %v1469_v20 = vpop.permute.xlu1 %1468  ;;  %v11803_v22 = vpop.permute.xlu0 %1367  ;;  %1623 = vrot.lane.b32.xlu0 %v1605_v18, %s16312_s2 }
  0xf3   : > { %v1379_v28 = vsel %vm1375_vm1, %v1366_v13, %v11803_v22  ;;  %v1481_v41 = vsel %vm1478_vm2, %v11757_v50, %v1469_v20  ;;  %v11850_v50 = vld [vmem:[%s11728_s16 + $0x28] sm:$0xff] }
  0xf4   : > { %v1396_v33 = vmul.f32 %v1379_v28, %v11790_v11  ;;  %v1498_v44 = vmul.f32 %v1481_v41, %v11774_v60 }
  0xf5   : > { %1282 = vrot.lane.b32.xlu1 %v11790_v11, %s11392_s18 }
  0xf6   : > { %v11810_v26 = vpop.permute.xlu0 %1470  ;;  %1728 = vrot.lane.b32.xlu0 %v1708_v24, %s11387_s12  ;;  %v1580_v29 = vpop.permute.xlu1 %1579  ;;  %v11394_v24 = vmov 0  }
  0xf7   : > { %v1482_v34 = vsel %vm1478_vm2, %v1469_v20, %v11810_v26  ;;  %v1591_v51 = vsel %vm1531_vm3, %v11765_v54, %v1580_v29  ;;  %11062 = vset.pattern.permute.xlu0 %v11394_v24  ;;  %11063 = vset.pattern.permute.xlu1 %v11394_v24 }
  0xf8   : > { %v1499_v38 = vmul.f32 %v1482_v34, %v11790_v11  ;;  %v1608_v56 = vmul.f32 %v1591_v51, %v11790_v11 }
  0xf9   : > { %1726 = vrot.lane.b32.xlu1 %v1707_v25, %s11387_s12 }
  0xfa   : > { %v11816_v32 = vpop.permute.xlu0 %1581  ;;  %1788 = vrot.lane.b32.xlu0 %v11774_v60, %s11393_s23  ;;  %v1173_v36 = vpop.permute.xlu1 %1172 }
  0xfb   : > { %v1592_v39 = vsel %vm1531_vm3, %v1580_v29, %v11816_v32  ;;  %v1183_v57 = vsel %vm1178_vm0, %v11778_v62, %v1173_v36 }
  0xfc   : > { %v1609_v47 = vmul.f32 %v1592_v39, %v11841_v45  ;;  %v1200_v59 = vmul.f32 %v1183_v57, %v11841_v45 }
  0xfd   : > { %1786 = vrot.lane.b32.xlu1 %v11736_v31, %s11393_s23 }
  0xfe   : > { %v11827_v37 = vpop.permute.xlu0 %1174  ;;  %1418 = vrot.lane.b32.xlu0 %v1396_v33, %s11390_s10  ;;  %v1837_v43 = vpop.permute.xlu1 %1836 }
  0xff   : > { %v1184_v49 = vsel %vm1178_vm0, %v1173_v36, %v11827_v37  ;;  %v1868_v10 = vmul.f32 %v1837_v43, %v11733_v30 }
 0x100   : > { %v1201_v53 = vmul.f32 %v1184_v49, %v11850_v50 }
 0x101   : > { %1416 = vrot.lane.b32.xlu1 %v1395_v40, %s11390_s10 }
 0x102   : > { %v1839_v42 = vpop.permute.xlu0 %1838  ;;  %1521 = vrot.lane.b32.xlu0 %v1499_v38, %s16308_s7  ;;  %v1841_v52 = vpop.permute.xlu1 %1840 }
 0x103   : > { %v1853_v54 = vsel %vm1231_vm5, %v1839_v42, %v1841_v52  ;;  %v1852_v63 = vsel %vm1231_vm5, %v1837_v43, %v1839_v42  ;;  %v11919_v43 = vld [vmem:[%s11728_s16 + $0x30] sm:$0xff] }
 0x104   : > { %v1870_v62 = vmul.f32 %v1853_v54, %v11774_v60  ;;  %v1869_v2 = vmul.f32 %v1852_v63, %v11736_v31 }
 0x105   : > { %1519 = vrot.lane.b32.xlu1 %v1498_v44, %s16308_s7 }
 0x106   : > { %v1681_v46 = vpop.permute.xlu0 %1680  ;;  %1784 = vrot.lane.b32.xlu0 %v11733_v30, %s11393_s23  ;;  %v1683_v58 = vpop.permute.xlu1 %1682 }
 0x107   : > { %v1692_v0 = vsel %vm1428_vm4, %v11794_v14, %v1681_v46  ;;  %v1693_v9 = vsel %vm1428_vm4, %v1681_v46, %v1683_v58 }
 0x108   : > { %v1709_v8 = vmul.f32 %v1692_v0, %v11790_v11  ;;  %v1710_v17 = vmul.f32 %v1693_v9, %v11841_v45 }
 0x109   : > { %1724 = vrot.lane.b32.xlu1 %v1706_v48, %s11387_s12 }
 0x10a   : > { %1631 = vrot.lane.b32.xlu0 %v1609_v47, %s16312_s2  ;;  %v1370_v55 = vpop.permute.xlu0 %1369  ;;  %v11871_v1 = vpop.permute.xlu1 %1371 }
 0x10b   : > { %v1380_v13 = vsel %vm1375_vm1, %v11803_v22, %v1370_v55  ;;  %v1381_v25 = vsel %vm1375_vm1, %v1370_v55, %v11871_v1 }
 0x10c   : > { %v1397_v18 = vmul.f32 %v1380_v13, %v11841_v45  ;;  %v1398_v33 = vmul.f32 %v1381_v25, %v11850_v50 }
 0x10d   : > { %1629 = vrot.lane.b32.xlu1 %v1608_v56, %s16312_s2 }
 0x10e   : > { %1225 = vrot.lane.b32.xlu0 %v1201_v53, %s11391_s11  ;;  %v1473_v61 = vpop.permute.xlu0 %1472  ;;  %v11882_v12 = vpop.permute.xlu1 %1474 }
 0x10f   : > { %v1483_v19 = vsel %vm1478_vm2, %v11810_v26, %v1473_v61  ;;  %v1484_v34 = vsel %vm1478_vm2, %v1473_v61, %v11882_v12 }
 0x110   : > { %v1500_v28 = vmul.f32 %v1483_v19, %v11841_v45 }
 0x111   : > { %1223 = vrot.lane.b32.xlu1 %v1200_v59, %s11391_s11 }
 0x112   : > { %1286 = vrot.lane.b32.xlu0 %v11850_v50, %s11392_s18  ;;  %v1584_v4 = vpop.permute.xlu0 %1583  ;;  %v11893_v20 = vpop.permute.xlu1 %1585 }
 0x113   : > { %v1593_v29 = vsel %vm1531_vm3, %v11816_v32, %v1584_v4  ;;  %v1501_v32 = vmul.f32 %v1484_v34, %v11850_v50  ;;  %v1594_v40 = vsel %vm1531_vm3, %v1584_v4, %v11893_v20 }
 0x114   : > { %v1610_v35 = vmul.f32 %v1593_v29, %v11850_v50  ;;  %v1611_v46 = vmul.f32 %v1594_v40, %v11919_v43 }
 0x115   : > { %1284 = vrot.lane.b32.xlu1 %v11841_v45, %s11392_s18 }
 0x116   : > { %1890 = vrot.lane.b32.xlu0 %v1870_v62, %s11386_s0  ;;  %v1843_v14 = vpop.permute.xlu0 %1842  ;;  %v1845_v26 = vpop.permute.xlu1 %1844 }
 0x117   : > { %v1854_v36 = vsel %vm1231_vm5, %v1841_v52, %v1843_v14  ;;  %v1855_v47 = vsel %vm1231_vm5, %v1843_v14, %v1845_v26 }
 0x118   : > { %v1871_v41 = vmul.f32 %v1854_v36, %v11790_v11  ;;  %v1872_v51 = vmul.f32 %v1855_v47, %v11841_v45 }
 0x119   : > { %1888 = vrot.lane.b32.xlu1 %v1869_v2, %s11386_s0 }
 0x11a   : > { %1730 = vrot.lane.b32.xlu0 %v1709_v8, %s11387_s12  ;;  %v1685_v22 = vpop.permute.xlu0 %1684  ;;  %v1687_v39 = vpop.permute.xlu1 %1686  ;;  %v11951_v8 = vld [vmem:[%s11728_s16 + $0x38] sm:$0xff]  ;;  %s16306_s16 = smov 112  }
 0x11b   : > { %v1694_v42 = vsel %vm1428_vm4, %v1683_v58, %v1685_v22  ;;  %v1695_v52 = vsel %vm1428_vm4, %v1685_v22, %v1687_v39 }
 0x11c   : > { %v1711_v48 = vmul.f32 %v1694_v42, %v11850_v50  ;;  %v1712_v56 = vmul.f32 %v1695_v52, %v11919_v43 }
 0x11d   : > { %1886 = vrot.lane.b32.xlu1 %v1868_v10, %s11386_s0 }
 0x11e   : > { %1790 = vrot.lane.b32.xlu0 %v11790_v11, %s11393_s23  ;;  %v1847_v38 = vpop.permute.xlu0 %1846  ;;  %v1849_v49 = vpop.permute.xlu1 %1848 }
 0x11f   : > { %v1856_v53 = vsel %vm1231_vm5, %v1845_v26, %v1847_v38  ;;  %v1857_v61 = vsel %vm1231_vm5, %v1847_v38, %v1849_v49 }
 0x120   : > { %v1873_v57 = vmul.f32 %v1856_v53, %v11850_v50  ;;  %v1874_v2 = vmul.f32 %v1857_v61, %v11919_v43  ;;  %v2001_v53 = vld [vmem:[%s16365_s13] sm:$0xff]  ;;  %s16426_s13 = sld [smem:[#allocation19_spill]] }
 0x121   : > { %1732 = vrot.lane.b32.xlu1 %v1710_v17, %s11387_s12 }
 0x122   : > { %1420 = vrot.lane.b32.xlu0 %v1397_v18, %s11390_s10  ;;  %v1177_v44 = vpop.permute.xlu0 %1176  ;;  %v1374_v58 = vpop.permute.xlu1 %1373 }
 0x123   : > { %v1185_v54 = vsel %vm1178_vm0, %v11827_v37, %v1177_v44  ;;  %v1382_v37 = vsel %vm1375_vm1, %v11871_v1, %v1374_v58  ;;  %v1203_v9 = vmul.f32 %v1177_v44, %v11951_v8  ;;  %v1400_v22 = vmul.f32 %v1374_v58, %v11951_v8 }
 0x124   : > { %v1202_v63 = vmul.f32 %v1185_v54, %v11919_v43  ;;  %v1399_v13 = vmul.f32 %v1382_v37, %v11919_v43 }
 0x125   : > { %1792 = vrot.lane.b32.xlu1 %v11841_v45, %s11393_s23 }
 0x126   : > { %1523 = vrot.lane.b32.xlu0 %v1500_v28, %s16308_s7  ;;  %v1477_v55 = vpop.permute.xlu0 %1476  ;;  %v1588_v62 = vpop.permute.xlu1 %1587 }
 0x127   : > { %v1485_v14 = vsel %vm1478_vm2, %v11882_v12, %v1477_v55  ;;  %v1595_v19 = vsel %vm1531_vm3, %v11893_v20, %v1588_v62  ;;  %v1503_v29 = vmul.f32 %v1477_v55, %v11951_v8  ;;  %v1613_v34 = vmul.f32 0.0, %v1588_v62  ;;  %v11998_v55 = vld [vmem:[%s16360_s4] ss:$2 sm:$0xff] }
 0x128   : > { %v1502_v18 = vmul.f32 %v1485_v14, %v11919_v43  ;;  %v1612_v25 = vmul.f32 %v1595_v19, %v11951_v8  ;;  %v2317_v19 = vld [vmem:[%s11435_s21] sm:$0xff] }
 0x129   : > { %1422 = vrot.lane.b32.xlu1 %v1398_v33, %s11390_s10 }
 0x12a   : > { %1633 = vrot.lane.b32.xlu0 %v1610_v35, %s16312_s2  ;;  %v1689_v59 = vpop.permute.xlu0 %1688  ;;  %v11947_v4 = vpop.permute.xlu1 %1850 }
 0x12b   : > { %v1696_v28 = vsel %vm1428_vm4, %v1687_v39, %v1689_v59  ;;  %v1876_v62 = vmul.f32 0.0, %v11947_v4 }
 0x12c   : > { %v1713_v33 = vmul.f32 %v1696_v28, %v11951_v8 }
 0x12d   : > { %1525 = vrot.lane.b32.xlu1 %v1501_v32, %s16308_s7 }
 0x12e   : > { %1892 = vrot.lane.b32.xlu0 %v1871_v41, %s11386_s0  ;;  %v1277_v0 = vpop.permute.xlu0 %1276  ;;  %v11959_v17 = vpop.permute.xlu1 %1278  ;;  %v1858_v41 = vsel %vm1231_vm5, %v1849_v49, %v11947_v4  ;;  %v12023_v4 = vrot.slane %v11998_v55, %v11616_v5 }
 0x12f   : > { %v1294_v32 = vsel %vm1292_vm6, %v1277_v0, %v11959_v17 }
 0x131   : > { %1635 = vrot.lane.b32.xlu1 %v1611_v46, %s16312_s2  ;;  %v1714_v46 = vmul.f32 0.0, %v1689_v59 }
 0x132   : > { %1734 = vrot.lane.b32.xlu0 %v1711_v48, %s11387_s12  ;;  %v1275_v12 = vpop.permute.xlu1 %1274  ;;  %v1875_v48 = vmul.f32 %v1858_v41, %v11951_v8 }
 0x133   : > { %v1293_v42 = vsel %vm1292_vm6, %v1275_v12, %v1277_v0 }
 0x135   : > { %1894 = vrot.lane.b32.xlu1 %v1872_v51, %s11386_s0 }
 0x136   : > { %1794 = vrot.lane.b32.xlu0 %v11850_v50, %s11393_s23 }
 0x139   : > { %1736 = vrot.lane.b32.xlu1 %v1712_v56, %s11387_s12 }
 0x13a   : > { %1896 = vrot.lane.b32.xlu0 %v1873_v57, %s11386_s0 }
 0x13d   : > { %1796 = vrot.lane.b32.xlu1 %v11919_v43, %s11393_s23 }
 0x13e   : > { %1227 = vrot.lane.b32.xlu0 %v1202_v63, %s11391_s11  ;;  %v12009_v63 = vrot.slane %v11998_v55, %v11619_v6 }
 0x141   : > { %1898 = vrot.lane.b32.xlu1 %v1874_v2, %s11386_s0 }
 0x142   : > { %1288 = vrot.lane.b32.xlu0 %v11919_v43, %s11392_s18 }
 0x143   : > { %v1214_v10 = vpop.permute.xlu0 %1213 }
 0x145   : > { %1229 = vrot.lane.b32.xlu1 %v1203_v9, %s11391_s11 }
 0x146   : > { %1424 = vrot.lane.b32.xlu0 %v1399_v13, %s11390_s10 }
 0x147   : > { %v1411_v1 = vpop.permute.xlu0 %1410 }
 0x149   : > { %1290 = vrot.lane.b32.xlu1 %v11951_v8, %s11392_s18 }
 0x14a   : > { %1527 = vrot.lane.b32.xlu0 %v1502_v18, %s16308_s7 }
 0x14b   : > { %v1216_v24 = vpop.permute.xlu0 %1215 }
 0x14c   : > { %v1232_v35 = vsel %vm1231_vm5, %v1214_v10, %v1216_v24  ;;  %v2303_v10 = vld [vmem:[%s11430_s17] sm:$0xff] }
 0x14d   : > { %1426 = vrot.lane.b32.xlu1 %v1400_v22, %s11390_s10  ;;  %v10220_v44 = vpack.c.bf16 %v1293_v42, %v1232_v35 }
 0x14e   : > { %1637 = vrot.lane.b32.xlu0 %v1612_v25, %s16312_s2 }
 0x14f   : > { %v1514_v20 = vpop.permute.xlu1 %1513  ;;  %v1413_v26 = vpop.permute.xlu0 %1412 }
 0x150   : > { %v1429_v58 = vsel %vm1428_vm4, %v1411_v1, %v1413_v26 }
 0x151   : > { %1529 = vrot.lane.b32.xlu1 %v1503_v29, %s16308_s7 }
 0x152   : > { %1738 = vrot.lane.b32.xlu0 %v1713_v33, %s11387_s12 }
 0x153   : > { %v1218_v36 = vpop.permute.xlu1 %1217  ;;  %v1516_v38 = vpop.permute.xlu0 %1515 }
 0x154   : > { %v1233_v40 = vsel %vm1231_vm5, %v1216_v24, %v1218_v36  ;;  %v1532_v49 = vsel %vm1531_vm3, %v1514_v20, %v1516_v38  ;;  %v12041_v24 = vld [vmem:[%s16360_s4 + $0x1] ss:$2 sm:$0xff] }
 0x155   : > { %1639 = vrot.lane.b32.xlu1 %v1613_v34, %s16312_s2  ;;  %v10218_v39 = vpack.c.bf16 %v1294_v32, %v1233_v40  ;;  %v10224_v61 = vpack.c.bf16 %v1532_v49, %v1429_v58  ;;  %v12058_v33 = vrot.slane %v12041_v24, %v11622_v7 }
 0x156   : > { %1798 = vrot.lane.b32.xlu0 %v11951_v8, %s11393_s23 }
 0x157   : > { %v11988_v47 = vpop.permute.xlu1 %1414  ;;  %10219 = vmatprep.subr.bf16.mxu0 %v10218_v39  ;;  %v12080_v39 = vrot.slane %v12041_v24, %v11619_v6 }
 0x158   : > { %v1626_v51 = vpop.permute.xlu0 %1625  ;;  %10221 = vmatpush1.bf16.msra.mxu0 %v10220_v44  ;;  %v1430_v56 = vsel %vm1428_vm4, %v1413_v26, %v11988_v47 }
 0x159   : > { %1740 = vrot.lane.b32.xlu1 %v1714_v46, %s11387_s12 }
 0x15a   : > { %1900 = vrot.lane.b32.xlu0 %v1875_v48, %s11386_s0  ;;  %v12090_v48 = vrot.slane %v12041_v24, %v11616_v5 }
 0x15b   : > { %v11994_v52 = vpop.permute.xlu1 %1517 }
 0x15c   : > { %v1533_v57 = vsel %vm1531_vm3, %v1516_v38, %v11994_v52  ;;  %v1220_v54 = vpop.permute.xlu0 %1219 }
 0x15d   : > { %1800 = vrot.lane.b32.xlu1 %v11385_v3, %s11393_s23  ;;  %v10222_v59 = vpack.c.bf16 %v1533_v57, %v1430_v56  ;;  %v1234_v29 = vsel %vm1231_vm5, %v1218_v36, %v1220_v54  ;;  %v12066_v36 = vrot.slane %v11998_v55, %v11653_v16 }
 0x15e   : > { %2004 = vperm.xlu0 %11062, %v2001_v53  }
 0x15f   : > { %v12012_v0 = vpop.permute.xlu1 %1627  ;;  %10223 = vmatprep.subr.bf16.mxu0 %v10222_v59 }
 0x160   : > { %v1642_v2 = vsel %vm1478_vm2, %v1626_v51, %v12012_v0  ;;  %v1281_v37 = vpop.permute.xlu0 %1280  ;;  %10225 = vmatpush1.bf16.msra.mxu0 %v10224_v61 }
 0x161   : > { %1902 = vrot.lane.b32.xlu1 %v1876_v62, %s11386_s0  ;;  %v10226_v9 = vpack.c.bf16 %v1642_v2, %v11736_v31  ;;  %v12034_v31 = vrot.slane %v11998_v55, %v11650_v15  ;;  %v1295_v22 = vsel %vm1292_vm6, %v11959_v17, %v1281_v37  ;;  %v12052_v17 = vrot.slane %v11998_v55, %v11622_v7 }
 0x162   : > { %2385 = vrot.lane.b32.xlu0 %v12009_v63, %s11386_s0  ;;  %v10236_v26 = vpack.c.bf16 %v1295_v22, %v1234_v29 }
 0x163   : > { %v12025_v13 = vpop.permute.xlu1 %1221  ;;  %10227 = vmatprep.subr.bf16.mxu0 %v10226_v9  ;;  %v2562_v9 = vrot.slane %v12041_v24, %v11653_v16 }
 0x164   : > { %v1624_v14 = vpop.permute.xlu0 %1623  ;;  %v1235_v25 = vsel %vm1231_vm5, %v1220_v54, %v12025_v13 }
 0x165   : > { %v1641_v1 = vsel %vm1478_vm2, %v1624_v14, %v1626_v51  ;;  %2306 = vperm.xlu1 %11063, %v2303_v10   ;;  %v12096_v51 = vrot.slane %v12041_v24, %v11650_v15 }
 0x166   : > { %v10228_v18 = vpack.c.bf16 %v1641_v1, %v11733_v30  ;;  %2389 = vrot.lane.b32.xlu0 %v12023_v4, %s11386_s0 }
 0x167   : > { %v12038_v12 = vpop.permute.xlu1 %1282 }
 0x168   : > { %v1296_v30 = vsel %vm1292_vm6, %v1281_v37, %v12038_v12  ;;  %v12047_v28 = vpop.permute.xlu0 %1728  ;;  %10229 = vmatpush1.bf16.msra.mxu0 %v10228_v18 }
 0x169   : > { %v10234_v20 = vpack.c.bf16 %v1296_v30, %v1235_v25  ;;  %2320 = vperm.xlu1 %11063, %v2317_v19  }
 0x16a   : > { %2393 = vrot.lane.b32.xlu0 %v12034_v31, %s11386_s0 }
 0x16b   : > { %v1727_v34 = vpop.permute.xlu1 %1726  ;;  %10235 = vmatprep.subr.bf16.mxu1 %v10234_v20 }
 0x16c   : > { %v12060_v35 = vpop.permute.xlu0 %1788  ;;  %10237 = vmatpush1.bf16.msra.mxu1 %v10236_v26  ;;  %v1743_v32 = vsel %vm1375_vm1, %v1727_v34, %v12047_v28 }
 0x16d   : > { %2387 = vrot.lane.b32.xlu1 %v12052_v17, %s11386_s0 }
 0x16e   : > { %2581 = vrot.lane.b32.xlu0 %v12058_v33, %s11387_s12 }
 0x16f   : > { %v1787_v38 = vpop.permute.xlu1 %1786 }
 0x170   : > { %v1804_v40 = vsel %vm1802_vm7, %v1787_v38, %v12060_v35  ;;  %v12074_v41 = vpop.permute.xlu0 %1418 }
 0x171   : > { %v10230_v42 = vpack.c.bf16 %v1804_v40, %v1743_v32  ;;  %2391 = vrot.lane.b32.xlu1 %v12066_v36, %s11386_s0  ;;  %v12155_v32 = vld [vmem:[%s16366_s9] sm:$0xff]  ;;  %s16423_s9 = smov 9  }
 0x172   : > { %2680 = vrot.lane.b32.xlu0 %v12009_v63, %s16312_s2 }
 0x173   : > { %v1417_v44 = vpop.permute.xlu1 %1416  ;;  %10231 = vmatprep.subr.bf16.mxu0 %v10230_v42 }
 0x174   : > { %v12084_v46 = vpop.permute.xlu0 %1521  ;;  %v1431_v53 = vsel %vm1428_vm4, %v11988_v47, %v1417_v44  ;;  %v1432_v56 = vsel %vm1428_vm4, %v1417_v44, %v12074_v41 }
 0x175   : > { %2579 = vrot.lane.b32.xlu1 %v12080_v39, %s11387_s12 }
 0x176   : > { %2684 = vrot.lane.b32.xlu0 %v12023_v4, %s16312_s2 }
 0x177   : > { %v1520_v49 = vpop.permute.xlu1 %1519 }
 0x178   : > { %v1534_v57 = vsel %vm1531_vm3, %v11994_v52, %v1520_v49  ;;  %v1535_v54 = vsel %vm1531_vm3, %v1520_v49, %v12084_v46  ;;  %v1785_v58 = vpop.permute.xlu0 %1784 }
 0x179   : > { %v10238_v59 = vpack.c.bf16 %v1535_v54, %v1432_v56  ;;  %v10240_v61 = vpack.c.bf16 %v1534_v57, %v1431_v53  ;;  %2583 = vrot.lane.b32.xlu1 %v12090_v48, %s11387_s12  ;;  %v1803_v47 = vsel %vm1802_vm7, %v1785_v58, %v1787_v38 }
 0x17a   : > { %2587 = vrot.lane.b32.xlu0 %v12096_v51, %s11387_s12 }
 0x17b   : > { %v1725_v62 = vpop.permute.xlu1 %1724  ;;  %10239 = vmatprep.subr.bf16.mxu1 %v10238_v59 }
 0x17c   : > { %v1742_v2 = vsel %vm1375_vm1, %v1725_v62, %v1727_v34  ;;  %v12112_v37 = vpop.permute.xlu0 %1631  ;;  %10241 = vmatpush1.bf16.msra.mxu1 %v10240_v61  ;;  %v2376_v61 = vrot.slane %v11998_v55, %v11674_v21 }
 0x17d   : > { %v10232_v52 = vpack.c.bf16 %v1803_v47, %v1742_v2  ;;  %2682 = vrot.lane.b32.xlu1 %v12052_v17, %s16312_s2  ;;  %v2570_v2 = vrot.slane %v12041_v24, %v11674_v21 }
 0x17e   : > { %2688 = vrot.lane.b32.xlu0 %v12034_v31, %s16312_s2 }
 0x17f   : > { %v1630_v10 = vpop.permute.xlu1 %1629  ;;  %10233 = vmatpush1.bf16.msra.mxu0 %v10232_v52 }
 0x180   : > { %v1643_v14 = vsel %vm1478_vm2, %v12012_v0, %v1630_v10  ;;  %v1644_v1 = vsel %vm1478_vm2, %v1630_v10, %v12112_v37  ;;  %v12124_v18 = vpop.permute.xlu0 %1225 }
 0x181   : > { %v10242_v19 = vpack.c.bf16 %v1644_v1, %v11790_v11  ;;  %v10244_v22 = vpack.c.bf16 %v1643_v14, %v11774_v60  ;;  %2585 = vrot.lane.b32.xlu1 %v2562_v9, %s11387_s12 }
 0x182   : > { %2791 = vrot.lane.b32.xlu0 %v12058_v33, %s16308_s7 }
 0x183   : > { %v1224_v25 = vpop.permute.xlu1 %1223  ;;  %10243 = vmatprep.subr.bf16.mxu1 %v10242_v19 }
 0x184   : > { %v12131_v30 = vpop.permute.xlu0 %1286  ;;  %10245 = vmatpush1.bf16.msra.mxu1 %v10244_v22  ;;  %v1236_v40 = vsel %vm1231_vm5, %v12025_v13, %v1224_v25 }
 0x185   : > { %2686 = vrot.lane.b32.xlu1 %v12066_v36, %s16312_s2 }
 0x186   : > { %2795 = vrot.lane.b32.xlu0 %v2562_v9, %s16308_s7 }
 0x187   : > { %v1285_v0 = vpop.permute.xlu1 %1284 }
 0x188   : > { %v12136_v11 = vpop.permute.xlu0 %1890  ;;  %v1298_v26 = vsel %vm1292_vm6, %v1285_v0, %v12131_v30  ;;  %v1297_v34 = vsel %vm1292_vm6, %v12038_v12, %v1285_v0 }
 0x189   : > { %2789 = vrot.lane.b32.xlu1 %v12080_v39, %s16308_s7  ;;  %v10252_v53 = vpack.c.bf16 %v1297_v34, %v1236_v40 }
 0x18a   : > { %2890 = vrot.lane.b32.xlu0 %v12009_v63, %s11390_s10  ;;  %v1237_v63 = vsel %vm1231_vm5, %v1224_v25, %v12124_v18 }
 0x18b   : > { %v1889_v60 = vpop.permute.xlu1 %1888  ;;  %v10250_v49 = vpack.c.bf16 %v1298_v26, %v1237_v63 }
 0x18c   : > { %v1905_v29 = vsel %vm1178_vm0, %v1889_v60, %v12136_v11  ;;  %v1731_v20 = vpop.permute.xlu0 %1730 }
 0x18d   : > { %2027 = vmatprep.subr.mxu0 %v1905_v29  ;;  %2793 = vrot.lane.b32.xlu1 %v12090_v48, %s16308_s7 }
 0x18e   : > { %2894 = vrot.lane.b32.xlu0 %v12023_v4, %s11390_s10 }
 0x18f   : > { %v1887_v38 = vpop.permute.xlu1 %1886 }
 0x190   : > { %v1904_v42 = vsel %vm1178_vm0, %v1887_v38, %v1889_v60  ;;  %v1791_v44 = vpop.permute.xlu0 %1790  ;;  %v12228_v60 = vld [vmem:[#allocation2 + $0xc0] sm:$0xff] }
 0x191   : > { %2028 = vmatpush1.msra.mxu0 %v1904_v42  ;;  %2797 = vrot.lane.b32.xlu1 %v12096_v51, %s16308_s7  ;;  %v1805_v13 = vsel %vm1802_vm7, %v12060_v35, %v1791_v44 }
 0x192   : > { %9995 = vmatmul.mubr.msk.f32.vlgmr.msra.gmra.mrb[0].mxu0 %vm2007_vm8, %v12155_v32  ;;  %10251 = vmatprep.subr.bf16.mxu0 %v10250_v49 }
 0x193   : > { %v12164_v4 = vpop.permute.xlu1 %1732  ;;  %10253 = vmatpush1.bf16.msra.mxu0 %v10252_v53  ;;  %2217 = vmatprep.mubr.f32.mxu0 %v11385_v3  ;;  %v1744_v3 = vsel %vm1375_vm1, %v12047_v28, %v1731_v20 }
 0x194   : > { %v1421_v12 = vpop.permute.xlu0 %1420  ;;  %2898 = vrot.lane.b32.xlu0 %v12034_v31, %s11390_s10  ;;  %v1745_v57 = vsel %vm1375_vm1, %v1731_v20, %v12164_v4 }
 0x195   : > { %2892 = vrot.lane.b32.xlu1 %v12052_v17, %s11390_s10  ;;  %v10248_v17 = vpack.c.bf16 %v1805_v13, %v1744_v3 }
 0x197   : > { %v1793_v56 = vpop.permute.xlu1 %1792 }
 0x198   : > { %v1806_v54 = vsel %vm1802_vm7, %v1791_v44, %v1793_v56  ;;  %v1524_v58 = vpop.permute.xlu0 %1523  ;;  %3053 = vrot.lane.b32.xlu0 %v12058_v33, %s11391_s11 }
 0x199   : > { %v10246_v31 = vpack.c.bf16 %v1806_v54, %v1745_v57  ;;  %2896 = vrot.lane.b32.xlu1 %v12066_v36, %s11390_s10  ;;  %v1536_v28 = vsel %vm1531_vm3, %v12084_v46, %v1524_v58 }
 0x19b   : > { %v12182_v59 = vpop.permute.xlu1 %1422  ;;  %10247 = vmatprep.subr.bf16.mxu1 %v10246_v31 }
 0x19c   : > { %v1634_v35 = vpop.permute.xlu0 %1633  ;;  %10249 = vmatpush1.bf16.msra.mxu1 %v10248_v17  ;;  %3057 = vrot.lane.b32.xlu0 %v2562_v9, %s11391_s11  ;;  %v1434_v36 = vsel %vm1428_vm4, %v1421_v12, %v12182_v59 }
 0x19d   : > { %3051 = vrot.lane.b32.xlu1 %v12080_v39, %s11391_s11  ;;  %v1433_v39 = vsel %vm1428_vm4, %v12074_v41, %v1421_v12  ;;  %v1645_v9 = vsel %vm1478_vm2, %v12112_v37, %v1634_v35 }
 0x19e   : > { %v10256_v46 = vpack.c.bf16 %v1536_v28, %v1433_v39  ;;  %v10260_v37 = vpack.c.bf16 %v1645_v9, %v11841_v45 }
 0x19f   : > { %v12191_v33 = vpop.permute.xlu1 %1525 }
 0x1a0   : > { %v1537_v62 = vsel %vm1531_vm3, %v1524_v58, %v12191_v33  ;;  %v1893_v47 = vpop.permute.xlu0 %1892  ;;  %2395 = vrot.lane.b32.xlu0 %v2376_v61, %s11386_s0 }
 0x1a1   : > { %v10254_v52 = vpack.c.bf16 %v1537_v62, %v1434_v36  ;;  %3055 = vrot.lane.b32.xlu1 %v12090_v48, %s11391_s11  ;;  %v2380_v48 = vrot.slane %v11998_v55, %v11681_v23  ;;  %v1906_v0 = vsel %vm1178_vm0, %v12136_v11, %v1893_v47 }
 0x1a3   : > { %v12206_v10 = vpop.permute.xlu1 %1635  ;;  %10255 = vmatprep.subr.bf16.mxu0 %v10254_v52 }
 0x1a4   : > { %v1646_v14 = vsel %vm1478_vm2, %v1634_v35, %v12206_v10  ;;  %v1735_v1 = vpop.permute.xlu0 %1734  ;;  %10257 = vmatpush1.bf16.msra.mxu0 %v10256_v46  ;;  %2589 = vrot.lane.b32.xlu0 %v2570_v2, %s11387_s12 }
 0x1a5   : > { %v10258_v41 = vpack.c.bf16 %v1646_v14, %v11850_v50  ;;  %3059 = vrot.lane.b32.xlu1 %v12096_v51, %s11391_s11  ;;  %v2574_v50 = vrot.slane %v12041_v24, %v11681_v23  ;;  %v1746_v63 = vsel %vm1375_vm1, %v12164_v4, %v1735_v1 }
 0x1a7   : > { %v1895_v19 = vpop.permute.xlu1 %1894  ;;  %10259 = vmatprep.subr.bf16.mxu0 %v10258_v41 }
 0x1a8   : > { %v1907_v22 = vsel %vm1178_vm0, %v1893_v47, %v1895_v19  ;;  %v1795_v25 = vpop.permute.xlu0 %1794  ;;  %10261 = vmatpush1.bf16.msra.mxu0 %v10260_v37  ;;  %2690 = vrot.lane.b32.xlu0 %v2376_v61, %s16312_s2 }
 0x1a9   : > { %2098 = vmatprep.subr.mxu1 %v1907_v22  ;;  %2397 = vrot.lane.b32.xlu1 %v2380_v48, %s11386_s0  ;;  %v1807_v11 = vsel %vm1802_vm7, %v1793_v56, %v1795_v25 }
 0x1aa   : > { %2099 = vmatpush1.msra.mxu1 %v1906_v0  ;;  %v10264_v40 = vpack.c.bf16 %v1807_v11, %v1746_v63 }
 0x1ab   : > { %v12224_v51 = vpop.permute.xlu1 %1736  ;;  %9996 = vmatmul.mubr.msk.f32.vlgmr.msra.gmra.mrb[0].mxu1 %vm2007_vm8, %v12155_v32 }
 0x1ac   : > { %v1897_v45 = vpop.permute.xlu0 %1896  ;;  %2288 = vmatprep.mubr.f32.mxu1 %v12228_v60  ;;  %2799 = vrot.lane.b32.xlu0 %v2570_v2, %s16308_s7  ;;  %v1747_v20 = vsel %vm1375_vm1, %v1735_v1, %v12224_v51 }
 0x1ad   : > { %2591 = vrot.lane.b32.xlu1 %v2574_v50, %s11387_s12  ;;  %v1908_v53 = vsel %vm1178_vm0, %v1895_v19, %v1897_v45 }
 0x1af   : > { %v1797_v29 = vpop.permute.xlu1 %1796 }
 0x1b0   : > { %v1808_v26 = vsel %vm1802_vm7, %v1795_v25, %v1797_v29  ;;  %v1228_v34 = vpop.permute.xlu0 %1227  ;;  %2900 = vrot.lane.b32.xlu0 %v2376_v61, %s11390_s10 }
 0x1b1   : > { %v10262_v38 = vpack.c.bf16 %v1808_v26, %v1747_v20  ;;  %2692 = vrot.lane.b32.xlu1 %v2380_v48, %s16312_s2  ;;  %v1238_v3 = vsel %vm1231_vm5, %v12124_v18, %v1228_v34 }
 0x1b3   : > { %v1899_v42 = vpop.permute.xlu1 %1898  ;;  %10263 = vmatprep.subr.bf16.mxu0 %v10262_v38 }
 0x1b4   : > { %v1909_v44 = vsel %vm1178_vm0, %v1897_v45, %v1899_v42  ;;  %v1289_v49 = vpop.permute.xlu0 %1288  ;;  %10265 = vmatpush1.bf16.msra.mxu0 %v10264_v40  ;;  %3061 = vrot.lane.b32.xlu0 %v2570_v2, %s11391_s11 }
 0x1b5   : > { %2169 = vmatprep.subr.mxu0 %v1909_v44  ;;  %2801 = vrot.lane.b32.xlu1 %v2574_v50, %s16308_s7  ;;  %v1299_v4 = vsel %vm1292_vm6, %v12131_v30, %v1289_v49 }
 0x1b6   : > { %v10268_v17 = vpack.c.bf16 %v1299_v4, %v1238_v3 }
 0x1b7   : > { %v1230_v12 = vpop.permute.xlu1 %1229 }
 0x1b8   : > { %v1425_v13 = vpop.permute.xlu0 %1424  ;;  %2170 = vmatpush1.msra.mxu0 %v1908_v53  ;;  %v1239_v57 = vsel %vm1231_vm5, %v1228_v34, %v1230_v12  ;;  %v12313_v12 = vrot.slane %v11998_v55, %v11708_v27 }
 0x1b9   : > { %9997 = vmatmul.mubr.msk.f32.vlgmr.msra.gmra.mrb[2].mxu0 %vm2007_vm8, %v12155_v32  ;;  %2902 = vrot.lane.b32.xlu1 %v2380_v48, %s11390_s10  ;;  %v1435_v18 = vsel %vm1428_vm4, %v12182_v59, %v1425_v13 }
 0x1ba   : > { %3299 = vmatprep.mubr.f32.mxu0 %v12228_v60 }
 0x1bb   : > { %v1291_v56 = vpop.permute.xlu1 %1290 }
 0x1bc   : > { %v1300_v54 = vsel %vm1292_vm6, %v1289_v49, %v1291_v56  ;;  %v1528_v58 = vpop.permute.xlu0 %1527  ;;  %v12307_v49 = vrot.slane %v12041_v24, %v11708_v27 }
 0x1bd   : > { %v10266_v31 = vpack.c.bf16 %v1300_v54, %v1239_v57  ;;  %3063 = vrot.lane.b32.xlu1 %v2574_v50, %s11391_s11  ;;  %v1538_v30 = vsel %vm1531_vm3, %v12191_v33, %v1528_v58 }
 0x1be   : > { %v10272_v39 = vpack.c.bf16 %v1538_v30, %v1435_v18 }
 0x1bf   : > { %v1427_v35 = vpop.permute.xlu1 %1426  ;;  %10267 = vmatprep.subr.bf16.mxu1 %v10266_v31 }
 0x1c0   : > { %v1638_v61 = vpop.permute.xlu0 %1637  ;;  %10269 = vmatpush1.bf16.msra.mxu1 %v10268_v17  ;;  %v1436_v36 = vsel %vm1428_vm4, %v1425_v13, %v1427_v35 }
 0x1c1   : > { %2495 = vrot.lane.b32.xlu1 %v12228_v60, %s11392_s18  ;;  %v1647_v52 = vsel %vm1478_vm2, %v12206_v10, %v1638_v61 }
 0x1c2   : > { %v10276_v14 = vpack.c.bf16 %v1647_v52, %v11919_v43 }
 0x1c3   : > { %v1530_v28 = vpop.permute.xlu1 %1529 }
 0x1c4   : > { %v1539_v62 = vsel %vm1531_vm3, %v1528_v58, %v1530_v28  ;;  %v1739_v2 = vpop.permute.xlu0 %1738 }
 0x1c5   : > { %v10270_v47 = vpack.c.bf16 %v1539_v62, %v1436_v36  ;;  %v1748_v19 = vsel %vm1375_vm1, %v12224_v51, %v1739_v2 }
 0x1c7   : > { %v1640_v46 = vpop.permute.xlu1 %1639  ;;  %10271 = vmatprep.subr.bf16.mxu1 %v10270_v47 }
 0x1c8   : > { %v1648_v9 = vsel %vm1478_vm2, %v1638_v61, %v1640_v46  ;;  %10273 = vmatpush1.bf16.msra.mxu1 %v10272_v39  ;;  %v1799_v41 = vpop.permute.xlu0 %1798 }
 0x1c9   : > { %v10274_v33 = vpack.c.bf16 %v1648_v9, %v11951_v8  ;;  %v1809_v59 = vsel %vm1802_vm7, %v1797_v29, %v1799_v41 }
 0x1ca   : > { %v10280_v25 = vpack.c.bf16 %v1809_v59, %v1748_v19 }
 0x1cb   : > { %v1741_v1 = vpop.permute.xlu1 %1740  ;;  %10275 = vmatprep.subr.bf16.mxu1 %v10274_v33 }
 0x1cc   : > { %10277 = vmatpush1.bf16.msra.mxu1 %v10276_v14  ;;  %v1749_v37 = vsel %vm1375_vm1, %v1739_v2, %v1741_v1  ;;  %v1901_v0 = vpop.permute.xlu0 %1900 }
 0x1cd   : > { %v1910_v50 = vsel %vm1178_vm0, %v1899_v42, %v1901_v0 }
 0x1cf   : > { %v1801_v48 = vpop.permute.xlu1 %1800 }
 0x1d0   : > { %v1810_v10 = vsel %vm1802_vm7, %v1799_v41, %v1801_v48 }
 0x1d1   : > { %v10278_v22 = vpack.c.bf16 %v1810_v10, %v1749_v37 }
 0x1d3   : > { %v1903_v8 = vpop.permute.xlu1 %1902  ;;  %10279 = vmatprep.subr.bf16.mxu1 %v10278_v22 }
 0x1d4   : > { %v1911_v43 = vsel %vm1178_vm0, %v1901_v0, %v1903_v8  ;;  %10281 = vmatpush1.bf16.msra.mxu1 %v10280_v25 }
 0x1d5   : > { %2240 = vmatprep.subr.mxu1 %v1911_v43 }
 0x1d8   : > { %2241 = vmatpush1.msra.mxu1 %v1910_v50 }
 0x1d9   : > { %9998 = vmatmul.mubr.msk.f32.vlgmr.msra.gmra.mrb[2].mxu1 %vm2007_vm8, %v12155_v32 }
 0x1da   : > { %3376 = vmatprep.mubr.f32.mxu1 %v12228_v60 }
 0x1dd   : > { %v12279_v45 = vpop.permute.xlu0 %2004 }
 0x1e1   : > { %v12281_v51 = vpop.permute.xlu0 %2385 }
 0x1e2   : > { %v2417_v11 = vmul.f32 %v12228_v60, %v12281_v51 }
 0x1e4   : > { %v12285_v29 = vpop.permute.xlu1 %2306  ;;  %2435 = vrot.lane.b32.xlu0 %v2417_v11, %s11391_s11 }
 0x1e5   : > { %v12288_v20 = vpop.permute.xlu0 %2389 }
 0x1e8   : > { %v12290_v26 = vpop.permute.xlu1 %2320 }
 0x1e9   : > { %v12292_v34 = vpop.permute.xlu0 %2393 }
 0x1ec   : > { %v12294_v32 = vpop.permute.xlu1 %2387 }
 0x1ed   : > { %v12296_v63 = vpop.permute.xlu0 %2581  ;;  %v2401_v25 = vsel %vm1178_vm0, %v12281_v51, %v12294_v32 }
 0x1f0   : > { %v12298_v38 = vpop.permute.xlu1 %2391 }
 0x1f1   : > { %v12300_v40 = vpop.permute.xlu0 %2680  ;;  %v2403_v0 = vsel %vm1178_vm0, %v12288_v20, %v12298_v38 }
 0x1f2   : > { %v2712_v42 = vmul.f32 %v12228_v60, %v12300_v40 }
 0x1f4   : > { %v2580_v44 = vpop.permute.xlu1 %2579  ;;  %2730 = vrot.lane.b32.xlu1 %v2712_v42, %s16308_s7 }
 0x1f5   : > { %v2611_v53 = vmul.f32 %v12228_v60, %v2580_v44  ;;  %v12341_v61 = vpop.permute.xlu0 %2684  ;;  %v2595_v43 = vsel %vm1375_vm1, %v2580_v44, %v12296_v63 }
 0x1f7   : > { %2629 = vrot.lane.b32.xlu0 %v2611_v53, %s11390_s10 }
 0x1f8   : > { %2593 = vrot.lane.b32.xlu1 %v12307_v49, %s11387_s12  ;;  %v12325_v57 = vpop.permute.xlu1 %2583 }
 0x1f9   : > { %v12345_v28 = vpop.permute.xlu0 %2587 }
 0x1fb   : > { %2399 = vrot.lane.b32.xlu0 %v12313_v12, %s11386_s0 }
 0x1fc   : > { %2803 = vrot.lane.b32.xlu1 %v12307_v49, %s16308_s7  ;;  %v12337_v35 = vpop.permute.xlu1 %2682 }
 0x1fd   : > { %v12350_v2 = vpop.permute.xlu0 %2688  ;;  %v2696_v44 = vsel %vm1478_vm2, %v12300_v40, %v12337_v35 }
 0x1ff   : > { %2694 = vrot.lane.b32.xlu0 %v12313_v12, %s16312_s2 }
 0x200   : > { %v12343_v30 = vpop.permute.xlu1 %2585 }
 0x201   : > { %v12360_v41 = vpop.permute.xlu0 %2791  ;;  %v2597_v42 = vsel %vm1375_vm1, %v12325_v57, %v12343_v30 }
 0x204   : > { %v12347_v36 = vpop.permute.xlu1 %2686 }
 0x205   : > { %v12373_v37 = vpop.permute.xlu0 %2795 }
 0x208   : > { %v12353_v52 = vpop.permute.xlu1 %2789 }
 0x209   : > { %v12397_v11 = vpop.permute.xlu0 %2890 }
 0x20c   : > { %v12365_v48 = vpop.permute.xlu1 %2793 }
 0x210   : > { %v12379_v19 = vpop.permute.xlu1 %2797 }
 0x214   : > { %v12399_v51 = vpop.permute.xlu1 %2892 }
 0x265   : > { %v2077_v24 = vpop.f32.mrb[0].mxu0 }
 0x266   : > { %v2078_v13 = vadd.f32 %v2077_v24, %v12279_v45  ;;  %v2079_v4 = vpop.f32.mrb[1].mxu0 }
 0x267   : > { %v2080_v56 = vadd.f32 %v2079_v4, %v12279_v45  ;;  %v2895_v4 = vpop.permute.xlu0 %2894 }
 0x268   : > { %v2295_v55 = vmax.f32 %v2078_v13, 0.0  ;;  %v2806_v13 = vsel %vm1531_vm3, %v12360_v41, %v12365_v48 }
 0x269   : > { %v2296_v54 = vmax.f32 %v2080_v56, 0.0  ;;  %v12416_v56 = vpop.permute.xlu1 %2896 }
 0x26a   : > { %v2309_v58 = vmul.f32 %v12285_v29, %v2295_v55 }
 0x26b   : > { %v2310_v3 = vmul.f32 %v12285_v29, %v2296_v54  ;;  %v2698_v54 = vsel %vm1478_vm2, %v12341_v61, %v12347_v36 }
 0x26c   : > { %v12330_v31 = vadd.f32 %v12290_v26, %v2309_v58 }
 0x26d   : > { %v12333_v17 = vadd.f32 %v12290_v26, %v2310_v3 }
 0x26e   : > { %2497 = vrot.lane.b32.xlu0 %v12330_v31, %s11392_s18  ;;  %v2418_v8 = vmul.f32 %v2401_v25, %v12330_v31  ;;  %v2612_v53 = vmul.f32 %v2595_v43, %v12330_v31  ;;  %v2713_v55 = vmul.f32 %v2696_v44, %v12330_v31  ;;  %v2922_v3 = vmul.f32 %v12397_v11, %v12330_v31 }
 0x26f   : > { %2499 = vrot.lane.b32.xlu1 %v12333_v17, %s11392_s18  ;;  %v2596_v43 = vsel %vm1375_vm1, %v12296_v63, %v12325_v57 }
 0x27e   : > { %v2148_v62 = vpop.f32.mrb[0].mxu1 }
 0x27f   : > { %v2149_v18 = vadd.f32 %v2148_v62, %v12279_v45  ;;  %v2150_v47 = vpop.f32.mrb[1].mxu1  ;;  %v12428_v62 = vpop.permute.xlu0 %2898 }
 0x280   : > { %v2151_v39 = vadd.f32 %v2150_v47, %v12279_v45  ;;  %v2821_v47 = vmul.f32 %v12353_v52, %v12330_v31 }
 0x281   : > { %v2297_v46 = vmax.f32 %v2149_v18, 0.0  ;;  %v12430_v18 = vpop.permute.xlu1 %3051 }
 0x282   : > { %v2298_v9 = vmax.f32 %v2151_v39, 0.0  ;;  %v2907_v39 = vsel %vm1428_vm4, %v12399_v51, %v2895_v4 }
 0x283   : > { %v2311_v33 = vmul.f32 %v12285_v29, %v2297_v46  ;;  %v3083_v46 = vmul.f32 %v12430_v18, %v12330_v31 }
 0x284   : > { %v2312_v14 = vmul.f32 %v12285_v29, %v2298_v9  ;;  %v2402_v9 = vsel %vm1178_vm0, %v12294_v32, %v12288_v20  ;;  %v2613_v32 = vmul.f32 %v2596_v43, %v12333_v17 }
 0x285   : > { %v12358_v1 = vadd.f32 %v12290_v26, %v2311_v33  ;;  %v3056_v33 = vpop.permute.xlu1 %3055 }
 0x286   : > { %v12363_v59 = vadd.f32 %v12290_v26, %v2312_v14  ;;  %v3054_v14 = vpop.permute.xlu0 %3053 }
 0x287   : > { %2501 = vrot.lane.b32.xlu0 %v12358_v1, %s11392_s18  ;;  %v2420_v50 = vmul.f32 %v2403_v0, %v12358_v1  ;;  %v2614_v24 = vmul.f32 %v2597_v42, %v12358_v1  ;;  %v2823_v40 = vmul.f32 %v2806_v13, %v12358_v1  ;;  %v2715_v58 = vmul.f32 %v2698_v54, %v12358_v1 }
 0x288   : > { %2503 = vrot.lane.b32.xlu1 %v12363_v59, %s11392_s18  ;;  %v2924_v25 = vmul.f32 %v2907_v39, %v12358_v1  ;;  %v3068_v0 = vsel %vm1231_vm5, %v3054_v14, %v3056_v33  ;;  %v2404_v42 = vsel %vm1178_vm0, %v12298_v38, %v12292_v34  ;;  %v2699_v38 = vsel %vm1478_vm2, %v12347_v36, %v12350_v2 }
 0x289   : > { %v3085_v20 = vmul.f32 %v3068_v0, %v12358_v1  ;;  %v2421_v44 = vmul.f32 %v2404_v42, %v12363_v59  ;;  %v2807_v36 = vsel %vm1531_vm3, %v12365_v48, %v12373_v37  ;;  %v2908_v48 = vsel %vm1428_vm4, %v2895_v4, %v12416_v56 }
 0x28a   : > { %v3058_v0 = vpop.permute.xlu0 %3057  ;;  %v2925_v43 = vmul.f32 %v2908_v48, %v12363_v59 }
 0x28b   : > { %3004 = vrot.lane.b32.xlu0 %v12358_v1, %s11393_s23 }
 0x28c   : > { %v12375_v10 = vpop.f32.mrb[2].mxu0  ;;  %3002 = vrot.lane.b32.xlu1 %v12333_v17, %s11393_s23 }
 0x28d   : > { %v12381_v22 = vpop.f32.mrb[3].mxu0 }
 0x28f   : > { %3000 = vrot.lane.b32.xlu0 %v12330_v31, %s11393_s23 }
 0x290   : > { %3006 = vrot.lane.b32.xlu1 %v12363_v59, %s11393_s23 }
 0x293   : > { %2437 = vrot.lane.b32.xlu0 %v2418_v8, %s11391_s11  ;;  %v2419_v8 = vmul.f32 %v2402_v9, %v12333_v17  ;;  %v2222_v9 = vadd.f32 %v12381_v22, %v12279_v45 }
 0x294   : > { %2441 = vrot.lane.b32.xlu1 %v2420_v50, %s11391_s11  ;;  %v2697_v50 = vsel %vm1478_vm2, %v12337_v35, %v12341_v61 }
 0x295   : > { %v2714_v61 = vmul.f32 %v2697_v50, %v12333_v17  ;;  %v2300_v22 = vmax.f32 %v2222_v9, 0.0 }
 0x297   : > { %2631 = vrot.lane.b32.xlu0 %v2612_v53, %s11390_s10 }
 0x298   : > { %2635 = vrot.lane.b32.xlu1 %v2614_v24, %s11390_s10  ;;  %v2598_v24 = vsel %vm1375_vm1, %v12343_v30, %v12345_v28  ;;  %v2805_v30 = vsel %vm1531_vm3, %v12353_v52, %v12360_v41  ;;  %v2220_v52 = vadd.f32 %v12375_v10, %v12279_v45  ;;  %v12495_v41 = vpop.permute.xlu1 %3059  ;;  %v2906_v10 = vsel %vm1428_vm4, %v12397_v11, %v12399_v51  ;;  %v2396_v11 = vpop.permute.xlu0 %2395 }
 0x299   : > { %v2923_v4 = vmul.f32 %v2906_v10, %v12333_v17 }
 0x29b   : > { %2732 = vrot.lane.b32.xlu0 %v2713_v55, %s16308_s7 }
 0x29c   : > { %2843 = vrot.lane.b32.xlu1 %v2823_v40, %s16312_s2  ;;  %v2615_v40 = vmul.f32 %v2598_v24, %v12363_v59 }
 0x29f   : > { %2736 = vrot.lane.b32.xlu0 %v2715_v58, %s16308_s7 }
 0x2a0   : > { %2940 = vrot.lane.b32.xlu1 %v2922_v3, %s11387_s12  ;;  %v2716_v3 = vmul.f32 %v2699_v38, %v12363_v59 }
 0x2a3   : > { %2839 = vrot.lane.b32.xlu0 %v2821_v47, %s16312_s2 }
 0x2a4   : > { %3101 = vrot.lane.b32.xlu1 %v3083_v46, %s11386_s0  ;;  %v2822_v46 = vmul.f32 %v2805_v30, %v12333_v17 }
 0x2a7   : > { %2944 = vrot.lane.b32.xlu0 %v2924_v25, %s11387_s12  ;;  %v2824_v25 = vmul.f32 %v2807_v36, %v12363_v59 }
 0x2a8   : > { %2439 = vrot.lane.b32.xlu1 %v2419_v8, %s11391_s11  ;;  %v2299_v8 = vmax.f32 %v2220_v52, 0.0 }
 0x2aa   : > { %v2313_v50 = vmul.f32 %v12285_v29, %v2299_v8 }
 0x2ab   : > { %3105 = vrot.lane.b32.xlu0 %v3085_v20, %s11386_s0  ;;  %v3067_v20 = vsel %vm1231_vm5, %v12430_v18, %v3054_v14 }
 0x2ac   : > { %v2290_v53 = vpop.f32.mrb[2].mxu1  ;;  %2633 = vrot.lane.b32.xlu1 %v2613_v32, %s11390_s10  ;;  %v12515_v32 = vpop.permute.xlu1 %2397  ;;  %v3084_v42 = vmul.f32 %v3067_v20, %v12333_v17  ;;  %v12526_v18 = vadd.f32 %v12290_v26, %v2313_v50 }
 0x2ad   : > { %v2291_v63 = vadd.f32 %v2290_v53, %v12279_v45  ;;  %v2292_v57 = vpop.f32.mrb[3].mxu1  ;;  %v2314_v53 = vmul.f32 %v12285_v29, %v2300_v22  ;;  %v2406_v52 = vsel %vm1178_vm0, %v2396_v11, %v12515_v32 }
 0x2ae   : > { %v2293_v35 = vadd.f32 %v2292_v57, %v12279_v45  ;;  %v3069_v45 = vsel %vm1231_vm5, %v3056_v33, %v3058_v0  ;;  %v2590_v33 = vpop.permute.xlu0 %2589  ;;  %v2909_v57 = vsel %vm1428_vm4, %v12416_v56, %v12428_v62 }
 0x2af   : > { %v2301_v13 = vmax.f32 %v2291_v63, 0.0  ;;  %2443 = vrot.lane.b32.xlu0 %v2421_v44, %s11391_s11  ;;  %v3086_v51 = vmul.f32 %v3069_v45, %v12363_v59  ;;  %v12531_v63 = vadd.f32 %v12290_v26, %v2314_v53  ;;  %v2926_v44 = vmul.f32 %v2909_v57, %v12526_v18 }
 0x2b0   : > { %v2302_v55 = vmax.f32 %v2293_v35, 0.0  ;;  %2734 = vrot.lane.b32.xlu1 %v2714_v61, %s16308_s7  ;;  %v12528_v14 = vpop.permute.xlu1 %2591 }
 0x2b1   : > { %v2315_v54 = vmul.f32 %v12285_v29, %v2301_v13  ;;  %v2599_v13 = vsel %vm1375_vm1, %v12345_v28, %v2590_v33  ;;  %v2600_v36 = vsel %vm1375_vm1, %v2590_v33, %v12528_v14 }
 0x2b2   : > { %v2316_v58 = vmul.f32 %v12285_v29, %v2302_v55  ;;  %v2808_v29 = vsel %vm1531_vm3, %v12373_v37, %v12379_v19  ;;  %v2691_v24 = vpop.permute.xlu0 %2690  ;;  %v2405_v37 = vsel %vm1178_vm0, %v12292_v34, %v2396_v11  ;;  %v2617_v48 = vmul.f32 %v2600_v36, %v12531_v63 }
 0x2b3   : > { %v12486_v47 = vadd.f32 %v12290_v26, %v2315_v54  ;;  %2637 = vrot.lane.b32.xlu0 %v2615_v40, %s11390_s10  ;;  %v2825_v56 = vmul.f32 %v2808_v29, %v12526_v18  ;;  %v2422_v54 = vmul.f32 %v2405_v37, %v12526_v18  ;;  %v2616_v40 = vmul.f32 %v2599_v13, %v12526_v18 }
 0x2b4   : > { %v12490_v39 = vadd.f32 %v12290_v26, %v2316_v58  ;;  %2738 = vrot.lane.b32.xlu1 %v2716_v3, %s16308_s7  ;;  %v3070_v26 = vsel %vm1231_vm5, %v3058_v0, %v12495_v41  ;;  %v12546_v35 = vpop.permute.xlu1 %2692  ;;  %v2700_v34 = vsel %vm1478_vm2, %v12350_v2, %v2691_v24  ;;  %v2423_v2 = vmul.f32 %v2406_v52, %v12531_v63 }
 0x2b5   : > { %2778 = vst [vmem:[#allocation3 + $0x130] sm:$0xff] %v12486_v47  ;;  %v3087_v61 = vmul.f32 %v3070_v26, %v12526_v18  ;;  %v2717_v28 = vmul.f32 %v2700_v34, %v12526_v18  ;;  %v2701_v9 = vsel %vm1478_vm2, %v2691_v24, %v12546_v35 }
 0x2b6   : > { %2779 = vst [vmem:[#allocation3 + $0x138] sm:$0xff] %v12490_v39  ;;  %v2800_v55 = vpop.permute.xlu0 %2799  ;;  %v2718_v0 = vmul.f32 %v2701_v9, %v12531_v63 }
 0x2b7   : > { %2841 = vrot.lane.b32.xlu0 %v2822_v46, %s16312_s2 }
 0x2b8   : > { %2845 = vrot.lane.b32.xlu1 %v2824_v25, %s16312_s2  ;;  %v12553_v38 = vpop.permute.xlu1 %2801 }
 0x2b9   : > { %v2810_v30 = vsel %vm1531_vm3, %v2800_v55, %v12553_v38 }
 0x2ba   : > { %v2827_v3 = vmul.f32 %v2810_v30, %v12486_v47  ;;  %v2901_v46 = vpop.permute.xlu0 %2900  ;;  %v3217_v30 = vld [vmem:[%s11445_s29] sm:$0xff] }
 0x2bb   : > { %2946 = vrot.lane.b32.xlu0 %v2925_v43, %s11387_s12  ;;  %v2910_v11 = vsel %vm1428_vm4, %v12428_v62, %v2901_v46 }
 0x2bc   : > { %2942 = vrot.lane.b32.xlu1 %v2923_v4, %s11387_s12  ;;  %v12569_v58 = vpop.permute.xlu1 %2902  ;;  %v2809_v4 = vsel %vm1531_vm3, %v12379_v19, %v2800_v55  ;;  %v2927_v19 = vmul.f32 %v2910_v11, %v12531_v63 }
 0x2bd   : > { %v2911_v25 = vsel %vm1428_vm4, %v2901_v46, %v12569_v58  ;;  %v2826_v20 = vmul.f32 %v2809_v4, %v12531_v63 }
 0x2be   : > { %v3062_v8 = vpop.permute.xlu0 %3061  ;;  %v2928_v43 = vmul.f32 %v2911_v25, %v12486_v47 }
 0x2bf   : > { %3107 = vrot.lane.b32.xlu0 %v3086_v51, %s11386_s0  ;;  %v3071_v51 = vsel %vm1231_vm5, %v12495_v41, %v3062_v8 }
 0x2c0   : > { %3103 = vrot.lane.b32.xlu1 %v3084_v42, %s11386_s0  ;;  %v12585_v10 = vpop.permute.xlu1 %3063  ;;  %v3088_v62 = vmul.f32 %v3071_v51, %v12531_v63 }
 0x2c1   : > { %v3072_v53 = vsel %vm1231_vm5, %v3062_v8, %v12585_v10 }
 0x2c2   : > { %v12595_v45 = vpop.permute.xlu0 %2435  ;;  %v3089_v57 = vmul.f32 %v3072_v53, %v12486_v47 }
 0x2c3   : > { %3008 = vrot.lane.b32.xlu0 %v12526_v18, %s11393_s23 }
 0x2c4   : > { %2507 = vrot.lane.b32.xlu1 %v12531_v63, %s11392_s18  ;;  %v12597_v22 = vpop.permute.xlu1 %2495 }
 0x2c6   : > { %v12608_v50 = vpop.permute.xlu0 %2629 }
 0x2c7   : > { %2505 = vrot.lane.b32.xlu0 %v12526_v18, %s11392_s18 }
 0x2c8   : > { %2948 = vrot.lane.b32.xlu1 %v2926_v44, %s11387_s12  ;;  %v12610_v42 = vpop.permute.xlu1 %2730 }
 0x2ca   : > { %v12621_v41 = vpop.permute.xlu0 %2399 }
 0x2cb   : > { %2847 = vrot.lane.b32.xlu0 %v2825_v56, %s16312_s2  ;;  %v2407_v29 = vsel %vm1178_vm0, %v12515_v32, %v12621_v41 }
 0x2cc   : > { %3109 = vrot.lane.b32.xlu1 %v3087_v61, %s11386_s0  ;;  %v12623_v33 = vpop.permute.xlu1 %2593  ;;  %v2424_v44 = vmul.f32 %v2407_v29, %v12486_v47 }
 0x2cd   : > { %v2601_v32 = vsel %vm1375_vm1, %v12528_v14, %v12623_v33 }
 0x2ce   : > { %v12637_v24 = vpop.permute.xlu0 %2694 }
 0x2cf   : > { %2445 = vrot.lane.b32.xlu0 %v2422_v54, %s11391_s11  ;;  %v2702_v61 = vsel %vm1478_vm2, %v12546_v35, %v12637_v24 }
 0x2d0   : > { %2639 = vrot.lane.b32.xlu1 %v2616_v40, %s11390_s10  ;;  %v2719_v13 = vmul.f32 %v2702_v61, %v12486_v47 }
 0x2d3   : > { %2851 = vrot.lane.b32.xlu0 %v2827_v3, %s16312_s2  ;;  %v3591_v3 = vld [vmem:[%s16361_s3] sm:$0xff] }
 0x2d4   : > { %2740 = vrot.lane.b32.xlu1 %v2717_v28, %s16308_s7 }
 0x2d7   : > { %2641 = vrot.lane.b32.xlu0 %v2617_v48, %s11390_s10 }
 0x2d8   : > { %2447 = vrot.lane.b32.xlu1 %v2423_v2, %s11391_s11 }
 0x2db   : > { %2742 = vrot.lane.b32.xlu0 %v2718_v0, %s16308_s7 }
 0x2dc   : > { %2952 = vrot.lane.b32.xlu1 %v2928_v43, %s11387_s12 }
 0x2df   : > { %3010 = vrot.lane.b32.xlu0 %v12531_v63, %s11393_s23 }
 0x2e0   : > { %2849 = vrot.lane.b32.xlu1 %v2826_v20, %s16312_s2  ;;  %v2498_v56 = vpop.permute.xlu0 %2497 }
 0x2e1   : > { %v2513_v51 = vsel %vm1292_vm6, %v12597_v22, %v2498_v56 }
 0x2e3   : > { %2950 = vrot.lane.b32.xlu0 %v2927_v19, %s11387_s12 }
 0x2e4   : > { %3012 = vrot.lane.b32.xlu1 %v12486_v47, %s11393_s23 }
 0x2e7   : > { %2904 = vrot.lane.b32.xlu0 %v12313_v12, %s11390_s10  ;;  %v2804_v12 = vpop.permute.xlu1 %2803 }
 0x2e8   : > { %3111 = vrot.lane.b32.xlu1 %v3088_v62, %s11386_s0  ;;  %v2829_v26 = vmul.f32 %v12228_v60, %v2804_v12  ;;  %v2811_v28 = vsel %vm1531_vm3, %v12553_v38, %v2804_v12 }
 0x2e9   : > { %v2828_v52 = vmul.f32 %v2811_v28, %v12490_v39 }
 0x2eb   : > { %3113 = vrot.lane.b32.xlu0 %v3089_v57, %s11386_s0  ;;  %v2500_v37 = vpop.permute.xlu1 %2499 }
 0x2ec   : > { %3065 = vrot.lane.b32.xlu1 %v12307_v49, %s11391_s11  ;;  %v2618_v49 = vmul.f32 %v2601_v32, %v12486_v47  ;;  %v2514_v11 = vsel %vm1292_vm6, %v2498_v56, %v2500_v37 }
 0x2ef   : > { %2449 = vrot.lane.b32.xlu0 %v2424_v44, %s11391_s11 }
 0x2f0   : > { %2511 = vrot.lane.b32.xlu1 %v12490_v39, %s11392_s18 }
 0x2f3   : > { %2509 = vrot.lane.b32.xlu0 %v12486_v47, %s11392_s18 }
 0x2f4   : > { %2855 = vrot.lane.b32.xlu1 %v2829_v26, %s16312_s2 }
 0x2f7   : > { %2643 = vrot.lane.b32.xlu0 %v2618_v49, %s11390_s10 }
 0x2f9   : > { %v2502_v55 = vpop.permute.xlu0 %2501 }
 0x2fa   : > { %v12651_v14 = vpop.permute.xlu1 %2503  ;;  %v2515_v49 = vsel %vm1292_vm6, %v2500_v37, %v2502_v55 }
 0x2fb   : > { %2744 = vrot.lane.b32.xlu0 %v2719_v13, %s16308_s7 }
 0x2fd   : > { %v12654_v54 = vpop.permute.xlu0 %3004 }
 0x2fe   : > { %v12656_v40 = vpop.permute.xlu1 %3002 }
 0x2ff   : > { %3014 = vrot.lane.b32.xlu0 %v12490_v39, %s11393_s23 }
 0x301   : > { %v12661_v34 = vpop.permute.xlu0 %3000 }
 0x302   : > { %v12663_v35 = vpop.permute.xlu1 %3006 }
 0x303   : > { %3221 = vperm.xlu0 %11062, %v3217_v30  }
 0x305   : > { %v2438_v47 = vpop.permute.xlu0 %2437 }
 0x306   : > { %v2442_v36 = vpop.permute.xlu1 %2441  ;;  %v2453_v38 = vsel %vm1231_vm5, %v12595_v45, %v2438_v47  ;;  %v2516_v45 = vsel %vm1292_vm6, %v2502_v55, %v12651_v14 }
 0x307   : > { %3595 = vperm.xlu0 %11062, %v3591_v3   ;;  %v10284_v57 = vpack.c.bf16 %v2513_v51, %v2453_v38 }
 0x309   : > { %v2632_v46 = vpop.permute.xlu0 %2631 }
 0x30a   : > { %v2636_v48 = vpop.permute.xlu1 %2635  ;;  %v2647_v30 = vsel %vm1428_vm4, %v12608_v50, %v2632_v46 }
 0x30b   : > { %2853 = vrot.lane.b32.xlu0 %v2828_v52, %s16312_s2 }
 0x30d   : > { %v2733_v2 = vpop.permute.xlu0 %2732 }
 0x30e   : > { %v12670_v9 = vpop.permute.xlu1 %2843  ;;  %v2748_v26 = vsel %vm1531_vm3, %v12610_v42, %v2733_v2 }
 0x30f   : > { %v10288_v42 = vpack.c.bf16 %v2748_v26, %v2647_v30 }
 0x311   : > { %v2737_v25 = vpop.permute.xlu0 %2736 }
 0x312   : > { %v2941_v0 = vpop.permute.xlu1 %2940 }
 0x315   : > { %v2840_v8 = vpop.permute.xlu0 %2839 }
 0x316   : > { %v12672_v43 = vpop.permute.xlu1 %3101 }
 0x319   : > { %v12674_v4 = vpop.permute.xlu0 %2944 }
 0x31a   : > { %v2440_v20 = vpop.permute.xlu1 %2439 }
 0x31b   : > { %v2454_v19 = vsel %vm1231_vm5, %v2438_v47, %v2440_v20  ;;  %v2455_v44 = vsel %vm1231_vm5, %v2440_v20, %v2442_v36 }
 0x31c   : > { %v10282_v62 = vpack.c.bf16 %v2514_v11, %v2454_v19  ;;  %v10300_v47 = vpack.c.bf16 %v2515_v49, %v2455_v44  ;;  %v12727_v49 = vld [vmem:[%s11440_s25] sm:$0xff] }
 0x31d   : > { %v12682_v53 = vpop.permute.xlu0 %3105 }
 0x31e   : > { %v2634_v29 = vpop.permute.xlu1 %2633  ;;  %10283 = vmatprep.subr.bf16.mxu0 %v10282_v62 }
 0x31f   : > { %10285 = vmatpush1.bf16.msra.mxu0 %v10284_v57  ;;  %v2648_v56 = vsel %vm1428_vm4, %v2632_v46, %v2634_v29  ;;  %v2649_v50 = vsel %vm1428_vm4, %v2634_v29, %v2636_v48 }
 0x321   : > { %v12685_v12 = vpop.permute.xlu0 %2443 }
 0x322   : > { %v2456_v22 = vsel %vm1231_vm5, %v2442_v36, %v12685_v12  ;;  %v2735_v32 = vpop.permute.xlu1 %2734 }
 0x323   : > { %v2749_v61 = vsel %vm1531_vm3, %v2733_v2, %v2735_v32  ;;  %v10298_v13 = vpack.c.bf16 %v2516_v45, %v2456_v22  ;;  %v2750_v52 = vsel %vm1531_vm3, %v2735_v32, %v2737_v25 }
 0x324   : > { %v10286_v3 = vpack.c.bf16 %v2749_v61, %v2648_v56  ;;  %v10304_v38 = vpack.c.bf16 %v2750_v52, %v2649_v50  ;;  %v12737_v56 = vld [vmem:[%s11440_s25 + $0x8] sm:$0xff] }
 0x325   : > { %v12698_v28 = vpop.permute.xlu0 %2637  ;;  %10299 = vmatprep.subr.bf16.mxu1 %v10298_v13 }
 0x326   : > { %v2650_v36 = vsel %vm1428_vm4, %v2636_v48, %v12698_v28  ;;  %v12703_v37 = vpop.permute.xlu1 %2738  ;;  %10287 = vmatprep.subr.bf16.mxu0 %v10286_v3  ;;  %10301 = vmatpush1.bf16.msra.mxu1 %v10300_v47  ;;  %v3019_v48 = vsel %vm1802_vm7, %v12656_v40, %v12654_v54 }
 0x327   : > { %v2751_v55 = vsel %vm1531_vm3, %v2737_v25, %v12703_v37  ;;  %10289 = vmatpush1.bf16.msra.mxu0 %v10288_v42 }
 0x328   : > { %v10302_v46 = vpack.c.bf16 %v2751_v55, %v2650_v36 }
 0x329   : > { %v2842_v2 = vpop.permute.xlu0 %2841 }
 0x32a   : > { %v2857_v20 = vsel %vm1478_vm2, %v2840_v8, %v2842_v2  ;;  %v2858_v11 = vsel %vm1478_vm2, %v2842_v2, %v12670_v9  ;;  %v2846_v19 = vpop.permute.xlu1 %2845  ;;  %10303 = vmatprep.subr.bf16.mxu1 %v10302_v46  ;;  %v3018_v8 = vsel %vm1802_vm7, %v12661_v34, %v12656_v40  ;;  %v3020_v2 = vsel %vm1802_vm7, %v12654_v54, %v12663_v35 }
 0x32b   : > { %10305 = vmatpush1.bf16.msra.mxu1 %v10304_v38  ;;  %v10290_v51 = vpack.c.bf16 %v2858_v11, %v12333_v17  ;;  %v10292_v62 = vpack.c.bf16 %v2857_v20, %v12330_v31  ;;  %v2859_v13 = vsel %vm1478_vm2, %v12670_v9, %v2846_v19 }
 0x32c   : > { %v10308_v36 = vpack.c.bf16 %v2859_v13, %v12358_v1 }
 0x32d   : > { %v2947_v57 = vpop.permute.xlu0 %2946  ;;  %10291 = vmatprep.subr.bf16.mxu0 %v10290_v51 }
 0x32e   : > { %v2943_v25 = vpop.permute.xlu1 %2942  ;;  %10293 = vmatpush1.bf16.msra.mxu0 %v10292_v62  ;;  %v2960_v9 = vsel %vm1375_vm1, %v12674_v4, %v2947_v57 }
 0x32f   : > { %v2958_v29 = vsel %vm1375_vm1, %v2941_v0, %v2943_v25  ;;  %v2959_v17 = vsel %vm1375_vm1, %v2943_v25, %v12674_v4 }
 0x330   : > { %v10294_v44 = vpack.c.bf16 %v3019_v48, %v2959_v17  ;;  %v10296_v31 = vpack.c.bf16 %v3018_v8, %v2958_v29 }
 0x331   : > { %v3108_v45 = vpop.permute.xlu0 %3107 }
 0x332   : > { %v3104_v26 = vpop.permute.xlu1 %3103  ;;  %10295 = vmatprep.subr.bf16.mxu0 %v10294_v44  ;;  %v3121_v4 = vsel %vm1178_vm0, %v12682_v53, %v3108_v45 }
 0x333   : > { %v3120_v22 = vsel %vm1178_vm0, %v3104_v26, %v12682_v53  ;;  %10297 = vmatpush1.bf16.msra.mxu0 %v10296_v31  ;;  %v3119_v40 = vsel %vm1178_vm0, %v12672_v43, %v3104_v26 }
 0x334   : > { %3251 = vmatprep.subr.mxu0 %v3120_v22 }
 0x335   : > { %v12724_v32 = vpop.permute.xlu0 %3008 }
 0x336   : > { %v12731_v34 = vpop.permute.xlu1 %2507  ;;  %v3021_v52 = vsel %vm1802_vm7, %v12663_v35, %v12724_v32 }
 0x337   : > { %3252 = vmatpush1.msra.mxu0 %v3119_v40 }
 0x338   : > { %10000 = vmatmul.mubr.msk.f32.vlgmr.msra.gmra.mrb[4].mxu0 %vm2007_vm8, %v12727_v49 }
 0x339   : > { %v2506_v0 = vpop.permute.xlu0 %2505  ;;  %3305 = vmatprep.mubr.f32.mxu0 %v12228_v60 }
 0x33a   : > { %v2949_v61 = vpop.permute.xlu1 %2948  ;;  %v2518_v54 = vsel %vm1292_vm6, %v2506_v0, %v12731_v34  ;;  %v2517_v53 = vsel %vm1292_vm6, %v12651_v14, %v2506_v0 }
 0x33b   : > { %v2961_v43 = vsel %vm1375_vm1, %v2947_v57, %v2949_v61 }
 0x33c   : > { %10001 = vmatmul.mubr.msk.f32.gmra.mrb[6].mxu0 %vm2007_vm8, %v12737_v56  ;;  %v10310_v50 = vpack.c.bf16 %v3021_v52, %v2961_v43 }
 0x33d   : > { %v2848_v30 = vpop.permute.xlu0 %2847  ;;  %3453 = vmatprep.mubr.f32.mxu0 %v12228_v60 }
 0x33e   : > { %v2860_v3 = vsel %vm1478_vm2, %v2846_v19, %v2848_v30  ;;  %v12746_v47 = vpop.permute.xlu1 %3109 }
 0x33f   : > { %v10306_v42 = vpack.c.bf16 %v2860_v3, %v12363_v59  ;;  %v10312_v59 = vpack.c.bf16 %v3020_v2, %v2960_v9  ;;  %v3122_v20 = vsel %vm1178_vm0, %v3108_v45, %v12746_v47 }
 0x341   : > { %v2446_v55 = vpop.permute.xlu0 %2445  ;;  %10307 = vmatprep.subr.bf16.mxu1 %v10306_v42 }
 0x342   : > { %v2640_v46 = vpop.permute.xlu1 %2639  ;;  %10309 = vmatpush1.bf16.msra.mxu1 %v10308_v36  ;;  %v2457_v19 = vsel %vm1231_vm5, %v12685_v12, %v2446_v55 }
 0x343   : > { %10311 = vmatprep.subr.bf16.mxu1 %v10310_v50  ;;  %v10316_v12 = vpack.c.bf16 %v2517_v53, %v2457_v19  ;;  %v2651_v17 = vsel %vm1428_vm4, %v12698_v28, %v2640_v46 }
 0x345   : > { %v12758_v38 = vpop.permute.xlu0 %2851 }
 0x346   : > { %v2741_v1 = vpop.permute.xlu1 %2740  ;;  %10313 = vmatpush1.bf16.msra.mxu1 %v10312_v59  ;;  %v2425_v59 = vmul.f32 %v12621_v41, %v12490_v39  ;;  %v2619_v41 = vmul.f32 %v12623_v33, %v12490_v39 }
 0x347   : > { %3328 = vmatprep.subr.mxu1 %v3122_v20  ;;  %v2752_v25 = vsel %vm1531_vm3, %v12703_v37, %v2741_v1  ;;  %v12829_v20 = vld [vmem:[#allocation2 + $0xc0] sm:$0xff] }
 0x348   : > { %v10320_v44 = vpack.c.bf16 %v2752_v25, %v2651_v17 }
 0x349   : > { %v12764_v11 = vpop.permute.xlu0 %2641 }
 0x34a   : > { %v12768_v51 = vpop.permute.xlu1 %2447  ;;  %3329 = vmatpush1.msra.mxu1 %v3121_v4  ;;  %v2652_v48 = vsel %vm1428_vm4, %v2640_v46, %v12764_v11  ;;  %v3619_v46 = vld [vmem:[%s16359_s8] sm:$0xff]  ;;  %v2720_v4 = vmul.f32 %v12637_v24, %v12490_v39 }
 0x34b   : > { %v2458_v35 = vsel %vm1231_vm5, %v2446_v55, %v12768_v51  ;;  %10002 = vmatmul.mubr.msk.f32.vlgmr.msra.gmra.mrb[4].mxu1 %vm2007_vm8, %v12727_v49 }
 0x34c   : > { %3382 = vmatprep.mubr.f32.mxu1 %v12228_v60  ;;  %v10314_v62 = vpack.c.bf16 %v2518_v54, %v2458_v35  ;;  %v12856_v54 = vld [vmem:[%s16360_s4 + $0x1] ss:$2 sm:$0xff] }
 0x34d   : > { %v12779_v57 = vpop.permute.xlu0 %2742  ;;  %v3218_v35 = vld [vmem:[%s11445_s29 + $0x8] sm:$0xff]  ;;  %v4018_v53 = vrot.slane %v12856_v54, %v11622_v7  ;;  %v4026_v24 = vrot.slane %v12856_v54, %v11653_v16 }
 0x34e   : > { %v2753_v8 = vsel %vm1531_vm3, %v2741_v1, %v12779_v57  ;;  %v12787_v29 = vpop.permute.xlu1 %2952  ;;  %10315 = vmatprep.subr.bf16.mxu0 %v10314_v62  ;;  %v3620_v62 = vld [vmem:[%s16359_s8 + $0x8] sm:$0xff]  ;;  %s16422_s8 = smov 119  }
 0x34f   : > { %10003 = vmatmul.mubr.msk.f32.gmra.mrb[6].mxu1 %vm2007_vm8, %v12737_v56  ;;  %10317 = vmatpush1.bf16.msra.mxu0 %v10316_v12  ;;  %v10318_v14 = vpack.c.bf16 %v2753_v8, %v2652_v48  ;;  %v4014_v48 = vrot.slane %v12856_v54, %v11619_v6  ;;  %v4022_v8 = vrot.slane %v12856_v54, %v11616_v5 }
 0x350   : > { %3530 = vmatprep.mubr.f32.mxu1 %v12228_v60 }
 0x351   : > { %v3011_v37 = vpop.permute.xlu0 %3010  ;;  %10319 = vmatprep.subr.bf16.mxu0 %v10318_v14 }
 0x352   : > { %v2850_v31 = vpop.permute.xlu1 %2849  ;;  %v3022_v3 = vsel %vm1802_vm7, %v12724_v32, %v3011_v37 }
 0x353   : > { %v2861_v45 = vsel %vm1478_vm2, %v2848_v30, %v2850_v31  ;;  %v2862_v26 = vsel %vm1478_vm2, %v2850_v31, %v12758_v38  ;;  %10321 = vmatpush1.bf16.msra.mxu0 %v10320_v44 }
 0x354   : > { %v10322_v22 = vpack.c.bf16 %v2862_v26, %v12531_v63  ;;  %v10324_v40 = vpack.c.bf16 %v2861_v45, %v12526_v18 }
 0x355   : > { %v2951_v0 = vpop.permute.xlu0 %2950 }
 0x356   : > { %v2962_v13 = vsel %vm1375_vm1, %v2949_v61, %v2951_v0  ;;  %v2963_v28 = vsel %vm1375_vm1, %v2951_v0, %v12787_v29  ;;  %v12802_v43 = vpop.permute.xlu1 %3012  ;;  %10323 = vmatprep.subr.bf16.mxu0 %v10322_v22 }
 0x357   : > { %v3023_v30 = vsel %vm1802_vm7, %v3011_v37, %v12802_v43  ;;  %10325 = vmatpush1.bf16.msra.mxu0 %v10324_v40  ;;  %v10328_v18 = vpack.c.bf16 %v3022_v3, %v2962_v13 }
 0x358   : > { %v10326_v63 = vpack.c.bf16 %v3023_v30, %v2963_v28 }
 0x359   : > { %v2905_v42 = vpop.permute.xlu0 %2904 }
 0x35a   : > { %v2912_v61 = vsel %vm1428_vm4, %v12569_v58, %v2905_v42  ;;  %v2930_v52 = vmul.f32 %v12228_v60, %v2905_v42  ;;  %v3112_v36 = vpop.permute.xlu1 %3111  ;;  %10327 = vmatprep.subr.bf16.mxu0 %v10326_v63 }
 0x35b   : > { %v2929_v9 = vmul.f32 %v2912_v61, %v12490_v39  ;;  %10329 = vmatpush1.bf16.msra.mxu0 %v10328_v18  ;;  %v3123_v58 = vsel %vm1178_vm0, %v12746_v47, %v3112_v36  ;;  %v12833_v47 = vld [vmem:[%s16360_s4] ss:$2 sm:$0xff]  ;;  %s16413_s4 = sld [smem:[#allocation18_spill]] }
 0x35c   : > { %2956 = vrot.lane.b32.xlu1 %v2930_v52, %s11387_s12  ;;  %v3699_v1 = vrot.slane %v12833_v47, %v11616_v5  ;;  %v3707_v33 = vrot.slane %v12833_v47, %v11650_v15  ;;  %v3695_v12 = vrot.slane %v12833_v47, %v11622_v7  ;;  %v3703_v25 = vrot.slane %v12833_v47, %v11653_v16 }
 0x35d   : > { %2954 = vrot.lane.b32.xlu0 %v2929_v9, %s11387_s12  ;;  %v12814_v55 = vpop.permute.xlu0 %3113  ;;  %v4030_v16 = vrot.slane %v12856_v54, %v11650_v15 }
 0x35e   : > { %v3124_v32 = vsel %vm1178_vm0, %v3112_v36, %v12814_v55  ;;  %v3066_v50 = vpop.permute.xlu1 %3065 }
 0x35f   : > { %3405 = vmatprep.subr.mxu0 %v3124_v32  ;;  %v3073_v2 = vsel %vm1231_vm5, %v12585_v10, %v3066_v50  ;;  %v3091_v19 = vmul.f32 %v12829_v20, %v3066_v50 }
 0x360   : > { %3016 = vrot.lane.b32.xlu1 %v12228_v60, %s11393_s23  ;;  %3406 = vmatpush1.msra.mxu0 %v3123_v58  ;;  %v3090_v10 = vmul.f32 %v3073_v2, %v12490_v39  ;;  %v3691_v60 = vrot.slane %v12833_v47, %v11619_v6  ;;  %v3592_v39 = vld [vmem:[%s16361_s3 + $0x8] sm:$0xff]  ;;  %s16412_s3 = sld [smem:[#allocation17_spill]] }
 0x361   : > { %3623 = vperm.xlu0 %11062, %v3619_v46   ;;  %10004 = vmatmul.mubr.msk.f32.vlgmr.msra.gmra.mrb[8].mxu0 %vm2007_vm8, %v12727_v49  ;;  %v2450_v5 = vpop.permute.xlu0 %2449 }
 0x362   : > { %3459 = vmatprep.mubr.f32.mxu0 %v12829_v20  ;;  %v2512_v37 = vpop.permute.xlu1 %2511  ;;  %v2459_v3 = vsel %vm1231_vm5, %v12768_v51, %v2450_v5 }
 0x364   : > { %2451 = vrot.lane.b32.xlu1 %v2425_v59, %s11391_s11  ;;  %v3182_v59 = vld [vmem:[#allocation3 + $0x138] sm:$0xff] }
 0x365   : > { %3115 = vrot.lane.b32.xlu0 %v3090_v10, %s11386_s0  ;;  %10005 = vmatmul.mubr.msk.f32.gmra.mrb[10].mxu0 %vm2007_vm8, %v12737_v56  ;;  %v2510_v15 = vpop.permute.xlu0 %2509 }
 0x366   : > { %v2856_v31 = vpop.permute.xlu1 %2855  ;;  %v2519_v0 = vsel %vm1292_vm6, %v12731_v34, %v2510_v15  ;;  %v2520_v28 = vsel %vm1292_vm6, %v2510_v15, %v2512_v37 }
 0x367   : > { %v10332_v18 = vpack.c.bf16 %v2519_v0, %v2459_v3 }
 0x368   : > { %2645 = vrot.lane.b32.xlu1 %v2619_v41, %s11390_s10 }
 0x369   : > { %3720 = vrot.lane.b32.xlu0 %v3691_v60, %s11386_s0  ;;  %v2644_v14 = vpop.permute.xlu0 %2643 }
 0x36a   : > { %v2653_v51 = vsel %vm1428_vm4, %v12764_v11, %v2644_v14 }
 0x36c   : > { %2746 = vrot.lane.b32.xlu1 %v2720_v4, %s16308_s7 }
 0x36d   : > { %3724 = vrot.lane.b32.xlu0 %v3699_v1, %s11386_s0  ;;  %v2745_v17 = vpop.permute.xlu0 %2744 }
 0x36e   : > { %v2754_v36 = vsel %vm1531_vm3, %v12779_v57, %v2745_v17 }
 0x36f   : > { %v10336_v2 = vpack.c.bf16 %v2754_v36, %v2653_v51 }
 0x370   : > { %3117 = vrot.lane.b32.xlu1 %v3091_v19, %s11386_s0 }
 0x371   : > { %3728 = vrot.lane.b32.xlu0 %v3707_v33, %s11386_s0  ;;  %v3015_v44 = vpop.permute.xlu0 %3014 }
 0x374   : > { %3226 = vperm.xlu1 %11063, %v3218_v35  }
 0x375   : > { %4045 = vrot.lane.b32.xlu0 %v4018_v53, %s11387_s12 }
 0x378   : > { %3600 = vperm.xlu1 %11063, %v3592_v39  }
 0x379   : > { %4049 = vrot.lane.b32.xlu0 %v4026_v24, %s11387_s12 }
 0x37c   : > { %3628 = vperm.xlu1 %11063, %v3620_v62   ;;  %v12939_v62 = vrot.slane %v12833_v47, %v11681_v23 }
 0x37d   : > { %4213 = vrot.lane.b32.xlu0 %v3691_v60, %s16312_s2 }
 0x380   : > { %3722 = vrot.lane.b32.xlu1 %v3695_v12, %s11386_s0 }
 0x381   : > { %4217 = vrot.lane.b32.xlu0 %v3699_v1, %s16312_s2 }
 0x382   : > { %v12904_v45 = vpop.permute.xlu0 %3221 }
 0x384   : > { %3726 = vrot.lane.b32.xlu1 %v3703_v25, %s11386_s0 }
 0x385   : > { %4221 = vrot.lane.b32.xlu0 %v3707_v33, %s16312_s2 }
 0x386   : > { %v12906_v22 = vpop.permute.xlu0 %3595 }
 0x388   : > { %4043 = vrot.lane.b32.xlu1 %v4014_v48, %s11387_s12 }
 0x389   : > { %4401 = vrot.lane.b32.xlu0 %v4018_v53, %s16308_s7 }
 0x38a   : > { %v2854_v63 = vpop.permute.xlu0 %2853 }
 0x38b   : > { %v2864_v34 = vsel %vm1478_vm2, %v2854_v63, %v2856_v31  ;;  %v2863_v10 = vsel %vm1478_vm2, %v12758_v38, %v2854_v63  ;;  %v3024_v38 = vsel %vm1802_vm7, %v12802_v43, %v3015_v44  ;;  %v4038_v31 = vrot.slane %v12856_v54, %v11681_v23 }
 0x38c   : > { %4047 = vrot.lane.b32.xlu1 %v4022_v8, %s11387_s12  ;;  %v10338_v57 = vpack.c.bf16 %v2864_v34, %v3182_v59 }
 0x38d   : > { %4405 = vrot.lane.b32.xlu0 %v4026_v24, %s16308_s7 }
 0x390   : > { %4051 = vrot.lane.b32.xlu1 %v4030_v16, %s11387_s12 }
 0x391   : > { %4569 = vrot.lane.b32.xlu0 %v3691_v60, %s11390_s10 }
 0x394   : > { %4215 = vrot.lane.b32.xlu1 %v3695_v12, %s16312_s2 }
 0x395   : > { %4573 = vrot.lane.b32.xlu0 %v3699_v1, %s11390_s10  ;;  %v3181_v1 = vld [vmem:[#allocation3 + $0x130] sm:$0xff] }
 0x396   : > { %v10340_v19 = vpack.c.bf16 %v2863_v10, %v3181_v1 }
 0x398   : > { %4219 = vrot.lane.b32.xlu1 %v3703_v25, %s16312_s2 }
 0x399   : > { %4577 = vrot.lane.b32.xlu0 %v3707_v33, %s11390_s10 }
 0x39c   : > { %4399 = vrot.lane.b32.xlu1 %v4014_v48, %s16308_s7 }
 0x39d   : > { %4861 = vrot.lane.b32.xlu0 %v4018_v53, %s11391_s11 }
 0x3a0   : > { %4403 = vrot.lane.b32.xlu1 %v4022_v8, %s16308_s7 }
 0x3a1   : > { %4865 = vrot.lane.b32.xlu0 %v4026_v24, %s11391_s11 }
 0x3a4   : > { %4407 = vrot.lane.b32.xlu1 %v4030_v16, %s16308_s7 }
 0x3a8   : > { %4571 = vrot.lane.b32.xlu1 %v3695_v12, %s11390_s10 }
 0x3ac   : > { %4575 = vrot.lane.b32.xlu1 %v3703_v25, %s11390_s10  ;;  %v11064_v25 = vpack.i.bf16 %v12829_v20, %v12829_v20 }
 0x3b0   : > { %4859 = vrot.lane.b32.xlu1 %v4014_v48, %s11391_s11 }
 0x3b4   : > { %4863 = vrot.lane.b32.xlu1 %v4022_v8, %s11391_s11 }
 0x3b8   : > { %4867 = vrot.lane.b32.xlu1 %v4030_v16, %s11391_s11 }
 0x3ce   : > { %v2957_v26 = vpop.permute.xlu1 %2956 }
 0x3cf   : > { %v2955_v52 = vpop.permute.xlu0 %2954 }
 0x3d0   : > { %v2965_v4 = vsel %vm1375_vm1, %v2955_v52, %v2957_v26  ;;  %v2964_v33 = vsel %vm1375_vm1, %v12787_v29, %v2955_v52  ;;  %v12943_v29 = vrot.slane %v12833_v47, %v11674_v21 }
 0x3d1   : > { %v10344_v39 = vpack.c.bf16 %v3024_v38, %v2964_v33 }
 0x3d2   : > { %v3017_v40 = vpop.permute.xlu1 %3016 }
 0x3d3   : > { %v3025_v60 = vsel %vm1802_vm7, %v3015_v44, %v3017_v40  ;;  %v4034_v44 = vrot.slane %v12856_v54, %v11674_v21 }
 0x3d4   : > { %v10342_v11 = vpack.c.bf16 %v3025_v60, %v2965_v4 }
 0x3d6   : > { %v2452_v13 = vpop.permute.xlu1 %2451 }
 0x3d7   : > { %v2460_v30 = vsel %vm1231_vm5, %v2450_v5, %v2452_v13 }
 0x3d8   : > { %v10330_v42 = vpack.c.bf16 %v2520_v28, %v2460_v30 }
 0x3da   : > { %v2646_v61 = vpop.permute.xlu1 %2645  ;;  %10331 = vmatprep.subr.bf16.mxu1 %v10330_v42 }
 0x3db   : > { %10333 = vmatpush1.bf16.msra.mxu1 %v10332_v18  ;;  %v2654_v32 = vsel %vm1428_vm4, %v2644_v14, %v2646_v61 }
 0x3de   : > { %v2747_v9 = vpop.permute.xlu1 %2746 }
 0x3df   : > { %v2755_v50 = vsel %vm1531_vm3, %v2745_v17, %v2747_v9 }
 0x3e0   : > { %v12921_v46 = vpop.permute.xlu0 %3623  ;;  %v10334_v58 = vpack.c.bf16 %v2755_v50, %v2654_v32 }
 0x3e2   : > { %10335 = vmatprep.subr.bf16.mxu1 %v10334_v58  ;;  %v3118_v24 = vpop.permute.xlu1 %3117 }
 0x3e3   : > { %10337 = vmatpush1.bf16.msra.mxu1 %v10336_v2 }
 0x3e4   : > { %v3116_v41 = vpop.permute.xlu0 %3115  ;;  %10339 = vmatprep.subr.bf16.mxu1 %v10338_v57 }
 0x3e5   : > { %v3126_v12 = vsel %vm1178_vm0, %v3116_v41, %v3118_v24  ;;  %v3125_v43 = vsel %vm1178_vm0, %v12814_v55, %v3116_v41 }
 0x3e7   : > { %10341 = vmatpush1.bf16.msra.mxu1 %v10340_v19 }
 0x3e8   : > { %v12929_v35 = vpop.permute.xlu0 %3720  ;;  %10343 = vmatprep.subr.bf16.mxu1 %v10342_v11 }
 0x3e9   : > { %v3752_v53 = vmul.f32 %v12829_v20, %v12929_v35 }
 0x3eb   : > { %3806 = vrot.lane.b32.xlu1 %v3752_v53, %s11391_s11  ;;  %3788 = vrot.lane.b32.xlu0 %v3752_v53, %s11391_s11 }
 0x3ec   : > { %10345 = vmatpush1.bf16.msra.mxu1 %v10344_v39  ;;  %v12962_v55 = vpop.permute.xlu0 %3724  ;;  %v13044_v39 = vrot.slane %v12833_v47, %v11708_v27 }
 0x3ed   : > { %3482 = vmatprep.subr.mxu1 %v3126_v12 }
 0x3ef   : > { %3732 = vrot.lane.b32.xlu1 %v12939_v62, %s11386_s0  ;;  %3730 = vrot.lane.b32.xlu0 %v12943_v29, %s11386_s0 }
 0x3f0   : > { %3483 = vmatpush1.msra.mxu1 %v3125_v43  ;;  %v12968_v5 = vpop.permute.xlu0 %3728 }
 0x3f1   : > { %10006 = vmatmul.mubr.msk.f32.vlgmr.msra.gmra.mrb[8].mxu1 %vm2007_vm8, %v12727_v49 }
 0x3f2   : > { %3536 = vmatprep.mubr.f32.mxu1 %v12829_v20 }
 0x3f3   : > { %v12957_v48 = vpop.permute.xlu1 %3226  ;;  %11065 = vrot.lane.b32.xlu0 %v11064_v25, %s11392_s18 }
 0x3f4   : > { %v12972_v49 = vpop.permute.xlu0 %4045 }
 0x3f5   : > { %10007 = vmatmul.mubr.msk.f32.gmra.mrb[10].mxu1 %vm2007_vm8, %v12737_v56 }
 0x3f7   : > { %v12964_v8 = vpop.permute.xlu1 %3600 }
 0x3f8   : > { %v12978_v37 = vpop.permute.xlu0 %4049 }
 0x3fb   : > { %v12966_v16 = vpop.permute.xlu1 %3628 }
 0x3fc   : > { %v12991_v28 = vpop.permute.xlu0 %4213 }
 0x3fd   : > { %v4245_v21 = vmul.f32 %v12829_v20, %v12991_v28 }
 0x3ff   : > { %v12970_v15 = vpop.permute.xlu1 %3722 }
 0x403   : > { %v12974_v14 = vpop.permute.xlu1 %3726 }
 0x407   : > { %v12976_v17 = vpop.permute.xlu1 %4043 }
 0x408   : > { %v4075_v56 = vmul.f32 %v12829_v20, %v12976_v17 }
 0x40a   : > { %4111 = vrot.lane.b32.xlu1 %v4075_v56, %s11390_s10  ;;  %4129 = vrot.lane.b32.xlu0 %v4075_v56, %s11390_s10 }
 0x40b   : > { %v12988_v26 = vpop.permute.xlu1 %4047  ;;  %v3301_v40 = vpop.f32.mrb[4].mxu0 }
 0x40c   : > { %v3302_v0 = vadd.f32 %v3301_v40, %v12904_v45  ;;  %v3303_v13 = vpop.f32.mrb[5].mxu0 }
 0x40d   : > { %v3304_v30 = vadd.f32 %v3303_v13, %v12904_v45 }
 0x40e   : > { %4053 = vrot.lane.b32.xlu1 %v4034_v44, %s11387_s12  ;;  %4055 = vrot.lane.b32.xlu0 %v4038_v31, %s11387_s12  ;;  %vm3543_vm9 = vcmp.ge.f32.partialorder %v3302_v0, 0.0  ;;  %v3559_v3 = vmul.f32 0.1, %v3302_v0 }
 0x40f   : > { %vm3544_vm10 = vcmp.ge.f32.partialorder %v3304_v30, 0.0  ;;  %v3560_v23 = vmul.f32 0.1, %v3304_v30  ;;  %v3307_v63 = vpop.f32.mrb[6].mxu0  ;;  %v12999_v52 = vpop.permute.xlu1 %4051 }
 0x410   : > { %v3575_v42 = vsel %vm3543_vm9, %v3302_v0, %v3559_v3  ;;  %v3308_v18 = vadd.f32 %v3307_v63, %v12957_v48  ;;  %v3309_v61 = vpop.f32.mrb[7].mxu0  ;;  %v13051_v0 = vpop.permute.xlu0 %4217 }
 0x411   : > { %v3603_v36 = vmul.f32 %v12906_v22, %v3575_v42  ;;  %v3576_v9 = vsel %vm3544_vm10, %v3304_v30, %v3560_v23  ;;  %v3310_v34 = vadd.f32 %v3309_v61, %v12957_v48 }
 0x412   : > { %4299 = vrot.lane.b32.xlu0 %v4245_v21, %s16308_s7  ;;  %4281 = vrot.lane.b32.xlu1 %v4245_v21, %s16308_s7  ;;  %v3604_v20 = vmul.f32 %v12906_v22, %v3576_v9  ;;  %vm3551_vm11 = vcmp.ge.f32.partialorder %v3308_v18, 0.0  ;;  %v3567_v32 = vmul.f32 0.1, %v3308_v18  ;;  %v3736_v21 = vsel %vm1178_vm0, %v12929_v35, %v12970_v15 }
 0x413   : > { %v13007_v50 = vadd.f32 %v12921_v46, %v3603_v36  ;;  %vm3552_vm12 = vcmp.ge.f32.partialorder %v3310_v34, 0.0  ;;  %v3568_v51 = vmul.f32 0.1, %v3310_v34  ;;  %v13020_v60 = vpop.permute.xlu1 %4215  ;;  %v13083_v35 = vsel %vm1375_vm1, %v12972_v49, %v12988_v26 }
 0x414   : > { %v13010_v58 = vadd.f32 %v12921_v46, %v3604_v20  ;;  %v3583_v2 = vsel %vm3551_vm11, %v3308_v18, %v3567_v32 }
 0x415   : > { %4365 = vst [vmem:[#allocation3 + $0x200] sm:$0xff] %v13007_v50  ;;  %v3611_v59 = vmul.f32 %v12964_v8, %v3583_v2  ;;  %v3584_v10 = vsel %vm3552_vm12, %v3310_v34, %v3568_v51  ;;  %v3753_v42 = vmul.f32 %v3736_v21, %v13007_v50  ;;  %v13085_v34 = vpop.permute.xlu0 %4221  ;;  %v13096_v51 = vsel %vm1478_vm2, %v13020_v60, %v13051_v0 }
 0x416   : > { %4366 = vst [vmem:[#allocation3 + $0x208] sm:$0xff] %v13010_v58  ;;  %4225 = vrot.lane.b32.xlu0 %v12939_v62, %s16312_s2  ;;  %4223 = vrot.lane.b32.xlu1 %v12943_v29, %s16312_s2  ;;  %v3612_v57 = vmul.f32 %v12964_v8, %v3584_v10  ;;  %v4077_v32 = vmul.f32 %v13083_v35, %v13010_v58 }
 0x417   : > { %v13023_v41 = vadd.f32 %v12966_v16, %v3611_v59  ;;  %v13032_v4 = vpop.permute.xlu1 %4219  ;;  %v4247_v59 = vmul.f32 %v13096_v51, %v13010_v58 }
 0x418   : > { %v13026_v1 = vadd.f32 %v12966_v16, %v3612_v57  ;;  %v13114_v57 = vsel %vm1375_vm1, %v12976_v17, %v12972_v49 }
 0x419   : > { %4373 = vst [vmem:[#allocation3 + $0x240] sm:$0xff] %v13023_v41  ;;  %v13106_v10 = vpop.permute.xlu0 %4401 }
 0x41a   : > { %4374 = vst [vmem:[#allocation3 + $0x248] sm:$0xff] %v13026_v1  ;;  %4411 = vrot.lane.b32.xlu0 %v4038_v31, %s16308_s7  ;;  %4409 = vrot.lane.b32.xlu1 %v4034_v44, %s16308_s7 }
 0x41e   : > { %4581 = vrot.lane.b32.xlu0 %v12939_v62, %s11390_s10  ;;  %4579 = vrot.lane.b32.xlu1 %v12943_v29, %s11390_s10  ;;  %v3378_v19 = vpop.f32.mrb[4].mxu1  ;;  %v13046_v29 = vpop.permute.xlu1 %4399 }
 0x41f   : > { %v3379_v11 = vadd.f32 %v3378_v19, %v12904_v45  ;;  %v3380_v33 = vpop.f32.mrb[5].mxu1  ;;  %v13119_v19 = vsel %vm1478_vm2, %v12991_v28, %v13020_v60  ;;  %v13132_v60 = vpop.permute.xlu0 %4405 }
 0x420   : > { %v3381_v38 = vadd.f32 %v3380_v33, %v12904_v45  ;;  %v4246_v28 = vmul.f32 %v13119_v19, %v13007_v50 }
 0x421   : > { %vm3545_vm13 = vcmp.ge.f32.partialorder %v3379_v11, 0.0  ;;  %v3561_v53 = vmul.f32 0.1, %v3379_v11 }
 0x422   : > { %4871 = vrot.lane.b32.xlu0 %v4038_v31, %s11391_s11  ;;  %4869 = vrot.lane.b32.xlu1 %v4034_v44, %s11391_s11  ;;  %vm3546_vm14 = vcmp.ge.f32.partialorder %v3381_v38, 0.0  ;;  %v3562_v24 = vmul.f32 0.1, %v3381_v38  ;;  %v3384_v62 = vpop.f32.mrb[6].mxu1  ;;  %v13070_v61 = vpop.permute.xlu1 %4403 }
 0x423   : > { %v3577_v12 = vsel %vm3545_vm13, %v3379_v11, %v3561_v53  ;;  %v3385_v43 = vadd.f32 %v3384_v62, %v12957_v48  ;;  %v3386_v25 = vpop.f32.mrb[7].mxu1  ;;  %v4076_v11 = vmul.f32 %v13114_v57, %v13007_v50  ;;  %vm5171_vm13 = vcmask 130048  }
 0x424   : > { %v3605_v56 = vmul.f32 %v12906_v22, %v3577_v12  ;;  %v3578_v40 = vsel %vm3546_vm14, %v3381_v38, %v3562_v24  ;;  %v3387_v31 = vadd.f32 %v3386_v25, %v12957_v48 }
 0x425   : > { %v3606_v44 = vmul.f32 %v12906_v22, %v3578_v40  ;;  %vm3553_vm15 = vcmp.ge.f32.partialorder %v3385_v43, 0.0  ;;  %v3569_v47 = vmul.f32 0.1, %v3385_v43 }
 0x426   : > { %v13055_v13 = vadd.f32 %v12921_v46, %v3605_v56  ;;  %3910 = vrot.lane.b32.xlu0 %v13007_v50, %s11392_s18  ;;  %3734 = vrot.lane.b32.xlu1 %v13044_v39, %s11386_s0  ;;  %vm3554_vm8 = vcmp.ge.f32.partialorder %v3387_v31, 0.0  ;;  %v3570_v30 = vmul.f32 0.1, %v3387_v31  ;;  %v13102_v2 = vpop.permute.xlu1 %4407 }
 0x427   : > { %v13065_v3 = vadd.f32 %v12921_v46, %v3606_v44  ;;  %v3585_v23 = vsel %vm3553_vm15, %v3385_v43, %v3569_v47 }
 0x428   : > { %4367 = vst [vmem:[#allocation3 + $0x210] sm:$0xff] %v13055_v13  ;;  %v3613_v63 = vmul.f32 %v12964_v8, %v3585_v23  ;;  %v3586_v18 = vsel %vm3554_vm8, %v3387_v31, %v3570_v30  ;;  %v4431_v23 = vmul.f32 %v13046_v29, %v13007_v50 }
 0x429   : > { %4368 = vst [vmem:[#allocation3 + $0x218] sm:$0xff] %v13065_v3  ;;  %v3614_v36 = vmul.f32 %v12964_v8, %v3586_v18  ;;  %v4570_v18 = vpop.permute.xlu0 %4569 }
 0x42a   : > { %v13075_v9 = vadd.f32 %v12966_v16, %v3613_v63  ;;  %3790 = vrot.lane.b32.xlu0 %v3753_v42, %s11391_s11  ;;  %4757 = vrot.lane.b32.xlu1 %v13007_v50, %s11393_s23  ;;  %v13123_v38 = vpop.permute.xlu1 %4571  ;;  %v3762_v63 = vmul.f32 %v3736_v21, %v13023_v41 }
 0x42b   : > { %v13088_v20 = vadd.f32 %v12966_v16, %v3614_v36 }
 0x42c   : > { %4375 = vst [vmem:[#allocation3 + $0x250] sm:$0xff] %v13075_v9 }
 0x42d   : > { %4376 = vst [vmem:[#allocation3 + $0x258] sm:$0xff] %v13088_v20 }
 0x42e   : > { %4115 = vrot.lane.b32.xlu0 %v4077_v32, %s11390_s10  ;;  %3912 = vrot.lane.b32.xlu1 %v13010_v58, %s11392_s18  ;;  %v13138_v31 = vpop.permute.xlu1 %4575 }
 0x432   : > { %4759 = vrot.lane.b32.xlu1 %v13010_v58, %s11393_s23  ;;  %4285 = vrot.lane.b32.xlu0 %v4247_v59, %s16308_s7 }
 0x434   : > { %v3455_v33 = vpop.f32.mrb[8].mxu0 }
 0x435   : > { %v3457_v53 = vpop.f32.mrb[9].mxu0  ;;  %v3456_v49 = vadd.f32 %v3455_v33, %v12904_v45 }
 0x436   : > { %4113 = vrot.lane.b32.xlu1 %v4076_v11, %s11390_s10  ;;  %3928 = vrot.lane.b32.xlu0 %v13023_v41, %s11392_s18  ;;  %v3458_v17 = vadd.f32 %v3457_v53, %v12904_v45  ;;  %v4440_v53 = vmul.f32 %v13046_v29, %v13023_v41 }
 0x437   : > { %vm3547_vm9 = vcmp.ge.f32.partialorder %v3456_v49, 0.0  ;;  %v3563_v24 = vmul.f32 0.1, %v3456_v49 }
 0x438   : > { %vm3548_vm10 = vcmp.ge.f32.partialorder %v3458_v17, 0.0  ;;  %v3564_v62 = vmul.f32 0.1, %v3458_v17  ;;  %v3461_v12 = vpop.f32.mrb[10].mxu0 }
 0x439   : > { %v3579_v43 = vsel %vm3547_vm9, %v3456_v49, %v3563_v24  ;;  %v3462_v56 = vadd.f32 %v3461_v12, %v12957_v48  ;;  %v3463_v40 = vpop.f32.mrb[11].mxu0  ;;  %v4601_v49 = vmul.f32 %v4570_v18, %v13007_v50 }
 0x43a   : > { %4283 = vrot.lane.b32.xlu1 %v4246_v28, %s16308_s7  ;;  %4775 = vrot.lane.b32.xlu0 %v13023_v41, %s11393_s23  ;;  %v3580_v25 = vsel %vm3548_vm10, %v3458_v17, %v3564_v62  ;;  %v3607_v44 = vmul.f32 %v12906_v22, %v3579_v43  ;;  %v3464_v30 = vadd.f32 %v3463_v40, %v12957_v48  ;;  %v4860_v28 = vpop.permute.xlu1 %4859  ;;  %v13164_v62 = vpop.permute.xlu0 %4573 }
 0x43b   : > { %v3608_v47 = vmul.f32 %v12906_v22, %v3580_v25  ;;  %vm3555_vm11 = vcmp.ge.f32.partialorder %v3462_v56, 0.0  ;;  %v3571_v42 = vmul.f32 0.1, %v3462_v56  ;;  %v4610_v43 = vmul.f32 %v4570_v18, %v13023_v41 }
 0x43c   : > { %v13147_v36 = vadd.f32 %v12921_v46, %v3607_v44  ;;  %vm3556_vm12 = vcmp.ge.f32.partialorder %v3464_v30, 0.0  ;;  %v3572_v59 = vmul.f32 0.1, %v3464_v30  ;;  %v4891_v25 = vmul.f32 %v4860_v28, %v13007_v50 }
 0x43d   : > { %v13150_v32 = vadd.f32 %v12921_v46, %v3608_v47  ;;  %v3587_v11 = vsel %vm3555_vm11, %v3462_v56, %v3571_v42  ;;  %v3737_v56 = vsel %vm1178_vm0, %v12970_v15, %v12962_v55  ;;  %v4900_v44 = vmul.f32 %v4860_v28, %v13023_v41 }
 0x43e   : > { %4467 = vrot.lane.b32.xlu1 %v4431_v23, %s16312_s2  ;;  %3808 = vrot.lane.b32.xlu0 %v3762_v63, %s11391_s11  ;;  %4369 = vst [vmem:[#allocation3 + $0x220] sm:$0xff] %v13147_v36  ;;  %v3615_v21 = vmul.f32 %v12964_v8, %v3587_v11  ;;  %v3588_v33 = vsel %vm3556_vm12, %v3464_v30, %v3572_v59  ;;  %v13180_v40 = vpop.permute.xlu0 %4577 }
 0x43f   : > { %4370 = vst [vmem:[#allocation3 + $0x228] sm:$0xff] %v13150_v32  ;;  %v3616_v17 = vmul.f32 %v12964_v8, %v3588_v33  ;;  %v3754_v47 = vmul.f32 %v3737_v56, %v13010_v58  ;;  %v4415_v50 = vsel %vm1531_vm3, %v13046_v29, %v13106_v10  ;;  %v4086_v23 = vmul.f32 %v13083_v35, %v13026_v1 }
 0x440   : > { %v13162_v24 = vadd.f32 %v12966_v16, %v3615_v21  ;;  %v4432_v30 = vmul.f32 %v4415_v50, %v13010_v58  ;;  %v4585_v15 = vsel %vm1428_vm4, %v4570_v18, %v13123_v38  ;;  %v4256_v29 = vmul.f32 %v13096_v51, %v13026_v1 }
 0x441   : > { %v13167_v12 = vadd.f32 %v12966_v16, %v3616_v17  ;;  %v4602_v42 = vmul.f32 %v4585_v15, %v13010_v58  ;;  %v4085_v18 = vmul.f32 %v13114_v57, %v13023_v41  ;;  %v13226_v11 = vsel %vm1478_vm2, %v13051_v0, %v13032_v4 }
 0x442   : > { %4485 = vrot.lane.b32.xlu0 %v4440_v53, %s16312_s2  ;;  %4637 = vrot.lane.b32.xlu1 %v4601_v49, %s11387_s12  ;;  %4377 = vst [vmem:[#allocation3 + $0x260] sm:$0xff] %v13162_v24  ;;  %v4862_v63 = vpop.permute.xlu0 %4861  ;;  %v4248_v21 = vmul.f32 %v13226_v11, %v13055_v13  ;;  %v13237_v33 = vsel %vm1531_vm3, %v13106_v10, %v13070_v61 }
 0x443   : > { %4378 = vst [vmem:[#allocation3 + $0x268] sm:$0xff] %v13167_v12  ;;  %v4875_v59 = vsel %vm1231_vm5, %v4860_v28, %v4862_v63  ;;  %v4433_v57 = vmul.f32 %v13237_v33, %v13055_v13  ;;  %v3763_v53 = vmul.f32 %v3737_v56, %v13026_v1  ;;  %v4441_v10 = vmul.f32 %v4415_v50, %v13026_v1 }
 0x444   : > { %v4892_v35 = vmul.f32 %v4875_v59, %v13010_v58  ;;  %v13217_v58 = vsel %vm1375_vm1, %v12988_v26, %v12978_v37  ;;  %v4255_v26 = vmul.f32 %v13119_v19, %v13023_v41  ;;  %v13249_v41 = vsel %vm1428_vm4, %v13123_v38, %v13164_v62  ;;  %v4864_v19 = vpop.permute.xlu1 %4863 }
 0x445   : > { %v4078_v51 = vmul.f32 %v13217_v58, %v13055_v13  ;;  %v4603_v49 = vmul.f32 %v13249_v41, %v13055_v13  ;;  %v13259_v28 = vsel %vm1231_vm5, %v4862_v63, %v4864_v19  ;;  %v4611_v38 = vmul.f32 %v4585_v15, %v13026_v1 }
 0x446   : > { %4655 = vrot.lane.b32.xlu0 %v4610_v43, %s11387_s12  ;;  %4927 = vrot.lane.b32.xlu1 %v4891_v25, %s11386_s0  ;;  %v13241_v0 = vpop.permute.xlu0 %4865  ;;  %v4893_v25 = vmul.f32 %v13259_v28, %v13055_v13  ;;  %v4901_v50 = vmul.f32 %v4875_v59, %v13026_v1 }
 0x448   : > { %v13261_v43 = vpop.permute.xlu1 %4867 }
 0x44a   : > { %4945 = vrot.lane.b32.xlu0 %v4900_v44, %s11386_s0  ;;  %3792 = vrot.lane.b32.xlu1 %v3754_v47, %s11391_s11  ;;  %v3739_v47 = vsel %vm1178_vm0, %v12974_v14, %v12968_v5 }
 0x44e   : > { %4133 = vrot.lane.b32.xlu0 %v4086_v23, %s11390_s10  ;;  %4469 = vrot.lane.b32.xlu1 %v4432_v30, %s16312_s2  ;;  %v3756_v30 = vmul.f32 %v3739_v47, %v13065_v3  ;;  %v4417_v23 = vsel %vm1531_vm3, %v13070_v61, %v13132_v60  ;;  %v3738_v61 = vsel %vm1178_vm0, %v12962_v55, %v12974_v14 }
 0x452   : > { %4303 = vrot.lane.b32.xlu0 %v4256_v29, %s16308_s7  ;;  %4639 = vrot.lane.b32.xlu1 %v4602_v42, %s11387_s12  ;;  %v4434_v42 = vmul.f32 %v4417_v23, %v13065_v3 }
 0x456   : > { %4761 = vrot.lane.b32.xlu0 %v13055_v13, %s11393_s23  ;;  %4929 = vrot.lane.b32.xlu1 %v4892_v35, %s11386_s0 }
 0x45a   : > { %3916 = vrot.lane.b32.xlu0 %v13065_v3, %s11392_s18  ;;  %3930 = vrot.lane.b32.xlu1 %v13026_v1, %s11392_s18 }
 0x45d   : > { %v13256_v17 = vpop.permute.xlu0 %3788  ;;  %v13268_v56 = vpop.permute.xlu1 %3806 }
 0x45e   : > { %4763 = vrot.lane.b32.xlu0 %v13065_v3, %s11393_s23  ;;  %4777 = vrot.lane.b32.xlu1 %v13026_v1, %s11393_s23  ;;  %v4587_v1 = vsel %vm1428_vm4, %v13164_v62, %v13138_v31  ;;  %v4877_v62 = vsel %vm1231_vm5, %v4864_v19, %v13241_v0 }
 0x45f   : > { %v4604_v29 = vmul.f32 %v4587_v1, %v13065_v3 }
 0x461   : > { %v13270_v44 = vpop.permute.xlu0 %3730  ;;  %v13286_v63 = vpop.permute.xlu1 %3732 }
 0x462   : > { %4117 = vrot.lane.b32.xlu0 %v4078_v51, %s11390_s10  ;;  %4131 = vrot.lane.b32.xlu1 %v4085_v18, %s11390_s10  ;;  %v3755_v51 = vmul.f32 %v3738_v61, %v13055_v13  ;;  %v4062_v18 = vsel %vm1375_vm1, %v12978_v37, %v12999_v52 }
 0x465   : > { %v13284_v15 = vpop.permute.xlu0 %11065 }
 0x466   : > { %4287 = vrot.lane.b32.xlu0 %v4248_v21, %s16308_s7  ;;  %4301 = vrot.lane.b32.xlu1 %v4255_v26, %s16308_s7  ;;  %v4079_v21 = vmul.f32 %v4062_v18, %v13065_v3  ;;  %v4894_v26 = vmul.f32 %v4877_v62, %v13065_v3 }
 0x46a   : > { %4471 = vrot.lane.b32.xlu0 %v4433_v57, %s16312_s2  ;;  %3810 = vrot.lane.b32.xlu1 %v3763_v53, %s11391_s11 }
 0x46e   : > { %4641 = vrot.lane.b32.xlu0 %v4603_v49, %s11387_s12  ;;  %4487 = vrot.lane.b32.xlu1 %v4441_v10, %s16312_s2 }
 0x472   : > { %4931 = vrot.lane.b32.xlu0 %v4893_v25, %s11386_s0  ;;  %4657 = vrot.lane.b32.xlu1 %v4611_v38, %s11387_s12 }
 0x476   : > { %3796 = vrot.lane.b32.xlu0 %v3756_v30, %s11391_s11  ;;  %4947 = vrot.lane.b32.xlu1 %v4901_v50, %s11386_s0  ;;  %v4087_v50 = vmul.f32 %v13217_v58, %v13075_v9  ;;  %v4442_v30 = vmul.f32 %v13237_v33, %v13075_v9 }
 0x47a   : > { %4473 = vrot.lane.b32.xlu0 %v4434_v42, %s16312_s2  ;;  %3914 = vrot.lane.b32.xlu1 %v13055_v13, %s11392_s18  ;;  %v4232_v13 = vsel %vm1478_vm2, %v13032_v4, %v13085_v34 }
 0x47b   : > { %v4249_v37 = vmul.f32 %v4232_v13, %v13065_v3  ;;  %v3764_v3 = vmul.f32 %v3738_v61, %v13075_v9 }
 0x47c   : > { %v13299_v59 = vpop.permute.xlu1 %4111  ;;  %v13301_v35 = vpop.permute.xlu0 %4129 }
 0x47e   : > { %4643 = vrot.lane.b32.xlu0 %v4604_v29, %s11387_s12  ;;  %3794 = vrot.lane.b32.xlu1 %v3755_v51, %s11391_s11  ;;  %v4257_v29 = vmul.f32 %v13226_v11, %v13075_v9  ;;  %v4612_v51 = vmul.f32 %v13249_v41, %v13075_v9 }
 0x480   : > { %v13311_v55 = vpop.permute.xlu1 %4053  ;;  %v13313_v14 = vpop.permute.xlu0 %4055 }
 0x481   : > { %16367 = vst [vmem:[#allocation32_spill] sm:$0xff] %v13313_v14  ;;  %v13489_v6 = vsel %vm1375_vm1, %v13311_v55, %v13313_v14 }
 0x482   : > { %4119 = vrot.lane.b32.xlu1 %v4079_v21, %s11390_s10  ;;  %4933 = vrot.lane.b32.xlu0 %v4894_v26, %s11386_s0  ;;  %v3765_v21 = vmul.f32 %v3739_v47, %v13088_v20  ;;  %v4902_v26 = vmul.f32 %v13259_v28, %v13075_v9  ;;  %v4613_v47 = vmul.f32 %v4587_v1, %v13088_v20 }
 0x483   : > { %v4903_v1 = vmul.f32 %v4877_v62, %v13088_v20  ;;  %v4418_v62 = vsel %vm1531_vm3, %v13132_v60, %v13102_v2 }
 0x484   : > { %v13322_v57 = vpop.permute.xlu1 %4281  ;;  %v13324_v53 = vpop.permute.xlu0 %4299 }
 0x486   : > { %4289 = vrot.lane.b32.xlu1 %v4249_v37, %s16308_s7  ;;  %4779 = vrot.lane.b32.xlu0 %v13075_v9, %s11393_s23  ;;  %v4443_v37 = vmul.f32 %v4417_v23, %v13088_v20  ;;  %v13397_v23 = vld [vmem:[%s11460_s14 + $0x8] sm:$0xff] }
 0x487   : > { %16370 = vst [vmem:[#allocation35_spill] sm:$0xff] %v13397_v23  ;;  %10009 = vmatprep.mubr.msk.f32.mxu0 %vm5171_vm13, %v13397_v23  ;;  %10011 = vmatprep.mubr.msk.f32.mxu1 %vm5171_vm13, %v13397_v23  ;;  %v4081_v23 = vmul.f32 %v13489_v6, %v13150_v32 }
 0x488   : > { %v13330_v19 = vpop.permute.xlu1 %4223  ;;  %v13332_v4 = vpop.permute.xlu0 %4225 }
 0x489   : > { %16368 = vst [vmem:[#allocation33_spill] sm:$0xff] %v13332_v4 }
 0x48a   : > { %3932 = vrot.lane.b32.xlu1 %v13075_v9, %s11392_s18  ;;  %3934 = vrot.lane.b32.xlu0 %v13088_v20, %s11392_s18 }
 0x48c   : > { %v13338_v10 = vpop.permute.xlu1 %4409  ;;  %v13340_v49 = vpop.permute.xlu0 %4411 }
 0x48e   : > { %4781 = vrot.lane.b32.xlu1 %v13088_v20, %s11393_s23  ;;  %3812 = vrot.lane.b32.xlu0 %v3764_v3, %s11391_s11  ;;  %v4088_v3 = vmul.f32 %v4062_v18, %v13088_v20 }
 0x490   : > { %v13346_v38 = vpop.permute.xlu1 %4579  ;;  %v13348_v25 = vpop.permute.xlu0 %4581 }
 0x492   : > { %4135 = vrot.lane.b32.xlu1 %v4087_v50, %s11390_s10  ;;  %4489 = vrot.lane.b32.xlu0 %v4442_v30, %s16312_s2  ;;  %v4258_v50 = vmul.f32 %v4232_v13, %v13088_v20  ;;  %v13392_v30 = vsel %vm1178_vm0, %v13270_v44, %v13286_v63 }
 0x493   : > { %v3758_v13 = vmul.f32 %v13392_v30, %v13150_v32 }
 0x494   : > { %v13356_v42 = vpop.permute.xlu1 %4869  ;;  %v13358_v61 = vpop.permute.xlu0 %4871 }
 0x496   : > { %4305 = vrot.lane.b32.xlu1 %v4257_v29, %s16308_s7  ;;  %4659 = vrot.lane.b32.xlu0 %v4612_v51, %s11387_s12 }
 0x498   : > { %v13366_v58 = vpop.permute.xlu1 %3734  ;;  %v13368_v33 = vpop.permute.xlu0 %3910 }
 0x49a   : > { %3814 = vrot.lane.b32.xlu1 %v3765_v21, %s11391_s11  ;;  %4949 = vrot.lane.b32.xlu0 %v4902_v26, %s11386_s0 }
 0x49c   : > { %v13375_v11 = vpop.permute.xlu1 %4757  ;;  %v13377_v41 = vpop.permute.xlu0 %3790 }
 0x49d   : > { %16369 = vst [vmem:[#allocation34_spill] sm:$0xff] %v13375_v11 }
 0x49e   : > { %4491 = vrot.lane.b32.xlu1 %v4443_v37, %s16312_s2  ;;  %4137 = vrot.lane.b32.xlu0 %v4088_v3, %s11390_s10  ;;  %v4435_v37 = vmul.f32 %v4418_v62, %v13147_v36  ;;  %v4588_v3 = vsel %vm1428_vm4, %v13138_v31, %v13180_v40 }
 0x49f   : > { %v4614_v7 = vmul.f32 %v4588_v3, %v13162_v24 }
 0x4a0   : > { %v13384_v9 = vpop.permute.xlu1 %3912  ;;  %v13386_v28 = vpop.permute.xlu0 %4115 }
 0x4a2   : > { %4661 = vrot.lane.b32.xlu1 %v4613_v47, %s11387_s12  ;;  %4307 = vrot.lane.b32.xlu0 %v4258_v50, %s16308_s7  ;;  %v4444_v47 = vmul.f32 %v4418_v62, %v13162_v24 }
 0x4a4   : > { %v13400_v18 = vpop.permute.xlu1 %4759  ;;  %v13402_v29 = vpop.permute.xlu0 %4285 }
 0x4a5   : > { %16371 = vst [vmem:[#allocation36_spill] sm:$0xff] %v13400_v18 }
 0x4a6   : > { %4951 = vrot.lane.b32.xlu1 %v4903_v1, %s11386_s0  ;;  %3800 = vrot.lane.b32.xlu0 %v3758_v13, %s11391_s11  ;;  %v4605_v1 = vmul.f32 %v4588_v3, %v13147_v36  ;;  %v4878_v13 = vsel %vm1231_vm5, %v13241_v0, %v13261_v43 }
 0x4a7   : > { %v4895_v31 = vmul.f32 %v4878_v13, %v13147_v36 }
 0x4a8   : > { %v13412_v51 = vpop.permute.xlu1 %4113  ;;  %v13414_v20 = vpop.permute.xlu0 %3928 }
 0x4aa   : > { %4765 = vrot.lane.b32.xlu1 %v13147_v36, %s11393_s23  ;;  %4783 = vrot.lane.b32.xlu0 %v13162_v24, %s11393_s23 }
 0x4ac   : > { %v13423_v21 = vpop.permute.xlu1 %4283  ;;  %v13425_v26 = vpop.permute.xlu0 %4775 }
 0x4ad   : > { %16372 = vst [vmem:[#allocation37_spill] sm:$0xff] %v13425_v26 }
 0x4ae   : > { %4475 = vrot.lane.b32.xlu1 %v4435_v37, %s16312_s2  ;;  %4493 = vrot.lane.b32.xlu0 %v4444_v47, %s16312_s2  ;;  %v13453_v47 = vsel %vm1178_vm0, %v12968_v5, %v13270_v44 }
 0x4af   : > { %v3757_v0 = vmul.f32 %v13453_v47, %v13147_v36 }
 0x4b0   : > { %v13434_v60 = vpop.permute.xlu1 %4467  ;;  %v13436_v50 = vpop.permute.xlu0 %3808 }
 0x4b1   : > { %16373 = vst [vmem:[#allocation38_spill] sm:$0xff] %v13434_v60 }
 0x4b2   : > { %4645 = vrot.lane.b32.xlu1 %v4605_v1, %s11387_s12  ;;  %4663 = vrot.lane.b32.xlu0 %v4614_v7, %s11387_s12  ;;  %v4904_v1 = vmul.f32 %v4878_v13, %v13162_v24 }
 0x4b4   : > { %v13446_v62 = vpop.permute.xlu1 %4637  ;;  %v13448_v37 = vpop.permute.xlu0 %4485 }
 0x4b5   : > { %16374 = vst [vmem:[#allocation39_spill] sm:$0xff] %v13446_v62  ;;  %16375 = vst [vmem:[#allocation40_spill] sm:$0xff] %v13448_v37 }
 0x4b6   : > { %4935 = vrot.lane.b32.xlu1 %v4895_v31, %s11386_s0  ;;  %3918 = vrot.lane.b32.xlu0 %v13147_v36, %s11392_s18  ;;  %v13474_v31 = vsel %vm1375_vm1, %v12999_v52, %v13311_v55  ;;  %v13496_v52 = vrot.slane %v12856_v54, %v11708_v27  ;;  %v13507_v55 = vsel %vm1478_vm2, %v13085_v34, %v13330_v19 }
 0x4b7   : > { %v4250_v34 = vmul.f32 %v13507_v55, %v13147_v36 }
 0x4b8   : > { %v13460_v7 = vpop.permute.xlu1 %4927  ;;  %v13462_v3 = vpop.permute.xlu0 %4655 }
 0x4b9   : > { %16376 = vst [vmem:[#allocation41_spill] sm:$0xff] %v13460_v7  ;;  %16377 = vst [vmem:[#allocation42_spill] sm:$0xff] %v13462_v3 }
 0x4ba   : > { %3798 = vrot.lane.b32.xlu1 %v3757_v0, %s11391_s11  ;;  %4953 = vrot.lane.b32.xlu0 %v4904_v1, %s11386_s0  ;;  %v4080_v1 = vmul.f32 %v13474_v31, %v13147_v36 }
 0x4bc   : > { %v13467_v5 = vpop.permute.xlu1 %3792  ;;  %v13469_v44 = vpop.permute.xlu0 %4945 }
 0x4bd   : > { %16378 = vst [vmem:[#allocation43_spill] sm:$0xff] %v13469_v44 }
 0x4be   : > { %3920 = vrot.lane.b32.xlu1 %v13150_v32, %s11392_s18  ;;  %3936 = vrot.lane.b32.xlu0 %v13162_v24, %s11392_s18 }
 0x4c0   : > { %v13480_v13 = vpop.permute.xlu1 %4469  ;;  %v13482_v0 = vpop.permute.xlu0 %4133 }
 0x4c1   : > { %16379 = vst [vmem:[#allocation44_spill] sm:$0xff] %v13480_v13 }
 0x4c2   : > { %3938 = vrot.lane.b32.xlu1 %v13167_v12, %s11392_s18  ;;  %4121 = vrot.lane.b32.xlu0 %v4080_v1, %s11390_s10  ;;  %v13512_v1 = vsel %vm1478_vm2, %v13330_v19, %v13332_v4 }
 0x4c4   : > { %v13500_v7 = vpop.permute.xlu1 %4639  ;;  %v13502_v44 = vpop.permute.xlu0 %4303 }
 0x4c5   : > { %16380 = vst [vmem:[#allocation45_spill] sm:$0xff] %v13500_v7  ;;  %v3532_v14 = vpop.f32.mrb[8].mxu1 }
 0x4c6   : > { %4123 = vrot.lane.b32.xlu1 %v4081_v23, %s11390_s10  ;;  %v3533_v27 = vadd.f32 %v3532_v14, %v12904_v45  ;;  %v3534_v54 = vpop.f32.mrb[9].mxu1  ;;  %4057 = vrot.lane.b32.xlu0 %v13496_v52, %s11387_s12  ;;  %v4251_v23 = vmul.f32 %v13512_v1, %v13150_v32  ;;  %v13530_v14 = vsel %vm1531_vm3, %v13102_v2, %v13338_v10 }
 0x4c7   : > { %v3535_v11 = vadd.f32 %v3534_v54, %v12904_v45  ;;  %v4436_v2 = vmul.f32 %v13530_v14, %v13150_v32 }
 0x4c8   : > { %v13521_v26 = vpop.permute.xlu1 %4929  ;;  %v13523_v18 = vpop.permute.xlu0 %4761  ;;  %vm3549_vm14 = vcmp.ge.f32.partialorder %v3533_v27, 0.0  ;;  %v3565_v19 = vmul.f32 0.1, %v3533_v27 }
 0x4c9   : > { %16381 = vst [vmem:[#allocation46_spill] sm:$0xff] %v13521_v26  ;;  %vm3550_vm15 = vcmp.ge.f32.partialorder %v3535_v11, 0.0  ;;  %v3566_v4 = vmul.f32 0.1, %v3535_v11  ;;  %v3538_v45 = vpop.f32.mrb[10].mxu1 }
 0x4ca   : > { %4291 = vrot.lane.b32.xlu1 %v4250_v34, %s16308_s7  ;;  %v3581_v36 = vsel %vm3549_vm14, %v3533_v27, %v3565_v19  ;;  %v3539_v54 = vadd.f32 %v3538_v45, %v12957_v48  ;;  %v3540_v26 = vpop.f32.mrb[11].mxu1  ;;  %4293 = vrot.lane.b32.xlu0 %v4251_v23, %s16308_s7  ;;  %v13547_v34 = vsel %vm1428_vm4, %v13180_v40, %v13346_v38 }
 0x4cb   : > { %v3609_v62 = vmul.f32 %v12906_v22, %v3581_v36  ;;  %v3582_v7 = vsel %vm3550_vm15, %v3535_v11, %v3566_v4  ;;  %v3541_v3 = vadd.f32 %v3540_v26, %v12957_v48  ;;  %v4089_v36 = vmul.f32 %v13474_v31, %v13162_v24 }
 0x4cc   : > { %v3610_v60 = vmul.f32 %v12906_v22, %v3582_v7  ;;  %v13540_v13 = vpop.permute.xlu1 %3930  ;;  %v13542_v37 = vpop.permute.xlu0 %3916  ;;  %vm3557_vm8 = vcmp.ge.f32.partialorder %v3539_v54, 0.0  ;;  %v3573_v27 = vmul.f32 0.1, %v3539_v54 }
 0x4cd   : > { %v13550_v4 = vadd.f32 %v12921_v46, %v3609_v62  ;;  %vm3558_vm9 = vcmp.ge.f32.partialorder %v3541_v3, 0.0  ;;  %v3574_v48 = vmul.f32 0.1, %v3541_v3  ;;  %v4606_v62 = vmul.f32 %v13547_v34, %v13150_v32 }
 0x4ce   : > { %v13553_v11 = vadd.f32 %v12921_v46, %v3610_v60  ;;  %4227 = vrot.lane.b32.xlu1 %v13044_v39, %s16312_s2  ;;  %v3589_v22 = vsel %vm3557_vm8, %v3539_v54, %v3573_v27  ;;  %4477 = vrot.lane.b32.xlu0 %v4436_v2, %s16312_s2  ;;  %v3766_v54 = vmul.f32 %v13453_v47, %v13162_v24 }
 0x4cf   : > { %4371 = vst [vmem:[#allocation3 + $0x230] sm:$0xff] %v13550_v4  ;;  %v3617_v26 = vmul.f32 %v12964_v8, %v3589_v22  ;;  %v3590_v40 = vsel %vm3558_vm9, %v3541_v3, %v3574_v48  ;;  %v3767_v48 = vmul.f32 %v13392_v30, %v13167_v12  ;;  %v3832_v47 = vsel %vm1231_vm5, %v13268_v56, %v13436_v50 }
 0x4d0   : > { %4372 = vst [vmem:[#allocation3 + $0x238] sm:$0xff] %v13553_v11  ;;  %3660 = vst [vmem:[#allocation2 + $0x40] sm:$0xff] %v13553_v11  ;;  %v3618_v46 = vmul.f32 %v12964_v8, %v3590_v40  ;;  %v13565_v60 = vpop.permute.xlu1 %4777  ;;  %v13567_v7 = vpop.permute.xlu0 %4763  ;;  %v3825_v30 = vsel %vm1231_vm5, %v13377_v41, %v13467_v5  ;;  %v3953_v40 = vsel %vm1292_vm6, %v13414_v20, %v13540_v13 }
 0x4d1   : > { %v13570_v19 = vadd.f32 %v12966_v16, %v3617_v26  ;;  %v13575_v3 = vsel %vm1802_vm7, %v13523_v18, %v13567_v7  ;;  %v3824_v56 = vsel %vm1231_vm5, %v13256_v17, %v13377_v41 }
 0x4d2   : > { %v13578_v23 = vadd.f32 %v12966_v16, %v3618_v46  ;;  %4647 = vrot.lane.b32.xlu1 %v4606_v62, %s11387_s12  ;;  %4413 = vrot.lane.b32.xlu0 %v13496_v52, %s16308_s7  ;;  %v3945_v46 = vsel %vm1292_vm6, %v13368_v33, %v13384_v9 }
 0x4d3   : > { %4379 = vst [vmem:[#allocation3 + $0x270] sm:$0xff] %v13570_v19 }
 0x4d4   : > { %3668 = vst [vmem:[#allocation2 + $0x90] sm:$0xff] %v13578_v23  ;;  %4380 = vst [vmem:[#allocation3 + $0x278] sm:$0xff] %v13578_v23  ;;  %v4132_v8 = vpop.permute.xlu1 %4131  ;;  %v13586_v45 = vpop.permute.xlu0 %4117 }
 0x4d5   : > { %v13593_v16 = vsel %vm1428_vm4, %v13386_v28, %v13586_v45 }
 0x4d6   : > { %4583 = vrot.lane.b32.xlu1 %v13044_v39, %s11390_s10  ;;  %4139 = vrot.lane.b32.xlu0 %v4089_v36, %s11390_s10  ;;  %v4259_v39 = vmul.f32 %v13507_v55, %v13162_v24  ;;  %v11068_v55 = vunpack.i.h.bf16 %v13284_v15  ;;  %v10348_v36 = vpack.c.bf16 %v3832_v47, %v3824_v56  ;;  %v4260_v56 = vmul.f32 %v13512_v1, %v13167_v12 }
 0x4d8   : > { %v4302_v2 = vpop.permute.xlu1 %4301  ;;  %v13600_v27 = vpop.permute.xlu0 %4287 }
 0x4d9   : > { %v13607_v31 = vsel %vm1531_vm3, %v13402_v29, %v13600_v27  ;;  %v4325_v1 = vsel %vm1531_vm3, %v13324_v53, %v4302_v2  ;;  %v4420_v53 = vsel %vm1531_vm3, %v13338_v10, %v13340_v49 }
 0x4da   : > { %3816 = vrot.lane.b32.xlu1 %v3766_v54, %s11391_s11  ;;  %3818 = vrot.lane.b32.xlu0 %v3767_v48, %s11391_s11  ;;  %v11067_v54 = vunpack.i.l.bf16 %v13284_v15  ;;  %v3952_v48 = vsel %vm1292_vm6, %v11068_v55, %v13414_v20  ;;  %v4615_v20 = vmul.f32 %v13547_v34, %v13167_v12 }
 0x4dc   : > { %v13616_v22 = vpop.permute.xlu1 %3810  ;;  %v13618_v26 = vpop.permute.xlu0 %4471  ;;  %v3944_v47 = vsel %vm1292_vm6, %v11067_v54, %v13368_v33  ;;  %v5076_v54 = vld [vmem:[#allocation3 + $0x208] sm:$0xff] }
 0x4dd   : > { %v3833_v24 = vsel %vm1231_vm5, %v13436_v50, %v13616_v22  ;;  %v4090_v50 = vmul.f32 %v13489_v6, %v13167_v12  ;;  %v4148_v6 = vsel %vm1428_vm4, %v13412_v51, %v13386_v28  ;;  %v10352_v15 = vpack.c.bf16 %v3952_v48, %v3944_v47 }
 0x4de   : > { %4309 = vrot.lane.b32.xlu1 %v4259_v39, %s16308_s7  ;;  %v10346_v62 = vpack.c.bf16 %v3833_v24, %v3825_v30  ;;  %4767 = vrot.lane.b32.xlu0 %v13150_v32, %s11393_s23  ;;  %v10350_v39 = vpack.c.bf16 %v3953_v40, %v3945_v46  ;;  %v4156_v30 = vsel %vm1428_vm4, %v4132_v8, %v13482_v0 }
 0x4df   : > { %v4155_v40 = vsel %vm1428_vm4, %v13301_v35, %v4132_v8  ;;  %v10354_v55 = vpack.c.bf16 %v4156_v30, %v4148_v6  ;;  %v4326_v28 = vsel %vm1531_vm3, %v4302_v2, %v13502_v44  ;;  %v4318_v35 = vsel %vm1531_vm3, %v13423_v21, %v13402_v29  ;;  %v5075_v6 = vld [vmem:[#allocation3 + $0x200] sm:$0xff] }
 0x4e0   : > { %v13644_v17 = vpop.permute.xlu1 %4487  ;;  %v13646_v41 = vpop.permute.xlu0 %4641  ;;  %10347 = vmatprep.subr.bf16.mxu0 %v10346_v62  ;;  %v4147_v62 = vsel %vm1428_vm4, %v13299_v59, %v13412_v51  ;;  %v4445_v59 = vmul.f32 %v13530_v14, %v13167_v12  ;;  %v5084_v51 = vld [vmem:[#allocation3 + $0x248] sm:$0xff]  ;;  %v4317_v29 = vsel %vm1531_vm3, %v13322_v57, %v13423_v21  ;;  %v4590_v14 = vsel %vm1428_vm4, %v13346_v38, %v13348_v25 }
 0x4e1   : > { %10349 = vmatpush1.bf16.msra.mxu0 %v10348_v36  ;;  %v10356_v34 = vpack.c.bf16 %v4155_v40, %v4147_v62  ;;  %v10358_v36 = vpack.c.bf16 %v4326_v28, %v4318_v35  ;;  %v10360_v2 = vpack.c.bf16 %v4325_v1, %v4317_v29  ;;  %v4437_v57 = vmul.f32 %v4420_v53, %v13550_v4 }
 0x4e2   : > { %4141 = vrot.lane.b32.xlu1 %v4090_v50, %s11390_s10  ;;  %10351 = vmatprep.subr.bf16.mxu0 %v10350_v39  ;;  %v10362_v21 = vpack.c.bf16 %v5084_v51, %v5076_v54  ;;  %v5083_v39 = vld [vmem:[#allocation3 + $0x240] sm:$0xff]  ;;  %v4607_v38 = vmul.f32 %v4590_v14, %v13550_v4  ;;  %v4446_v40 = vmul.f32 %v4420_v53, %v13570_v19 }
 0x4e3   : > { %4785 = vrot.lane.b32.xlu0 %v13167_v12, %s11393_s23  ;;  %v4616_v62 = vmul.f32 %v4590_v14, %v13570_v19  ;;  %v4879_v35 = vsel %vm1231_vm5, %v13261_v43, %v13356_v42  ;;  %v4880_v43 = vsel %vm1231_vm5, %v13356_v42, %v13358_v61 }
 0x4e4   : > { %v13662_v24 = vpop.permute.xlu1 %4657  ;;  %v13664_v33 = vpop.permute.xlu0 %4931  ;;  %v4905_v51 = vmul.f32 %v4879_v35, %v13167_v12  ;;  %v4906_v42 = vmul.f32 %v4880_v43, %v13570_v19 }
 0x4e5   : > { %10353 = vmatpush1.bf16.msra.mxu0 %v10352_v15 }
 0x4e6   : > { %4665 = vrot.lane.b32.xlu1 %v4615_v20, %s11387_s12  ;;  %10355 = vmatprep.subr.bf16.mxu0 %v10354_v55 }
 0x4e7   : > { %4311 = vrot.lane.b32.xlu0 %v4260_v56, %s16308_s7 }
 0x4e8   : > { %v13680_v8 = vpop.permute.xlu1 %4947  ;;  %v13682_v46 = vpop.permute.xlu0 %3796 }
 0x4e9   : > { %10357 = vmatpush1.bf16.msra.mxu0 %v10356_v34  ;;  %v4896_v34 = vmul.f32 %v4879_v35, %v13150_v32  ;;  %v16384_v35 = vld [vmem:[#allocation38_spill] sm:$0xff] }
 0x4ea   : > { %4769 = vrot.lane.b32.xlu1 %v13550_v4, %s11393_s23  ;;  %10359 = vmatprep.subr.bf16.mxu0 %v10358_v36 }
 0x4eb   : > { %4495 = vrot.lane.b32.xlu0 %v4445_v59, %s16312_s2 }
 0x4ec   : > { %v3915_v50 = vpop.permute.xlu1 %3914  ;;  %v13698_v48 = vpop.permute.xlu0 %4473 }
 0x4ed   : > { %v13703_v30 = vsel %vm1292_vm6, %v13384_v9, %v3915_v50  ;;  %v13707_v10 = vsel %vm1292_vm6, %v3915_v50, %v13542_v37  ;;  %v13712_v47 = vsel %vm1478_vm2, %v13618_v26, %v13698_v48  ;;  %10361 = vmatpush1.bf16.msra.mxu0 %v10360_v2  ;;  %v10364_v9 = vpack.c.bf16 %v5083_v39, %v5075_v6 }
 0x4ee   : > { %4479 = vrot.lane.b32.xlu1 %v4437_v57, %s16312_s2  ;;  %10363 = vmatprep.subr.bf16.mxu0 %v10362_v21  ;;  %v3760_v39 = vmul.f32 %v13366_v58, %v13553_v11 }
 0x4ef   : > { %4649 = vrot.lane.b32.xlu0 %v4607_v38, %s11387_s12  ;;  %v16382_v38 = vld [vmem:[#allocation40_spill] sm:$0xff] }
 0x4f0   : > { %v3795_v15 = vpop.permute.xlu1 %3794  ;;  %v13717_v20 = vpop.permute.xlu0 %4643  ;;  %v4511_v6 = vsel %vm1478_vm2, %v16382_v38, %v13644_v17 }
 0x4f1   : > { %v13722_v55 = vsel %vm1231_vm5, %v13467_v5, %v3795_v15  ;;  %v13726_v56 = vsel %vm1231_vm5, %v3795_v15, %v13682_v46  ;;  %v13731_v28 = vsel %vm1375_vm1, %v13646_v41, %v13717_v20  ;;  %10365 = vmatpush1.bf16.msra.mxu0 %v10364_v9 }
 0x4f2   : > { %4497 = vrot.lane.b32.xlu1 %v4446_v40, %s16312_s2  ;;  %v16383_v40 = vld [vmem:[#allocation44_spill] sm:$0xff] }
 0x4f3   : > { %4667 = vrot.lane.b32.xlu0 %v4616_v62, %s11387_s12  ;;  %v4504_v62 = vsel %vm1478_vm2, %v16383_v40, %v13618_v26 }
 0x4f4   : > { %v13739_v5 = vpop.permute.xlu1 %4119  ;;  %v13747_v36 = vpop.permute.xlu0 %4933 }
 0x4f5   : > { %v13745_v1 = vsel %vm1428_vm4, %v13586_v45, %v13739_v5  ;;  %v13752_v59 = vsel %vm1178_vm0, %v13664_v33, %v13747_v36  ;;  %v4897_v45 = vmul.f32 %v4880_v43, %v13550_v4 }
 0x4f6   : > { %4787 = vrot.lane.b32.xlu1 %v13570_v19, %s11393_s23 }
 0x4f7   : > { %4937 = vrot.lane.b32.xlu0 %v4896_v34, %s11386_s0  ;;  %v4503_v34 = vsel %vm1478_vm2, %v16384_v35, %v16383_v40 }
 0x4f8   : > { %v13760_v32 = vpop.permute.xlu1 %4289  ;;  %v4780_v53 = vpop.permute.xlu0 %4779 }
 0x4f9   : > { %v13767_v29 = vsel %vm1531_vm3, %v13600_v27, %v13760_v32  ;;  %v13784_v27 = vsel %vm1178_vm0, %v13286_v63, %v13366_v58 }
 0x4fa   : > { %4939 = vrot.lane.b32.xlu1 %v4897_v45, %s11386_s0  ;;  %v10368_v45 = vpack.c.bf16 %v4511_v6, %v4503_v34  ;;  %v16387_v6 = vld [vmem:[#allocation39_spill] sm:$0xff] }
 0x4fb   : > { %4955 = vrot.lane.b32.xlu0 %v4905_v51, %s11386_s0  ;;  %v16385_v51 = vld [vmem:[#allocation42_spill] sm:$0xff] }
 0x4fc   : > { %v3933_v2 = vpop.permute.xlu1 %3932  ;;  %v13776_v14 = vpop.permute.xlu0 %3934  ;;  %v4681_v26 = vsel %vm1375_vm1, %v16385_v51, %v13662_v24 }
 0x4fd   : > { %v13774_v54 = vsel %vm1292_vm6, %v13540_v13, %v3933_v2  ;;  %v3955_v12 = vsel %vm1292_vm6, %v3933_v2, %v13776_v14  ;;  %v3759_v13 = vmul.f32 %v13784_v27, %v13550_v4 }
 0x4fe   : > { %4957 = vrot.lane.b32.xlu1 %v4906_v42, %s11386_s0  ;;  %v16386_v42 = vld [vmem:[#allocation45_spill] sm:$0xff] }
 0x4ff   : > { %4873 = vrot.lane.b32.xlu0 %v13496_v52, %s11391_s11 }
 0x500   : > { %v13788_v50 = vpop.permute.xlu1 %4781  ;;  %v3813_v21 = vpop.permute.xlu0 %3812 }
 0x501   : > { %v13794_v57 = vsel %vm1802_vm7, %v4780_v53, %v13788_v50  ;;  %v3834_v63 = vsel %vm1231_vm5, %v13616_v22, %v3813_v21 }
 0x502   : > { %3802 = vrot.lane.b32.xlu1 %v3759_v13, %s11391_s11  ;;  %v4674_v13 = vsel %vm1375_vm1, %v16386_v42, %v13646_v41  ;;  %v16388_v41 = vld [vmem:[#allocation36_spill] sm:$0xff] }
 0x503   : > { %3804 = vrot.lane.b32.xlu0 %v3760_v39, %s11391_s11  ;;  %v4802_v39 = vsel %vm1802_vm7, %v13565_v60, %v4780_v53 }
 0x504   : > { %v4136_v52 = vpop.permute.xlu1 %4135  ;;  %v4490_v15 = vpop.permute.xlu0 %4489 }
 0x505   : > { %v13807_v9 = vsel %vm1428_vm4, %v13482_v0, %v4136_v52  ;;  %v4512_v22 = vsel %vm1478_vm2, %v13644_v17, %v4490_v15 }
 0x506   : > { %3922 = vrot.lane.b32.xlu1 %v13550_v4, %s11392_s18  ;;  %v10366_v0 = vpack.c.bf16 %v4512_v22, %v4504_v62  ;;  %v4794_v62 = vsel %vm1802_vm7, %v16388_v41, %v13523_v18  ;;  %v16390_v18 = vld [vmem:[#allocation34_spill] sm:$0xff] }
 0x507   : > { %3924 = vrot.lane.b32.xlu0 %v13553_v11, %s11392_s18 }
 0x508   : > { %v4306_v43 = vpop.permute.xlu1 %4305  ;;  %v4660_v2 = vpop.permute.xlu0 %4659  ;;  %10367 = vmatprep.subr.bf16.mxu0 %v10366_v0 }
 0x509   : > { %v13826_v17 = vsel %vm1531_vm3, %v13502_v44, %v4306_v43  ;;  %v4682_v38 = vsel %vm1375_vm1, %v13662_v24, %v4660_v2  ;;  %10369 = vmatpush1.bf16.msra.mxu0 %v10368_v45  ;;  %v4673_v44 = vsel %vm1375_vm1, %v16387_v6, %v16386_v42  ;;  %v16389_v24 = vld [vmem:[#allocation37_spill] sm:$0xff]  ;;  %v10374_v45 = vpack.c.bf16 %v4802_v39, %v4794_v62 }
 0x50a   : > { %3940 = vrot.lane.b32.xlu1 %v13570_v19, %s11392_s18  ;;  %v10370_v40 = vpack.c.bf16 %v4682_v38, %v4674_v13  ;;  %v10372_v22 = vpack.c.bf16 %v4681_v26, %v4673_v44  ;;  %v4801_v35 = vsel %vm1802_vm7, %v16389_v24, %v13565_v60  ;;  %v4793_v26 = vsel %vm1802_vm7, %v16390_v18, %v16388_v41  ;;  %v16391_v60 = vld [vmem:[#allocation46_spill] sm:$0xff]  ;;  %v16392_v44 = vld [vmem:[#allocation43_spill] sm:$0xff] }
 0x50b   : > { %3942 = vrot.lane.b32.xlu0 %v13578_v23, %s11392_s18  ;;  %v10384_v13 = vpack.c.bf16 %v3834_v63, %v13722_v55  ;;  %v10376_v39 = vpack.c.bf16 %v4801_v35, %v4793_v26  ;;  %v10386_v6 = vpack.c.bf16 %v3955_v12, %v13707_v10  ;;  %v13883_v35 = vld [vmem:[%s11460_s14] sm:$0xff]  ;;  %s16401_s18 = sld [smem:[#allocation12_spill]] }
 0x50c   : > { %v13845_v53 = vpop.permute.xlu1 %3814  ;;  %v4950_v0 = vpop.permute.xlu0 %4949  ;;  %10371 = vmatprep.subr.bf16.mxu0 %v10370_v40 }
 0x50d   : > { %v3835_v34 = vsel %vm1231_vm5, %v3813_v21, %v13845_v53  ;;  %v4972_v51 = vsel %vm1178_vm0, %v13680_v8, %v4950_v0  ;;  %10373 = vmatpush1.bf16.msra.mxu0 %v10372_v22  ;;  %v4964_v21 = vsel %vm1178_vm0, %v16391_v60, %v13664_v33  ;;  %v16393_v33 = vld [vmem:[#allocation41_spill] sm:$0xff] }
 0x50e   : > { %v10382_v42 = vpack.c.bf16 %v3835_v34, %v13726_v56  ;;  %10375 = vmatprep.subr.bf16.mxu0 %v10374_v45  ;;  %v4971_v56 = vsel %vm1178_vm0, %v16392_v44, %v13680_v8  ;;  %v10378_v41 = vpack.c.bf16 %v4972_v51, %v4964_v21  ;;  %v4963_v10 = vsel %vm1178_vm0, %v16393_v33, %v16391_v60  ;;  %v13898_v51 = vld [vmem:[%s11460_s14 + $0x10] sm:$0xff] }
 0x50f   : > { %v10388_v8 = vpack.c.bf16 %v13774_v54, %v13703_v30  ;;  %v10380_v63 = vpack.c.bf16 %v4971_v56, %v4963_v10  ;;  %v10392_v30 = vpack.c.bf16 %v13807_v9, %v13593_v16  ;;  %v13888_v54 = vld [vmem:[%s11460_s14 + $0x18] sm:$0xff]  ;;  %v10396_v16 = vpack.c.bf16 %v13826_v17, %v13607_v31  ;;  %v5077_v31 = vld [vmem:[#allocation3 + $0x210] sm:$0xff] }
 0x510   : > { %v4492_v38 = vpop.permute.xlu1 %4491  ;;  %10383 = vmatprep.subr.bf16.mxu1 %v10382_v42  ;;  %v13867_v62 = vpop.permute.xlu0 %4137  ;;  %v5078_v9 = vld [vmem:[#allocation3 + $0x218] sm:$0xff]  ;;  %v16394_v17 = vld [vmem:[#allocation35_spill] sm:$0xff] }
 0x511   : > { %v4513_v40 = vsel %vm1478_vm2, %v4490_v15, %v4492_v38  ;;  %10385 = vmatpush1.bf16.msra.mxu1 %v10384_v13  ;;  %v4158_v55 = vsel %vm1428_vm4, %v4136_v52, %v13867_v62  ;;  %10377 = vmatpush1.bf16.msra.mxu0 %v10376_v39 }
 0x512   : > { %10387 = vmatprep.subr.bf16.mxu1 %v10386_v6  ;;  %10379 = vmatprep.subr.bf16.mxu0 %v10378_v41  ;;  %v10390_v15 = vpack.c.bf16 %v4158_v55, %v13745_v1  ;;  %v10404_v56 = vpack.c.bf16 %v4513_v40, %v13712_v47 }
 0x514   : > { %v4662_v12 = vpop.permute.xlu1 %4661  ;;  %v13878_v24 = vpop.permute.xlu0 %4307 }
 0x515   : > { %v4683_v22 = vsel %vm1375_vm1, %v4660_v2, %v4662_v12  ;;  %10389 = vmatpush1.bf16.msra.mxu1 %v10388_v8  ;;  %v4328_v52 = vsel %vm1531_vm3, %v4306_v43, %v13878_v24  ;;  %10381 = vmatpush1.bf16.msra.mxu0 %v10380_v63  ;;  %v5086_v43 = vld [vmem:[#allocation3 + $0x258] sm:$0xff]  ;;  %v10412_v63 = vpack.c.bf16 %v13794_v57, %v13575_v3 }
 0x516   : > { %10391 = vmatprep.subr.bf16.mxu1 %v10390_v15  ;;  %v10394_v1 = vpack.c.bf16 %v4328_v52, %v13767_v29  ;;  %v10398_v29 = vpack.c.bf16 %v5086_v43, %v5078_v9  ;;  %v10408_v8 = vpack.c.bf16 %v4683_v22, %v13731_v28  ;;  %v16395_v9 = vld [vmem:[#allocation32_spill] sm:$0xff] }
 0x518   : > { %v4952_v34 = vpop.permute.xlu1 %4951  ;;  %v13892_v45 = vpop.permute.xlu0 %3800  ;;  %5243 = vmatmul.mubr.f32.vlgmr.msra.gmra.mrb[12].mxu0 %v13883_v35 }
 0x519   : > { %v4973_v2 = vsel %vm1178_vm0, %v4950_v0, %v4952_v34  ;;  %10393 = vmatpush1.bf16.msra.mxu1 %v10392_v30  ;;  %10010 = vmatprep.mubr.msk.f32.mxu0 %vm5171_vm13, %v13888_v54  ;;  %v5085_v0 = vld [vmem:[#allocation3 + $0x250] sm:$0xff] }
 0x51a   : > { %10395 = vmatprep.subr.bf16.mxu1 %v10394_v1  ;;  %v10400_v60 = vpack.c.bf16 %v5085_v0, %v5077_v31  ;;  %v10416_v30 = vpack.c.bf16 %v4973_v2, %v13752_v59 }
 0x51c   : > { %v13902_v42 = vpop.permute.xlu1 %4765  ;;  %v13907_v26 = vpop.permute.xlu0 %4783  ;;  %5249 = vmatmul.mubr.f32.gmra.mrb[14].mxu0 %v13898_v51 }
 0x51d   : > { %v4796_v18 = vsel %vm1802_vm7, %v13567_v7, %v13902_v42  ;;  %10397 = vmatpush1.bf16.msra.mxu1 %v10396_v16  ;;  %v4804_v13 = vsel %vm1802_vm7, %v13788_v50, %v13907_v26  ;;  %10013 = vmatprep.mubr.msk.f32.mxu0 %vm5171_vm13, %v16394_v17 }
 0x51e   : > { %10399 = vmatprep.subr.bf16.mxu1 %v10398_v29  ;;  %v10410_v40 = vpack.c.bf16 %v4804_v13, %v4796_v18 }
 0x520   : > { %v13915_v21 = vpop.permute.xlu1 %4475  ;;  %v13920_v39 = vpop.permute.xlu0 %4493 }
 0x521   : > { %v4506_v7 = vsel %vm1478_vm2, %v13698_v48, %v13915_v21  ;;  %10401 = vmatpush1.bf16.msra.mxu1 %v10400_v60  ;;  %v4514_v6 = vsel %vm1478_vm2, %v4492_v38, %v13920_v39 }
 0x522   : > { %v10402_v44 = vpack.c.bf16 %v4514_v6, %v4506_v7  ;;  %v16396_v6 = vld [vmem:[#allocation33_spill] sm:$0xff] }
 0x524   : > { %v4646_v50 = vpop.permute.xlu1 %4645  ;;  %v13927_v55 = vpop.permute.xlu0 %4663  ;;  %10403 = vmatprep.subr.bf16.mxu1 %v10402_v44 }
 0x525   : > { %v4676_v41 = vsel %vm1375_vm1, %v13717_v20, %v4646_v50  ;;  %v4684_v33 = vsel %vm1375_vm1, %v4662_v12, %v13927_v55  ;;  %10405 = vmatpush1.bf16.msra.mxu1 %v10404_v56 }
 0x526   : > { %v10406_v48 = vpack.c.bf16 %v4684_v33, %v4676_v41 }
 0x528   : > { %v13931_v10 = vpop.permute.xlu1 %4935  ;;  %v3919_v47 = vpop.permute.xlu0 %3918  ;;  %10407 = vmatprep.subr.bf16.mxu1 %v10406_v48 }
 0x529   : > { %v4966_v38 = vsel %vm1178_vm0, %v13747_v36, %v13931_v10  ;;  %v13939_v20 = vsel %vm1292_vm6, %v13542_v37, %v3919_v47  ;;  %10409 = vmatpush1.bf16.msra.mxu1 %v10408_v8 }
 0x52a   : > { %10411 = vmatprep.subr.bf16.mxu1 %v10410_v40 }
 0x52c   : > { %v3799_v12 = vpop.permute.xlu1 %3798  ;;  %v13951_v15 = vpop.permute.xlu0 %4953 }
 0x52d   : > { %v13945_v28 = vsel %vm1231_vm5, %v13682_v46, %v3799_v12  ;;  %v13949_v36 = vsel %vm1231_vm5, %v3799_v12, %v13892_v45  ;;  %v4974_v37 = vsel %vm1178_vm0, %v4952_v34, %v13951_v15  ;;  %10413 = vmatpush1.bf16.msra.mxu1 %v10412_v63  ;;  %v3768_v63 = vmul.f32 %v13784_v27, %v13570_v19 }
 0x52e   : > { %v10414_v22 = vpack.c.bf16 %v4974_v37, %v4966_v38 }
 0x530   : > { %v13955_v52 = vpop.permute.xlu1 %3920  ;;  %v3937_v46 = vpop.permute.xlu0 %3936  ;;  %10415 = vmatprep.subr.bf16.mxu1 %v10414_v22 }
 0x531   : > { %v13960_v3 = vsel %vm1292_vm6, %v3919_v47, %v13955_v52  ;;  %v13964_v57 = vsel %vm1292_vm6, %v13776_v14, %v3937_v46  ;;  %10417 = vmatpush1.bf16.msra.mxu1 %v10416_v30 }
 0x534   : > { %v13966_v1 = vpop.permute.xlu1 %3938  ;;  %v4122_v43 = vpop.permute.xlu0 %4121  ;;  %5320 = vmatmul.mubr.f32.vlgmr.msra.gmra.mrb[12].mxu1 %v13883_v35 }
 0x535   : > { %v3957_v34 = vsel %vm1292_vm6, %v3937_v46, %v13966_v1  ;;  %v13973_v59 = vsel %vm1428_vm4, %v13739_v5, %v4122_v43  ;;  %10012 = vmatprep.mubr.msk.f32.mxu1 %vm5171_vm13, %v13888_v54 }
 0x538   : > { %v13977_v2 = vpop.permute.xlu1 %4123  ;;  %v4058_v16 = vpop.permute.xlu0 %4057  ;;  %5326 = vmatmul.mubr.f32.gmra.mrb[14].mxu1 %v13898_v51 }
 0x539   : > { %v13981_v14 = vsel %vm1428_vm4, %v4122_v43, %v13977_v2  ;;  %v4065_v29 = vsel %vm1375_vm1, %v16395_v9, %v4058_v16  ;;  %v4083_v0 = vmul.f32 %v4058_v16, %v13553_v11  ;;  %10015 = vmatprep.mubr.msk.f32.mxu1 %vm5171_vm13, %v16394_v17 }
 0x53a   : > { %v4082_v5 = vmul.f32 %v4065_v29, %v13550_v4 }
 0x53b   : > { %4127 = vrot.lane.b32.xlu0 %v4083_v0, %s11390_s10  ;;  %v10422_v0 = vpack.c.bf16 %v3957_v34, %v13960_v3  ;;  %v10424_v3 = vpack.c.bf16 %v13964_v57, %v13939_v20 }
 0x53c   : > { %v4292_v18 = vpop.permute.xlu1 %4291  ;;  %4125 = vrot.lane.b32.xlu1 %v4082_v5, %s11390_s10  ;;  %v13996_v31 = vpop.permute.xlu0 %4293  ;;  %v4092_v5 = vmul.f32 %v4058_v16, %v13578_v23 }
 0x53d   : > { %v13993_v13 = vsel %vm1531_vm3, %v13760_v32, %v4292_v18  ;;  %v14000_v60 = vsel %vm1531_vm3, %v4292_v18, %v13996_v31 }
 0x540   : > { %v4228_v7 = vpop.permute.xlu1 %4227  ;;  %v14005_v56 = vpop.permute.xlu0 %4477 }
 0x541   : > { %v4235_v17 = vsel %vm1478_vm2, %v16396_v6, %v4228_v7  ;;  %v4253_v44 = vmul.f32 %v4228_v7, %v13553_v11  ;;  %v14011_v32 = vsel %vm1478_vm2, %v13915_v21, %v14005_v56  ;;  %v4262_v16 = vmul.f32 %v4228_v7, %v13578_v23 }
 0x542   : > { %v4252_v41 = vmul.f32 %v4235_v17, %v13550_v4  ;;  %v14025_v4 = vld [vmem:[#allocation2 + $0xc0] sm:$0xff] }
 0x543   : > { %4297 = vrot.lane.b32.xlu0 %v4253_v44, %s16308_s7 }
 0x544   : > { %v14014_v33 = vpop.permute.xlu1 %4647  ;;  %4295 = vrot.lane.b32.xlu1 %v4252_v41, %s16308_s7  ;;  %v4414_v8 = vpop.permute.xlu0 %4413  ;;  %v4728_v41 = vld [vmem:[#allocation2 + $0x40] sm:$0xff] }
 0x545   : > { %v14019_v48 = vsel %vm1375_vm1, %v4646_v50, %v14014_v33  ;;  %v14023_v38 = vsel %vm1531_vm3, %v13340_v49, %v4414_v8  ;;  %v4439_v21 = vmul.f32 %v14025_v4, %v4414_v8  ;;  %v3769_v49 = vmul.f32 %v13366_v58, %v13578_v23  ;;  %v5080_v8 = vld [vmem:[#allocation3 + $0x228] sm:$0xff] }
 0x546   : > { %v4438_v47 = vmul.f32 %v14023_v38, %v13553_v11  ;;  %v4091_v58 = vmul.f32 %v4065_v29, %v13570_v19 }
 0x547   : > { %4483 = vrot.lane.b32.xlu0 %v4439_v21, %s16312_s2 }
 0x548   : > { %v4584_v40 = vpop.permute.xlu1 %4583  ;;  %4481 = vrot.lane.b32.xlu1 %v4438_v47, %s16312_s2  ;;  %v4140_v12 = vpop.permute.xlu0 %4139 }
 0x549   : > { %v4159_v50 = vsel %vm1428_vm4, %v13867_v62, %v4140_v12  ;;  %v4591_v29 = vsel %vm1428_vm4, %v13348_v25, %v4584_v40  ;;  %v4609_v6 = vmul.f32 %v14025_v4, %v4584_v40  ;;  %v5087_v40 = vld [vmem:[#allocation3 + $0x260] sm:$0xff] }
 0x54a   : > { %v4608_v18 = vmul.f32 %v4591_v29, %v13553_v11  ;;  %v10428_v57 = vpack.c.bf16 %v4159_v50, %v13973_v59  ;;  %v5088_v11 = vld [vmem:[#allocation3 + $0x268] sm:$0xff] }
 0x54b   : > { %3822 = vrot.lane.b32.xlu0 %v3769_v49, %s11391_s11  ;;  %v10434_v47 = vpack.c.bf16 %v5088_v11, %v5080_v8 }
 0x54c   : > { %v3817_v37 = vpop.permute.xlu1 %3816  ;;  %3820 = vrot.lane.b32.xlu1 %v3768_v63, %s11391_s11  ;;  %v14042_v30 = vpop.permute.xlu0 %3818  ;;  %s16302_s11 = smov 17  }
 0x54d   : > { %v3836_v22 = vsel %vm1231_vm5, %v13845_v53, %v3817_v37  ;;  %v3837_v46 = vsel %vm1231_vm5, %v3817_v37, %v14042_v30 }
 0x54e   : > { %v10420_v62 = vpack.c.bf16 %v3836_v22, %v13945_v28  ;;  %v10418_v43 = vpack.c.bf16 %v3837_v46, %v13949_v36  ;;  %v4261_v36 = vmul.f32 %v4235_v17, %v13570_v19  ;;  %v4447_v22 = vmul.f32 %v14023_v38, %v13578_v23 }
 0x54f   : > { %4501 = vrot.lane.b32.xlu0 %v4439_v21, %s16312_s2 }
 0x550   : > { %v4310_v27 = vpop.permute.xlu1 %4309  ;;  %4143 = vrot.lane.b32.xlu1 %v4091_v58, %s11390_s10  ;;  %v4768_v53 = vpop.permute.xlu0 %4767  ;;  %10419 = vmatprep.subr.bf16.mxu0 %v10418_v43 }
 0x551   : > { %v4329_v9 = vsel %vm1531_vm3, %v13878_v24, %v4310_v27  ;;  %v14057_v28 = vsel %vm1802_vm7, %v13902_v42, %v4768_v53  ;;  %10421 = vmatpush1.bf16.msra.mxu0 %v10420_v62 }
 0x552   : > { %10423 = vmatprep.subr.bf16.mxu0 %v10422_v0  ;;  %v10432_v59 = vpack.c.bf16 %v4329_v9, %v13993_v13  ;;  %v11069_v13 = vpack.i.bf16 %v14025_v4, %v14025_v4 }
 0x553   : > { %4145 = vrot.lane.b32.xlu0 %v4092_v5, %s11390_s10  ;;  %s11397_s10 = smov 15  }
 0x554   : > { %v14063_v24 = vpop.permute.xlu1 %4141  ;;  %4313 = vrot.lane.b32.xlu1 %v4261_v36, %s16308_s7 }
 0x555   : > { %v4160_v34 = vsel %vm1428_vm4, %v4140_v12, %v14063_v24  ;;  %v4786_v42 = vpop.permute.xlu0 %4785  ;;  %10425 = vmatpush1.bf16.msra.mxu0 %v10424_v3  ;;  %v5079_v12 = vld [vmem:[#allocation3 + $0x220] sm:$0xff] }
 0x556   : > { %v14073_v19 = vsel %vm1802_vm7, %v13907_v26, %v4786_v42  ;;  %v10426_v25 = vpack.c.bf16 %v4160_v34, %v13981_v14  ;;  %v10436_v49 = vpack.c.bf16 %v5087_v40, %v5079_v12 }
 0x557   : > { %4315 = vrot.lane.b32.xlu0 %v4262_v16, %s16308_s7 }
 0x558   : > { %v4666_v20 = vpop.permute.xlu1 %4665  ;;  %10427 = vmatprep.subr.bf16.mxu0 %v10426_v25  ;;  %4651 = vrot.lane.b32.xlu1 %v4608_v18, %s11387_s12 }
 0x559   : > { %v4685_v7 = vsel %vm1375_vm1, %v13927_v55, %v4666_v20  ;;  %v14083_v26 = vpop.permute.xlu0 %4311  ;;  %10429 = vmatpush1.bf16.msra.mxu0 %v10428_v57 }
 0x55a   : > { %v4330_v14 = vsel %vm1531_vm3, %v4310_v27, %v14083_v26  ;;  %v10444_v36 = vpack.c.bf16 %v4685_v7, %v14019_v48  ;;  %v4857_v7 = vld [vmem:[#allocation2 + $0x90] sm:$0xff] }
 0x55b   : > { %v10430_v17 = vpack.c.bf16 %v4330_v14, %v14000_v60  ;;  %4653 = vrot.lane.b32.xlu0 %v4609_v6, %s11387_s12 }
 0x55c   : > { %v14089_v44 = vpop.permute.xlu1 %4769  ;;  %4771 = vrot.lane.b32.xlu1 %v4728_v41, %s11393_s23 }
 0x55d   : > { %v4798_v55 = vsel %vm1802_vm7, %v4768_v53, %v14089_v44  ;;  %v4496_v21 = vpop.permute.xlu0 %4495  ;;  %10431 = vmatprep.subr.bf16.mxu0 %v10430_v17  ;;  %v5160_v17 = vld [vmem:[%s11465_s19 + $0x8] sm:$0xff] }
 0x55e   : > { %v4515_v60 = vsel %vm1478_vm2, %v13920_v39, %v4496_v21  ;;  %10433 = vmatpush1.bf16.msra.mxu0 %v10432_v59  ;;  %v5159_v59 = vld [vmem:[%s11465_s19] sm:$0xff] }
 0x55f   : > { %10435 = vmatprep.subr.bf16.mxu0 %v10434_v47  ;;  %4671 = vrot.lane.b32.xlu0 %v4609_v6, %s11387_s12  ;;  %v10440_v27 = vpack.c.bf16 %v4515_v60, %v14011_v32 }
 0x560   : > { %v14098_v50 = vpop.permute.xlu1 %4479  ;;  %4789 = vrot.lane.b32.xlu1 %v13578_v23, %s11393_s23 }
 0x561   : > { %v4508_v63 = vsel %vm1478_vm2, %v14005_v56, %v14098_v50  ;;  %v14107_v37 = vpop.permute.xlu0 %4649 }
 0x562   : > { %v4678_v39 = vsel %vm1375_vm1, %v14014_v33, %v14107_v37  ;;  %10437 = vmatpush1.bf16.msra.mxu0 %v10436_v49  ;;  %v4617_v33 = vmul.f32 %v4591_v29, %v13578_v23 }
 0x563   : > { %11070 = vrot.lane.b32.xlu0 %v11069_v13, %s11393_s23 }
 0x564   : > { %v14115_v46 = vpop.permute.xlu1 %4497  ;;  %4499 = vrot.lane.b32.xlu1 %v4447_v22, %s16312_s2 }
 0x565   : > { %v4516_v56 = vsel %vm1478_vm2, %v4496_v21, %v14115_v46  ;;  %v14120_v62 = vpop.permute.xlu0 %4667 }
 0x566   : > { %v4686_v58 = vsel %vm1375_vm1, %v4666_v20, %v14120_v62  ;;  %v10438_v43 = vpack.c.bf16 %v4516_v56, %v4508_v63 }
 0x567   : > { %v10442_v9 = vpack.c.bf16 %v4686_v58, %v4678_v39 }
 0x568   : > { %v14126_v38 = vpop.permute.xlu1 %4787  ;;  %10439 = vmatprep.subr.bf16.mxu0 %v10438_v43  ;;  %4669 = vrot.lane.b32.xlu1 %v4617_v33, %s11387_s12  ;;  %s11396_s12 = smov 113  }
 0x569   : > { %v4806_v53 = vsel %vm1802_vm7, %v4786_v42, %v14126_v38  ;;  %v4938_v0 = vpop.permute.xlu0 %4937  ;;  %10441 = vmatpush1.bf16.msra.mxu0 %v10440_v27  ;;  %v10448_v42 = vpack.c.bf16 %v14073_v19, %v14057_v28 }
 0x56a   : > { %v4967_v5 = vsel %vm1178_vm0, %v13931_v10, %v4938_v0  ;;  %10443 = vmatprep.subr.bf16.mxu0 %v10442_v9  ;;  %v10446_v32 = vpack.c.bf16 %v4806_v53, %v4798_v55 }
 0x56c   : > { %v14134_v23 = vpop.permute.xlu1 %4939 }
 0x56d   : > { %v4968_v29 = vsel %vm1178_vm0, %v4938_v0, %v14134_v23  ;;  %v4956_v3 = vpop.permute.xlu0 %4955  ;;  %10445 = vmatpush1.bf16.msra.mxu0 %v10444_v36 }
 0x56e   : > { %v4975_v34 = vsel %vm1178_vm0, %v13951_v15, %v4956_v3  ;;  %10447 = vmatprep.subr.bf16.mxu0 %v10446_v32 }
 0x56f   : > { %v10452_v57 = vpack.c.bf16 %v4975_v34, %v4967_v5 }
 0x570   : > { %v14142_v16 = vpop.permute.xlu1 %4957 }
 0x571   : > { %v4976_v10 = vsel %vm1178_vm0, %v4956_v3, %v14142_v16  ;;  %v4874_v48 = vpop.permute.xlu0 %4873  ;;  %10449 = vmatpush1.bf16.msra.mxu0 %v10448_v42 }
 0x572   : > { %v4881_v25 = vsel %vm1231_vm5, %v13358_v61, %v4874_v48  ;;  %v4899_v18 = vmul.f32 %v14025_v4, %v4874_v48  ;;  %v10450_v6 = vpack.c.bf16 %v4976_v10, %v4968_v29 }
 0x573   : > { %v4898_v20 = vmul.f32 %v4881_v25, %v4728_v41  ;;  %v4907_v4 = vmul.f32 %v4881_v25, %v4857_v7  ;;  %v5089_v7 = vld [vmem:[#allocation3 + $0x270] sm:$0xff] }
 0x574   : > { %4943 = vrot.lane.b32.xlu1 %v4899_v18, %s11386_s0  ;;  %v3803_v15 = vpop.permute.xlu1 %3802  ;;  %10451 = vmatprep.subr.bf16.mxu0 %v10450_v6  ;;  %v5090_v6 = vld [vmem:[#allocation3 + $0x278] sm:$0xff] }
 0x575   : > { %v3830_v28 = vsel %vm1231_vm5, %v13892_v45, %v3803_v15  ;;  %4941 = vrot.lane.b32.xlu0 %v4898_v20, %s11386_s0  ;;  %v3805_v19 = vpop.permute.xlu0 %3804  ;;  %10453 = vmatpush1.bf16.msra.mxu0 %v10452_v57  ;;  %v5082_v57 = vld [vmem:[#allocation3 + $0x238] sm:$0xff] }
 0x576   : > { %v3831_v61 = vsel %vm1231_vm5, %v3803_v15, %v3805_v19  ;;  %v10470_v19 = vpack.c.bf16 %v5090_v6, %v5082_v57  ;;  %v5860_v6 = vld [vmem:[%s11550_s20 + $0x90] sm:$0xff] }
 0x578   : > { %4961 = vrot.lane.b32.xlu1 %v4899_v18, %s11386_s0  ;;  %v3923_v14 = vpop.permute.xlu1 %3922  ;;  %5397 = vmatmul.mubr.f32.vlgmr.msra.gmra.mrb[16].mxu0 %v13883_v35 }
 0x579   : > { %v3950_v11 = vsel %vm1292_vm6, %v13955_v52, %v3923_v14  ;;  %4959 = vrot.lane.b32.xlu0 %v4907_v4, %s11386_s0  ;;  %v3925_v45 = vpop.permute.xlu0 %3924  ;;  %10014 = vmatprep.mubr.msk.f32.mxu0 %vm5171_vm13, %v13888_v54  ;;  %v5845_v4 = vld [vmem:[%s11550_s20 + $0x18] sm:$0xff] }
 0x57a   : > { %v3951_v41 = vsel %vm1292_vm6, %v3923_v14, %v3925_v45  ;;  %v5081_v14 = vld [vmem:[#allocation3 + $0x230] sm:$0xff]  ;;  %v5842_v45 = vld [vmem:[%s11550_s20] sm:$0xff] }
 0x57c   : > { %5168 = vperm.xlu1 %11063, %v5160_v17   ;;  %v3941_v8 = vpop.permute.xlu1 %3940  ;;  %5403 = vmatmul.mubr.f32.gmra.mrb[18].mxu0 %v13898_v51  ;;  %v5844_v17 = vld [vmem:[%s11550_s20 + $0x10] sm:$0xff] }
 0x57d   : > { %v3958_v55 = vsel %vm1292_vm6, %v13966_v1, %v3941_v8  ;;  %5163 = vperm.xlu0 %11062, %v5159_v59   ;;  %v3943_v21 = vpop.permute.xlu0 %3942  ;;  %v10472_v59 = vpack.c.bf16 %v5089_v7, %v5081_v14  ;;  %v5867_v7 = vld [vmem:[%s11550_s20 + $0xc8] sm:$0xff] }
 0x57e   : > { %v3959_v52 = vsel %vm1292_vm6, %v3941_v8, %v3943_v21  ;;  %v10460_v47 = vpack.c.bf16 %v3958_v55, %v3950_v11  ;;  %v10492_v8 = vpack.c.bf16 %v5844_v17, %v5842_v45  ;;  %v5847_v21 = vld [vmem:[%s11550_s20 + $0x28] sm:$0xff]  ;;  %v5868_v45 = vld [vmem:[%s11550_s20 + $0xd0] sm:$0xff] }
 0x57f   : > { %v10458_v40 = vpack.c.bf16 %v3959_v52, %v3951_v41  ;;  %v5849_v52 = vld [vmem:[%s11550_s20 + $0x38] sm:$0xff] }
 0x5ad   : > { %v4128_v60 = vpop.permute.xlu0 %4127 }
 0x5ae   : > { %v4126_v12 = vpop.permute.xlu1 %4125 }
 0x5af   : > { %v4153_v13 = vsel %vm1428_vm4, %v13977_v2, %v4126_v12  ;;  %v4154_v49 = vsel %vm1428_vm4, %v4126_v12, %v4128_v60  ;;  %v5848_v60 = vld [vmem:[%s11550_s20 + $0x30] sm:$0xff] }
 0x5b0   : > { %4185 = vst [vmem:[#allocation3 + $0x130] sm:$0xff] %v4153_v13  ;;  %4186 = vst [vmem:[#allocation3 + $0x138] sm:$0xff] %v4154_v49 }
 0x5b5   : > { %v4298_v63 = vpop.permute.xlu0 %4297 }
 0x5b6   : > { %v4296_v39 = vpop.permute.xlu1 %4295 }
 0x5b7   : > { %v4323_v1 = vsel %vm1531_vm3, %v13996_v31, %v4296_v39  ;;  %v4324_v22 = vsel %vm1531_vm3, %v4296_v39, %v4298_v63  ;;  %v5853_v63 = vld [vmem:[%s11550_s20 + $0x58] sm:$0xff] }
 0x5b9   : > { %v4484_v56 = vpop.permute.xlu0 %4483 }
 0x5ba   : > { %v4482_v58 = vpop.permute.xlu1 %4481 }
 0x5bb   : > { %v14176_v43 = vsel %vm1478_vm2, %v14098_v50, %v4482_v58  ;;  %v14179_v33 = vsel %vm1478_vm2, %v4482_v58, %v4484_v56  ;;  %v5850_v56 = vld [vmem:[%s11550_s20 + $0x40] sm:$0xff]  ;;  %v5852_v58 = vld [vmem:[%s11550_s20 + $0x50] sm:$0xff] }
 0x5bd   : > { %v3823_v2 = vpop.permute.xlu0 %3822 }
 0x5be   : > { %v3821_v27 = vpop.permute.xlu1 %3820 }
 0x5bf   : > { %v3838_v9 = vsel %vm1231_vm5, %v14042_v30, %v3821_v27  ;;  %v3839_v53 = vsel %vm1231_vm5, %v3821_v27, %v3823_v2 }
 0x5c0   : > { %v10454_v0 = vpack.c.bf16 %v3839_v53, %v3831_v61  ;;  %v10456_v31 = vpack.c.bf16 %v3838_v9, %v3830_v28  ;;  %v10500_v9 = vpack.c.bf16 %v5852_v58, %v5850_v56 }
 0x5c1   : > { %v14184_v5 = vpop.permute.xlu0 %4501 }
 0x5c2   : > { %v4144_v36 = vpop.permute.xlu1 %4143  ;;  %10455 = vmatprep.subr.bf16.mxu1 %v10454_v0 }
 0x5c3   : > { %v4161_v50 = vsel %vm1428_vm4, %v14063_v24, %v4144_v36  ;;  %10457 = vmatpush1.bf16.msra.mxu1 %v10456_v31 }
 0x5c4   : > { %10459 = vmatprep.subr.bf16.mxu1 %v10458_v40  ;;  %v10464_v10 = vpack.c.bf16 %v4161_v50, %v4153_v13  ;;  %v5846_v40 = vld [vmem:[%s11550_s20 + $0x20] sm:$0xff]  ;;  %v5855_v50 = vld [vmem:[%s11550_s20 + $0x68] sm:$0xff] }
 0x5c5   : > { %v4146_v32 = vpop.permute.xlu0 %4145  ;;  %v10496_v13 = vpack.c.bf16 %v5848_v60, %v5846_v40 }
 0x5c6   : > { %v4162_v29 = vsel %vm1428_vm4, %v4144_v36, %v4146_v32  ;;  %v4314_v3 = vpop.permute.xlu1 %4313  ;;  %v5857_v32 = vld [vmem:[%s11550_s20 + $0x78] sm:$0xff] }
 0x5c7   : > { %v4331_v30 = vsel %vm1531_vm3, %v14083_v26, %v4314_v3  ;;  %10461 = vmatpush1.bf16.msra.mxu1 %v10460_v47  ;;  %v10462_v34 = vpack.c.bf16 %v4162_v29, %v4154_v49  ;;  %v10494_v47 = vpack.c.bf16 %v5849_v52, %v5847_v21  ;;  %v5851_v49 = vld [vmem:[%s11550_s20 + $0x48] sm:$0xff]  ;;  %v10502_v29 = vpack.c.bf16 %v5857_v32, %v5855_v50  ;;  %v5880_v50 = vld [vmem:[%s11550_s20 + $0x130] sm:$0xff] }
 0x5c8   : > { %v10468_v26 = vpack.c.bf16 %v4331_v30, %v4323_v1 }
 0x5c9   : > { %v4316_v42 = vpop.permute.xlu0 %4315  ;;  %10463 = vmatprep.subr.bf16.mxu1 %v10462_v34 }
 0x5ca   : > { %v4332_v48 = vsel %vm1531_vm3, %v4314_v3, %v4316_v42  ;;  %v4652_v25 = vpop.permute.xlu1 %4651 }
 0x5cb   : > { %v14194_v24 = vsel %vm1375_vm1, %v14107_v37, %v4652_v25  ;;  %10465 = vmatpush1.bf16.msra.mxu1 %v10464_v10  ;;  %v10466_v18 = vpack.c.bf16 %v4332_v48, %v4324_v22  ;;  %v5843_v37 = vld [vmem:[%s11550_s20 + $0x8] sm:$0xff]  ;;  %v5861_v48 = vld [vmem:[%s11550_s20 + $0x98] sm:$0xff] }
 0x5cc   : > { %v10490_v11 = vpack.c.bf16 %v5845_v4, %v5843_v37  ;;  %v5859_v10 = vld [vmem:[%s11550_s20 + $0x88] sm:$0xff]  ;;  %v5869_v37 = vld [vmem:[%s11550_s20 + $0xd8] sm:$0xff] }
 0x5cd   : > { %v4654_v20 = vpop.permute.xlu0 %4653  ;;  %10467 = vmatprep.subr.bf16.mxu1 %v10466_v18  ;;  %v10506_v18 = vpack.c.bf16 %v5861_v48, %v5859_v10  ;;  %v10514_v14 = vpack.c.bf16 %v5869_v37, %v5867_v7  ;;  %v5888_v10 = vld [vmem:[%s11550_s20 + $0x170] sm:$0xff]  ;;  %v5891_v48 = vld [vmem:[%s11550_s20 + $0x188] sm:$0xff] }
 0x5ce   : > { %v14197_v15 = vsel %vm1375_vm1, %v4652_v25, %v4654_v20  ;;  %v4772_v28 = vpop.permute.xlu1 %4771  ;;  %10491 = vmatprep.subr.bf16.mxu0 %v10490_v11  ;;  %v5858_v25 = vld [vmem:[%s11550_s20 + $0x80] sm:$0xff]  ;;  %v5865_v20 = vld [vmem:[%s11550_s20 + $0xb8] sm:$0xff] }
 0x5cf   : > { %v14201_v61 = vsel %vm1802_vm7, %v14089_v44, %v4772_v28  ;;  %10469 = vmatpush1.bf16.msra.mxu1 %v10468_v26  ;;  %10493 = vmatpush1.bf16.msra.mxu0 %v10492_v8  ;;  %v10508_v57 = vpack.c.bf16 %v5860_v6, %v5858_v25  ;;  %v5866_v11 = vld [vmem:[%s11550_s20 + $0xc0] sm:$0xff]  ;;  %v5893_v25 = vld [vmem:[%s11550_s20 + $0x198] sm:$0xff] }
 0x5d0   : > { %10471 = vmatprep.subr.bf16.mxu1 %v10470_v19  ;;  %10495 = vmatprep.subr.bf16.mxu0 %v10494_v47 }
 0x5d1   : > { %v4672_v41 = vpop.permute.xlu0 %4671 }
 0x5d2   : > { %v4790_v55 = vpop.permute.xlu1 %4789 }
 0x5d3   : > { %v14209_v44 = vsel %vm1802_vm7, %v14126_v38, %v4790_v55  ;;  %10473 = vmatpush1.bf16.msra.mxu1 %v10472_v59  ;;  %v10498_v38 = vpack.c.bf16 %v5853_v63, %v5851_v49  ;;  %10497 = vmatpush1.bf16.msra.mxu0 %v10496_v13  ;;  %v5873_v59 = vld [vmem:[%s11550_s20 + $0xf8] sm:$0xff]  ;;  %v5870_v63 = vld [vmem:[%s11550_s20 + $0xe0] sm:$0xff] }
 0x5d4   : > { %v10484_v19 = vpack.c.bf16 %v14209_v44, %v14201_v61  ;;  %v10516_v61 = vpack.c.bf16 %v5868_v45, %v5866_v11 }
 0x5d5   : > { %v11071_v12 = vpop.permute.xlu0 %11070  ;;  %10499 = vmatprep.subr.bf16.mxu0 %v10498_v38  ;;  %v5877_v38 = vld [vmem:[%s11550_s20 + $0x118] sm:$0xff] }
 0x5d6   : > { %v11073_v39 = vunpack.i.h.bf16 %v11071_v12  ;;  %v11072_v1 = vunpack.i.l.bf16 %v11071_v12  ;;  %v4500_v22 = vpop.permute.xlu1 %4499 }
 0x5d7   : > { %v4517_v2 = vsel %vm1478_vm2, %v14115_v46, %v4500_v22  ;;  %v4518_v27 = vsel %vm1478_vm2, %v4500_v22, %v14184_v5  ;;  %v5854_v46 = vld [vmem:[%s11550_s20 + $0x60] sm:$0xff]  ;;  %v5856_v5 = vld [vmem:[%s11550_s20 + $0x70] sm:$0xff]  ;;  %10501 = vmatpush1.bf16.msra.mxu0 %v10500_v9 }
 0x5d8   : > { %v4808_v53 = vsel %vm1802_vm7, %v4790_v55, %v11073_v39  ;;  %v4800_v0 = vsel %vm1802_vm7, %v4772_v28, %v11072_v1  ;;  %v10474_v31 = vpack.c.bf16 %v4518_v27, %v14179_v33  ;;  %v10476_v36 = vpack.c.bf16 %v4517_v2, %v14176_v43  ;;  %10503 = vmatprep.subr.bf16.mxu0 %v10502_v29  ;;  %v5864_v28 = vld [vmem:[%s11550_s20 + $0xb0] sm:$0xff]  ;;  %v5874_v2 = vld [vmem:[%s11550_s20 + $0x100] sm:$0xff] }
 0x5d9   : > { %v10504_v43 = vpack.c.bf16 %v5856_v5, %v5854_v46  ;;  %v10482_v26 = vpack.c.bf16 %v4808_v53, %v4800_v0  ;;  %v5872_v39 = vld [vmem:[%s11550_s20 + $0xf0] sm:$0xff]  ;;  %v5879_v53 = vld [vmem:[%s11550_s20 + $0x128] sm:$0xff]  ;;  %v5881_v0 = vld [vmem:[%s11550_s20 + $0x138] sm:$0xff] }
 0x5da   : > { %v4670_v3 = vpop.permute.xlu1 %4669  ;;  %10475 = vmatprep.subr.bf16.mxu1 %v10474_v31  ;;  %v10520_v1 = vpack.c.bf16 %v5872_v39, %v5870_v63  ;;  %v5876_v27 = vld [vmem:[%s11550_s20 + $0x110] sm:$0xff]  ;;  %v10526_v31 = vpack.c.bf16 %v5881_v0, %v5879_v53  ;;  %v5885_v46 = vld [vmem:[%s11550_s20 + $0x158] sm:$0xff]  ;;  %v5882_v29 = vld [vmem:[%s11550_s20 + $0x140] sm:$0xff] }
 0x5db   : > { %v4687_v30 = vsel %vm1375_vm1, %v14120_v62, %v4670_v3  ;;  %v4688_v33 = vsel %vm1375_vm1, %v4670_v3, %v4672_v41  ;;  %10477 = vmatpush1.bf16.msra.mxu1 %v10476_v36  ;;  %v5863_v62 = vld [vmem:[%s11550_s20 + $0xa8] sm:$0xff]  ;;  %10505 = vmatpush1.bf16.msra.mxu0 %v10504_v43  ;;  %v10524_v9 = vpack.c.bf16 %v5876_v27, %v5874_v2  ;;  %v5878_v36 = vld [vmem:[%s11550_s20 + $0x120] sm:$0xff]  ;;  %v5884_v5 = vld [vmem:[%s11550_s20 + $0x150] sm:$0xff] }
 0x5dc   : > { %v10478_v34 = vpack.c.bf16 %v4688_v33, %v14197_v15  ;;  %v10480_v42 = vpack.c.bf16 %v4687_v30, %v14194_v24  ;;  %10507 = vmatprep.subr.bf16.mxu0 %v10506_v18  ;;  %v10510_v24 = vpack.c.bf16 %v5865_v20, %v5863_v62  ;;  %v5862_v15 = vld [vmem:[%s11550_s20 + $0xa0] sm:$0xff]  ;;  %v5871_v41 = vld [vmem:[%s11550_s20 + $0xe8] sm:$0xff]  ;;  %v10528_v32 = vpack.c.bf16 %v5880_v50, %v5878_v36  ;;  %v5889_v43 = vld [vmem:[%s11550_s20 + $0x178] sm:$0xff] }
 0x5dd   : > { %v10512_v4 = vpack.c.bf16 %v5864_v28, %v5862_v15  ;;  %v10518_v44 = vpack.c.bf16 %v5873_v59, %v5871_v41  ;;  %v10532_v3 = vpack.c.bf16 %v5884_v5, %v5882_v29  ;;  %v5887_v33 = vld [vmem:[%s11550_s20 + $0x168] sm:$0xff]  ;;  %v10538_v62 = vpack.c.bf16 %v5893_v25, %v5891_v48  ;;  %v5890_v20 = vld [vmem:[%s11550_s20 + $0x180] sm:$0xff]  ;;  %v5901_v59 = vld [vmem:[%s11550_s20 + $0x1d8] sm:$0xff] }
 0x5de   : > { %10479 = vmatprep.subr.bf16.mxu1 %v10478_v34  ;;  %v5895_v28 = vld [vmem:[%s11550_s20 + $0x1a8] sm:$0xff]  ;;  %v5905_v39 = vld [vmem:[%s11550_s20 + $0x1f8] sm:$0xff]  ;;  %v5902_v2 = vld [vmem:[%s11550_s20 + $0x1e0] sm:$0xff] }
 0x5df   : > { %10481 = vmatpush1.bf16.msra.mxu1 %v10480_v42  ;;  %10509 = vmatpush1.bf16.msra.mxu0 %v10508_v57  ;;  %v10534_v42 = vpack.c.bf16 %v5889_v43, %v5887_v33  ;;  %v5899_v41 = vld [vmem:[%s11550_s20 + $0x1c8] sm:$0xff]  ;;  %v5904_v27 = vld [vmem:[%s11550_s20 + $0x1f0] sm:$0xff] }
 0x5e0   : > { %10483 = vmatprep.subr.bf16.mxu1 %v10482_v26  ;;  %10511 = vmatprep.subr.bf16.mxu0 %v10510_v24  ;;  %v5892_v26 = vld [vmem:[%s11550_s20 + $0x190] sm:$0xff]  ;;  %v5903_v63 = vld [vmem:[%s11550_s20 + $0x1e8] sm:$0xff]  ;;  %v10552_v0 = vpack.c.bf16 %v5904_v27, %v5902_v2 }
 0x5e1   : > { %v10540_v24 = vpack.c.bf16 %v5892_v26, %v5890_v20  ;;  %v5907_v50 = vld [vmem:[%s11550_s20 + $0x208] sm:$0xff] }
 0x5e3   : > { %10485 = vmatpush1.bf16.msra.mxu1 %v10484_v19  ;;  %10513 = vmatpush1.bf16.msra.mxu0 %v10512_v4  ;;  %v5897_v19 = vld [vmem:[%s11550_s20 + $0x1b8] sm:$0xff]  ;;  %v5894_v4 = vld [vmem:[%s11550_s20 + $0x1a0] sm:$0xff] }
 0x5e4   : > { %10515 = vmatprep.subr.bf16.mxu0 %v10514_v14  ;;  %v10542_v37 = vpack.c.bf16 %v5897_v19, %v5895_v28  ;;  %v5896_v14 = vld [vmem:[%s11550_s20 + $0x1b0] sm:$0xff] }
 0x5e5   : > { %v10544_v45 = vpack.c.bf16 %v5896_v14, %v5894_v4 }
 0x5e6   : > { %v4944_v17 = vpop.permute.xlu1 %4943 }
 0x5e7   : > { %v4942_v8 = vpop.permute.xlu0 %4941  ;;  %10517 = vmatpush1.bf16.msra.mxu0 %v10516_v61  ;;  %v10546_v61 = vpack.c.bf16 %v5901_v59, %v5899_v41 }
 0x5e8   : > { %v4969_v55 = vsel %vm1178_vm0, %v14134_v23, %v4942_v8  ;;  %v4970_v21 = vsel %vm1178_vm0, %v4942_v8, %v4944_v17  ;;  %10519 = vmatprep.subr.bf16.mxu0 %v10518_v44  ;;  %v5898_v44 = vld [vmem:[%s11550_s20 + $0x1c0] sm:$0xff] }
 0x5ea   : > { %v4962_v52 = vpop.permute.xlu1 %4961 }
 0x5eb   : > { %v4960_v47 = vpop.permute.xlu0 %4959  ;;  %v5244_v12 = vpop.f32.mrb[12].mxu0  ;;  %10521 = vmatpush1.bf16.msra.mxu0 %v10520_v1 }
 0x5ec   : > { %v4977_v40 = vsel %vm1178_vm0, %v14142_v16, %v4960_v47  ;;  %v4978_v60 = vsel %vm1178_vm0, %v4960_v47, %v4962_v52  ;;  %v5246_v49 = vpop.f32.mrb[13].mxu0  ;;  %v5875_v16 = vld [vmem:[%s11550_s20 + $0x108] sm:$0xff]  ;;  %v5900_v52 = vld [vmem:[%s11550_s20 + $0x1d0] sm:$0xff] }
 0x5ed   : > { %v10486_v23 = vpack.c.bf16 %v4978_v60, %v4970_v21  ;;  %v10488_v13 = vpack.c.bf16 %v4977_v40, %v4969_v55  ;;  %v10522_v58 = vpack.c.bf16 %v5877_v38, %v5875_v16  ;;  %v10548_v60 = vpack.c.bf16 %v5900_v52, %v5898_v44 }
 0x5ef   : > { %10487 = vmatprep.subr.bf16.mxu1 %v10486_v23  ;;  %v5250_v22 = vpop.f32.mrb[14].mxu0  ;;  %10523 = vmatprep.subr.bf16.mxu0 %v10522_v58  ;;  %v10550_v58 = vpack.c.bf16 %v5905_v39, %v5903_v63 }
 0x5f0   : > { %10489 = vmatpush1.bf16.msra.mxu1 %v10488_v13  ;;  %v14262_v56 = vpop.f32.mrb[15].mxu0  ;;  %10525 = vmatpush1.bf16.msra.mxu0 %v10524_v9 }
 0x5f1   : > { %10527 = vmatprep.subr.bf16.mxu0 %v10526_v31 }
 0x5f3   : > { %5474 = vmatmul.mubr.f32.vlgmr.msra.gmra.mrb[16].mxu1 %v13883_v35  ;;  %v5883_v35 = vld [vmem:[%s11550_s20 + $0x148] sm:$0xff] }
 0x5f4   : > { %10016 = vmatprep.mubr.msk.f32.mxu1 %vm5171_vm13, %v13888_v54  ;;  %10529 = vmatpush1.bf16.msra.mxu0 %v10528_v32  ;;  %v10530_v54 = vpack.c.bf16 %v5885_v46, %v5883_v35  ;;  %v5909_v32 = vld [vmem:[%s11550_s20 + $0x218] sm:$0xff] }
 0x5f5   : > { %v10554_v35 = vpack.c.bf16 %v5909_v32, %v5907_v50 }
 0x5f6   : > { %10531 = vmatprep.subr.bf16.mxu0 %v10530_v54 }
 0x5f7   : > { %5480 = vmatmul.mubr.f32.gmra.mrb[18].mxu1 %v13898_v51  ;;  %v5886_v51 = vld [vmem:[%s11550_s20 + $0x160] sm:$0xff] }
 0x5f8   : > { %10533 = vmatpush1.bf16.msra.mxu0 %v10532_v3  ;;  %v10536_v6 = vpack.c.bf16 %v5888_v10, %v5886_v51 }
 0x5f9   : > { %10535 = vmatprep.subr.bf16.mxu0 %v10534_v42 }
 0x5fb   : > { %v14293_v15 = vpop.permute.xlu1 %5168 }
 0x5fc   : > { %v14278_v30 = vpop.permute.xlu0 %5163  ;;  %10537 = vmatpush1.bf16.msra.mxu0 %v10536_v6  ;;  %v5251_v11 = vadd.f32 %v5250_v22, %v14293_v15  ;;  %v5253_v23 = vadd.f32 %v14262_v56, %v14293_v15 }
 0x5fd   : > { %v5245_v34 = vadd.f32 %v5244_v12, %v14278_v30  ;;  %10539 = vmatprep.subr.bf16.mxu0 %v10538_v62  ;;  %v5247_v7 = vadd.f32 %v5246_v49, %v14278_v30 }
 0x5fe   : > { %v5510_v47 = vmul.f32 0.1, %v5251_v11  ;;  %vm5494_vm5 = vcmp.ge.f32.partialorder %v5251_v11, 0.0  ;;  %v5511_v46 = vmul.f32 0.1, %v5253_v23  ;;  %vm5495_vm14 = vcmp.ge.f32.partialorder %v5253_v23, 0.0 }
 0x5ff   : > { %vm5486_vm1 = vcmp.ge.f32.partialorder %v5245_v34, 0.0  ;;  %v5502_v18 = vmul.f32 0.1, %v5245_v34  ;;  %v5503_v8 = vmul.f32 0.1, %v5247_v7  ;;  %vm5487_vm4 = vcmp.ge.f32.partialorder %v5247_v7, 0.0 }
 0x600   : > { %10541 = vmatpush1.bf16.msra.mxu0 %v10540_v24  ;;  %v14323_v9 = vsel %vm5494_vm5, %v5251_v11, %v5510_v47  ;;  %v14339_v29 = vsel %vm5495_vm14, %v5253_v23, %v5511_v46  ;;  %vm6596_vm14 = vcmask 121856  }
 0x601   : > { %v14289_v57 = vsel %vm5486_vm1, %v5245_v34, %v5502_v18  ;;  %10543 = vmatprep.subr.bf16.mxu0 %v10542_v37  ;;  %v14315_v1 = vsel %vm5487_vm4, %v5247_v7, %v5503_v8 }
 0x602   : > { %5590 = vrot.lane.b32.xlu1 %v14289_v57, %s16312_s2 }
 0x604   : > { %10545 = vmatpush1.bf16.msra.mxu0 %v10544_v45 }
 0x605   : > { %10547 = vmatprep.subr.bf16.mxu0 %v10546_v61 }
 0x606   : > { %5674 = vrot.lane.b32.xlu1 %v14289_v57, %s11393_s23 }
 0x607   : > { %v5321_v17 = vpop.f32.mrb[12].mxu1 }
 0x608   : > { %v5322_v55 = vadd.f32 %v5321_v17, %v14278_v30  ;;  %v5323_v21 = vpop.f32.mrb[13].mxu1  ;;  %10549 = vmatpush1.bf16.msra.mxu0 %v10548_v60 }
 0x609   : > { %v5324_v40 = vadd.f32 %v5323_v21, %v14278_v30  ;;  %10551 = vmatprep.subr.bf16.mxu0 %v10550_v58 }
 0x60a   : > { %5758 = vrot.lane.b32.xlu1 %v14289_v57, %s11386_s0  ;;  %vm5488_vm10 = vcmp.ge.f32.partialorder %v5322_v55, 0.0  ;;  %v5504_v12 = vmul.f32 0.1, %v5322_v55 }
 0x60b   : > { %vm5489_vm11 = vcmp.ge.f32.partialorder %v5324_v40, 0.0  ;;  %v5505_v13 = vmul.f32 0.1, %v5324_v40  ;;  %v5327_v49 = vpop.f32.mrb[14].mxu1 }
 0x60c   : > { %v14317_v22 = vsel %vm5488_vm10, %v5322_v55, %v5504_v12  ;;  %v5328_v16 = vadd.f32 %v5327_v49, %v14293_v15  ;;  %v5329_v38 = vpop.f32.mrb[15].mxu1  ;;  %10553 = vmatpush1.bf16.msra.mxu0 %v10552_v0 }
 0x60d   : > { %v14325_v56 = vsel %vm5489_vm11, %v5324_v40, %v5505_v13  ;;  %v11074_v53 = vpack.i.bf16 %v14317_v22, %v14315_v1  ;;  %10555 = vmatprep.subr.bf16.mxu0 %v10554_v35  ;;  %v5330_v33 = vadd.f32 %v5329_v38, %v14293_v15 }
 0x60e   : > { %v11089_v31 = vpack.i.bf16 %v14325_v56, %v14323_v9  ;;  %v5512_v36 = vmul.f32 0.1, %v5328_v16  ;;  %vm5496_vm12 = vcmp.ge.f32.partialorder %v5328_v16, 0.0 }
 0x60f   : > { %11075 = vrot.lane.b32.xlu0 %v11074_v53, %s16312_s2  ;;  %v5513_v25 = vmul.f32 0.1, %v5330_v33  ;;  %vm5497_vm9 = vcmp.ge.f32.partialorder %v5330_v33, 0.0 }
 0x610   : > { %11090 = vrot.lane.b32.xlu1 %v11089_v31, %s16312_s2  ;;  %v14335_v54 = vsel %vm5496_vm12, %v5328_v16, %v5512_v36  ;;  %v5913_v36 = vld [vmem:[%s11550_s20 + $0x238] sm:$0xff] }
 0x611   : > { %v11114_v5 = vpack.i.bf16 %v14335_v54, %v14339_v29  ;;  %v14361_v19 = vsel %vm5497_vm9, %v5330_v33, %v5513_v25 }
 0x613   : > { %11080 = vrot.lane.b32.xlu0 %v11074_v53, %s11393_s23 }
 0x614   : > { %11095 = vrot.lane.b32.xlu1 %v11089_v31, %s11393_s23 }
 0x617   : > { %11085 = vrot.lane.b32.xlu0 %v11074_v53, %s11386_s0  ;;  %v5908_v53 = vld [vmem:[%s11550_s20 + $0x210] sm:$0xff] }
 0x618   : > { %11115 = vrot.lane.b32.xlu1 %v11114_v5, %s11386_s0 }
 0x61b   : > { %11100 = vrot.lane.b32.xlu0 %v11089_v31, %s11386_s0 }
 0x61f   : > { %11105 = vrot.lane.b32.xlu0 %v11114_v5, %s16312_s2 }
 0x623   : > { %11110 = vrot.lane.b32.xlu0 %v11114_v5, %s11393_s23 }
 0x64b   : > { %v5398_v3 = vpop.f32.mrb[16].mxu0 }
 0x64c   : > { %v5399_v43 = vadd.f32 %v5398_v3, %v14278_v30  ;;  %v5400_v51 = vpop.f32.mrb[17].mxu0 }
 0x64d   : > { %v5401_v34 = vadd.f32 %v5400_v51, %v14278_v30  ;;  %v5912_v51 = vld [vmem:[%s11550_s20 + $0x230] sm:$0xff] }
 0x64e   : > { %vm5490_vm15 = vcmp.ge.f32.partialorder %v5399_v43, 0.0  ;;  %v5506_v42 = vmul.f32 0.1, %v5399_v43 }
 0x64f   : > { %vm5491_vm8 = vcmp.ge.f32.partialorder %v5401_v34, 0.0  ;;  %v5507_v10 = vmul.f32 0.1, %v5401_v34  ;;  %v5404_v48 = vpop.f32.mrb[18].mxu0 }
 0x650   : > { %v14351_v18 = vsel %vm5490_vm15, %v5399_v43, %v5506_v42  ;;  %v5405_v6 = vadd.f32 %v5404_v48, %v14293_v15  ;;  %v5406_v62 = vpop.f32.mrb[19].mxu0  ;;  %v5910_v43 = vld [vmem:[%s11550_s20 + $0x220] sm:$0xff]  ;;  %v5917_v42 = vld [vmem:[%s11550_s20 + $0x258] sm:$0xff]  ;;  %vm6499_vm15 = vcmask 138240  }
 0x651   : > { %v14354_v20 = vsel %vm5491_vm8, %v5401_v34, %v5507_v10  ;;  %v5407_v26 = vadd.f32 %v5406_v62, %v14293_v15  ;;  %5598 = vrot.lane.b32.xlu0 %v14351_v18, %s16312_s2  ;;  %5682 = vrot.lane.b32.xlu1 %v14351_v18, %s11393_s23  ;;  %v5915_v34 = vld [vmem:[%s11550_s20 + $0x248] sm:$0xff]  ;;  %v5914_v62 = vld [vmem:[%s11550_s20 + $0x240] sm:$0xff]  ;;  %vm6787_vm8 = vcmask 916480  }
 0x652   : > { %vm5498_vm1 = vcmp.ge.f32.partialorder %v5405_v6, 0.0  ;;  %v5514_v24 = vmul.f32 0.1, %v5405_v6 }
 0x653   : > { %vm5499_vm4 = vcmp.ge.f32.partialorder %v5407_v26, 0.0  ;;  %v5515_v28 = vmul.f32 0.1, %v5407_v26 }
 0x654   : > { %v14363_v7 = vsel %vm5498_vm1, %v5405_v6, %v5514_v24  ;;  %v10560_v6 = vpack.c.bf16 %v5912_v51, %v5910_v43 }
 0x655   : > { %v14365_v37 = vsel %vm5499_vm4, %v5407_v26, %v5515_v28  ;;  %5766 = vrot.lane.b32.xlu0 %v14351_v18, %s11386_s0  ;;  %v11119_v4 = vpack.i.bf16 %v14363_v7, %v14361_v19 }
 0x657   : > { %11120 = vrot.lane.b32.xlu1 %v11119_v4, %s16312_s2 }
 0x659   : > { %11125 = vrot.lane.b32.xlu0 %v11119_v4, %s11393_s23 }
 0x65d   : > { %11130 = vrot.lane.b32.xlu0 %v11119_v4, %s11386_s0 }
 0x674   : > { %v5591_v14 = vpop.permute.xlu1 %5590 }
 0x678   : > { %v5675_v11 = vpop.permute.xlu1 %5674 }
 0x67c   : > { %v5759_v45 = vpop.permute.xlu1 %5758 }
 0x681   : > { %v11076_v17 = vpop.permute.xlu0 %11075 }
 0x682   : > { %v11078_v41 = vunpack.i.h.bf16 %v11076_v17  ;;  %v11077_v59 = vunpack.i.l.bf16 %v11076_v17  ;;  %v14374_v8 = vpop.permute.xlu1 %11090  ;;  %v5921_v17 = vld [vmem:[%s11550_s20 + $0x278] sm:$0xff] }
 0x683   : > { %v11093_v55 = vunpack.i.h.bf16 %v14374_v8  ;;  %v11092_v26 = vunpack.i.l.bf16 %v14374_v8  ;;  %v5973_v8 = vld [vmem:[%s11550_s20 + $0x418] sm:$0xff] }
 0x684   : > { %v5626_v44 = vsel %vm1478_vm2, %v5591_v14, %v11077_v59  ;;  %v5627_v52 = vsel %vm1478_vm2, %v11077_v59, %v11078_v41  ;;  %v10562_v14 = vpack.c.bf16 %v5917_v42, %v5915_v34  ;;  %v5926_v34 = vld [vmem:[%s11550_s20 + $0x2a0] sm:$0xff]  ;;  %v5928_v42 = vld [vmem:[%s11550_s20 + $0x2b0] sm:$0xff] }
 0x685   : > { %v5628_v21 = vsel %vm1478_vm2, %v11078_v41, %v11093_v55  ;;  %v11081_v61 = vpop.permute.xlu0 %11080  ;;  %v5658_v63 = vmax.f32 %v14289_v57, %v5626_v44  ;;  %v5659_v38 = vmax.f32 %v14315_v1, %v5627_v52  ;;  %v5911_v57 = vld [vmem:[%s11550_s20 + $0x228] sm:$0xff] }
 0x686   : > { %v11083_v47 = vunpack.i.h.bf16 %v11081_v61  ;;  %v11082_v40 = vunpack.i.l.bf16 %v11081_v61  ;;  %v14382_v60 = vpop.permute.xlu1 %11095  ;;  %v5660_v23 = vmax.f32 %v14317_v22, %v5628_v21  ;;  %v5906_v22 = vld [vmem:[%s11550_s20 + $0x200] sm:$0xff]  ;;  %v10558_v33 = vpack.c.bf16 %v5913_v36, %v5911_v57 }
 0x687   : > { %v11098_v12 = vunpack.i.h.bf16 %v14382_v60  ;;  %v10556_v5 = vpack.c.bf16 %v5908_v53, %v5906_v22  ;;  %v11097_v21 = vunpack.i.l.bf16 %v14382_v60 }
 0x688   : > { %v5710_v13 = vsel %vm1802_vm7, %v5675_v11, %v11082_v40  ;;  %v5711_v49 = vsel %vm1802_vm7, %v11082_v40, %v11083_v47  ;;  %v5916_v11 = vld [vmem:[%s11550_s20 + $0x250] sm:$0xff] }
 0x689   : > { %v5712_v39 = vsel %vm1802_vm7, %v11083_v47, %v11098_v12  ;;  %v11086_v16 = vpop.permute.xlu0 %11085  ;;  %v5742_v0 = vmax.f32 %v5658_v63, %v5710_v13  ;;  %v5743_v31 = vmax.f32 %v5659_v38, %v5711_v49  ;;  %v10564_v52 = vpack.c.bf16 %v5916_v11, %v5914_v62  ;;  %v5918_v63 = vld [vmem:[%s11550_s20 + $0x260] sm:$0xff]  ;;  %v5933_v62 = vld [vmem:[%s11550_s20 + $0x2d8] sm:$0xff]  ;;  %v5932_v11 = vld [vmem:[%s11550_s20 + $0x2d0] sm:$0xff] }
 0x68a   : > { %v14393_v58 = vmax.f32 %v5660_v23, %v5712_v39  ;;  %v11088_v2 = vunpack.i.h.bf16 %v11086_v16  ;;  %v11087_v27 = vunpack.i.l.bf16 %v11086_v16  ;;  %v14419_v24 = vpop.permute.xlu1 %11115  ;;  %v5920_v39 = vld [vmem:[%s11550_s20 + $0x270] sm:$0xff] }
 0x68b   : > { %v11118_v61 = vunpack.i.h.bf16 %v14419_v24  ;;  %v11117_v40 = vunpack.i.l.bf16 %v14419_v24 }
 0x68c   : > { %v5794_v50 = vsel %vm1178_vm0, %v5759_v45, %v11087_v27  ;;  %v5795_v32 = vsel %vm1178_vm0, %v11087_v27, %v11088_v2  ;;  %v5919_v45 = vld [vmem:[%s11550_s20 + $0x268] sm:$0xff]  ;;  %v5925_v27 = vld [vmem:[%s11550_s20 + $0x298] sm:$0xff] }
 0x68d   : > { %v5826_v35 = vmax.f32 %v5742_v0, %v5794_v50  ;;  %v14401_v1 = vpop.permute.xlu0 %11100  ;;  %v5827_v46 = vmax.f32 %v5743_v31, %v5795_v32  ;;  %v10566_v47 = vpack.c.bf16 %v5921_v17, %v5919_v45  ;;  %v10568_v0 = vpack.c.bf16 %v5920_v39, %v5918_v63  ;;  %v5922_v50 = vld [vmem:[%s11550_s20 + $0x280] sm:$0xff]  ;;  %v5924_v32 = vld [vmem:[%s11550_s20 + $0x290] sm:$0xff]  ;;  %v5935_v45 = vld [vmem:[%s11550_s20 + $0x2e8] sm:$0xff] }
 0x68e   : > { %v11103_v3 = vunpack.i.h.bf16 %v14401_v1  ;;  %v11102_v23 = vunpack.i.l.bf16 %v14401_v1  ;;  %v10572_v43 = vpack.c.bf16 %v5924_v32, %v5922_v50  ;;  %v5937_v17 = vld [vmem:[%s11550_s20 + $0x2f8] sm:$0xff]  ;;  %v5938_v63 = vld [vmem:[%s11550_s20 + $0x300] sm:$0xff]  ;;  %v5940_v39 = vld [vmem:[%s11550_s20 + $0x310] sm:$0xff] }
 0x68f   : > { %6162 = vmatprep.mubr.f32.mxu0 %v5827_v46  ;;  %v5951_v50 = vld [vmem:[%s11550_s20 + $0x368] sm:$0xff]  ;;  %v5953_v32 = vld [vmem:[%s11550_s20 + $0x378] sm:$0xff] }
 0x690   : > { %v14411_v10 = vsel %vm1178_vm0, %v11088_v2, %v11103_v3  ;;  %6163 = vmatmul.mubr.f32.vlgmr.msra.gmra.mrb[20].mxu0 %v5826_v35  ;;  %v5923_v2 = vld [vmem:[%s11550_s20 + $0x288] sm:$0xff] }
 0x691   : > { %v5828_v48 = vmax.f32 %v14393_v58, %v14411_v10  ;;  %10557 = vmatpush1.bf16.msra.mxu0 %v10556_v5  ;;  %v14415_v25 = vpop.permute.xlu0 %11105  ;;  %v10570_v36 = vpack.c.bf16 %v5925_v27, %v5923_v2  ;;  %v5927_v5 = vld [vmem:[%s11550_s20 + $0x2a8] sm:$0xff]  ;;  %v10588_v2 = vpack.c.bf16 %v5940_v39, %v5938_v63  ;;  %v5981_v10 = vld [vmem:[%s11550_s20 + $0x458] sm:$0xff] }
 0x692   : > { %v11108_v28 = vunpack.i.h.bf16 %v14415_v25  ;;  %v11107_v4 = vunpack.i.l.bf16 %v14415_v25  ;;  %10559 = vmatprep.subr.bf16.mxu0 %v10558_v33  ;;  %v5929_v33 = vld [vmem:[%s11550_s20 + $0x2b8] sm:$0xff]  ;;  %v5967_v39 = vld [vmem:[%s11550_s20 + $0x3e8] sm:$0xff] }
 0x693   : > { %v10574_v51 = vpack.c.bf16 %v5929_v33, %v5927_v5  ;;  %v5950_v5 = vld [vmem:[%s11550_s20 + $0x360] sm:$0xff]  ;;  %v5952_v33 = vld [vmem:[%s11550_s20 + $0x370] sm:$0xff]  ;;  %v5979_v58 = vld [vmem:[%s11550_s20 + $0x448] sm:$0xff] }
 0x694   : > { %v5634_v41 = vsel %vm1478_vm2, %v11092_v26, %v11107_v4  ;;  %v5635_v59 = vsel %vm1478_vm2, %v11107_v4, %v11108_v28  ;;  %v10576_v26 = vpack.c.bf16 %v5928_v42, %v5926_v34  ;;  %v10600_v34 = vpack.c.bf16 %v5952_v33, %v5950_v5 }
 0x695   : > { %10561 = vmatpush1.bf16.msra.mxu0 %v10560_v6  ;;  %v14432_v44 = vpop.permute.xlu0 %11110  ;;  %v5667_v16 = vmax.f32 %v14339_v29, %v5635_v59  ;;  %v5666_v38 = vmax.f32 %v14323_v9, %v5634_v41  ;;  %v5803_v9 = vsel %vm1178_vm0, %v11117_v40, %v11118_v61  ;;  %v5802_v29 = vsel %vm1178_vm0, %v11102_v23, %v11117_v40  ;;  %v5931_v6 = vld [vmem:[%s11550_s20 + $0x2c8] sm:$0xff]  ;;  %v5941_v40 = vld [vmem:[%s11550_s20 + $0x318] sm:$0xff] }
 0x696   : > { %v11113_v13 = vunpack.i.h.bf16 %v14432_v44  ;;  %v11112_v49 = vunpack.i.l.bf16 %v14432_v44  ;;  %10563 = vmatprep.subr.bf16.mxu0 %v10562_v14  ;;  %v10578_v4 = vpack.c.bf16 %v5933_v62, %v5931_v6  ;;  %v5930_v14 = vld [vmem:[%s11550_s20 + $0x2c0] sm:$0xff]  ;;  %v10582_v59 = vpack.c.bf16 %v5937_v17, %v5935_v45  ;;  %v5956_v62 = vld [vmem:[%s11550_s20 + $0x390] sm:$0xff] }
 0x697   : > { %v10580_v41 = vpack.c.bf16 %v5932_v11, %v5930_v14  ;;  %v5954_v6 = vld [vmem:[%s11550_s20 + $0x380] sm:$0xff]  ;;  %v5960_v17 = vld [vmem:[%s11550_s20 + $0x3b0] sm:$0xff]  ;;  %v10626_v24 = vpack.c.bf16 %v5981_v10, %v5979_v58 }
 0x698   : > { %v5719_v22 = vsel %vm1802_vm7, %v11112_v49, %v11113_v13  ;;  %v5718_v53 = vsel %vm1802_vm7, %v11097_v21, %v11112_v49  ;;  %v5934_v21 = vld [vmem:[%s11550_s20 + $0x2e0] sm:$0xff]  ;;  %v10604_v14 = vpack.c.bf16 %v5956_v62, %v5954_v6 }
 0x699   : > { %10565 = vmatpush1.bf16.msra.mxu0 %v10564_v52  ;;  %v5751_v31 = vmax.f32 %v5667_v16, %v5719_v22  ;;  %v5750_v57 = vmax.f32 %v5666_v38, %v5718_v53  ;;  %v5936_v52 = vld [vmem:[%s11550_s20 + $0x2f0] sm:$0xff]  ;;  %v5943_v16 = vld [vmem:[%s11550_s20 + $0x328] sm:$0xff]  ;;  %v5945_v38 = vld [vmem:[%s11550_s20 + $0x338] sm:$0xff] }
 0x69a   : > { %10567 = vmatprep.subr.bf16.mxu0 %v10566_v47  ;;  %v5939_v47 = vld [vmem:[%s11550_s20 + $0x308] sm:$0xff]  ;;  %v10584_v23 = vpack.c.bf16 %v5936_v52, %v5934_v21  ;;  %v10590_v27 = vpack.c.bf16 %v5945_v38, %v5943_v16  ;;  %v5942_v22 = vld [vmem:[%s11550_s20 + $0x320] sm:$0xff]  ;;  %v5944_v53 = vld [vmem:[%s11550_s20 + $0x330] sm:$0xff] }
 0x69b   : > { %v5835_v35 = vmax.f32 %v5751_v31, %v5803_v9  ;;  %v5834_v46 = vmax.f32 %v5750_v57, %v5802_v29  ;;  %v10586_v49 = vpack.c.bf16 %v5941_v40, %v5939_v47  ;;  %v5949_v31 = vld [vmem:[%s11550_s20 + $0x358] sm:$0xff]  ;;  %v10592_v57 = vpack.c.bf16 %v5944_v53, %v5942_v22  ;;  %v5946_v29 = vld [vmem:[%s11550_s20 + $0x340] sm:$0xff] }
 0x69c   : > { %v5958_v45 = vld [vmem:[%s11550_s20 + $0x3a0] sm:$0xff]  ;;  %v5969_v16 = vld [vmem:[%s11550_s20 + $0x3f8] sm:$0xff] }
 0x69d   : > { %10569 = vmatpush1.bf16.msra.mxu0 %v10568_v0  ;;  %6168 = vmatprep.mubr.f32.mxu0 %v5835_v35  ;;  %v5947_v0 = vld [vmem:[%s11550_s20 + $0x348] sm:$0xff]  ;;  %v10608_v21 = vpack.c.bf16 %v5960_v17, %v5958_v45  ;;  %v6002_v10 = vld [vmem:[%s11550_s20 + $0x500] sm:$0xff] }
 0x69e   : > { %6169 = vmatmul.mubr.f32.gmra.mrb[22].mxu0 %v5834_v46  ;;  %10571 = vmatprep.subr.bf16.mxu0 %v10570_v36  ;;  %v10594_v9 = vpack.c.bf16 %v5949_v31, %v5947_v0  ;;  %v5948_v36 = vld [vmem:[%s11550_s20 + $0x350] sm:$0xff]  ;;  %v10598_v46 = vpack.c.bf16 %v5953_v32, %v5951_v50  ;;  %v5971_v31 = vld [vmem:[%s11550_s20 + $0x408] sm:$0xff]  ;;  %v5970_v50 = vld [vmem:[%s11550_s20 + $0x400] sm:$0xff] }
 0x69f   : > { %v10596_v35 = vpack.c.bf16 %v5948_v36, %v5946_v29  ;;  %v5972_v32 = vld [vmem:[%s11550_s20 + $0x410] sm:$0xff]  ;;  %v10618_v33 = vpack.c.bf16 %v5973_v8, %v5971_v31 }
 0x6a0   : > { %v10620_v62 = vpack.c.bf16 %v5972_v32, %v5970_v50  ;;  %v5984_v50 = vld [vmem:[%s11550_s20 + $0x470] sm:$0xff] }
 0x6a1   : > { %10573 = vmatpush1.bf16.msra.mxu0 %v10572_v43  ;;  %v5955_v43 = vld [vmem:[%s11550_s20 + $0x388] sm:$0xff] }
 0x6a2   : > { %10575 = vmatprep.subr.bf16.mxu0 %v10574_v51  ;;  %v5957_v51 = vld [vmem:[%s11550_s20 + $0x398] sm:$0xff] }
 0x6a3   : > { %v10602_v42 = vpack.c.bf16 %v5957_v51, %v5955_v43 }
 0x6a5   : > { %10577 = vmatpush1.bf16.msra.mxu0 %v10576_v26  ;;  %v5959_v26 = vld [vmem:[%s11550_s20 + $0x3a8] sm:$0xff] }
 0x6a6   : > { %10579 = vmatprep.subr.bf16.mxu0 %v10578_v4  ;;  %v5961_v4 = vld [vmem:[%s11550_s20 + $0x3b8] sm:$0xff] }
 0x6a7   : > { %v10606_v11 = vpack.c.bf16 %v5961_v4, %v5959_v26  ;;  %v5975_v26 = vld [vmem:[%s11550_s20 + $0x428] sm:$0xff]  ;;  %v5977_v4 = vld [vmem:[%s11550_s20 + $0x438] sm:$0xff] }
 0x6a8   : > { %v10622_v25 = vpack.c.bf16 %v5977_v4, %v5975_v26  ;;  %v5990_v4 = vld [vmem:[%s11550_s20 + $0x4a0] sm:$0xff] }
 0x6a9   : > { %10581 = vmatpush1.bf16.msra.mxu0 %v10580_v41  ;;  %v5963_v41 = vld [vmem:[%s11550_s20 + $0x3c8] sm:$0xff] }
 0x6aa   : > { %10583 = vmatprep.subr.bf16.mxu0 %v10582_v59  ;;  %v5965_v59 = vld [vmem:[%s11550_s20 + $0x3d8] sm:$0xff] }
 0x6ab   : > { %v10610_v40 = vpack.c.bf16 %v5965_v59, %v5963_v41 }
 0x6ad   : > { %10585 = vmatpush1.bf16.msra.mxu0 %v10584_v23  ;;  %v5962_v23 = vld [vmem:[%s11550_s20 + $0x3c0] sm:$0xff] }
 0x6ae   : > { %10587 = vmatprep.subr.bf16.mxu0 %v10586_v49  ;;  %v5964_v49 = vld [vmem:[%s11550_s20 + $0x3d0] sm:$0xff] }
 0x6af   : > { %v10612_v0 = vpack.c.bf16 %v5964_v49, %v5962_v23 }
 0x6b1   : > { %10589 = vmatpush1.bf16.msra.mxu0 %v10588_v2  ;;  %v5966_v2 = vld [vmem:[%s11550_s20 + $0x3e0] sm:$0xff] }
 0x6b2   : > { %10591 = vmatprep.subr.bf16.mxu0 %v10590_v27  ;;  %v5968_v27 = vld [vmem:[%s11550_s20 + $0x3f0] sm:$0xff] }
 0x6b5   : > { %10593 = vmatpush1.bf16.msra.mxu0 %v10592_v57 }
 0x6b6   : > { %10595 = vmatprep.subr.bf16.mxu0 %v10594_v9 }
 0x6b9   : > { %10597 = vmatpush1.bf16.msra.mxu0 %v10596_v35 }
 0x6ba   : > { %10599 = vmatprep.subr.bf16.mxu0 %v10598_v46 }
 0x6bd   : > { %10601 = vmatpush1.bf16.msra.mxu0 %v10600_v34 }
 0x6be   : > { %10603 = vmatprep.subr.bf16.mxu0 %v10602_v42 }
 0x6c1   : > { %10605 = vmatpush1.bf16.msra.mxu0 %v10604_v14 }
 0x6c2   : > { %10607 = vmatprep.subr.bf16.mxu0 %v10606_v11 }
 0x6c3   : > { %v14492_v52 = vpop.permute.xlu0 %5598  ;;  %v14494_v47 = vpop.permute.xlu1 %5682 }
 0x6c4   : > { %v5629_v63 = vsel %vm1478_vm2, %v11093_v55, %v14492_v52  ;;  %v5713_v53 = vsel %vm1802_vm7, %v11098_v12, %v14494_v47  ;;  %v10616_v12 = vpack.c.bf16 %v5968_v27, %v5966_v2  ;;  %v5974_v27 = vld [vmem:[%s11550_s20 + $0x420] sm:$0xff] }
 0x6c5   : > { %v5661_v38 = vmax.f32 %v14325_v56, %v5629_v63  ;;  %10609 = vmatpush1.bf16.msra.mxu0 %v10608_v21  ;;  %v10614_v56 = vpack.c.bf16 %v5969_v16, %v5967_v39 }
 0x6c6   : > { %v5475_v22 = vpop.f32.mrb[16].mxu1  ;;  %10611 = vmatprep.subr.bf16.mxu0 %v10610_v40 }
 0x6c7   : > { %v5476_v55 = vadd.f32 %v5475_v22, %v14278_v30  ;;  %v5477_v57 = vpop.f32.mrb[17].mxu1  ;;  %v5745_v9 = vmax.f32 %v5661_v38, %v5713_v53  ;;  %v14514_v29 = vpop.permute.xlu0 %5766  ;;  %v5976_v22 = vld [vmem:[%s11550_s20 + $0x430] sm:$0xff] }
 0x6c8   : > { %v5478_v36 = vadd.f32 %v5477_v57, %v14278_v30  ;;  %v5797_v60 = vsel %vm1178_vm0, %v11103_v3, %v14514_v29  ;;  %v5980_v57 = vld [vmem:[%s11550_s20 + $0x450] sm:$0xff] }
 0x6c9   : > { %vm5492_vm5 = vcmp.ge.f32.partialorder %v5476_v55, 0.0  ;;  %v5508_v35 = vmul.f32 0.1, %v5476_v55  ;;  %v14523_v46 = vpop.permute.xlu1 %11120  ;;  %v5829_v5 = vmax.f32 %v5745_v9, %v5797_v60  ;;  %10613 = vmatpush1.bf16.msra.mxu0 %v10612_v0 }
 0x6ca   : > { %vm5493_vm10 = vcmp.ge.f32.partialorder %v5478_v36, 0.0  ;;  %v5509_v43 = vmul.f32 0.1, %v5478_v36  ;;  %v5481_v51 = vpop.f32.mrb[18].mxu1  ;;  %v11123_v30 = vunpack.i.h.bf16 %v14523_v46  ;;  %v11122_v1 = vunpack.i.l.bf16 %v14523_v46  ;;  %10615 = vmatprep.subr.bf16.mxu0 %v10614_v56  ;;  %v5983_v56 = vld [vmem:[%s11550_s20 + $0x468] sm:$0xff] }
 0x6cb   : > { %v14527_v3 = vsel %vm5492_vm5, %v5476_v55, %v5508_v35  ;;  %v5482_v34 = vadd.f32 %v5481_v51, %v14293_v15  ;;  %v5483_v42 = vpop.f32.mrb[19].mxu1  ;;  %v14530_v6 = vpop.permute.xlu0 %11125  ;;  %6239 = vmatprep.mubr.f32.mxu0 %v5829_v5  ;;  %v10624_v55 = vpack.c.bf16 %v5976_v22, %v5974_v27  ;;  %v5987_v5 = vld [vmem:[%s11550_s20 + $0x488] sm:$0xff]  ;;  %v5986_v51 = vld [vmem:[%s11550_s20 + $0x480] sm:$0xff] }
 0x6cc   : > { %v14534_v14 = vsel %vm5493_vm10, %v5478_v36, %v5509_v43  ;;  %v5484_v11 = vadd.f32 %v5483_v42, %v14293_v15  ;;  %v5636_v45 = vsel %vm1478_vm2, %v11108_v28, %v11122_v1  ;;  %v5637_v17 = vsel %vm1478_vm2, %v11122_v1, %v11123_v30  ;;  %v5985_v36 = vld [vmem:[%s11550_s20 + $0x478] sm:$0xff]  ;;  %v5988_v1 = vld [vmem:[%s11550_s20 + $0x490] sm:$0xff]  ;;  %v5991_v42 = vld [vmem:[%s11550_s20 + $0x4a8] sm:$0xff] }
 0x6cd   : > { %5545 = vst [vmem:[#allocation2 + $0x40] sm:$0xff] %v14534_v14  ;;  %vm5500_vm11 = vcmp.ge.f32.partialorder %v5482_v34, 0.0  ;;  %v5516_v41 = vmul.f32 0.1, %v5482_v34  ;;  %v11128_v59 = vunpack.i.h.bf16 %v14530_v6  ;;  %v11127_v21 = vunpack.i.l.bf16 %v14530_v6  ;;  %10617 = vmatpush1.bf16.msra.mxu0 %v10616_v12  ;;  %v5982_v12 = vld [vmem:[%s11550_s20 + $0x460] sm:$0xff] }
 0x6ce   : > { %vm5501_vm12 = vcmp.ge.f32.partialorder %v5484_v11, 0.0  ;;  %v5517_v40 = vmul.f32 0.1, %v5484_v11  ;;  %v11144_v15 = vpack.i.bf16 %v14527_v3, %v14354_v20  ;;  %v5669_v49 = vmax.f32 %v14361_v19, %v5637_v17  ;;  %10619 = vmatprep.subr.bf16.mxu0 %v10618_v33  ;;  %v5989_v33 = vld [vmem:[%s11550_s20 + $0x498] sm:$0xff]  ;;  %v5998_v22 = vld [vmem:[%s11550_s20 + $0x4e0] sm:$0xff] }
 0x6cf   : > { %v14548_v28 = vsel %vm5500_vm11, %v5482_v34, %v5516_v41  ;;  %v14550_v23 = vpop.permute.xlu0 %11130  ;;  %v5721_v63 = vsel %vm1802_vm7, %v11127_v21, %v11128_v59  ;;  %v5668_v39 = vmax.f32 %v14335_v54, %v5636_v45  ;;  %v5720_v53 = vsel %vm1802_vm7, %v11113_v13, %v11127_v21  ;;  %v5978_v13 = vld [vmem:[%s11550_s20 + $0x440] sm:$0xff]  ;;  %v5995_v41 = vld [vmem:[%s11550_s20 + $0x4c8] sm:$0xff]  ;;  %v5997_v21 = vld [vmem:[%s11550_s20 + $0x4d8] sm:$0xff] }
 0x6d0   : > { %v14557_v16 = vsel %vm5501_vm12, %v5484_v11, %v5517_v40  ;;  %11145 = vrot.lane.b32.xlu0 %v11144_v15, %s11386_s0  ;;  %11135 = vrot.lane.b32.xlu1 %v11144_v15, %s16312_s2  ;;  %v11133_v38 = vunpack.i.h.bf16 %v14550_v23  ;;  %v11132_v2 = vunpack.i.l.bf16 %v14550_v23  ;;  %v11169_v19 = vpack.i.bf16 %v14548_v28, %v14365_v37  ;;  %v5992_v11 = vld [vmem:[%s11550_s20 + $0x4b0] sm:$0xff]  ;;  %v6406_v45 = vld [vmem:[%s11470_s24] sm:$0xff] }
 0x6d1   : > { %5553 = vst [vmem:[#allocation2 + $0x90] sm:$0xff] %v14557_v16  ;;  %6240 = vmatmul.mubr.f32.vlgmr.msra.gmra.mrb[20].mxu0 %v5828_v48  ;;  %v5753_v54 = vmax.f32 %v5669_v49, %v5721_v63  ;;  %v5752_v31 = vmax.f32 %v5668_v39, %v5720_v53  ;;  %v10628_v60 = vpack.c.bf16 %v5980_v57, %v5978_v13  ;;  %v6422_v49 = vld [vmem:[%s16397_s22] sm:$0xff]  ;;  %v5999_v39 = vld [vmem:[%s11550_s20 + $0x4e8] sm:$0xff]  ;;  %v6009_v13 = vld [vmem:[%s11550_s20 + $0x538] sm:$0xff] }
 0x6d2   : > { %v5805_v0 = vsel %vm1178_vm0, %v11132_v2, %v11133_v38  ;;  %v5804_v8 = vsel %vm1178_vm0, %v11118_v61, %v11132_v2  ;;  %10621 = vmatpush1.bf16.msra.mxu0 %v10620_v62  ;;  %v14586_v61 = vld [vmem:[#allocation2 + $0xc0] sm:$0xff]  ;;  %v10630_v32 = vpack.c.bf16 %v5985_v36, %v5983_v56  ;;  %v10632_v43 = vpack.c.bf16 %v5984_v50, %v5982_v12  ;;  %v5993_v62 = vld [vmem:[%s11550_s20 + $0x4b8] sm:$0xff]  ;;  %v6407_v53 = vld [vmem:[%s11470_s24 + $0x8] sm:$0xff] }
 0x6d3   : > { %v5837_v48 = vmax.f32 %v5753_v54, %v5805_v0  ;;  %10623 = vmatprep.subr.bf16.mxu0 %v10622_v25  ;;  %v5836_v44 = vmax.f32 %v5752_v31, %v5804_v8  ;;  %v11149_v9 = vpack.i.bf16 %v14586_v61, %v14534_v14  ;;  %v11179_v35 = vpack.i.bf16 %v14586_v61, %v14557_v16  ;;  %v5996_v25 = vld [vmem:[%s11550_s20 + $0x4d0] sm:$0xff]  ;;  %v6001_v2 = vld [vmem:[%s11550_s20 + $0x4f8] sm:$0xff]  ;;  %v6003_v0 = vld [vmem:[%s11550_s20 + $0x508] sm:$0xff] }
 0x6d4   : > { %11170 = vrot.lane.b32.xlu0 %v11169_v19, %s11393_s23  ;;  %11140 = vrot.lane.b32.xlu1 %v11144_v15, %s11393_s23  ;;  %v10634_v34 = vpack.c.bf16 %v5989_v33, %v5987_v5  ;;  %v10636_v26 = vpack.c.bf16 %v5988_v1, %v5986_v51  ;;  %v10638_v17 = vpack.c.bf16 %v5993_v62, %v5991_v42  ;;  %v5994_v15 = vld [vmem:[%s11550_s20 + $0x4c0] sm:$0xff]  ;;  %v6000_v54 = vld [vmem:[%s11550_s20 + $0x4f0] sm:$0xff] }
 0x6d5   : > { %6245 = vmatprep.mubr.f32.mxu0 %v5837_v48  ;;  %v10640_v40 = vpack.c.bf16 %v5992_v11, %v5990_v4  ;;  %v10642_v63 = vpack.c.bf16 %v5997_v21, %v5995_v41  ;;  %v10646_v27 = vpack.c.bf16 %v6001_v2, %v5999_v39  ;;  %v6005_v31 = vld [vmem:[%s11550_s20 + $0x518] sm:$0xff]  ;;  %v10648_v8 = vpack.c.bf16 %v6000_v54, %v5998_v22  ;;  %v6004_v48 = vld [vmem:[%s11550_s20 + $0x510] sm:$0xff]  ;;  %v6011_v36 = vld [vmem:[%s11550_s20 + $0x548] sm:$0xff] }
 0x6d6   : > { %6246 = vmatmul.mubr.f32.gmra.mrb[22].mxu0 %v5836_v44  ;;  %v10650_v58 = vpack.c.bf16 %v6005_v31, %v6003_v0  ;;  %v6007_v44 = vld [vmem:[%s11550_s20 + $0x528] sm:$0xff]  ;;  %v10652_v57 = vpack.c.bf16 %v6004_v48, %v6002_v10  ;;  %v6008_v56 = vld [vmem:[%s11550_s20 + $0x530] sm:$0xff]  ;;  %v6017_v33 = vld [vmem:[%s11550_s20 + $0x578] sm:$0xff] }
 0x6d7   : > { %10625 = vmatpush1.bf16.msra.mxu0 %v10624_v55  ;;  %v6423_v55 = vld [vmem:[%s16397_s22 + $0x8] sm:$0xff]  ;;  %v6014_v1 = vld [vmem:[%s11550_s20 + $0x560] sm:$0xff]  ;;  %v6021_v62 = vld [vmem:[%s11550_s20 + $0x598] sm:$0xff] }
 0x6d8   : > { %11175 = vrot.lane.b32.xlu0 %v11169_v19, %s11386_s0  ;;  %11150 = vrot.lane.b32.xlu1 %v11149_v9, %s16312_s2  ;;  %v6015_v5 = vld [vmem:[%s11550_s20 + $0x568] sm:$0xff]  ;;  %v6018_v11 = vld [vmem:[%s11550_s20 + $0x580] sm:$0xff] }
 0x6d9   : > { %10627 = vmatprep.subr.bf16.mxu0 %v10626_v24  ;;  %v10654_v24 = vpack.c.bf16 %v6009_v13, %v6007_v44  ;;  %v10662_v51 = vpack.c.bf16 %v6017_v33, %v6015_v5  ;;  %v6019_v42 = vld [vmem:[%s11550_s20 + $0x588] sm:$0xff]  ;;  %v6025_v41 = vld [vmem:[%s11550_s20 + $0x5b8] sm:$0xff]  ;;  %v6030_v31 = vld [vmem:[%s11550_s20 + $0x5e0] sm:$0xff] }
 0x6da   : > { %v10666_v4 = vpack.c.bf16 %v6021_v62, %v6019_v42  ;;  %v6031_v22 = vld [vmem:[%s11550_s20 + $0x5e8] sm:$0xff]  ;;  %v6033_v54 = vld [vmem:[%s11550_s20 + $0x5f8] sm:$0xff]  ;;  %v6438_v44 = vld [vmem:[%s16398_s26] ss:$2 sm:$0x3] }
 0x6db   : > { %10629 = vmatpush1.bf16.msra.mxu0 %v10628_v60  ;;  %v6013_v60 = vld [vmem:[%s11550_s20 + $0x558] sm:$0xff]  ;;  %v10678_v0 = vpack.c.bf16 %v6033_v54, %v6031_v22  ;;  %v16399_v13 = vld [vmem:[#allocation30_spill] sm:$0xff]  ;;  %v6040_v22 = vld [vmem:[%s11550_s20 + $0x630] sm:$0xff] }
 0x6dc   : > { %11180 = vrot.lane.b32.xlu0 %v11179_v35, %s16312_s2  ;;  %11155 = vrot.lane.b32.xlu1 %v11169_v19, %s16312_s2  ;;  %v10644_v19 = vpack.c.bf16 %v5996_v25, %v5994_v15  ;;  %v10658_v50 = vpack.c.bf16 %v6013_v60, %v6011_v36  ;;  %v6022_v15 = vld [vmem:[%s11550_s20 + $0x5a0] sm:$0xff]  ;;  %v6024_v25 = vld [vmem:[%s11550_s20 + $0x5b0] sm:$0xff] }
 0x6dd   : > { %10631 = vmatprep.subr.bf16.mxu0 %v10630_v32  ;;  %v6010_v32 = vld [vmem:[%s11550_s20 + $0x540] sm:$0xff]  ;;  %v10672_v39 = vpack.c.bf16 %v6024_v25, %v6022_v15  ;;  %v6037_v10 = vld [vmem:[%s11550_s20 + $0x618] sm:$0xff]  ;;  %v6039_v15 = vld [vmem:[%s11550_s20 + $0x628] sm:$0xff] }
 0x6de   : > { %v6041_v25 = vld [vmem:[%s11550_s20 + $0x638] sm:$0xff]  ;;  %v6043_v54 = vld [vmem:[%s11550_s20 + $0x648] sm:$0xff] }
 0x6df   : > { %10633 = vmatpush1.bf16.msra.mxu0 %v10632_v43 }
 0x6e0   : > { %11185 = vrot.lane.b32.xlu0 %v11179_v35, %s11393_s23  ;;  %11160 = vrot.lane.b32.xlu1 %v11149_v9, %s11393_s23  ;;  %s16402_s23 = sld [smem:[#allocation13_spill]] }
 0x6e1   : > { %10635 = vmatprep.subr.bf16.mxu0 %v10634_v34  ;;  %v6016_v34 = vld [vmem:[%s11550_s20 + $0x570] sm:$0xff] }
 0x6e3   : > { %10637 = vmatpush1.bf16.msra.mxu0 %v10636_v26  ;;  %v10664_v26 = vpack.c.bf16 %v6016_v34, %v6014_v1 }
 0x6e4   : > { %6410 = vperm.xlu0 %11062, %v6406_v45   ;;  %11165 = vrot.lane.b32.xlu1 %v11149_v9, %s11386_s0  ;;  %v6006_v9 = vld [vmem:[%s11550_s20 + $0x520] sm:$0xff]  ;;  %v6020_v45 = vld [vmem:[%s11550_s20 + $0x590] sm:$0xff] }
 0x6e5   : > { %10639 = vmatprep.subr.bf16.mxu0 %v10638_v17  ;;  %v10656_v12 = vpack.c.bf16 %v6008_v56, %v6006_v9  ;;  %v6023_v17 = vld [vmem:[%s11550_s20 + $0x5a8] sm:$0xff]  ;;  %v10668_v21 = vpack.c.bf16 %v6020_v45, %v6018_v11  ;;  %v10017_v56 = vld [vmem:[%s16398_s26 + $0x1] ss:$2 sm:$0x3] }
 0x6e6   : > { %v6558_v36 = vrot.slane %v10017_v56, %v16399_v13  ;;  %v6034_v45 = vld [vmem:[%s11550_s20 + $0x600] sm:$0xff] }
 0x6e7   : > { %10641 = vmatpush1.bf16.msra.mxu0 %v10640_v40  ;;  %v10670_v40 = vpack.c.bf16 %v6025_v41, %v6023_v17  ;;  %v6036_v17 = vld [vmem:[%s11550_s20 + $0x610] sm:$0xff] }
 0x6e8   : > { %6426 = vperm.xlu0 %11062, %v6422_v49   ;;  %11190 = vrot.lane.b32.xlu1 %v11179_v35, %s11386_s0  ;;  %v6012_v35 = vld [vmem:[%s11550_s20 + $0x550] sm:$0xff]  ;;  %v6027_v49 = vld [vmem:[%s11550_s20 + $0x5c8] sm:$0xff]  ;;  %s16304_s0 = smov 111  }
 0x6e9   : > { %10643 = vmatprep.subr.bf16.mxu0 %v10642_v63  ;;  %v10660_v43 = vpack.c.bf16 %v6012_v35, %v6010_v32  ;;  %v6029_v63 = vld [vmem:[%s11550_s20 + $0x5d8] sm:$0xff] }
 0x6ea   : > { %v10674_v2 = vpack.c.bf16 %v6029_v63, %v6027_v49  ;;  %v10684_v63 = vpack.c.bf16 %v6036_v17, %v6034_v45 }
 0x6eb   : > { %10645 = vmatpush1.bf16.msra.mxu0 %v10644_v19  ;;  %v6026_v19 = vld [vmem:[%s11550_s20 + $0x5c0] sm:$0xff] }
 0x6ec   : > { %6415 = vperm.xlu1 %11063, %v6407_v53   ;;  %10647 = vmatprep.subr.bf16.mxu0 %v10646_v27  ;;  %v6028_v27 = vld [vmem:[%s11550_s20 + $0x5d0] sm:$0xff] }
 0x6ed   : > { %v10676_v53 = vpack.c.bf16 %v6028_v27, %v6026_v19  ;;  %v10686_v27 = vpack.c.bf16 %v6041_v25, %v6039_v15 }
 0x6ef   : > { %10649 = vmatpush1.bf16.msra.mxu0 %v10648_v8  ;;  %v6032_v8 = vld [vmem:[%s11550_s20 + $0x5f0] sm:$0xff] }
 0x6f0   : > { %6431 = vperm.xlu1 %11063, %v6423_v55   ;;  %10651 = vmatprep.subr.bf16.mxu0 %v10650_v58  ;;  %v6035_v58 = vld [vmem:[%s11550_s20 + $0x608] sm:$0xff]  ;;  %v10680_v48 = vpack.c.bf16 %v6032_v8, %v6030_v31 }
 0x6f1   : > { %v10682_v55 = vpack.c.bf16 %v6037_v10, %v6035_v58 }
 0x6f3   : > { %10653 = vmatpush1.bf16.msra.mxu0 %v10652_v57  ;;  %v6461_v57 = vrot.slane %v6438_v44, %v16399_v13 }
 0x6f4   : > { %10655 = vmatprep.subr.bf16.mxu0 %v10654_v24  ;;  %v16400_v24 = vld [vmem:[#allocation31_spill] sm:$0xff] }
 0x6f5   : > { %v6465_v9 = vrot.slane %v6438_v44, %v16400_v24  ;;  %6466 = vrot.lane.b32.xlu0 %v6461_v57, %s16304_s0  ;;  %v6562_v60 = vrot.slane %v10017_v56, %v16400_v24 }
 0x6f7   : > { %10657 = vmatpush1.bf16.msra.mxu0 %v10656_v12  ;;  %6468 = vrot.lane.b32.xlu1 %v6465_v9, %s16304_s0 }
 0x6f8   : > { %10659 = vmatprep.subr.bf16.mxu0 %v10658_v50 }
 0x6f9   : > { %6563 = vrot.lane.b32.xlu0 %v6558_v36, %s11396_s12 }
 0x6fb   : > { %10661 = vmatpush1.bf16.msra.mxu0 %v10660_v43  ;;  %6565 = vrot.lane.b32.xlu1 %v6562_v60, %s11396_s12 }
 0x6fc   : > { %10663 = vmatprep.subr.bf16.mxu0 %v10662_v51 }
 0x6fd   : > { %6615 = vrot.lane.b32.xlu0 %v6461_v57, %s16312_s2 }
 0x6ff   : > { %10665 = vmatpush1.bf16.msra.mxu0 %v10664_v26  ;;  %6617 = vrot.lane.b32.xlu1 %v6465_v9, %s16312_s2 }
 0x700   : > { %10667 = vmatprep.subr.bf16.mxu0 %v10666_v4 }
 0x701   : > { %6669 = vrot.lane.b32.xlu0 %v6558_v36, %s16308_s7 }
 0x703   : > { %10669 = vmatpush1.bf16.msra.mxu0 %v10668_v21  ;;  %6671 = vrot.lane.b32.xlu1 %v6562_v60, %s16308_s7 }
 0x704   : > { %10671 = vmatprep.subr.bf16.mxu0 %v10670_v40 }
 0x705   : > { %6719 = vrot.lane.b32.xlu0 %v6461_v57, %s11397_s10 }
 0x707   : > { %10673 = vmatpush1.bf16.msra.mxu0 %v10672_v39  ;;  %6721 = vrot.lane.b32.xlu1 %v6465_v9, %s11397_s10  ;;  %v6038_v39 = vld [vmem:[%s11550_s20 + $0x620] sm:$0xff] }
 0x708   : > { %10675 = vmatprep.subr.bf16.mxu0 %v10674_v2  ;;  %v10688_v57 = vpack.c.bf16 %v6040_v22, %v6038_v39 }
 0x709   : > { %6806 = vrot.lane.b32.xlu0 %v6558_v36, %s16302_s11 }
 0x70b   : > { %10677 = vmatpush1.bf16.msra.mxu0 %v10676_v53  ;;  %6808 = vrot.lane.b32.xlu1 %v6562_v60, %s16302_s11  ;;  %v6045_v53 = vld [vmem:[%s11550_s20 + $0x658] sm:$0xff] }
 0x70c   : > { %10679 = vmatprep.subr.bf16.mxu0 %v10678_v0  ;;  %v10690_v9 = vpack.c.bf16 %v6045_v53, %v6043_v54 }
 0x70f   : > { %10681 = vmatpush1.bf16.msra.mxu0 %v10680_v48  ;;  %v6042_v48 = vld [vmem:[%s11550_s20 + $0x640] sm:$0xff] }
 0x710   : > { %10683 = vmatprep.subr.bf16.mxu0 %v10682_v55  ;;  %v6044_v55 = vld [vmem:[%s11550_s20 + $0x650] sm:$0xff] }
 0x742   : > { %v14676_v12 = vpop.permute.xlu0 %11145  ;;  %v11136_v50 = vpop.permute.xlu1 %11135 }
 0x743   : > { %v11138_v32 = vunpack.i.h.bf16 %v11136_v50  ;;  %v11137_v35 = vunpack.i.l.bf16 %v11136_v50  ;;  %v11148_v51 = vunpack.i.h.bf16 %v14676_v12  ;;  %v11147_v1 = vunpack.i.l.bf16 %v14676_v12  ;;  %v6055_v12 = vld [vmem:[%s11550_s20 + $0x6a8] sm:$0xff] }
 0x745   : > { %v5630_v5 = vsel %vm1478_vm2, %v14492_v52, %v11137_v35  ;;  %v5631_v33 = vsel %vm1478_vm2, %v11137_v35, %v11138_v32  ;;  %v6047_v35 = vld [vmem:[%s11550_s20 + $0x668] sm:$0xff] }
 0x746   : > { %v14681_v43 = vpop.permute.xlu1 %11140  ;;  %v14685_v34 = vpop.permute.xlu0 %11170  ;;  %v5662_v26 = vmax.f32 %v14351_v18, %v5630_v5  ;;  %v5663_v52 = vmax.f32 %v14354_v20, %v5631_v33  ;;  %v5798_v18 = vsel %vm1178_vm0, %v14514_v29, %v11147_v1  ;;  %v5799_v20 = vsel %vm1178_vm0, %v11147_v1, %v11148_v51  ;;  %v6049_v5 = vld [vmem:[%s11550_s20 + $0x678] sm:$0xff] }
 0x747   : > { %v11143_v42 = vunpack.i.h.bf16 %v14681_v43  ;;  %v11142_v62 = vunpack.i.l.bf16 %v14681_v43  ;;  %v11173_v0 = vunpack.i.h.bf16 %v14685_v34  ;;  %v11172_v29 = vunpack.i.l.bf16 %v14685_v34 }
 0x748   : > { %v10692_v43 = vpack.c.bf16 %v6044_v55, %v6042_v48  ;;  %v10694_v45 = vpack.c.bf16 %v6049_v5, %v6047_v35  ;;  %v6059_v48 = vld [vmem:[%s11550_s20 + $0x6c8] sm:$0xff]  ;;  %v6061_v55 = vld [vmem:[%s11550_s20 + $0x6d8] sm:$0xff] }
 0x749   : > { %v5714_v4 = vsel %vm1802_vm7, %v14494_v47, %v11142_v62  ;;  %v5715_v11 = vsel %vm1802_vm7, %v11142_v62, %v11143_v42 }
 0x74a   : > { %v5746_v41 = vmax.f32 %v5662_v26, %v5714_v4  ;;  %v11151_v21 = vpop.permute.xlu1 %11150  ;;  %v5747_v40 = vmax.f32 %v5663_v52, %v5715_v11  ;;  %v14704_v2 = vpop.permute.xlu0 %11175  ;;  %v5722_v52 = vsel %vm1802_vm7, %v11128_v59, %v11172_v29  ;;  %v6046_v59 = vld [vmem:[%s11550_s20 + $0x660] sm:$0xff] }
 0x74b   : > { %v11152_v19 = vunpack.i.l.bf16 %v11151_v21  ;;  %v11153_v8 = vunpack.i.h.bf16 %v11151_v21  ;;  %v11178_v44 = vunpack.i.h.bf16 %v14704_v2  ;;  %v11177_v56 = vunpack.i.l.bf16 %v14704_v2 }
 0x74c   : > { %v5830_v47 = vmax.f32 %v5746_v41, %v5798_v18  ;;  %v5831_v49 = vmax.f32 %v5747_v40, %v5799_v20  ;;  %v6048_v41 = vld [vmem:[%s11550_s20 + $0x670] sm:$0xff]  ;;  %v6051_v18 = vld [vmem:[%s11550_s20 + $0x688] sm:$0xff]  ;;  %v6053_v20 = vld [vmem:[%s11550_s20 + $0x698] sm:$0xff] }
 0x74d   : > { %v5632_v36 = vsel %vm1478_vm2, %v11138_v32, %v11152_v19  ;;  %v5723_v32 = vsel %vm1802_vm7, %v11172_v29, %v11173_v0  ;;  %v5806_v6 = vsel %vm1178_vm0, %v11133_v38, %v11177_v56  ;;  %v10696_v38 = vpack.c.bf16 %v6048_v41, %v6046_v59 }
 0x74e   : > { %v14711_v31 = vpop.permute.xlu1 %11155  ;;  %6316 = vmatprep.mubr.f32.mxu0 %v5831_v49  ;;  %v5664_v4 = vmax.f32 %v14527_v3, %v5632_v36  ;;  %v10698_v39 = vpack.c.bf16 %v6053_v20, %v6051_v18  ;;  %v6060_v36 = vld [vmem:[%s11550_s20 + $0x6d0] sm:$0xff] }
 0x74f   : > { %v11158_v58 = vunpack.i.h.bf16 %v14711_v31  ;;  %v11157_v10 = vunpack.i.l.bf16 %v14711_v31  ;;  %6317 = vmatmul.mubr.f32.vlgmr.msra.gmra.mrb[20].mxu0 %v5830_v47 }
 0x750   : > { %10685 = vmatpush1.bf16.msra.mxu0 %v10684_v63 }
 0x751   : > { %v5638_v60 = vsel %vm1478_vm2, %v11123_v30, %v11157_v10  ;;  %v5639_v50 = vsel %vm1478_vm2, %v11157_v10, %v11158_v58  ;;  %10687 = vmatprep.subr.bf16.mxu0 %v10686_v27  ;;  %v5633_v30 = vsel %vm1478_vm2, %v11152_v19, %v11153_v8  ;;  %v6050_v19 = vld [vmem:[%s11550_s20 + $0x680] sm:$0xff]  ;;  %v6052_v27 = vld [vmem:[%s11550_s20 + $0x690] sm:$0xff] }
 0x752   : > { %v11161_v33 = vpop.permute.xlu1 %11160  ;;  %v5671_v1 = vmax.f32 %v14365_v37, %v5639_v50  ;;  %v5670_v46 = vmax.f32 %v14363_v7, %v5638_v60  ;;  %v5807_v7 = vsel %vm1178_vm0, %v11177_v56, %v11178_v44  ;;  %v10700_v53 = vpack.c.bf16 %v6052_v27, %v6050_v19  ;;  %v6054_v8 = vld [vmem:[%s11550_s20 + $0x6a0] sm:$0xff]  ;;  %v6056_v10 = vld [vmem:[%s11550_s20 + $0x6b0] sm:$0xff]  ;;  %v6063_v60 = vld [vmem:[%s11550_s20 + $0x6e8] sm:$0xff] }
 0x753   : > { %v11163_v62 = vunpack.i.h.bf16 %v11161_v33  ;;  %v11162_v26 = vunpack.i.l.bf16 %v11161_v33  ;;  %v6058_v56 = vld [vmem:[%s11550_s20 + $0x6c0] sm:$0xff]  ;;  %v6065_v50 = vld [vmem:[%s11550_s20 + $0x6f8] sm:$0xff]  ;;  %v6084_v27 = vld [vmem:[%s11550_s20 + $0x790] sm:$0xff] }
 0x754   : > { %10689 = vmatpush1.bf16.msra.mxu0 %v10688_v57  ;;  %v5755_v37 = vmax.f32 %v5671_v1, %v5723_v32  ;;  %v5754_v11 = vmax.f32 %v5670_v46, %v5722_v52  ;;  %v10704_v57 = vpack.c.bf16 %v6056_v10, %v6054_v8  ;;  %v10708_v35 = vpack.c.bf16 %v6060_v36, %v6058_v56  ;;  %v6062_v33 = vld [vmem:[%s11550_s20 + $0x6e0] sm:$0xff]  ;;  %v6067_v1 = vld [vmem:[%s11550_s20 + $0x708] sm:$0xff]  ;;  %v6069_v32 = vld [vmem:[%s11550_s20 + $0x718] sm:$0xff] }
 0x755   : > { %v5716_v17 = vsel %vm1802_vm7, %v11143_v42, %v11162_v26  ;;  %10691 = vmatprep.subr.bf16.mxu0 %v10690_v9  ;;  %v5717_v3 = vsel %vm1802_vm7, %v11162_v26, %v11163_v62  ;;  %v5665_v42 = vmax.f32 %v14534_v14, %v5633_v30  ;;  %v10706_v9 = vpack.c.bf16 %v6061_v55, %v6059_v48  ;;  %v6066_v62 = vld [vmem:[%s11550_s20 + $0x700] sm:$0xff]  ;;  %v6068_v26 = vld [vmem:[%s11550_s20 + $0x710] sm:$0xff]  ;;  %v6071_v52 = vld [vmem:[%s11550_s20 + $0x728] sm:$0xff] }
 0x756   : > { %v14748_v21 = vmax.f32 %v5664_v4, %v5716_v17  ;;  %v11166_v40 = vpop.permute.xlu1 %11165  ;;  %v5839_v15 = vmax.f32 %v5755_v37, %v5807_v7  ;;  %v5838_v25 = vmax.f32 %v5754_v11, %v5806_v6  ;;  %v10710_v5 = vpack.c.bf16 %v6065_v50, %v6063_v60  ;;  %v6073_v4 = vld [vmem:[%s11550_s20 + $0x738] sm:$0xff]  ;;  %v6072_v17 = vld [vmem:[%s11550_s20 + $0x730] sm:$0xff]  ;;  %v6075_v7 = vld [vmem:[%s11550_s20 + $0x748] sm:$0xff] }
 0x757   : > { %v11168_v47 = vunpack.i.h.bf16 %v11166_v40  ;;  %v11167_v23 = vunpack.i.l.bf16 %v11166_v40  ;;  %v5749_v49 = vmax.f32 %v5665_v42, %v5717_v3  ;;  %v10714_v30 = vpack.c.bf16 %v6069_v32, %v6067_v1  ;;  %v6077_v6 = vld [vmem:[%s11550_s20 + $0x758] sm:$0xff]  ;;  %v6074_v3 = vld [vmem:[%s11550_s20 + $0x740] sm:$0xff]  ;;  %v6076_v40 = vld [vmem:[%s11550_s20 + $0x750] sm:$0xff]  ;;  %v11181_v42 = vpop.permute.xlu0 %11180 }
 0x758   : > { %10693 = vmatpush1.bf16.msra.mxu0 %v10692_v43  ;;  %6322 = vmatprep.mubr.f32.mxu0 %v5839_v15  ;;  %v6064_v43 = vld [vmem:[%s11550_s20 + $0x6f0] sm:$0xff]  ;;  %v10716_v37 = vpack.c.bf16 %v6068_v26, %v6066_v62  ;;  %v10718_v11 = vpack.c.bf16 %v6073_v4, %v6071_v52  ;;  %v10722_v41 = vpack.c.bf16 %v6077_v6, %v6075_v7  ;;  %v6079_v15 = vld [vmem:[%s11550_s20 + $0x768] sm:$0xff]  ;;  %v6082_v19 = vld [vmem:[%s11550_s20 + $0x780] sm:$0xff]  ;;  %v11182_v1 = vunpack.i.l.bf16 %v11181_v42 }
 0x759   : > { %v14756_v63 = vsel %vm1178_vm0, %v11148_v51, %v11167_v23  ;;  %6323 = vmatmul.mubr.f32.gmra.mrb[22].mxu0 %v5838_v25  ;;  %10695 = vmatprep.subr.bf16.mxu0 %v10694_v45  ;;  %v5801_v14 = vsel %vm1178_vm0, %v11167_v23, %v11168_v47  ;;  %v6057_v51 = vld [vmem:[%s11550_s20 + $0x6b8] sm:$0xff]  ;;  %v10712_v46 = vpack.c.bf16 %v6064_v43, %v6062_v33  ;;  %v6070_v45 = vld [vmem:[%s11550_s20 + $0x720] sm:$0xff]  ;;  %v6080_v23 = vld [vmem:[%s11550_s20 + $0x770] sm:$0xff]  ;;  %v11183_v43 = vunpack.i.h.bf16 %v11181_v42 }
 0x75a   : > { %v5832_v22 = vmax.f32 %v14748_v21, %v14756_v63  ;;  %v5833_v54 = vmax.f32 %v5749_v49, %v5801_v14  ;;  %v10702_v29 = vpack.c.bf16 %v6057_v51, %v6055_v12  ;;  %v10720_v59 = vpack.c.bf16 %v6072_v17, %v6070_v45  ;;  %v6081_v25 = vld [vmem:[%s11550_s20 + $0x778] sm:$0xff]  ;;  %v6078_v47 = vld [vmem:[%s11550_s20 + $0x760] sm:$0xff]  ;;  %v11191_v12 = vpop.permute.xlu1 %11190  ;;  %v6087_v51 = vld [vmem:[%s11550_s20 + $0x7a8] sm:$0xff] }
 0x75b   : > { %v10724_v18 = vpack.c.bf16 %v6076_v40, %v6074_v3  ;;  %v10726_v20 = vpack.c.bf16 %v6081_v25, %v6079_v15  ;;  %v6085_v49 = vld [vmem:[%s11550_s20 + $0x798] sm:$0xff]  ;;  %v10728_v14 = vpack.c.bf16 %v6080_v23, %v6078_v47  ;;  %v6086_v10 = vld [vmem:[%s11550_s20 + $0x7a0] sm:$0xff]  ;;  %v6088_v48 = vld [vmem:[%s11550_s20 + $0x7b0] sm:$0xff]  ;;  %v11193_v45 = vunpack.i.h.bf16 %v11191_v12 }
 0x75c   : > { %10697 = vmatpush1.bf16.msra.mxu0 %v10696_v38  ;;  %6393 = vmatprep.mubr.f32.mxu0 %v5833_v54  ;;  %v6083_v38 = vld [vmem:[%s11550_s20 + $0x788] sm:$0xff]  ;;  %v11186_v54 = vpop.permute.xlu0 %11185  ;;  %v6093_v56 = vld [vmem:[%s11550_s20 + $0x7d8] sm:$0xff]  ;;  %v10736_v36 = vpack.c.bf16 %v6088_v48, %v6086_v10  ;;  %v6090_v50 = vld [vmem:[%s11550_s20 + $0x7c0] sm:$0xff]  ;;  %v11192_v17 = vunpack.i.l.bf16 %v11191_v12  ;;  %v5640_v40 = vsel %vm1478_vm2, %v11158_v58, %v11182_v1  ;;  %v14828_v42 = vpack.i.bf16 %v14586_v61, %v14586_v61 }
 0x75d   : > { %10699 = vmatprep.subr.bf16.mxu0 %v10698_v39  ;;  %v10730_v39 = vpack.c.bf16 %v6085_v49, %v6083_v38  ;;  %v6097_v33 = vld [vmem:[%s11550_s20 + $0x7f8] sm:$0xff]  ;;  %v11188_v62 = vunpack.i.h.bf16 %v11186_v54  ;;  %v11187_v26 = vunpack.i.l.bf16 %v11186_v54  ;;  %v6094_v4 = vld [vmem:[%s11550_s20 + $0x7e0] sm:$0xff] }
 0x75e   : > { %v5809_v25 = vsel %vm1178_vm0, %v11192_v17, %v11193_v45  ;;  %v5808_v23 = vsel %vm1178_vm0, %v11178_v44, %v11192_v17  ;;  %vm6470_vm0 = vcmask 908288  }
 0x75f   : > { %v5724_v31 = vsel %vm1802_vm7, %v11173_v0, %v11187_v26 }
 0x760   : > { %10701 = vmatpush1.bf16.msra.mxu0 %v10700_v53  ;;  %v6089_v53 = vld [vmem:[%s11550_s20 + $0x7b8] sm:$0xff] }
 0x761   : > { %10703 = vmatprep.subr.bf16.mxu0 %v10702_v29  ;;  %v10732_v29 = vpack.c.bf16 %v6084_v27, %v6082_v19  ;;  %v10734_v8 = vpack.c.bf16 %v6089_v53, %v6087_v51 }
 0x763   : > { %v14799_v55 = vpop.permute.xlu0 %6410 }
 0x764   : > { %10705 = vmatpush1.bf16.msra.mxu0 %v10704_v57 }
 0x765   : > { %10707 = vmatprep.subr.bf16.mxu0 %v10706_v9  ;;  %v6091_v9 = vld [vmem:[%s11550_s20 + $0x7c8] sm:$0xff] }
 0x766   : > { %v10738_v60 = vpack.c.bf16 %v6093_v56, %v6091_v9 }
 0x767   : > { %v14809_v32 = vpop.permute.xlu0 %6426 }
 0x768   : > { %10709 = vmatpush1.bf16.msra.mxu0 %v10708_v35  ;;  %v6092_v35 = vld [vmem:[%s11550_s20 + $0x7d0] sm:$0xff] }
 0x769   : > { %10711 = vmatprep.subr.bf16.mxu0 %v10710_v5  ;;  %v6095_v5 = vld [vmem:[%s11550_s20 + $0x7e8] sm:$0xff] }
 0x76a   : > { %v10742_v52 = vpack.c.bf16 %v6097_v33, %v6095_v5 }
 0x76b   : > { %v14801_v57 = vpop.permute.xlu1 %6415  ;;  %v6467_v6 = vpop.permute.xlu0 %6466 }
 0x76c   : > { %10713 = vmatpush1.bf16.msra.mxu0 %v10712_v46  ;;  %v6475_v3 = vmul.f32 %v14586_v61, %v6467_v6 }
 0x76d   : > { %10715 = vmatprep.subr.bf16.mxu0 %v10714_v30  ;;  %v10740_v30 = vpack.c.bf16 %v6092_v35, %v6090_v50 }
 0x76e   : > { %6487 = vrot.lane.b32.xlu0 %v6475_v3, %s16302_s11  ;;  %6493 = vrot.lane.b32.xlu1 %v6475_v3, %s16302_s11 }
 0x76f   : > { %v14811_v46 = vpop.permute.xlu1 %6431 }
 0x770   : > { %10717 = vmatpush1.bf16.msra.mxu0 %v10716_v37  ;;  %v6096_v37 = vld [vmem:[%s11550_s20 + $0x7f0] sm:$0xff] }
 0x771   : > { %10719 = vmatprep.subr.bf16.mxu0 %v10718_v11  ;;  %v5641_v11 = vsel %vm1478_vm2, %v11182_v1, %v11183_v43  ;;  %v10744_v7 = vpack.c.bf16 %v6096_v37, %v6094_v4 }
 0x772   : > { %v5673_v15 = vmax.f32 %v14557_v16, %v5641_v11  ;;  %v5672_v16 = vmax.f32 %v14548_v28, %v5640_v40  ;;  %11195 = vrot.lane.b32.xlu0 %v14828_v42, %s16300_s15 }
 0x774   : > { %10721 = vmatpush1.bf16.msra.mxu0 %v10720_v59  ;;  %v14816_v59 = vpop.permute.xlu1 %6468  ;;  %v5756_v49 = vmax.f32 %v5672_v16, %v5724_v31  ;;  %v6896_v16 = vld [vmem:[%s16401_s18 + $0x10] sm:$0xff] }
 0x775   : > { %10723 = vmatprep.subr.bf16.mxu0 %v10722_v41  ;;  %v5725_v41 = vsel %vm1802_vm7, %v11187_v26, %v11188_v62  ;;  %vm6567_vm7 = vcmask 924672  }
 0x776   : > { %v5840_v28 = vmax.f32 %v5756_v49, %v5808_v23 }
 0x778   : > { %10725 = vmatpush1.bf16.msra.mxu0 %v10724_v18  ;;  %v5757_v18 = vmax.f32 %v5673_v15, %v5725_v41  ;;  %v14834_v58 = vpop.permute.xlu1 %6565 }
 0x779   : > { %10727 = vmatprep.subr.bf16.mxu0 %v10726_v20  ;;  %v6564_v20 = vpop.permute.xlu0 %6563 }
 0x77a   : > { %v5841_v47 = vmax.f32 %v5757_v18, %v5809_v25  ;;  %v6572_v38 = vmul.f32 %v14586_v61, %v6564_v20  ;;  %v6568_v48 = vsel %vm6567_vm7, %v6564_v20, %v14834_v58  ;;  %v6894_v20 = vld [vmem:[%s16401_s18] sm:$0xff] }
 0x77c   : > { %10729 = vmatpush1.bf16.msra.mxu0 %v10728_v14  ;;  %v14846_v0 = vpop.permute.xlu1 %6617  ;;  %6584 = vrot.lane.b32.xlu1 %v6572_v38, %s11397_s10 }
 0x77d   : > { %10731 = vmatprep.subr.bf16.mxu0 %v10730_v39  ;;  %v6616_v34 = vpop.permute.xlu0 %6615  ;;  %6590 = vrot.lane.b32.xlu0 %v6572_v38, %s11397_s10  ;;  %v7043_v38 = vld [vmem:[%s16402_s23] sm:$0xff] }
 0x77e   : > { %v6623_v2 = vmul.f32 %v14586_v61, %v6616_v34 }
 0x780   : > { %10733 = vmatpush1.bf16.msra.mxu0 %v10732_v29  ;;  %v6672_v44 = vpop.permute.xlu1 %6671  ;;  %6635 = vrot.lane.b32.xlu1 %v6623_v2, %s16308_s7 }
 0x781   : > { %10735 = vmatprep.subr.bf16.mxu0 %v10734_v8  ;;  %6641 = vrot.lane.b32.xlu0 %v6623_v2, %s16308_s7  ;;  %v6679_v21 = vmul.f32 %v14586_v61, %v6672_v44  ;;  %v6471_v8 = vsel %vm6470_vm0, %v6467_v6, %v14816_v59  ;;  %v6670_v33 = vpop.permute.xlu0 %6669 }
 0x784   : > { %10737 = vmatpush1.bf16.msra.mxu0 %v10736_v36  ;;  %v6722_v63 = vpop.permute.xlu1 %6721 }
 0x785   : > { %10739 = vmatprep.subr.bf16.mxu0 %v10738_v60  ;;  %6693 = vrot.lane.b32.xlu0 %v6679_v21, %s16312_s2  ;;  %v6720_v26 = vpop.permute.xlu0 %6719 }
 0x788   : > { %10741 = vmatpush1.bf16.msra.mxu0 %v10740_v30  ;;  %v6809_v40 = vpop.permute.xlu1 %6808 }
 0x789   : > { %10743 = vmatprep.subr.bf16.mxu0 %v10742_v52  ;;  %6699 = vrot.lane.b32.xlu0 %v6679_v21, %s16312_s2  ;;  %v6723_v52 = vsel %vm6596_vm14, %v6720_v26, %v6722_v63  ;;  %v6807_v3 = vpop.permute.xlu0 %6806  ;;  %v6816_v23 = vmul.f32 %v14586_v61, %v6809_v40  ;;  %v7107_v21 = vld [vmem:[%s16398_s26] ss:$2 sm:$0x3] }
 0x78a   : > { %v6810_v25 = vsel %vm6499_vm15, %v6807_v3, %v6809_v40 }
 0x78c   : > { %10745 = vmatpush1.bf16.msra.mxu0 %v10744_v7 }
 0x78f   : > { %6394 = vmatmul.mubr.f32.vlgmr.msra.gmra.mrb[20].mxu0 %v5832_v22  ;;  %v6729_v22 = vmul.f32 %v14586_v61, %v6722_v63  ;;  %v7045_v61 = vld [vmem:[%s16402_s23 + $0x10] sm:$0xff]  ;;  %v6895_v63 = vld [vmem:[%s16401_s18 + $0x8] sm:$0xff] }
 0x790   : > { %6399 = vmatprep.mubr.f32.mxu0 %v5841_v47 }
 0x791   : > { %6743 = vrot.lane.b32.xlu0 %v6729_v22, %s11396_s12 }
 0x793   : > { %6400 = vmatmul.mubr.f32.gmra.mrb[22].mxu0 %v5840_v28 }
 0x795   : > { %6749 = vrot.lane.b32.xlu0 %v6729_v22, %s11396_s12 }
 0x7e0   : > { %v14962_v49 = vpop.permute.xlu0 %6487 }
 0x7e4   : > { %v14967_v28 = vpop.permute.xlu0 %11195 }
 0x7ef   : > { %v14977_v22 = vpop.permute.xlu0 %6590 }
 0x862   : > { %v6395_v14 = vpop.f32.mrb[20].mxu0 }
 0x863   : > { %v6418_v39 = vmul.f32 %v14799_v55, %v6395_v14  ;;  %v6397_v19 = vpop.f32.mrb[21].mxu0  ;;  %v7145_v14 = vrot.slane %v7107_v21, %v16399_v13 }
 0x864   : > { %v6419_v27 = vmul.f32 %v14799_v55, %v6397_v19  ;;  %v14981_v19 = vpop.permute.xlu0 %6641 }
 0x865   : > { %v14862_v54 = vadd.f32 %v14809_v32, %v6418_v39  ;;  %v6897_v39 = vld [vmem:[%s16401_s18 + $0x18] sm:$0xff] }
 0x866   : > { %v14865_v12 = vadd.f32 %v14809_v32, %v6419_v27  ;;  %v6401_v51 = vpop.f32.mrb[22].mxu0  ;;  %v7044_v27 = vld [vmem:[%s16402_s23 + $0x8] sm:$0xff] }
 0x867   : > { %v6420_v53 = vmul.f32 %v14801_v57, %v6401_v51  ;;  %v6403_v29 = vpop.f32.mrb[23].mxu0  ;;  %6526 = vrot.lane.b32.xlu0 %v14862_v54, %s16300_s15  ;;  %v6476_v55 = vmul.f32 %v6471_v8, %v14862_v54  ;;  %v6573_v36 = vmul.f32 %v6568_v48, %v14862_v54  ;;  %v6677_v1 = vmul.f32 %v6670_v33, %v14862_v54 }
 0x868   : > { %v6421_v10 = vmul.f32 %v14801_v57, %v6403_v29  ;;  %6528 = vrot.lane.b32.xlu1 %v14865_v12, %s16300_s15  ;;  %v6619_v57 = vsel %vm1478_vm2, %v6616_v34, %v14846_v0  ;;  %v6574_v60 = vmul.f32 %v14834_v58, %v14865_v12  ;;  %v6625_v43 = vmul.f32 %v14846_v0, %v14865_v12  ;;  %v7046_v29 = vld [vmem:[%s16402_s23 + $0x18] sm:$0xff] }
 0x869   : > { %v14879_v9 = vadd.f32 %v14811_v46, %v6420_v53  ;;  %v6624_v50 = vmul.f32 %v6619_v57, %v14862_v54  ;;  %v6477_v32 = vmul.f32 %v14816_v59, %v14865_v12  ;;  %v6728_v37 = vmul.f32 %v6723_v52, %v14865_v12  ;;  %v14986_v53 = vpop.permute.xlu0 %6693 }
 0x86a   : > { %v14882_v56 = vadd.f32 %v14811_v46, %v6421_v10  ;;  %v6673_v46 = vsel %vm1531_vm3, %v6670_v33, %v6672_v44  ;;  %v6727_v15 = vmul.f32 %v6720_v26, %v14862_v54  ;;  %v6814_v31 = vmul.f32 %v6807_v3, %v14862_v54  ;;  %v6494_v10 = vpop.permute.xlu1 %6493 }
 0x86b   : > { %6489 = vrot.lane.b32.xlu0 %v6476_v55, %s16302_s11  ;;  %v10764_v5 = vpack.c.bf16 %v14879_v9, %v14862_v54  ;;  %v6479_v30 = vmul.f32 %v6471_v8, %v14879_v9  ;;  %v6678_v62 = vmul.f32 %v6673_v46, %v14865_v12  ;;  %v6680_v4 = vmul.f32 %v6670_v33, %v14879_v9  ;;  %v10022_v55 = vld [vmem:[%s16398_s26 + $0x1] ss:$2 sm:$0x3] }
 0x86c   : > { %6586 = vrot.lane.b32.xlu1 %v6573_v36, %s11397_s10  ;;  %v10762_v35 = vpack.c.bf16 %v14882_v56, %v14865_v12  ;;  %v6577_v11 = vmul.f32 %v14834_v58, %v14882_v56  ;;  %v6628_v45 = vmul.f32 %v14846_v0, %v14882_v56  ;;  %v6576_v17 = vmul.f32 %v6568_v48, %v14879_v9 }
 0x86d   : > { %v6730_v7 = vmul.f32 %v6720_v26, %v14879_v9  ;;  %v6627_v6 = vmul.f32 %v6619_v57, %v14879_v9  ;;  %v6480_v41 = vmul.f32 %v14816_v59, %v14882_v56  ;;  %v6815_v59 = vmul.f32 %v6810_v25, %v14865_v12  ;;  %v14989_v8 = vpop.permute.xlu0 %6699 }
 0x86e   : > { %v6818_v18 = vmul.f32 %v6810_v25, %v14882_v56  ;;  %v6681_v58 = vmul.f32 %v6673_v46, %v14882_v56  ;;  %v6731_v47 = vmul.f32 %v6723_v52, %v14882_v56  ;;  %v6817_v2 = vmul.f32 %v6807_v3, %v14879_v9 }
 0x86f   : > { %6588 = vrot.lane.b32.xlu0 %v6574_v60, %s11397_s10  ;;  %v7149_v36 = vrot.slane %v7107_v21, %v16400_v24  ;;  %v14995_v57 = vrot.slane %v10022_v55, %v16399_v13  ;;  %v15003_v33 = vrot.slane %v10022_v55, %v16400_v24 }
 0x870   : > { %6637 = vrot.lane.b32.xlu1 %v6624_v50, %s16308_s7  ;;  %v6585_v50 = vpop.permute.xlu1 %6584 }
 0x871   : > { %v14997_v60 = vpop.permute.xlu0 %6743 }
 0x873   : > { %6639 = vrot.lane.b32.xlu0 %v6625_v43, %s16308_s7 }
 0x874   : > { %6689 = vrot.lane.b32.xlu1 %v6677_v1, %s16312_s2  ;;  %v15008_v1 = vpop.permute.xlu1 %6635 }
 0x875   : > { %v15006_v43 = vpop.permute.xlu0 %6749 }
 0x877   : > { %6532 = vrot.lane.b32.xlu0 %v14879_v9, %s16300_s15 }
 0x878   : > { %6491 = vrot.lane.b32.xlu1 %v6477_v32, %s16302_s11 }
 0x87b   : > { %6495 = vrot.lane.b32.xlu0 %v6479_v30, %s16302_s11 }
 0x87c   : > { %6691 = vrot.lane.b32.xlu1 %v6678_v62, %s16312_s2 }
 0x87f   : > { %6695 = vrot.lane.b32.xlu0 %v6680_v4, %s16312_s2 }
 0x880   : > { %6741 = vrot.lane.b32.xlu1 %v6728_v37, %s11396_s12 }
 0x883   : > { %6594 = vrot.lane.b32.xlu0 %v6577_v11, %s11397_s10 }
 0x884   : > { %6534 = vrot.lane.b32.xlu1 %v14882_v56, %s16300_s15  ;;  %s16403_s15 = sld [smem:[#allocation14_spill]] }
 0x887   : > { %6645 = vrot.lane.b32.xlu0 %v6628_v45, %s16308_s7 }
 0x888   : > { %6592 = vrot.lane.b32.xlu1 %v6576_v17, %s11397_s10 }
 0x88a   : > { %v7075_v34 = vld [vmem:[%s16403_s15] sm:$0xff]  ;;  %v7077_v44 = vld [vmem:[%s16403_s15 + $0x10] sm:$0xff]  ;;  %v7076_v51 = vld [vmem:[%s16403_s15 + $0x8] sm:$0xff] }
 0x88b   : > { %6745 = vrot.lane.b32.xlu0 %v6730_v7, %s11396_s12  ;;  %v7078_v48 = vld [vmem:[%s16403_s15 + $0x18] sm:$0xff] }
 0x88c   : > { %6643 = vrot.lane.b32.xlu1 %v6627_v6, %s16308_s7 }
 0x88f   : > { %11200 = vrot.lane.b32.xlu0 %v14828_v42, %s16306_s16 }
 0x890   : > { %6497 = vrot.lane.b32.xlu1 %v6480_v41, %s16302_s11  ;;  %s16404_s11 = sld [smem:[#allocation11_spill]] }
 0x893   : > { %6775 = vrot.lane.b32.xlu0 %v14862_v54, %s16306_s16 }
 0x894   : > { %6739 = vrot.lane.b32.xlu1 %v6727_v15, %s11396_s12 }
 0x896   : > { %v6887_v0 = vld [vmem:[%s16404_s11 + $0x8] sm:$0xff] }
 0x897   : > { %6828 = vrot.lane.b32.xlu0 %v6815_v59, %s16304_s0  ;;  %10018 = vmatprep.mubr.msk.f32.mxu1 %vm5171_vm13, %v6887_v0  ;;  %v11197_v0 = vunpack.i.l.bf16 %v14967_v28 }
 0x898   : > { %6777 = vrot.lane.b32.xlu1 %v14865_v12, %s16306_s16 }
 0x89b   : > { %6834 = vrot.lane.b32.xlu0 %v6818_v18, %s16304_s0 }
 0x89c   : > { %6783 = vrot.lane.b32.xlu1 %v14882_v56, %s16306_s16 }
 0x89f   : > { %6826 = vrot.lane.b32.xlu0 %v6814_v31, %s16304_s0 }
 0x8a0   : > { %6781 = vrot.lane.b32.xlu1 %v14879_v9, %s16306_s16  ;;  %s16406_s16 = smov 16  }
 0x8a3   : > { %6900 = vperm.xlu0 %11062, %v6894_v20  }
 0x8a4   : > { %6697 = vrot.lane.b32.xlu1 %v6681_v58, %s16312_s2 }
 0x8a7   : > { %6910 = vperm.xlu0 %11062, %v6896_v16   ;;  %v11198_v16 = vunpack.i.h.bf16 %v14967_v28 }
 0x8a8   : > { %6747 = vrot.lane.b32.xlu1 %v6731_v47, %s11396_s12 }
 0x8ab   : > { %7049 = vperm.xlu0 %11062, %v7043_v38  }
 0x8ac   : > { %6830 = vrot.lane.b32.xlu1 %v6816_v23, %s16304_s0 }
 0x8af   : > { %7081 = vperm.xlu0 %11062, %v7075_v34  }
 0x8b0   : > { %6836 = vrot.lane.b32.xlu1 %v6816_v23, %s16304_s0 }
 0x8b3   : > { %7059 = vperm.xlu0 %11062, %v7045_v61  }
 0x8b4   : > { %6832 = vrot.lane.b32.xlu1 %v6817_v2, %s16304_s0 }
 0x8b7   : > { %7091 = vperm.xlu0 %11062, %v7077_v44  }
 0x8b8   : > { %6905 = vperm.xlu1 %11063, %v6895_v63  }
 0x8bb   : > { %7150 = vrot.lane.b32.xlu0 %v7145_v14, %s16304_s0 }
 0x8bc   : > { %6915 = vperm.xlu1 %11063, %v6897_v39  }
 0x8bf   : > { %7323 = vrot.lane.b32.xlu0 %v14995_v57, %s11396_s12 }
 0x8c0   : > { %7054 = vperm.xlu1 %11063, %v7044_v27  }
 0x8c3   : > { %7415 = vrot.lane.b32.xlu0 %v7145_v14, %s16312_s2 }
 0x8c4   : > { %7086 = vperm.xlu1 %11063, %v7076_v51  }
 0x8c7   : > { %7515 = vrot.lane.b32.xlu0 %v14995_v57, %s16308_s7 }
 0x8c8   : > { %7064 = vperm.xlu1 %11063, %v7046_v29  }
 0x8cb   : > { %7607 = vrot.lane.b32.xlu0 %v7145_v14, %s11397_s10 }
 0x8cc   : > { %7096 = vperm.xlu1 %11063, %v7078_v48  }
 0x8d0   : > { %7152 = vrot.lane.b32.xlu1 %v7149_v36, %s16304_s0  ;;  %s16405_s0 = smov 17  }
 0x8d4   : > { %7325 = vrot.lane.b32.xlu1 %v15003_v33, %s11396_s12 }
 0x8d8   : > { %7417 = vrot.lane.b32.xlu1 %v7149_v36, %s16312_s2 }
 0x8d9   : > { %v6527_v13 = vpop.permute.xlu0 %6526 }
 0x8da   : > { %v6529_v32 = vpop.permute.xlu1 %6528  ;;  %v6536_v14 = vsel %vm5171_vm13, %v11197_v0, %v6527_v13  ;;  %v6889_v0 = vld [vmem:[%s16404_s11 + $0x18] sm:$0xff] }
 0x8db   : > { %v6537_v38 = vsel %vm5171_vm13, %v6527_v13, %v6529_v32 }
 0x8dc   : > { %7517 = vrot.lane.b32.xlu1 %v15003_v33, %s16308_s7 }
 0x8dd   : > { %v6490_v24 = vpop.permute.xlu0 %6489 }
 0x8de   : > { %v6587_v46 = vpop.permute.xlu1 %6586  ;;  %v6500_v47 = vsel %vm6499_vm15, %v14962_v49, %v6490_v24 }
 0x8e0   : > { %7609 = vrot.lane.b32.xlu1 %v7149_v36, %s11397_s10 }
 0x8e1   : > { %v6589_v30 = vpop.permute.xlu0 %6588 }
 0x8e2   : > { %v6638_v62 = vpop.permute.xlu1 %6637  ;;  %v6598_v49 = vsel %vm6596_vm14, %v6587_v46, %v6589_v30 }
 0x8e5   : > { %v6640_v26 = vpop.permute.xlu0 %6639 }
 0x8e6   : > { %v6690_v52 = vpop.permute.xlu1 %6689  ;;  %v6648_v55 = vsel %vm1531_vm3, %v6638_v62, %v6640_v26 }
 0x8e9   : > { %v6533_v4 = vpop.permute.xlu0 %6532 }
 0x8ea   : > { %v6492_v37 = vpop.permute.xlu1 %6491  ;;  %v6538_v61 = vsel %vm5171_vm13, %v11198_v16, %v6533_v4 }
 0x8eb   : > { %v6501_v31 = vsel %vm6499_vm15, %v6490_v24, %v6492_v37  ;;  %v10752_v39 = vpack.c.bf16 %v6538_v61, %v6536_v14  ;;  %v6893_v14 = vld [vmem:[%s16404_s11 + $0x38] sm:$0xff] }
 0x8ed   : > { %v6496_v11 = vpop.permute.xlu0 %6495 }
 0x8ee   : > { %v6692_v45 = vpop.permute.xlu1 %6691  ;;  %v6502_v59 = vsel %vm6499_vm15, %v6494_v10, %v6496_v11  ;;  %v6597_v10 = vsel %vm6596_vm14, %v6585_v50, %v6587_v46 }
 0x8ef   : > { %v10748_v34 = vpack.c.bf16 %v6502_v59, %v6500_v47  ;;  %v6701_v50 = vsel %vm1478_vm2, %v6690_v52, %v6692_v45 }
 0x8f1   : > { %v6696_v17 = vpop.permute.xlu0 %6695 }
 0x8f2   : > { %v15019_v7 = vpop.permute.xlu1 %6741 }
 0x8f5   : > { %v6595_v6 = vpop.permute.xlu0 %6594 }
 0x8f6   : > { %v6535_v41 = vpop.permute.xlu1 %6534 }
 0x8f7   : > { %v6539_v20 = vsel %vm5171_vm13, %v6533_v4, %v6535_v41 }
 0x8f8   : > { %v10750_v21 = vpack.c.bf16 %v6539_v20, %v6537_v38 }
 0x8f9   : > { %v6646_v3 = vpop.permute.xlu0 %6645 }
 0x8fa   : > { %v6593_v40 = vpop.permute.xlu1 %6592 }
 0x8fb   : > { %v6600_v63 = vsel %vm6596_vm14, %v6593_v40, %v6595_v6  ;;  %v6599_v27 = vsel %vm6596_vm14, %v14977_v22, %v6593_v40  ;;  %v6647_v22 = vsel %vm1531_vm3, %v15008_v1, %v6638_v62 }
 0x8fc   : > { %v10754_v28 = vpack.c.bf16 %v6600_v63, %v6598_v49  ;;  %v10756_v36 = vpack.c.bf16 %v6599_v27, %v6597_v10  ;;  %v6890_v63 = vld [vmem:[%s16404_s11 + $0x20] sm:$0xff] }
 0x8fd   : > { %v6746_v25 = vpop.permute.xlu0 %6745 }
 0x8fe   : > { %v6644_v15 = vpop.permute.xlu1 %6643 }
 0x8ff   : > { %v6650_v29 = vsel %vm1531_vm3, %v6644_v15, %v6646_v3  ;;  %v6649_v13 = vsel %vm1531_vm3, %v14981_v19, %v6644_v15  ;;  %v6702_v19 = vsel %vm1478_vm2, %v6692_v45, %v14986_v53 }
 0x900   : > { %v10758_v24 = vpack.c.bf16 %v6650_v29, %v6648_v55  ;;  %v10760_v30 = vpack.c.bf16 %v6649_v13, %v6647_v22 }
 0x901   : > { %v11201_v2 = vpop.permute.xlu0 %11200 }
 0x902   : > { %v6498_v18 = vpop.permute.xlu1 %6497  ;;  %v11203_v26 = vunpack.i.h.bf16 %v11201_v2  ;;  %v11202_v56 = vunpack.i.l.bf16 %v11201_v2  ;;  %v6888_v2 = vld [vmem:[%s16404_s11 + $0x10] sm:$0xff] }
 0x903   : > { %v6503_v58 = vsel %vm6499_vm15, %v6496_v11, %v6498_v18 }
 0x904   : > { %v10746_v23 = vpack.c.bf16 %v6503_v58, %v6501_v31 }
 0x905   : > { %v6776_v48 = vpop.permute.xlu0 %6775 }
 0x906   : > { %v6740_v44 = vpop.permute.xlu1 %6739  ;;  %10747 = vmatprep.subr.bf16.mxu1 %v10746_v23 }
 0x907   : > { %10749 = vmatpush1.bf16.msra.mxu1 %v10748_v34  ;;  %v6751_v52 = vsel %vm6567_vm7, %v6740_v44, %v15019_v7  ;;  %v6886_v34 = vld [vmem:[%s16404_s11] sm:$0xff]  ;;  %v6891_v44 = vld [vmem:[%s16404_s11 + $0x28] sm:$0xff] }
 0x908   : > { %10751 = vmatprep.subr.bf16.mxu1 %v10750_v21 }
 0x909   : > { %v6829_v4 = vpop.permute.xlu0 %6828 }
 0x90a   : > { %v6778_v51 = vpop.permute.xlu1 %6777 }
 0x90b   : > { %10753 = vmatpush1.bf16.msra.mxu1 %v10752_v39  ;;  %v6892_v39 = vld [vmem:[%s16404_s11 + $0x30] sm:$0xff]  ;;  %s16424_s11 = sld [smem:[#allocation22_spill]] }
 0x90c   : > { %10755 = vmatprep.subr.bf16.mxu1 %v10754_v28 }
 0x90d   : > { %v6835_v62 = vpop.permute.xlu0 %6834 }
 0x90e   : > { %v6784_v32 = vpop.permute.xlu1 %6783 }
 0x90f   : > { %10757 = vmatpush1.bf16.msra.mxu1 %v10756_v36 }
 0x910   : > { %10759 = vmatprep.subr.bf16.mxu1 %v10758_v24 }
 0x911   : > { %v6827_v41 = vpop.permute.xlu0 %6826 }
 0x912   : > { %v6782_v37 = vpop.permute.xlu1 %6781  ;;  %v6838_v16 = vsel %vm6470_vm0, %v6827_v41, %v6829_v4 }
 0x913   : > { %10761 = vmatpush1.bf16.msra.mxu1 %v10760_v30 }
 0x914   : > { %10763 = vmatprep.subr.bf16.mxu1 %v10762_v35  ;;  %v6752_v35 = vsel %vm6567_vm7, %v15019_v7, %v14997_v60  ;;  %v6790_v60 = vsel %vm6787_vm8, %v6782_v37, %v6784_v32  ;;  %v6788_v7 = vsel %vm6787_vm8, %v6776_v48, %v6778_v51 }
 0x915   : > { %v10776_v15 = vpack.c.bf16 %v6790_v60, %v6788_v7 }
 0x916   : > { %v6698_v46 = vpop.permute.xlu1 %6697 }
 0x917   : > { %v6703_v11 = vsel %vm1478_vm2, %v6696_v17, %v6698_v46  ;;  %v6704_v1 = vsel %vm1478_vm2, %v6698_v46, %v14989_v8  ;;  %10765 = vmatpush1.bf16.msra.mxu1 %v10764_v5  ;;  %v6791_v8 = vsel %vm6787_vm8, %v6784_v32, %v11203_v26  ;;  %v6789_v17 = vsel %vm6787_vm8, %v6778_v51, %v11202_v56  ;;  %v15095_v51 = vld [vmem:[#allocation2 + $0xc0] sm:$0xff] }
 0x918   : > { %v10766_v6 = vpack.c.bf16 %v6704_v1, %v6702_v19  ;;  %v10768_v12 = vpack.c.bf16 %v6703_v11, %v6701_v50  ;;  %v10774_v40 = vpack.c.bf16 %v6791_v8, %v6789_v17 }
 0x91a   : > { %v6748_v53 = vpop.permute.xlu1 %6747  ;;  %10767 = vmatprep.subr.bf16.mxu1 %v10766_v6 }
 0x91b   : > { %v6753_v45 = vsel %vm6567_vm7, %v6746_v25, %v6748_v53  ;;  %v6754_v54 = vsel %vm6567_vm7, %v6748_v53, %v15006_v43  ;;  %10769 = vmatpush1.bf16.msra.mxu1 %v10768_v12 }
 0x91c   : > { %v10770_v9 = vpack.c.bf16 %v6754_v54, %v6752_v35  ;;  %v10772_v5 = vpack.c.bf16 %v6753_v45, %v6751_v52 }
 0x91e   : > { %v6831_v3 = vpop.permute.xlu1 %6830  ;;  %10771 = vmatprep.subr.bf16.mxu1 %v10770_v9 }
 0x91f   : > { %10773 = vmatpush1.bf16.msra.mxu1 %v10772_v5  ;;  %v6839_v59 = vsel %vm6470_vm0, %v6829_v4, %v6831_v3 }
 0x920   : > { %10775 = vmatprep.subr.bf16.mxu1 %v10774_v40 }
 0x922   : > { %v15067_v25 = vpop.permute.xlu0 %6900  ;;  %v6837_v43 = vpop.permute.xlu1 %6836 }
 0x923   : > { %v6841_v18 = vsel %vm6470_vm0, %v6835_v62, %v6837_v43  ;;  %10777 = vmatpush1.bf16.msra.mxu1 %v10776_v15 }
 0x924   : > { %v10778_v31 = vpack.c.bf16 %v6841_v18, %v6839_v59 }
 0x926   : > { %v15071_v20 = vpop.permute.xlu0 %6910  ;;  %v6833_v58 = vpop.permute.xlu1 %6832  ;;  %10779 = vmatprep.subr.bf16.mxu1 %v10778_v31 }
 0x927   : > { %v6840_v47 = vsel %vm6470_vm0, %v6833_v58, %v6835_v62 }
 0x928   : > { %v10780_v23 = vpack.c.bf16 %v6840_v47, %v6838_v16 }
 0x92a   : > { %v15075_v38 = vpop.permute.xlu0 %7049  ;;  %10781 = vmatpush1.bf16.msra.mxu1 %v10780_v23 }
 0x92d   : > { %6995 = vmatmul.mubr.f32.vlgmr.msra.gmra.mrb[20].mxu1 %v6886_v34 }
 0x92e   : > { %v15079_v61 = vpop.permute.xlu0 %7081  ;;  %10019 = vmatprep.mubr.msk.f32.mxu1 %vm5171_vm13, %v6889_v0 }
 0x931   : > { %7001 = vmatmul.mubr.f32.gmra.mrb[22].mxu1 %v6888_v2 }
 0x932   : > { %v15084_v21 = vpop.permute.xlu0 %7059  ;;  %10020 = vmatprep.mubr.msk.f32.mxu1 %vm5171_vm13, %v6891_v44 }
 0x935   : > { %7007 = vmatmul.mubr.f32.gmra.mrb[24].mxu1 %v6890_v63 }
 0x936   : > { %v15089_v49 = vpop.permute.xlu0 %7091  ;;  %10021 = vmatprep.mubr.msk.f32.mxu1 %vm5171_vm13, %v6893_v14 }
 0x937   : > { %v6906_v10 = vpop.permute.xlu1 %6905 }
 0x939   : > { %7013 = vmatmul.mubr.f32.gmra.mrb[26].mxu1 %v6892_v39 }
 0x93a   : > { %v15093_v27 = vpop.permute.xlu0 %7150 }
 0x93b   : > { %v7158_v28 = vmul.f32 %v15095_v51, %v15093_v27  ;;  %v15119_v36 = vpop.permute.xlu1 %6915 }
 0x93d   : > { %7182 = vrot.lane.b32.xlu0 %v7158_v28, %s16405_s0  ;;  %7188 = vrot.lane.b32.xlu1 %v7158_v28, %s16405_s0 }
 0x93e   : > { %v15107_v29 = vpop.permute.xlu0 %7323 }
 0x93f   : > { %v7334_v48 = vmul.f32 %v15095_v51, %v15107_v29 }
 0x941   : > { %7194 = vrot.lane.b32.xlu0 %v7158_v28, %s16405_s0  ;;  %7200 = vrot.lane.b32.xlu1 %v7158_v28, %s16405_s0 }
 0x942   : > { %v15117_v55 = vpop.permute.xlu0 %7415 }
 0x945   : > { %11205 = vrot.lane.b32.xlu0 %v14828_v42, %s16406_s16  ;;  %7771 = vrot.lane.b32.xlu1 %v14995_v57, %s16405_s0  ;;  %v7426_v57 = vmul.f32 %v15095_v51, %v15117_v55 }
 0x949   : > { %7773 = vrot.lane.b32.xlu0 %v15003_v33, %s16405_s0  ;;  %11210 = vrot.lane.b32.xlu1 %v14828_v42, %s16406_s16  ;;  %v7055_v33 = vpop.permute.xlu1 %7054 }
 0x94d   : > { %7361 = vrot.lane.b32.xlu1 %v7334_v48, %s11397_s10  ;;  %7355 = vrot.lane.b32.xlu0 %v7334_v48, %s11397_s10  ;;  %v7087_v42 = vpop.permute.xlu1 %7086 }
 0x951   : > { %7373 = vrot.lane.b32.xlu1 %v7334_v48, %s11397_s10  ;;  %7367 = vrot.lane.b32.xlu0 %v7334_v48, %s11397_s10  ;;  %v15129_v13 = vpop.permute.xlu1 %7064 }
 0x955   : > { %7453 = vrot.lane.b32.xlu1 %v7426_v57, %s16308_s7  ;;  %7447 = vrot.lane.b32.xlu0 %v7426_v57, %s16308_s7  ;;  %v15131_v32 = vpop.permute.xlu1 %7096 }
 0x959   : > { %7465 = vrot.lane.b32.xlu1 %v7426_v57, %s16308_s7  ;;  %7459 = vrot.lane.b32.xlu0 %v7426_v57, %s16308_s7  ;;  %v15133_v24 = vpop.permute.xlu1 %7152 }
 0x95a   : > { %v15168_v59 = vsel %vm6470_vm0, %v15093_v27, %v15133_v24 }
 0x95d   : > { %v15135_v22 = vpop.permute.xlu1 %7325 }
 0x95e   : > { %v15189_v14 = vsel %vm6567_vm7, %v15107_v29, %v15135_v22 }
 0x961   : > { %v15137_v30 = vpop.permute.xlu1 %7417 }
 0x965   : > { %v15139_v4 = vpop.permute.xlu1 %7517 }
 0x966   : > { %v7525_v37 = vmul.f32 %v15095_v51, %v15139_v4 }
 0x968   : > { %7551 = vrot.lane.b32.xlu1 %v7525_v37, %s16312_s2 }
 0x96c   : > { %7557 = vrot.lane.b32.xlu1 %v7525_v37, %s16312_s2 }
 0x970   : > { %7563 = vrot.lane.b32.xlu1 %v7525_v37, %s16312_s2 }
 0x974   : > { %7569 = vrot.lane.b32.xlu1 %v7525_v37, %s16312_s2 }
 0xa00   : > { %v6996_v50 = vpop.f32.mrb[20].mxu1 }
 0xa01   : > { %v6997_v46 = vadd.f32 %v6996_v50, %v15067_v25  ;;  %v6998_v19 = vpop.f32.mrb[21].mxu1 }
 0xa02   : > { %v6999_v26 = vadd.f32 %v6998_v19, %v15067_v25  ;;  %v7610_v19 = vpop.permute.xlu1 %7609 }
 0xa03   : > { %vm7019_vm9 = vcmp.ge.f32.partialorder %v6997_v46, 0.0  ;;  %v7027_v11 = vmul.f32 0.1, %v6997_v46 }
 0xa04   : > { %vm7020_vm1 = vcmp.ge.f32.partialorder %v6999_v26, 0.0  ;;  %v7028_v1 = vmul.f32 0.1, %v6999_v26  ;;  %v7002_v62 = vpop.f32.mrb[22].mxu1 }
 0xa05   : > { %v7035_v6 = vsel %vm7019_vm9, %v6997_v46, %v7027_v11  ;;  %v7003_v12 = vadd.f32 %v7002_v62, %v6906_v10  ;;  %v7004_v56 = vpop.f32.mrb[23].mxu1 }
 0xa06   : > { %v7067_v35 = vmul.f32 %v15075_v38, %v7035_v6  ;;  %v7036_v53 = vsel %vm7020_vm1, %v6999_v26, %v7028_v1  ;;  %v7005_v52 = vadd.f32 %v7004_v56, %v6906_v10 }
 0xa07   : > { %v7068_v8 = vmul.f32 %v15075_v38, %v7036_v53  ;;  %vm7021_vm4 = vcmp.ge.f32.partialorder %v7003_v12, 0.0  ;;  %v7029_v45 = vmul.f32 0.1, %v7003_v12 }
 0xa08   : > { %v15152_v54 = vadd.f32 %v15079_v61, %v7067_v35  ;;  %vm7022_vm5 = vcmp.ge.f32.partialorder %v7005_v52, 0.0  ;;  %v7030_v9 = vmul.f32 0.1, %v7005_v52  ;;  %v7008_v5 = vpop.f32.mrb[24].mxu1 }
 0xa09   : > { %v15155_v17 = vadd.f32 %v15079_v61, %v7068_v8  ;;  %v7037_v41 = vsel %vm7021_vm4, %v7003_v12, %v7029_v45  ;;  %v7009_v60 = vadd.f32 %v7008_v5, %v15071_v20  ;;  %v7010_v3 = vpop.f32.mrb[25].mxu1 }
 0xa0a   : > { %7495 = vst [vmem:[#allocation3 + $0x400] sm:$0xff] %v15152_v54  ;;  %v7069_v40 = vmul.f32 %v7055_v33, %v7037_v41  ;;  %v7038_v7 = vsel %vm7022_vm5, %v7005_v52, %v7030_v9  ;;  %v7011_v15 = vadd.f32 %v7010_v3, %v15071_v20  ;;  %7256 = vrot.lane.b32.xlu0 %v15152_v54, %s16406_s16  ;;  %v15277_v9 = vpop.permute.xlu1 %7188 }
 0xa0b   : > { %7496 = vst [vmem:[#allocation3 + $0x408] sm:$0xff] %v15155_v17  ;;  %v7070_v25 = vmul.f32 %v7055_v33, %v7038_v7  ;;  %vm7023_vm10 = vcmp.ge.f32.partialorder %v7009_v60, 0.0  ;;  %v7031_v43 = vmul.f32 0.1, %v7009_v60  ;;  %7258 = vrot.lane.b32.xlu1 %v15155_v17, %s16406_s16  ;;  %v7159_v58 = vmul.f32 %v15168_v59, %v15152_v54 }
 0xa0c   : > { %v15170_v18 = vadd.f32 %v7087_v42, %v7069_v40  ;;  %vm7024_vm11 = vcmp.ge.f32.partialorder %v7011_v15, 0.0  ;;  %v7032_v31 = vmul.f32 0.1, %v7011_v15  ;;  %v7014_v20 = vpop.f32.mrb[26].mxu1  ;;  %v7160_v34 = vmul.f32 %v15133_v24, %v15155_v17 }
 0xa0d   : > { %v15174_v16 = vadd.f32 %v7087_v42, %v7070_v25  ;;  %v7039_v47 = vsel %vm7023_vm10, %v7009_v60, %v7031_v43  ;;  %v7015_v23 = vadd.f32 %v7014_v20, %v15119_v36  ;;  %v7016_v38 = vpop.f32.mrb[27].mxu1  ;;  %v7332_v28 = vmul.f32 %v15189_v14, %v15152_v54 }
 0xa0e   : > { %7497 = vst [vmem:[#allocation3 + $0x440] sm:$0xff] %v15170_v18  ;;  %v7071_v0 = vmul.f32 %v15084_v21, %v7039_v47  ;;  %v7040_v61 = vsel %vm7024_vm11, %v7011_v15, %v7032_v31  ;;  %v7017_v2 = vadd.f32 %v7016_v38, %v15119_v36  ;;  %7184 = vrot.lane.b32.xlu0 %v7159_v58, %s16405_s0  ;;  %v15287_v60 = vpop.permute.xlu1 %7200 }
 0xa0f   : > { %7498 = vst [vmem:[#allocation3 + $0x448] sm:$0xff] %v15174_v16  ;;  %v7072_v44 = vmul.f32 %v15084_v21, %v7040_v61  ;;  %vm7025_vm12 = vcmp.ge.f32.partialorder %v7015_v23, 0.0  ;;  %v7033_v63 = vmul.f32 0.1, %v7015_v23  ;;  %7186 = vrot.lane.b32.xlu1 %v7160_v34, %s16405_s0  ;;  %v7333_v48 = vmul.f32 %v15135_v22, %v15155_v17 }
 0xa10   : > { %v15192_v39 = vadd.f32 %v15089_v49, %v7071_v0  ;;  %vm7026_vm9 = vcmp.ge.f32.partialorder %v7017_v2, 0.0  ;;  %v7034_v27 = vmul.f32 0.1, %v7017_v2  ;;  %v7425_v50 = vmul.f32 %v15137_v30, %v15155_v17 }
 0xa11   : > { %v15197_v10 = vadd.f32 %v15089_v49, %v7072_v44  ;;  %v7041_v21 = vsel %vm7025_vm12, %v7015_v23, %v7033_v63  ;;  %v15210_v49 = vsel %vm1478_vm2, %v15117_v55, %v15137_v30  ;;  %v7163_v62 = vmul.f32 %v15133_v24, %v15174_v16 }
 0xa12   : > { %7499 = vst [vmem:[#allocation3 + $0x480] sm:$0xff] %v15192_v39  ;;  %v7073_v29 = vmul.f32 %v15129_v13, %v7041_v21  ;;  %v7042_v36 = vsel %vm7026_vm9, %v7017_v2, %v7034_v27  ;;  %7357 = vrot.lane.b32.xlu0 %v7332_v28, %s11397_s10  ;;  %v7424_v42 = vmul.f32 %v15210_v49, %v15152_v54  ;;  %v15296_v7 = vpop.permute.xlu1 %7771  ;;  %vm8707_vm12 = vcmask 56320  }
 0xa13   : > { %7500 = vst [vmem:[#allocation3 + $0x488] sm:$0xff] %v15197_v10  ;;  %v7074_v57 = vmul.f32 %v15129_v13, %v7042_v36  ;;  %7359 = vrot.lane.b32.xlu1 %v7333_v48, %s11397_s10  ;;  %v7516_v13 = vpop.permute.xlu0 %7515  ;;  %v7336_v6 = vmul.f32 %v15135_v22, %v15174_v16  ;;  %v7162_v12 = vmul.f32 %v15168_v59, %v15170_v18 }
 0xa14   : > { %v15213_v33 = vadd.f32 %v15131_v32, %v7073_v29  ;;  %v7523_v55 = vmul.f32 %v7516_v13, %v15152_v54  ;;  %v7526_v11 = vmul.f32 %v7516_v13, %v15170_v18  ;;  %v7428_v56 = vmul.f32 %v15137_v30, %v15174_v16 }
 0xa15   : > { %v15218_v37 = vadd.f32 %v15131_v32, %v7074_v57  ;;  %v15231_v32 = vsel %vm1531_vm3, %v7516_v13, %v15139_v4  ;;  %v7335_v35 = vmul.f32 %v15189_v14, %v15170_v18  ;;  %v7427_v53 = vmul.f32 %v15210_v49, %v15170_v18 }
 0xa16   : > { %7501 = vst [vmem:[#allocation3 + $0x4c0] sm:$0xff] %v15213_v33  ;;  %7449 = vrot.lane.b32.xlu0 %v7424_v42, %s16308_s7  ;;  %v7524_v26 = vmul.f32 %v15231_v32, %v15155_v17  ;;  %v7166_v52 = vmul.f32 %v15133_v24, %v15197_v10  ;;  %v7527_v8 = vmul.f32 %v15231_v32, %v15174_v16  ;;  %v15305_v43 = vpop.permute.xlu1 %11210 }
 0xa17   : > { %7451 = vrot.lane.b32.xlu1 %v7425_v50, %s16308_s7  ;;  %v15233_v46 = vpop.permute.xlu0 %7607  ;;  %v7339_v45 = vmul.f32 %v15135_v22, %v15197_v10  ;;  %v7431_v5 = vmul.f32 %v15137_v30, %v15197_v10  ;;  %v7165_v41 = vmul.f32 %v15168_v59, %v15192_v39  ;;  %v7338_v3 = vmul.f32 %v15189_v14, %v15192_v39 }
 0xa18   : > { %v15240_v1 = vsel %vm6596_vm14, %v15233_v46, %v7610_v19  ;;  %v7532_v40 = vmul.f32 %v7516_v13, %v15213_v33  ;;  %v7430_v15 = vmul.f32 %v15210_v49, %v15192_v39  ;;  %v7169_v25 = vmul.f32 %v15133_v24, %v15218_v37 }
 0xa19   : > { %v7616_v4 = vmul.f32 %v15240_v1, %v15155_v17  ;;  %v7529_v31 = vmul.f32 %v7516_v13, %v15192_v39  ;;  %v7617_v20 = vmul.f32 %v15095_v51, %v7610_v19  ;;  %v7530_v58 = vmul.f32 %v15231_v32, %v15197_v10 }
 0xa1a   : > { %7547 = vrot.lane.b32.xlu0 %v7523_v55, %s16312_s2  ;;  %v15313_v47 = vpop.permute.xlu1 %7361  ;;  %v7618_v23 = vmul.f32 %v15233_v46, %v15170_v18  ;;  %v7168_v34 = vmul.f32 %v15168_v59, %v15213_v33  ;;  %v7342_v0 = vmul.f32 %v15135_v22, %v15218_v37  ;;  %v7341_v2 = vmul.f32 %v15189_v14, %v15213_v33 }
 0xa1b   : > { %7264 = vrot.lane.b32.xlu1 %v15174_v16, %s16406_s16  ;;  %v7183_v24 = vpop.permute.xlu0 %7182  ;;  %v7433_v22 = vmul.f32 %v15210_v49, %v15213_v33  ;;  %v7434_v59 = vmul.f32 %v15137_v30, %v15218_v37  ;;  %v7619_v14 = vmul.f32 %v15240_v1, %v15174_v16  ;;  %v7615_v21 = vmul.f32 %v15233_v46, %v15152_v54 }
 0xa1c   : > { %v7624_v30 = vmul.f32 %v15233_v46, %v15213_v33  ;;  %v11214_v36 = vpack.i.bf16 %v15095_v51, %v15095_v51  ;;  %v7622_v57 = vmul.f32 %v15240_v1, %v15197_v10  ;;  %v7621_v50 = vmul.f32 %v15233_v46, %v15192_v39 }
 0xa1e   : > { %7549 = vrot.lane.b32.xlu0 %v7524_v26, %s16312_s2  ;;  %v15322_v38 = vpop.permute.xlu1 %7373 }
 0xa1f   : > { %7553 = vrot.lane.b32.xlu1 %v7526_v11, %s16312_s2  ;;  %v15328_v61 = vpop.permute.xlu0 %7194 }
 0xa22   : > { %7641 = vrot.lane.b32.xlu0 %v7616_v4, %s11396_s12  ;;  %v15334_v44 = vpop.permute.xlu1 %7453  ;;  %v7533_v4 = vmul.f32 %v15231_v32, %v15218_v37 }
 0xa23   : > { %7192 = vrot.lane.b32.xlu1 %v7163_v62, %s16405_s0  ;;  %v15338_v63 = vpop.permute.xlu0 %11205 }
 0xa24   : > { %v11207_v26 = vunpack.i.l.bf16 %v15338_v63 }
 0xa26   : > { %7262 = vrot.lane.b32.xlu0 %v15170_v18, %s16406_s16  ;;  %v15346_v27 = vpop.permute.xlu1 %7465 }
 0xa27   : > { %7365 = vrot.lane.b32.xlu1 %v7336_v6, %s11397_s10  ;;  %v7774_v28 = vpop.permute.xlu0 %7773 }
 0xa2a   : > { %7190 = vrot.lane.b32.xlu0 %v7162_v12, %s16405_s0  ;;  %v15356_v48 = vpop.permute.xlu1 %7551  ;;  %v7781_v12 = vmul.f32 %v15095_v51, %v7774_v28 }
 0xa2b   : > { %7457 = vrot.lane.b32.xlu1 %v7428_v56, %s16308_s7  ;;  %v7356_v29 = vpop.permute.xlu0 %7355 }
 0xa2e   : > { %7363 = vrot.lane.b32.xlu0 %v7335_v35, %s11397_s10  ;;  %v15366_v49 = vpop.permute.xlu1 %7557 }
 0xa2f   : > { %7268 = vrot.lane.b32.xlu1 %v15192_v39, %s16406_s16  ;;  %v15368_v42 = vpop.permute.xlu0 %7367 }
 0xa32   : > { %7455 = vrot.lane.b32.xlu0 %v7427_v53, %s16308_s7  ;;  %v15375_v13 = vpop.permute.xlu1 %7563 }
 0xa33   : > { %7198 = vrot.lane.b32.xlu1 %v7166_v52, %s16405_s0  ;;  %v7448_v55 = vpop.permute.xlu0 %7447 }
 0xa36   : > { %7555 = vrot.lane.b32.xlu0 %v7527_v8, %s16312_s2  ;;  %v15385_v46 = vpop.permute.xlu1 %7569  ;;  %v7625_v8 = vmul.f32 %v15240_v1, %v15218_v37 }
 0xa37   : > { %7371 = vrot.lane.b32.xlu1 %v7339_v45, %s11397_s10  ;;  %v15387_v19 = vpop.permute.xlu0 %7459 }
 0xa3a   : > { %7270 = vrot.lane.b32.xlu0 %v15197_v10, %s16406_s16 }
 0xa3b   : > { %7463 = vrot.lane.b32.xlu1 %v7431_v5, %s16308_s7 }
 0xa3e   : > { %7196 = vrot.lane.b32.xlu0 %v7165_v41, %s16405_s0  ;;  %v7782_v41 = vmul.f32 %v15296_v7, %v15170_v18 }
 0xa3f   : > { %7274 = vrot.lane.b32.xlu1 %v15213_v33, %s16406_s16 }
 0xa42   : > { %7369 = vrot.lane.b32.xlu0 %v7338_v3, %s11397_s10 }
 0xa43   : > { %7565 = vrot.lane.b32.xlu1 %v7532_v40, %s16312_s2 }
 0xa46   : > { %7461 = vrot.lane.b32.xlu0 %v7430_v15, %s16308_s7 }
 0xa47   : > { %7204 = vrot.lane.b32.xlu1 %v7169_v25, %s16405_s0  ;;  %v7775_v25 = vsel %vm6499_vm15, %v15296_v7, %v7774_v28 }
 0xa4a   : > { %7559 = vrot.lane.b32.xlu0 %v7529_v31, %s16312_s2 }
 0xa4b   : > { %7643 = vrot.lane.b32.xlu1 %v7617_v20, %s11396_s12 }
 0xa4e   : > { %7561 = vrot.lane.b32.xlu0 %v7530_v58, %s16312_s2 }
 0xa4f   : > { %7649 = vrot.lane.b32.xlu1 %v7617_v20, %s11396_s12 }
 0xa52   : > { %7276 = vrot.lane.b32.xlu0 %v15218_v37, %s16406_s16  ;;  %s16410_s16 = sld [smem:[#allocation16_spill]] }
 0xa53   : > { %7645 = vrot.lane.b32.xlu1 %v7618_v23, %s11396_s12  ;;  %v7783_v23 = vmul.f32 %v7775_v25, %v15174_v16 }
 0xa56   : > { %7202 = vrot.lane.b32.xlu0 %v7168_v34, %s16405_s0  ;;  %s16407_s0 = smov 112  }
 0xa57   : > { %7377 = vrot.lane.b32.xlu1 %v7342_v0, %s11397_s10 }
 0xa5a   : > { %7375 = vrot.lane.b32.xlu0 %v7341_v2, %s11397_s10  ;;  %s16408_s10 = smov 111  }
 0xa5b   : > { %7655 = vrot.lane.b32.xlu1 %v7617_v20, %s11396_s12 }
 0xa5e   : > { %7467 = vrot.lane.b32.xlu0 %v7433_v22, %s16308_s7 }
 0xa5f   : > { %7469 = vrot.lane.b32.xlu1 %v7434_v59, %s16308_s7  ;;  %v7779_v59 = vmul.f32 %v15296_v7, %v15152_v54  ;;  %s16411_s7 = sld [smem:[#allocation25_spill]] }
 0xa62   : > { %7647 = vrot.lane.b32.xlu0 %v7619_v14, %s11396_s12  ;;  %v7936_v14 = vld [vmem:[%s16410_s16 + $0x8] sm:$0xff] }
 0xa63   : > { %7661 = vrot.lane.b32.xlu1 %v7617_v20, %s11396_s12  ;;  %v7780_v20 = vmul.f32 %v7775_v25, %v15155_v17 }
 0xa66   : > { %7639 = vrot.lane.b32.xlu0 %v7615_v21, %s11396_s12  ;;  %v11208_v21 = vunpack.i.h.bf16 %v15338_v63  ;;  %v7789_v63 = vmul.f32 %v7775_v25, %v15218_v37 }
 0xa67   : > { %7657 = vrot.lane.b32.xlu1 %v7624_v30, %s11396_s12 }
 0xa6a   : > { %7653 = vrot.lane.b32.xlu0 %v7622_v57, %s11396_s12 }
 0xa6b   : > { %11215 = vrot.lane.b32.xlu1 %v11214_v36, %s16407_s0 }
 0xa6e   : > { %7651 = vrot.lane.b32.xlu0 %v7621_v50, %s11396_s12 }
 0xa6f   : > { %7711 = vrot.lane.b32.xlu1 %v15152_v54, %s16407_s0 }
 0xa72   : > { %7713 = vrot.lane.b32.xlu0 %v15155_v17, %s16407_s0  ;;  %v7788_v17 = vmul.f32 %v15296_v7, %v15213_v33 }
 0xa73   : > { %7725 = vrot.lane.b32.xlu1 %v15197_v10, %s16407_s0 }
 0xa76   : > { %7719 = vrot.lane.b32.xlu0 %v15174_v16, %s16407_s0 }
 0xa77   : > { %7731 = vrot.lane.b32.xlu1 %v15218_v37, %s16407_s0 }
 0xa7a   : > { %7717 = vrot.lane.b32.xlu0 %v15170_v18, %s16407_s0 }
 0xa7b   : > { %7729 = vrot.lane.b32.xlu1 %v15213_v33, %s16407_s0 }
 0xa7c   : > { %v7257_v11 = vpop.permute.xlu0 %7256 }
 0xa7d   : > { %v15397_v62 = vsel %vm5171_vm13, %v11207_v26, %v7257_v11  ;;  %v7259_v6 = vpop.permute.xlu1 %7258 }
 0xa7e   : > { %7294 = vst [vmem:[#allocation3 + $0x100] sm:$0xff] %v15397_v62  ;;  %v15402_v56 = vsel %vm5171_vm13, %v7257_v11, %v7259_v6  ;;  %7567 = vrot.lane.b32.xlu0 %v7533_v4, %s16312_s2  ;;  %v11212_v6 = vunpack.i.l.bf16 %v15305_v43 }
 0xa7f   : > { %7807 = vrot.lane.b32.xlu1 %v7781_v12, %s16408_s10 }
 0xa80   : > { %v7185_v35 = vpop.permute.xlu0 %7184 }
 0xa81   : > { %v15407_v53 = vsel %vm6499_vm15, %v7183_v24, %v7185_v35  ;;  %v7187_v32 = vpop.permute.xlu1 %7186 }
 0xa82   : > { %7222 = vst [vmem:[#allocation3] sm:$0xff] %v15407_v53  ;;  %v15411_v52 = vsel %vm6499_vm15, %v7185_v35, %v7187_v32  ;;  %11220 = vrot.lane.b32.xlu0 %v11214_v36, %s16407_s0  ;;  %v7785_v35 = vmul.f32 %v15296_v7, %v15192_v39 }
 0xa83   : > { %7813 = vrot.lane.b32.xlu1 %v7781_v12, %s16408_s10 }
 0xa84   : > { %v7358_v51 = vpop.permute.xlu0 %7357 }
 0xa85   : > { %v15418_v45 = vsel %vm6596_vm14, %v7356_v29, %v7358_v51  ;;  %v7360_v5 = vpop.permute.xlu1 %7359  ;;  %v7938_v29 = vld [vmem:[%s16410_s16 + $0x18] sm:$0xff] }
 0xa86   : > { %7395 = vst [vmem:[#allocation3 + $0x200] sm:$0xff] %v15418_v45  ;;  %v15424_v3 = vsel %vm6596_vm14, %v7358_v51, %v7360_v5  ;;  %7659 = vrot.lane.b32.xlu0 %v7625_v8, %s11396_s12  ;;  %s16409_s12 = sld [smem:[#allocation15_spill]]  ;;  %v7937_v5 = vld [vmem:[%s16410_s16 + $0x10] sm:$0xff] }
 0xa87   : > { %7396 = vst [vmem:[#allocation3 + $0x208] sm:$0xff] %v15424_v3  ;;  %7809 = vrot.lane.b32.xlu1 %v7782_v41, %s16408_s10 }
 0xa88   : > { %v7450_v40 = vpop.permute.xlu0 %7449 }
 0xa89   : > { %v15430_v1 = vsel %vm1531_vm3, %v7448_v55, %v7450_v40  ;;  %v7452_v15 = vpop.permute.xlu1 %7451 }
 0xa8a   : > { %7487 = vst [vmem:[#allocation3 + $0x300] sm:$0xff] %v15430_v1  ;;  %v15436_v18 = vsel %vm1531_vm3, %v7450_v40, %v7452_v15  ;;  %7723 = vrot.lane.b32.xlu0 %v15192_v39, %s16407_s0  ;;  %v7935_v39 = vld [vmem:[%s16410_s16] sm:$0xff] }
 0xa8b   : > { %7819 = vrot.lane.b32.xlu1 %v7781_v12, %s16408_s10 }
 0xa8c   : > { %v7548_v31 = vpop.permute.xlu0 %7547  ;;  %v7924_v22 = vld [vmem:[%s16409_s12 + $0x8] sm:$0xff] }
 0xa8d   : > { %v7265_v58 = vpop.permute.xlu1 %7264  ;;  %8035 = vmatprep.mubr.f32.mxu1 %v7924_v22 }
 0xa8e   : > { %7805 = vrot.lane.b32.xlu0 %v7780_v20, %s16408_s10 }
 0xa8f   : > { %7825 = vrot.lane.b32.xlu1 %v7781_v12, %s16408_s10 }
 0xa90   : > { %v7550_v24 = vpop.permute.xlu0 %7549 }
 0xa91   : > { %v15446_v34 = vsel %vm1478_vm2, %v7548_v31, %v7550_v24  ;;  %v15450_v0 = vsel %vm1478_vm2, %v7550_v24, %v15356_v48  ;;  %v7554_v2 = vpop.permute.xlu1 %7553  ;;  %v7786_v48 = vmul.f32 %v7775_v25, %v15197_v10 }
 0xa92   : > { %7587 = vst [vmem:[#allocation3 + $0x500] sm:$0xff] %v15446_v34  ;;  %7811 = vrot.lane.b32.xlu0 %v7783_v23, %s16408_s10  ;;  %v11213_v23 = vunpack.i.h.bf16 %v15305_v43 }
 0xa93   : > { %7821 = vrot.lane.b32.xlu1 %v7788_v17, %s16408_s10 }
 0xa94   : > { %v15458_v16 = vpop.permute.xlu0 %7641 }
 0xa95   : > { %v7193_v28 = vpop.permute.xlu1 %7192 }
 0xa96   : > { %7803 = vrot.lane.b32.xlu0 %v7779_v59, %s16408_s10 }
 0xa97   : > { %7946 = vperm.xlu1 %11063, %v7936_v14  }
 0xa98   : > { %v7263_v30 = vpop.permute.xlu0 %7262 }
 0xa99   : > { %v15468_v36 = vsel %vm5171_vm13, %v11208_v21, %v7263_v30  ;;  %v15471_v57 = vsel %vm5171_vm13, %v7263_v30, %v7265_v58  ;;  %v7366_v50 = vpop.permute.xlu1 %7365 }
 0xa9a   : > { %7296 = vst [vmem:[#allocation3 + $0x140] sm:$0xff] %v15468_v36  ;;  %7817 = vrot.lane.b32.xlu0 %v7786_v48, %s16408_s10 }
 0xa9b   : > { %7956 = vperm.xlu1 %11063, %v7938_v29  }
 0xa9c   : > { %v7191_v54 = vpop.permute.xlu0 %7190 }
 0xa9d   : > { %v7208_v55 = vsel %vm6499_vm15, %v15277_v9, %v7191_v54  ;;  %v7209_v10 = vsel %vm6499_vm15, %v7191_v54, %v7193_v28  ;;  %v7458_v26 = vpop.permute.xlu1 %7457 }
 0xa9e   : > { %7224 = vst [vmem:[#allocation3 + $0x40] sm:$0xff] %v7208_v55  ;;  %7823 = vrot.lane.b32.xlu0 %v7789_v63, %s16408_s10  ;;  %v10782_v11 = vpack.c.bf16 %v7209_v10, %v15411_v52  ;;  %v10784_v4 = vpack.c.bf16 %v7208_v55, %v15407_v53 }
 0xaa0   : > { %v7364_v12 = vpop.permute.xlu0 %7363  ;;  %10783 = vmatprep.subr.bf16.mxu1 %v10782_v11 }
 0xaa1   : > { %v15487_v9 = vsel %vm6596_vm14, %v15313_v47, %v7364_v12  ;;  %v15490_v32 = vsel %vm6596_vm14, %v7364_v12, %v7366_v50  ;;  %v7269_v51 = vpop.permute.xlu1 %7268  ;;  %10785 = vmatpush1.bf16.msra.mxu1 %v10784_v4 }
 0xaa2   : > { %7397 = vst [vmem:[#allocation3 + $0x240] sm:$0xff] %v15487_v9  ;;  %7398 = vst [vmem:[#allocation3 + $0x248] sm:$0xff] %v15490_v32  ;;  %v15495_v53 = vsel %vm5171_vm13, %v11212_v6, %v7269_v51  ;;  %7815 = vrot.lane.b32.xlu0 %v7785_v35, %s16408_s10 }
 0xaa3   : > { %7298 = vst [vmem:[#allocation3 + $0x180] sm:$0xff] %v15495_v53 }
 0xaa4   : > { %v7456_v7 = vpop.permute.xlu0 %7455 }
 0xaa5   : > { %v15502_v47 = vsel %vm1531_vm3, %v15334_v44, %v7456_v7  ;;  %v15505_v52 = vsel %vm1531_vm3, %v7456_v7, %v7458_v26  ;;  %v7199_v8 = vpop.permute.xlu1 %7198 }
 0xaa6   : > { %7489 = vst [vmem:[#allocation3 + $0x340] sm:$0xff] %v15502_v47  ;;  %7941 = vperm.xlu0 %11062, %v7935_v39  }
 0xaa8   : > { %v7556_v41 = vpop.permute.xlu0 %7555 }
 0xaa9   : > { %v15510_v40 = vsel %vm1478_vm2, %v7554_v2, %v7556_v41  ;;  %v15514_v15 = vsel %vm1478_vm2, %v7556_v41, %v15366_v49  ;;  %v7372_v25 = vpop.permute.xlu1 %7371 }
 0xaaa   : > { %7589 = vst [vmem:[#allocation3 + $0x540] sm:$0xff] %v15510_v40  ;;  %7951 = vperm.xlu0 %11062, %v7937_v5   ;;  %v10822_v44 = vpack.c.bf16 %v15514_v15, %v15450_v0  ;;  %v10824_v31 = vpack.c.bf16 %v15510_v40, %v15446_v34 }
 0xaac   : > { %v7271_v20 = vpop.permute.xlu0 %7270 }
 0xaad   : > { %v7283_v58 = vsel %vm5171_vm13, %v7269_v51, %v7271_v20  ;;  %v7464_v24 = vpop.permute.xlu1 %7463 }
 0xab0   : > { %v7197_v2 = vpop.permute.xlu0 %7196 }
 0xab1   : > { %v7210_v49 = vsel %vm6499_vm15, %v15328_v61, %v7197_v2  ;;  %v7211_v17 = vsel %vm6499_vm15, %v7197_v2, %v7199_v8  ;;  %v7275_v22 = vpop.permute.xlu1 %7274 }
 0xab2   : > { %7226 = vst [vmem:[#allocation3 + $0x80] sm:$0xff] %v7210_v49  ;;  %v7284_v59 = vsel %vm5171_vm13, %v11213_v23, %v7275_v22 }
 0xab3   : > { %7300 = vst [vmem:[#allocation3 + $0x1c0] sm:$0xff] %v7284_v59 }
 0xab4   : > { %v7370_v14 = vpop.permute.xlu0 %7369 }
 0xab5   : > { %v15529_v28 = vsel %vm6596_vm14, %v15368_v42, %v7370_v14  ;;  %v7384_v21 = vsel %vm6596_vm14, %v7370_v14, %v7372_v25  ;;  %v15532_v30 = vpop.permute.xlu1 %7565  ;;  %v10806_v14 = vpack.c.bf16 %v15505_v52, %v15436_v18  ;;  %v7884_v52 = vld [vmem:[#allocation3 + $0x408] sm:$0xff] }
 0xab6   : > { %7399 = vst [vmem:[#allocation3 + $0x280] sm:$0xff] %v15529_v28 }
 0xab8   : > { %v7462_v43 = vpop.permute.xlu0 %7461 }
 0xab9   : > { %v15537_v61 = vsel %vm1531_vm3, %v15387_v19, %v7462_v43  ;;  %v15540_v48 = vsel %vm1531_vm3, %v7462_v43, %v7464_v24  ;;  %v7205_v29 = vpop.permute.xlu1 %7204 }
 0xaba   : > { %7491 = vst [vmem:[#allocation3 + $0x380] sm:$0xff] %v15537_v61 }
 0xabc   : > { %v7560_v50 = vpop.permute.xlu0 %7559 }
 0xabd   : > { %v7644_v42 = vpop.permute.xlu1 %7643 }
 0xabe   : > { %v15545_v54 = vsel %vm6567_vm7, %v15458_v16, %v7644_v42  ;;  %v7886_v42 = vld [vmem:[#allocation3 + $0x448] sm:$0xff] }
 0xac0   : > { %v7562_v63 = vpop.permute.xlu0 %7561 }
 0xac1   : > { %v15548_v55 = vsel %vm1478_vm2, %v7560_v50, %v7562_v63  ;;  %v15552_v19 = vsel %vm1478_vm2, %v7562_v63, %v15375_v13  ;;  %v7650_v10 = vpop.permute.xlu1 %7649  ;;  %v10790_v13 = vpack.c.bf16 %v15471_v57, %v15402_v56 }
 0xac2   : > { %7591 = vst [vmem:[#allocation3 + $0x580] sm:$0xff] %v15548_v55 }
 0xac4   : > { %v7277_v26 = vpop.permute.xlu0 %7276 }
 0xac5   : > { %v7285_v11 = vsel %vm5171_vm13, %v7275_v22, %v7277_v26  ;;  %v7646_v4 = vpop.permute.xlu1 %7645  ;;  %v7885_v26 = vld [vmem:[#allocation3 + $0x440] sm:$0xff] }
 0xac6   : > { %v10794_v24 = vpack.c.bf16 %v7285_v11, %v7283_v58 }
 0xac8   : > { %v7203_v6 = vpop.permute.xlu0 %7202 }
 0xac9   : > { %v7212_v12 = vsel %vm6499_vm15, %v15287_v60, %v7203_v6  ;;  %v7213_v35 = vsel %vm6499_vm15, %v7203_v6, %v7205_v29  ;;  %v7378_v51 = vpop.permute.xlu1 %7377  ;;  %v10792_v60 = vpack.c.bf16 %v15468_v36, %v15397_v62  ;;  %v7883_v6 = vld [vmem:[#allocation3 + $0x400] sm:$0xff] }
 0xaca   : > { %7228 = vst [vmem:[#allocation3 + $0xc0] sm:$0xff] %v7212_v12  ;;  %v10786_v39 = vpack.c.bf16 %v7213_v35, %v7211_v17  ;;  %v10788_v7 = vpack.c.bf16 %v7212_v12, %v7210_v49  ;;  %v10798_v49 = vpack.c.bf16 %v15490_v32, %v15424_v3  ;;  %v10816_v12 = vpack.c.bf16 %v7885_v26, %v7883_v6 }
 0xacc   : > { %v7376_v8 = vpop.permute.xlu0 %7375  ;;  %10787 = vmatprep.subr.bf16.mxu1 %v10786_v39 }
 0xacd   : > { %v7385_v5 = vsel %vm6596_vm14, %v15322_v38, %v7376_v8  ;;  %v7386_v41 = vsel %vm6596_vm14, %v7376_v8, %v7378_v51  ;;  %v7656_v25 = vpop.permute.xlu1 %7655  ;;  %10789 = vmatpush1.bf16.msra.mxu1 %v10788_v7  ;;  %v10796_v38 = vpack.c.bf16 %v7284_v59, %v15495_v53  ;;  %v7887_v51 = vld [vmem:[#allocation3 + $0x480] sm:$0xff] }
 0xace   : > { %7401 = vst [vmem:[#allocation3 + $0x2c0] sm:$0xff] %v7385_v5  ;;  %10791 = vmatprep.subr.bf16.mxu1 %v10790_v13  ;;  %v10802_v58 = vpack.c.bf16 %v7386_v41, %v7384_v21  ;;  %v10804_v22 = vpack.c.bf16 %v7385_v5, %v15529_v28  ;;  %v10820_v8 = vpack.c.bf16 %v15213_v33, %v7887_v51  ;;  %v7928_v51 = vld [vmem:[%s16409_s12 + $0x28] sm:$0xff] }
 0xad0   : > { %v7468_v20 = vpop.permute.xlu0 %7467 }
 0xad1   : > { %v7477_v23 = vsel %vm1531_vm3, %v15346_v27, %v7468_v20  ;;  %v7470_v2 = vpop.permute.xlu1 %7469  ;;  %10793 = vmatpush1.bf16.msra.mxu1 %v10792_v60  ;;  %v10800_v27 = vpack.c.bf16 %v15487_v9, %v15418_v45 }
 0xad2   : > { %7493 = vst [vmem:[#allocation3 + $0x3c0] sm:$0xff] %v7477_v23  ;;  %v7478_v56 = vsel %vm1531_vm3, %v7468_v20, %v7470_v2  ;;  %10795 = vmatprep.subr.bf16.mxu1 %v10794_v24  ;;  %v10812_v18 = vpack.c.bf16 %v7477_v23, %v15537_v61 }
 0xad3   : > { %v10810_v43 = vpack.c.bf16 %v7478_v56, %v15540_v48 }
 0xad4   : > { %v7648_v57 = vpop.permute.xlu0 %7647 }
 0xad5   : > { %v15573_v17 = vsel %vm6567_vm7, %v7646_v4, %v7648_v57  ;;  %v15576_v62 = vsel %vm6567_vm7, %v7648_v57, %v7650_v10  ;;  %v15578_v36 = vpop.permute.xlu1 %7661  ;;  %10797 = vmatpush1.bf16.msra.mxu1 %v10796_v38  ;;  %v10814_v10 = vpack.c.bf16 %v7886_v42, %v7884_v52  ;;  %v7888_v4 = vld [vmem:[#allocation3 + $0x488] sm:$0xff]  ;;  %v7929_v52 = vld [vmem:[%s16409_s12 + $0x30] sm:$0xff] }
 0xad6   : > { %7681 = vst [vmem:[#allocation3 + $0x640] sm:$0xff] %v15573_v17  ;;  %10799 = vmatprep.subr.bf16.mxu1 %v10798_v49  ;;  %v10818_v61 = vpack.c.bf16 %v15218_v37, %v7888_v4  ;;  %v10830_v15 = vpack.c.bf16 %v15576_v62, %v15545_v54 }
 0xad8   : > { %v7640_v53 = vpop.permute.xlu0 %7639 }
 0xad9   : > { %v15585_v3 = vsel %vm6567_vm7, %v7640_v53, %v15458_v16  ;;  %v15587_v32 = vpop.permute.xlu1 %7657  ;;  %10801 = vmatpush1.bf16.msra.mxu1 %v10800_v27  ;;  %v10808_v16 = vpack.c.bf16 %v15502_v47, %v15430_v1 }
 0xada   : > { %7679 = vst [vmem:[#allocation3 + $0x600] sm:$0xff] %v15585_v3  ;;  %10803 = vmatprep.subr.bf16.mxu1 %v10802_v58  ;;  %v10832_v40 = vpack.c.bf16 %v15573_v17, %v15585_v3 }
 0xadc   : > { %v7654_v59 = vpop.permute.xlu0 %7653 }
 0xadd   : > { %v15594_v45 = vsel %vm6567_vm7, %v7654_v59, %v7656_v25  ;;  %v11216_v9 = vpop.permute.xlu1 %11215  ;;  %10805 = vmatpush1.bf16.msra.mxu1 %v10804_v22 }
 0xade   : > { %10807 = vmatprep.subr.bf16.mxu1 %v10806_v14  ;;  %v11217_v29 = vunpack.i.l.bf16 %v11216_v9  ;;  %v11218_v1 = vunpack.i.h.bf16 %v11216_v9  ;;  %v7923_v14 = vld [vmem:[%s16409_s12] sm:$0xff] }
 0xadf   : > { %v7927_v9 = vld [vmem:[%s16409_s12 + $0x20] sm:$0xff] }
 0xae0   : > { %v7652_v21 = vpop.permute.xlu0 %7651 }
 0xae1   : > { %v15600_v50 = vsel %vm6567_vm7, %v7652_v21, %v7654_v59  ;;  %v7712_v28 = vpop.permute.xlu1 %7711  ;;  %10809 = vmatpush1.bf16.msra.mxu1 %v10808_v16 }
 0xae2   : > { %7683 = vst [vmem:[#allocation3 + $0x680] sm:$0xff] %v15600_v50  ;;  %10811 = vmatprep.subr.bf16.mxu1 %v10810_v43 }
 0xae4   : > { %v7714_v63 = vpop.permute.xlu0 %7713 }
 0xae5   : > { %v15605_v47 = vsel %vm6787_vm8, %v7712_v28, %v7714_v63  ;;  %v7736_v48 = vsel %vm6787_vm8, %v7714_v63, %v11217_v29  ;;  %v7726_v11 = vpop.permute.xlu1 %7725  ;;  %10813 = vmatpush1.bf16.msra.mxu1 %v10812_v18  ;;  %v7930_v28 = vld [vmem:[%s16409_s12 + $0x38] sm:$0xff]  ;;  %v7933_v63 = vld [vmem:[%s16409_s12 + $0x50] sm:$0xff] }
 0xae6   : > { %7751 = vst [vmem:[#allocation3 + $0x700] sm:$0xff] %v15605_v47  ;;  %10815 = vmatprep.subr.bf16.mxu1 %v10814_v10 }
 0xae8   : > { %v7720_v35 = vpop.permute.xlu0 %7719 }
 0xae9   : > { %v7738_v39 = vsel %vm6787_vm8, %v7720_v35, %v11218_v1  ;;  %v7732_v7 = vpop.permute.xlu1 %7731  ;;  %10817 = vmatpush1.bf16.msra.mxu1 %v10816_v12 }
 0xaea   : > { %10819 = vmatprep.subr.bf16.mxu1 %v10818_v61  ;;  %v10838_v57 = vpack.c.bf16 %v7738_v39, %v7736_v48  ;;  %v7925_v61 = vld [vmem:[%s16409_s12 + $0x10] sm:$0xff]  ;;  %v7931_v39 = vld [vmem:[%s16409_s12 + $0x40] sm:$0xff] }
 0xaec   : > { %v7718_v13 = vpop.permute.xlu0 %7717 }
 0xaed   : > { %v7737_v5 = vsel %vm6787_vm8, %v7718_v13, %v7720_v35  ;;  %v7730_v41 = vpop.permute.xlu1 %7729  ;;  %10821 = vmatpush1.bf16.msra.mxu1 %v10820_v8  ;;  %v15655_v35 = vld [vmem:[#allocation2 + $0xc0] sm:$0xff]  ;;  %v8378_v13 = vld [vmem:[%s16411_s7 + $0x88] sm:$0xff] }
 0xaee   : > { %7753 = vst [vmem:[#allocation3 + $0x740] sm:$0xff] %v7737_v5  ;;  %v7741_v25 = vsel %vm6787_vm8, %v7730_v41, %v7732_v7  ;;  %10823 = vmatprep.subr.bf16.mxu1 %v10822_v44  ;;  %v10840_v62 = vpack.c.bf16 %v7737_v5, %v15605_v47  ;;  %v8377_v8 = vld [vmem:[%s16411_s7 + $0x80] sm:$0xff] }
 0xaef   : > { %7757 = vst [vmem:[#allocation3 + $0x7c0] sm:$0xff] %v7741_v25  ;;  %v10854_v5 = vpack.c.bf16 %v8378_v13, %v8377_v8  ;;  %v8361_v41 = vld [vmem:[%s16411_s7] sm:$0xff] }
 0xaf0   : > { %v7568_v37 = vpop.permute.xlu0 %7567 }
 0xaf1   : > { %v7577_v60 = vsel %vm1478_vm2, %v15532_v30, %v7568_v37  ;;  %v7578_v33 = vsel %vm1478_vm2, %v7568_v37, %v15385_v46  ;;  %10825 = vmatpush1.bf16.msra.mxu1 %v10824_v31  ;;  %v7808_v20 = vpop.permute.xlu1 %7807  ;;  %v8379_v37 = vld [vmem:[%s16411_s7 + $0x90] sm:$0xff] }
 0xaf2   : > { %7593 = vst [vmem:[#allocation3 + $0x5c0] sm:$0xff] %v7577_v60  ;;  %v10826_v24 = vpack.c.bf16 %v7578_v33, %v15552_v19  ;;  %v10828_v23 = vpack.c.bf16 %v7577_v60, %v15548_v55  ;;  %v8380_v33 = vld [vmem:[%s16411_s7 + $0x98] sm:$0xff] }
 0xaf4   : > { %v11221_v0 = vpop.permute.xlu0 %11220  ;;  %10827 = vmatprep.subr.bf16.mxu1 %v10826_v24  ;;  %v8364_v24 = vld [vmem:[%s16411_s7 + $0x18] sm:$0xff] }
 0xaf5   : > { %v11223_v44 = vunpack.i.h.bf16 %v11221_v0  ;;  %v11222_v30 = vunpack.i.l.bf16 %v11221_v0  ;;  %10829 = vmatpush1.bf16.msra.mxu1 %v10828_v23  ;;  %v7814_v31 = vpop.permute.xlu1 %7813  ;;  %v10858_v23 = vpack.c.bf16 %v8380_v33, %v8379_v37  ;;  %v8381_v0 = vld [vmem:[%s16411_s7 + $0xa0] sm:$0xff]  ;;  %v8392_v33 = vld [vmem:[%s16411_s7 + $0xf8] sm:$0xff] }
 0xaf6   : > { %10831 = vmatprep.subr.bf16.mxu1 %v10830_v15  ;;  %v8382_v15 = vld [vmem:[%s16411_s7 + $0xa8] sm:$0xff] }
 0xaf7   : > { %v7740_v46 = vsel %vm6787_vm8, %v7726_v11, %v11222_v30  ;;  %v7742_v34 = vsel %vm6787_vm8, %v7732_v7, %v11223_v44  ;;  %v7934_v7 = vld [vmem:[%s16409_s12 + $0x58] sm:$0xff]  ;;  %v10862_v30 = vpack.c.bf16 %v8382_v15, %v8381_v0 }
 0xaf8   : > { %v7660_v19 = vpop.permute.xlu0 %7659  ;;  %v10842_v27 = vpack.c.bf16 %v7742_v34, %v7740_v46  ;;  %v8365_v46 = vld [vmem:[%s16411_s7 + $0x20] sm:$0xff]  ;;  %v8366_v34 = vld [vmem:[%s16411_s7 + $0x28] sm:$0xff]  ;;  %v8376_v15 = vld [vmem:[%s16411_s7 + $0x78] sm:$0xff] }
 0xaf9   : > { %v7669_v55 = vsel %vm6567_vm7, %v15587_v32, %v7660_v19  ;;  %v7670_v2 = vsel %vm6567_vm7, %v7660_v19, %v15578_v36  ;;  %10833 = vmatpush1.bf16.msra.mxu1 %v10832_v40  ;;  %v7810_v17 = vpop.permute.xlu1 %7809  ;;  %v8383_v40 = vld [vmem:[%s16411_s7 + $0xb0] sm:$0xff]  ;;  %v8384_v19 = vld [vmem:[%s16411_s7 + $0xb8] sm:$0xff] }
 0xafa   : > { %7685 = vst [vmem:[#allocation3 + $0x6c0] sm:$0xff] %v7669_v55  ;;  %v10834_v54 = vpack.c.bf16 %v7670_v2, %v15594_v45  ;;  %v10836_v56 = vpack.c.bf16 %v7669_v55, %v15600_v50  ;;  %v7926_v50 = vld [vmem:[%s16409_s12 + $0x18] sm:$0xff]  ;;  %v10866_v2 = vpack.c.bf16 %v8384_v19, %v8383_v40 }
 0xafc   : > { %v7724_v38 = vpop.permute.xlu0 %7723  ;;  %10835 = vmatprep.subr.bf16.mxu1 %v10834_v54  ;;  %v8367_v54 = vld [vmem:[%s16411_s7 + $0x30] sm:$0xff] }
 0xafd   : > { %v7739_v49 = vsel %vm6787_vm8, %v7724_v38, %v7726_v11  ;;  %10837 = vmatpush1.bf16.msra.mxu1 %v10836_v56  ;;  %v7820_v3 = vpop.permute.xlu1 %7819  ;;  %v7932_v11 = vld [vmem:[%s16409_s12 + $0x48] sm:$0xff]  ;;  %v8368_v56 = vld [vmem:[%s16411_s7 + $0x38] sm:$0xff]  ;;  %v8385_v38 = vld [vmem:[%s16411_s7 + $0xc0] sm:$0xff]  ;;  %s16425_s12 = smov 8  }
 0xafe   : > { %7755 = vst [vmem:[#allocation3 + $0x780] sm:$0xff] %v7739_v49  ;;  %10839 = vmatprep.subr.bf16.mxu1 %v10838_v57  ;;  %v10844_v58 = vpack.c.bf16 %v7741_v25, %v7739_v49  ;;  %v8362_v25 = vld [vmem:[%s16411_s7 + $0x8] sm:$0xff] }
 0xaff   : > { %v10856_v60 = vpack.c.bf16 %v8362_v25, %v8361_v41  ;;  %v8374_v41 = vld [vmem:[%s16411_s7 + $0x68] sm:$0xff] }
 0xb00   : > { %v7806_v36 = vpop.permute.xlu0 %7805 }
 0xb01   : > { %v7828_v53 = vsel %vm6470_vm0, %v7806_v36, %v7808_v20  ;;  %10841 = vmatpush1.bf16.msra.mxu1 %v10840_v62  ;;  %v7826_v43 = vpop.permute.xlu1 %7825  ;;  %v8363_v20 = vld [vmem:[%s16411_s7 + $0x10] sm:$0xff]  ;;  %v8386_v62 = vld [vmem:[%s16411_s7 + $0xc8] sm:$0xff] }
 0xb02   : > { %10843 = vmatprep.subr.bf16.mxu1 %v10842_v27  ;;  %v10860_v44 = vpack.c.bf16 %v8364_v24, %v8363_v20  ;;  %v10870_v27 = vpack.c.bf16 %v8386_v62, %v8385_v38  ;;  %v8375_v20 = vld [vmem:[%s16411_s7 + $0x70] sm:$0xff]  ;;  %v8479_v62 = vld [vmem:[%s16412_s3 + $0x8] sm:$0xff] }
 0xb04   : > { %v7812_v32 = vpop.permute.xlu0 %7811 }
 0xb05   : > { %v7829_v22 = vsel %vm6470_vm0, %v7810_v17, %v7812_v32  ;;  %v7830_v59 = vsel %vm6470_vm0, %v7812_v32, %v7814_v31  ;;  %10845 = vmatpush1.bf16.msra.mxu1 %v10844_v58  ;;  %v7822_v10 = vpop.permute.xlu1 %7821  ;;  %v10864_v31 = vpack.c.bf16 %v8366_v34, %v8365_v46  ;;  %v10868_v17 = vpack.c.bf16 %v8368_v56, %v8367_v54  ;;  %v8369_v32 = vld [vmem:[%s16411_s7 + $0x40] sm:$0xff] }
 0xb06   : > { %7845 = vst [vmem:[#allocation3 + $0x840] sm:$0xff] %v7829_v22  ;;  %v10846_v45 = vpack.c.bf16 %v7830_v59, %v7828_v53  ;;  %v10884_v34 = vpack.c.bf16 %v8376_v15, %v8375_v20 }
 0xb08   : > { %v7804_v16 = vpop.permute.xlu0 %7803  ;;  %10847 = vmatprep.subr.bf16.mxu1 %v10846_v45  ;;  %8036 = vmatmul.mubr.f32.vlgmr.msra.gmra.mrb[28].mxu1 %v7923_v14  ;;  %v8387_v45 = vld [vmem:[%s16411_s7 + $0xd0] sm:$0xff] }
 0xb09   : > { %v7827_v21 = vsel %vm6470_vm0, %v7804_v16, %v7806_v36  ;;  %8041 = vmatprep.mubr.f32.mxu1 %v7927_v9  ;;  %v8388_v9 = vld [vmem:[%s16411_s7 + $0xd8] sm:$0xff] }
 0xb0a   : > { %7843 = vst [vmem:[#allocation3 + $0x800] sm:$0xff] %v7827_v21  ;;  %v10848_v29 = vpack.c.bf16 %v7829_v22, %v7827_v21  ;;  %v8370_v22 = vld [vmem:[%s16411_s7 + $0x48] sm:$0xff] }
 0xb0b   : > { %v10872_v21 = vpack.c.bf16 %v8370_v22, %v8369_v32  ;;  %v8509_v32 = vld [vmem:[%s16413_s4 + $0x18] sm:$0xff]  ;;  %v15756_v22 = vld [vmem:[%s16414_s5] ss:$0 sm:$0xff] }
 0xb0c   : > { %v7818_v42 = vpop.permute.xlu0 %7817  ;;  %10849 = vmatpush1.bf16.msra.mxu1 %v10848_v29 }
 0xb0d   : > { %v7832_v18 = vsel %vm6470_vm0, %v7818_v42, %v7820_v3  ;;  %8042 = vmatmul.mubr.f32.gmra.mrb[30].mxu1 %v7926_v50  ;;  %v10874_v50 = vpack.c.bf16 %v8388_v9, %v8387_v45 }
 0xb0e   : > { %8047 = vmatprep.mubr.f32.mxu1 %v7930_v28 }
 0xb10   : > { %v7824_v26 = vpop.permute.xlu0 %7823 }
 0xb11   : > { %v7833_v1 = vsel %vm6470_vm0, %v7822_v10, %v7824_v26  ;;  %v7834_v47 = vsel %vm6470_vm0, %v7824_v26, %v7826_v43  ;;  %8048 = vmatmul.mubr.f32.gmra.mrb[32].mxu1 %v7929_v52 }
 0xb12   : > { %7849 = vst [vmem:[#allocation3 + $0x8c0] sm:$0xff] %v7833_v1  ;;  %v10850_v48 = vpack.c.bf16 %v7834_v47, %v7832_v18  ;;  %8053 = vmatprep.mubr.f32.mxu1 %v7933_v63  ;;  %v8372_v47 = vld [vmem:[%s16411_s7 + $0x58] sm:$0xff] }
 0xb14   : > { %v7816_v4 = vpop.permute.xlu0 %7815  ;;  %10851 = vmatprep.subr.bf16.mxu1 %v10850_v48  ;;  %v8389_v48 = vld [vmem:[%s16411_s7 + $0xe0] sm:$0xff] }
 0xb15   : > { %v7831_v6 = vsel %vm6470_vm0, %v7816_v4, %v7818_v42  ;;  %8054 = vmatmul.mubr.f32.gmra.mrb[34].mxu1 %v7932_v11 }
 0xb16   : > { %7847 = vst [vmem:[#allocation3 + $0x880] sm:$0xff] %v7831_v6  ;;  %v10852_v12 = vpack.c.bf16 %v7833_v1, %v7831_v6  ;;  %8124 = vmatprep.mubr.f32.mxu1 %v15655_v35  ;;  %v7947_v53 = vpop.permute.xlu1 %7946  ;;  %v8371_v1 = vld [vmem:[%s16411_s7 + $0x50] sm:$0xff] }
 0xb18   : > { %10853 = vmatpush1.bf16.msra.mxu1 %v10852_v12  ;;  %v10876_v12 = vpack.c.bf16 %v8372_v47, %v8371_v1 }
 0xb19   : > { %10855 = vmatprep.subr.bf16.mxu1 %v10854_v5  ;;  %v8373_v5 = vld [vmem:[%s16411_s7 + $0x60] sm:$0xff] }
 0xb1a   : > { %v10880_v37 = vpack.c.bf16 %v8374_v41, %v8373_v5  ;;  %v7957_v24 = vpop.permute.xlu1 %7956 }
 0xb1b   : > { %10023 = vmatmul.mubr.msk.f32.vlgmr.msra.gmra.mrb[28].mxu1 %vm1292_vm6, %v7925_v61  ;;  %v8390_v61 = vld [vmem:[%s16411_s7 + $0xe8] sm:$0xff] }
 0xb1c   : > { %8130 = vmatprep.mubr.f32.mxu1 %v15655_v35  ;;  %10857 = vmatpush3.bf16.msra.mxu1 %v10856_v60  ;;  %v8391_v60 = vld [vmem:[%s16411_s7 + $0xf0] sm:$0xff]  ;;  %s16421_s7 = sld [smem:[#allocation21_spill]] }
 0xb1d   : > { %10859 = vmatprep.subr.bf16.mxu1 %v10858_v23  ;;  %v10882_v0 = vpack.c.bf16 %v8392_v33, %v8391_v60 }
 0xb1f   : > { %10024 = vmatmul.mubr.msk.f32.gmra.mrb[30].mxu1 %vm1292_vm6, %v7928_v51 }
 0xb20   : > { %8136 = vmatprep.mubr.f32.mxu1 %v15655_v35  ;;  %10861 = vmatpush3.bf16.msra.mxu1 %v10860_v44 }
 0xb21   : > { %10863 = vmatprep.subr.bf16.mxu1 %v10862_v30 }
 0xb23   : > { %10025 = vmatmul.mubr.msk.f32.gmra.mrb[32].mxu1 %vm1292_vm6, %v7931_v39  ;;  %v10878_v39 = vpack.c.bf16 %v8390_v61, %v8389_v48 }
 0xb24   : > { %8142 = vmatprep.mubr.f32.mxu1 %v15655_v35  ;;  %10865 = vmatpush3.bf16.msra.mxu1 %v10864_v31 }
 0xb25   : > { %v7942_v57 = vpop.permute.xlu0 %7941  ;;  %10867 = vmatprep.subr.bf16.mxu1 %v10866_v2 }
 0xb27   : > { %10026 = vmatmul.mubr.msk.f32.gmra.mrb[34].mxu1 %vm1292_vm6, %v7934_v7 }
 0xb28   : > { %10869 = vmatpush3.bf16.msra.mxu1 %v10868_v17  ;;  %v8478_v17 = vld [vmem:[%s16412_s3] sm:$0xff] }
 0xb29   : > { %10871 = vmatprep.subr.bf16.mxu1 %v10870_v27  ;;  %v7952_v26 = vpop.permute.xlu0 %7951  ;;  %v8507_v27 = vld [vmem:[%s16413_s4 + $0x8] sm:$0xff] }
 0xb2c   : > { %10873 = vmatpush3.bf16.msra.mxu1 %v10872_v21 }
 0xb2d   : > { %10875 = vmatprep.subr.bf16.mxu1 %v10874_v50 }
 0xb30   : > { %10877 = vmatpush3.bf16.msra.mxu1 %v10876_v12 }
 0xb31   : > { %10879 = vmatprep.subr.bf16.mxu1 %v10878_v39 }
 0xb34   : > { %10881 = vmatpush3.bf16.msra.mxu1 %v10880_v37 }
 0xb35   : > { %10883 = vmatprep.subr.bf16.mxu1 %v10882_v0 }
 0xb38   : > { %10885 = vmatpush3.bf16.msra.mxu1 %v10884_v34 }
 0xbee   : > { %v8126_v55 = vpop.f32.mrb[28].mxu1 }
 0xbef   : > { %v8128_v49 = vpop.f32.mrb[29].mxu1  ;;  %v10966_v63 = vadd.f32 %v8126_v55, %v7942_v57 }
 0xbf0   : > { %v10967_v36 = vadd.f32 %v8128_v49, %v7942_v57 }
 0xbf1   : > { %v8157_v7 = vmul.f32 0.1, %v10966_v63  ;;  %vm8149_vm1 = vcmp.ge.f32.partialorder %v10966_v63, 0.0 }
 0xbf2   : > { %vm8150_vm7 = vcmp.ge.f32.partialorder %v10967_v36, 0.0  ;;  %v8158_v58 = vmul.f32 0.1, %v10967_v36  ;;  %v8132_v3 = vpop.f32.mrb[30].mxu1 }
 0xbf3   : > { %v10968_v59 = vadd.f32 %v8132_v3, %v7947_v53  ;;  %v8134_v14 = vpop.f32.mrb[31].mxu1  ;;  %v15713_v25 = vsel %vm8149_vm1, %v10966_v63, %v8157_v7  ;;  %v8508_v3 = vld [vmem:[%s16413_s4 + $0x10] sm:$0xff] }
 0xbf4   : > { %v15691_v16 = vsel %vm8150_vm7, %v10967_v36, %v8158_v58  ;;  %v10969_v28 = vadd.f32 %v8134_v14, %v7947_v53  ;;  %v8506_v36 = vld [vmem:[%s16413_s4] sm:$0xff]  ;;  %v8480_v53 = vld [vmem:[%s16412_s3 + $0x10] sm:$0xff]  ;;  %v8481_v58 = vld [vmem:[%s16412_s3 + $0x18] sm:$0xff]  ;;  %s16319_s3 = smov 7   ;;  %s16416_s4 = smov 127   ;;  %v15775_v14 = vpack.i.bf16 %v15655_v35, %v15655_v35 }
 0xbf5   : > { %vm8151_vm14 = vcmp.ge.f32.partialorder %v10968_v59, 0.0  ;;  %v8159_v43 = vmul.f32 0.1, %v10968_v59  ;;  %v11234_v29 = vpack.i.bf16 %v15655_v35, %v15691_v16 }
 0xbf6   : > { %v8138_v42 = vpop.f32.mrb[32].mxu1  ;;  %v8160_v11 = vmul.f32 0.1, %v10969_v28  ;;  %vm8152_vm15 = vcmp.ge.f32.partialorder %v10969_v28, 0.0 }
 0xbf7   : > { %v15695_v18 = vsel %vm8151_vm14, %v10968_v59, %v8159_v43  ;;  %v8140_v52 = vpop.f32.mrb[33].mxu1  ;;  %11235 = vrot.lane.b32.xlu1 %v11234_v29, %s16408_s10  ;;  %11225 = vrot.lane.b32.xlu0 %v11234_v29, %s16312_s2  ;;  %v10970_v40 = vadd.f32 %v8138_v42, %v7952_v26  ;;  %v15759_v59 = vld [vmem:[%s16414_s5 + $0x1] ss:$0 sm:$0xff]  ;;  %s16327_s5 = smov 9  }
 0xbf8   : > { %v11244_v10 = vpack.i.bf16 %v15695_v18, %v15655_v35  ;;  %v10971_v4 = vadd.f32 %v8140_v52, %v7952_v26  ;;  %v15707_v8 = vsel %vm8152_vm15, %v10969_v28, %v8160_v11 }
 0xbf9   : > { %v11264_v23 = vpack.i.bf16 %v15707_v8, %v15713_v25  ;;  %v8161_v2 = vmul.f32 0.1, %v10970_v40  ;;  %vm8153_vm11 = vcmp.ge.f32.partialorder %v10970_v40, 0.0 }
 0xbfa   : > { %v8144_v6 = vpop.f32.mrb[34].mxu1  ;;  %v8162_v13 = vmul.f32 0.1, %v10971_v4  ;;  %vm8154_vm4 = vcmp.ge.f32.partialorder %v10971_v4, 0.0 }
 0xbfb   : > { %v8146_v51 = vpop.f32.mrb[35].mxu1  ;;  %11245 = vrot.lane.b32.xlu1 %v11244_v10, %s16407_s0  ;;  %11230 = vrot.lane.b32.xlu0 %v11234_v29, %s16407_s0  ;;  %v10972_v30 = vadd.f32 %v8144_v6, %v7957_v24  ;;  %v15735_v38 = vsel %vm8153_vm11, %v10970_v40, %v8161_v2 }
 0xbfc   : > { %v15721_v44 = vsel %vm8154_vm4, %v10971_v4, %v8162_v13  ;;  %v10973_v46 = vadd.f32 %v8146_v51, %v7957_v24 }
 0xbfd   : > { %v11269_v31 = vpack.i.bf16 %v15655_v35, %v15721_v44  ;;  %v8163_v19 = vmul.f32 0.1, %v10972_v30  ;;  %vm8155_vm5 = vcmp.ge.f32.partialorder %v10972_v30, 0.0 }
 0xbfe   : > { %v8164_v55 = vmul.f32 0.1, %v10973_v46  ;;  %vm8156_vm10 = vcmp.ge.f32.partialorder %v10973_v46, 0.0 }
 0xbff   : > { %11250 = vrot.lane.b32.xlu1 %v11244_v10, %s16408_s10  ;;  %11240 = vrot.lane.b32.xlu0 %v11244_v10, %s16312_s2  ;;  %v15729_v54 = vsel %vm8155_vm5, %v10972_v30, %v8163_v19 }
 0xc00   : > { %v15731_v56 = vsel %vm8156_vm10, %v10973_v46, %v8164_v55  ;;  %v11284_v49 = vpack.i.bf16 %v15729_v54, %v15655_v35  ;;  %vm9886_vm10 = vcmask 122880  }
 0xc01   : > { %v11289_v57 = vpack.i.bf16 %v15731_v56, %v15735_v38 }
 0xc03   : > { %11265 = vrot.lane.b32.xlu0 %v11264_v23, %s16408_s10  ;;  %11255 = vrot.lane.b32.xlu1 %v11264_v23, %s16312_s2 }
 0xc07   : > { %11270 = vrot.lane.b32.xlu0 %v11269_v31, %s16312_s2  ;;  %11260 = vrot.lane.b32.xlu1 %v11264_v23, %s16407_s0 }
 0xc0b   : > { %11280 = vrot.lane.b32.xlu0 %v11269_v31, %s16408_s10  ;;  %11275 = vrot.lane.b32.xlu1 %v11269_v31, %s16407_s0 }
 0xc0f   : > { %11290 = vrot.lane.b32.xlu0 %v11289_v57, %s16312_s2  ;;  %11285 = vrot.lane.b32.xlu1 %v11284_v49, %s16312_s2  ;;  %s16321_s2 = smov 121  }
 0xc13   : > { %11295 = vrot.lane.b32.xlu0 %v11289_v57, %s16407_s0  ;;  %11305 = vrot.lane.b32.xlu1 %v11289_v57, %s16408_s10 }
 0xc17   : > { %11300 = vrot.lane.b32.xlu0 %v11284_v49, %s16407_s0  ;;  %11310 = vrot.lane.b32.xlu1 %v11284_v49, %s16408_s10  ;;  %s16317_s0 = smov 119   ;;  %s16415_s10 = smov 1  }
 0xc1b   : > { %8484 = vperm.xlu0 %11062, %v8478_v17   ;;  %8489 = vperm.xlu1 %11063, %v8479_v62  }
 0xc1f   : > { %8512 = vperm.xlu0 %11062, %v8506_v36   ;;  %8517 = vperm.xlu1 %11063, %v8507_v27  }
 0xc23   : > { %8494 = vperm.xlu0 %11062, %v8480_v53   ;;  %8499 = vperm.xlu1 %11063, %v8481_v58  }
 0xc27   : > { %8522 = vperm.xlu0 %11062, %v8508_v3   ;;  %8527 = vperm.xlu1 %11063, %v8509_v32  }
 0xc2b   : > { %8566 = vrot.lane.b32.xlu0 %v15756_v22, %s16317_s0  ;;  %8783 = vrot.lane.b32.xlu1 %v15759_v59, %s16415_s10  ;;  %s16323_s0 = smov 8  }
 0xc2f   : > { %8672 = vrot.lane.b32.xlu0 %v15759_v59, %s16321_s2  ;;  %8814 = vrot.lane.b32.xlu1 %v15756_v22, %s16319_s3 }
 0xc33   : > { %8728 = vrot.lane.b32.xlu0 %v15756_v22, %s16416_s4  ;;  %8869 = vrot.lane.b32.xlu1 %v15759_v59, %s16327_s5 }
 0xc37   : > { %11320 = vrot.lane.b32.xlu1 %v15775_v14, %s16323_s0 }
 0xc69   : > { %v11236_v45 = vpop.permute.xlu1 %11235  ;;  %v11226_v9 = vpop.permute.xlu0 %11225 }
 0xc6a   : > { %v11228_v21 = vunpack.i.h.bf16 %v11226_v9  ;;  %v11227_v43 = vunpack.i.l.bf16 %v11226_v9  ;;  %v11238_v42 = vunpack.i.h.bf16 %v11236_v45  ;;  %v11237_v52 = vunpack.i.l.bf16 %v11236_v45 }
 0xc6c   : > { %v8242_v29 = vsel %vm1478_vm2, %v11227_v43, %v11228_v21  ;;  %v8338_v4 = vsel %vm6470_vm0, %v11237_v52, %v11238_v42 }
 0xc6d   : > { %v11246_v50 = vpop.permute.xlu1 %11245  ;;  %v11231_v28 = vpop.permute.xlu0 %11230  ;;  %v8258_v26 = vmax.f32 %v15691_v16, %v8242_v29 }
 0xc6e   : > { %v11233_v63 = vunpack.i.h.bf16 %v11231_v28  ;;  %v11232_v10 = vunpack.i.l.bf16 %v11231_v28  ;;  %v11248_v37 = vunpack.i.h.bf16 %v11246_v50  ;;  %v11247_v60 = vunpack.i.l.bf16 %v11246_v50 }
 0xc70   : > { %v8290_v1 = vsel %vm6787_vm8, %v11232_v10, %v11233_v63 }
 0xc71   : > { %v11251_v47 = vpop.permute.xlu1 %11250  ;;  %v11241_v48 = vpop.permute.xlu0 %11240  ;;  %v8306_v11 = vmax.f32 %v8258_v26, %v8290_v1 }
 0xc72   : > { %v11242_v51 = vunpack.i.l.bf16 %v11241_v48  ;;  %v11243_v13 = vunpack.i.h.bf16 %v11241_v48  ;;  %v11252_v34 = vunpack.i.l.bf16 %v11251_v47  ;;  %v11253_v29 = vunpack.i.h.bf16 %v11251_v47 }
 0xc73   : > { %v8354_v6 = vmax.f32 %v8306_v11, %v8338_v4 }
 0xc75   : > { %8457 = vmatprep.mubr.f32.mxu1 %v8354_v6  ;;  %v11266_v12 = vpop.permute.xlu0 %11265  ;;  %v11256_v61 = vpop.permute.xlu1 %11255 }
 0xc76   : > { %v11258_v39 = vunpack.i.h.bf16 %v11256_v61  ;;  %v11257_v7 = vunpack.i.l.bf16 %v11256_v61  ;;  %v11267_v5 = vunpack.i.l.bf16 %v11266_v12  ;;  %v11268_v33 = vunpack.i.h.bf16 %v11266_v12 }
 0xc78   : > { %v8244_v41 = vsel %vm1478_vm2, %v11258_v39, %v11242_v51  ;;  %v8241_v16 = vsel %vm1478_vm2, %v11257_v7, %v11227_v43  ;;  %v8243_v20 = vsel %vm1478_vm2, %v11243_v13, %v11258_v39  ;;  %v8337_v40 = vsel %vm6470_vm0, %v11267_v5, %v11237_v52 }
 0xc79   : > { %v11271_v24 = vpop.permute.xlu0 %11270  ;;  %v11261_v23 = vpop.permute.xlu1 %11260  ;;  %v8257_v31 = vmax.f32 %v15713_v25, %v8241_v16  ;;  %v8260_v19 = vmax.f32 %v15707_v8, %v8244_v41  ;;  %v8340_v53 = vsel %vm6470_vm0, %v11268_v33, %v11252_v34  ;;  %v8259_v58 = vmax.f32 %v15695_v18, %v8243_v20 }
 0xc7a   : > { %v11273_v0 = vunpack.i.h.bf16 %v11271_v24  ;;  %v11272_v15 = vunpack.i.l.bf16 %v11271_v24  ;;  %v11263_v30 = vunpack.i.h.bf16 %v11261_v23  ;;  %v11262_v46 = vunpack.i.l.bf16 %v11261_v23 }
 0xc7b   : > { %v8339_v18 = vsel %vm6470_vm0, %v11253_v29, %v11268_v33 }
 0xc7c   : > { %v8246_v55 = vsel %vm1478_vm2, %v11272_v15, %v11273_v0  ;;  %v8289_v2 = vsel %vm6787_vm8, %v11262_v46, %v11232_v10  ;;  %v8292_v57 = vsel %vm6787_vm8, %v11263_v30, %v11247_v60  ;;  %v8291_v49 = vsel %vm6787_vm8, %v11248_v37, %v11263_v30 }
 0xc7d   : > { %v8305_v17 = vmax.f32 %v8257_v31, %v8289_v2  ;;  %v11281_v62 = vpop.permute.xlu0 %11280  ;;  %v11276_v36 = vpop.permute.xlu1 %11275  ;;  %v8308_v27 = vmax.f32 %v8260_v19, %v8292_v57  ;;  %v8307_v21 = vmax.f32 %v8259_v58, %v8291_v49  ;;  %v8262_v43 = vmax.f32 %v15721_v44, %v8246_v55 }
 0xc7e   : > { %v11283_v3 = vunpack.i.h.bf16 %v11281_v62  ;;  %v11282_v25 = vunpack.i.l.bf16 %v11281_v62  ;;  %v11278_v32 = vunpack.i.h.bf16 %v11276_v36  ;;  %v11277_v8 = vunpack.i.l.bf16 %v11276_v36 }
 0xc7f   : > { %v8353_v45 = vmax.f32 %v8305_v17, %v8337_v40  ;;  %v8356_v9 = vmax.f32 %v8308_v27, %v8340_v53  ;;  %v8355_v26 = vmax.f32 %v8307_v21, %v8339_v18 }
 0xc80   : > { %v8294_v50 = vsel %vm6787_vm8, %v11277_v8, %v11278_v32  ;;  %v8342_v10 = vsel %vm6470_vm0, %v11282_v25, %v11283_v3 }
 0xc81   : > { %v11291_v28 = vpop.permute.xlu0 %11290  ;;  %v11286_v42 = vpop.permute.xlu1 %11285  ;;  %8458 = vmatmul.mubr.f32.vlgmr.msra.gmra.mrb[36].mxu1 %v8353_v45  ;;  %v8310_v52 = vmax.f32 %v8262_v43, %v8294_v50 }
 0xc82   : > { %v11292_v63 = vunpack.i.l.bf16 %v11291_v28  ;;  %8462 = vmatprep.mubr.f32.mxu1 %v8356_v9  ;;  %v11293_v48 = vunpack.i.h.bf16 %v11291_v28  ;;  %v11288_v4 = vunpack.i.h.bf16 %v11286_v42  ;;  %v11287_v44 = vunpack.i.l.bf16 %v11286_v42 }
 0xc83   : > { %v8358_v1 = vmax.f32 %v8310_v52, %v8342_v10 }
 0xc84   : > { %v8245_v11 = vsel %vm1478_vm2, %v11292_v63, %v11272_v15  ;;  %v8247_v39 = vsel %vm1478_vm2, %v11288_v4, %v11293_v48  ;;  %v8248_v7 = vsel %vm1478_vm2, %v11293_v48, %v11287_v44  ;;  %vm8548_vm2 = vcmask 523264  }
 0xc85   : > { %v11296_v47 = vpop.permute.xlu0 %11295  ;;  %v11306_v6 = vpop.permute.xlu1 %11305  ;;  %8463 = vmatmul.mubr.f32.gmra.mrb[38].mxu1 %v8355_v26  ;;  %v8261_v51 = vmax.f32 %v15735_v38, %v8245_v11  ;;  %v8264_v15 = vmax.f32 %v15731_v56, %v8248_v7  ;;  %v8263_v38 = vmax.f32 %v15729_v54, %v8247_v39 }
 0xc86   : > { %v11297_v12 = vunpack.i.l.bf16 %v11296_v47  ;;  %v11307_v61 = vunpack.i.l.bf16 %v11306_v6  ;;  %8467 = vmatprep.mubr.f32.mxu1 %v8358_v1  ;;  %v11298_v5 = vunpack.i.h.bf16 %v11296_v47  ;;  %v11308_v30 = vunpack.i.h.bf16 %v11306_v6 }
 0xc88   : > { %v8293_v13 = vsel %vm6787_vm8, %v11297_v12, %v11277_v8  ;;  %v8341_v60 = vsel %vm6470_vm0, %v11307_v61, %v11282_v25 }
 0xc89   : > { %v11301_v41 = vpop.permute.xlu0 %11300  ;;  %v11311_v16 = vpop.permute.xlu1 %11310  ;;  %v8309_v37 = vmax.f32 %v8261_v51, %v8293_v13 }
 0xc8a   : > { %v11303_v33 = vunpack.i.h.bf16 %v11301_v41  ;;  %v11302_v20 = vunpack.i.l.bf16 %v11301_v41  ;;  %v11313_v24 = vunpack.i.h.bf16 %v11311_v16  ;;  %v11312_v23 = vunpack.i.l.bf16 %v11311_v16 }
 0xc8b   : > { %v8357_v0 = vmax.f32 %v8309_v37, %v8341_v60 }
 0xc8c   : > { %v8296_v46 = vsel %vm6787_vm8, %v11298_v5, %v11302_v20  ;;  %v8295_v34 = vsel %vm6787_vm8, %v11303_v33, %v11298_v5  ;;  %v8344_v19 = vsel %vm6470_vm0, %v11308_v30, %v11312_v23  ;;  %v8343_v55 = vsel %vm6470_vm0, %v11313_v24, %v11308_v30 }
 0xc8d   : > { %8468 = vmatmul.mubr.f32.gmra.mrb[40].mxu1 %v8357_v0  ;;  %v8312_v40 = vmax.f32 %v8264_v15, %v8296_v46  ;;  %v8311_v31 = vmax.f32 %v8263_v38, %v8295_v34  ;;  %vm8646_vm0 = vcmask 64512   ;;  %vm8601_vm8 = vcmask 72704  }
 0xc8f   : > { %v8360_v2 = vmax.f32 %v8312_v40, %v8344_v19  ;;  %v8359_v57 = vmax.f32 %v8311_v31, %v8343_v55 }
 0xc91   : > { %8472 = vmatprep.mubr.f32.mxu1 %v8360_v2 }
 0xc92   : > { %8473 = vmatmul.mubr.f32.gmra.mrb[42].mxu1 %v8359_v57 }
 0xc9a   : > { %v8485_v49 = vpop.permute.xlu0 %8484  ;;  %v8490_v25 = vpop.permute.xlu1 %8489 }
 0xc9e   : > { %v8513_v56 = vpop.permute.xlu0 %8512  ;;  %v8518_v32 = vpop.permute.xlu1 %8517 }
 0xca2   : > { %v8495_v17 = vpop.permute.xlu0 %8494  ;;  %v8500_v45 = vpop.permute.xlu1 %8499 }
 0xca6   : > { %v8523_v54 = vpop.permute.xlu0 %8522  ;;  %v8528_v52 = vpop.permute.xlu1 %8527 }
 0xcaa   : > { %v15811_v62 = vpop.permute.xlu0 %8566  ;;  %v15841_v10 = vpop.permute.xlu1 %8783 }
 0xcab   : > { %v8569_v36 = vmul.f32 %v15655_v35, %v15811_v62 }
 0xcad   : > { %8585 = vrot.lane.b32.xlu0 %v8569_v36, %s16327_s5 }
 0xcae   : > { %v15819_v27 = vpop.permute.xlu0 %8672  ;;  %v15848_v44 = vpop.permute.xlu1 %8814 }
 0xcaf   : > { %v8675_v53 = vmul.f32 %v15655_v35, %v15819_v27 }
 0xcb1   : > { %8589 = vrot.lane.b32.xlu0 %v8569_v36, %s16327_s5 }
 0xcb2   : > { %v15829_v58 = vpop.permute.xlu0 %8728  ;;  %v8870_v40 = vpop.permute.xlu1 %8869 }
 0xcb3   : > { %v15833_v3 = vmul.f32 %v15655_v35, %v15829_v58 }
 0xcb5   : > { %8593 = vrot.lane.b32.xlu0 %v8569_v36, %s16327_s5 }
 0xcb9   : > { %8597 = vrot.lane.b32.xlu0 %v8569_v36, %s16327_s5 }
 0xcbd   : > { %11315 = vrot.lane.b32.xlu0 %v15775_v14, %s16323_s0 }
 0xcc1   : > { %8691 = vrot.lane.b32.xlu0 %v8675_v53, %s16319_s3 }
 0xcc5   : > { %8695 = vrot.lane.b32.xlu0 %v8675_v53, %s16319_s3 }
 0xcc9   : > { %8699 = vrot.lane.b32.xlu0 %v8675_v53, %s16319_s3 }
 0xccd   : > { %8703 = vrot.lane.b32.xlu0 %v8675_v53, %s16319_s3  ;;  %s16325_s3 = smov 120  }
 0xcd1   : > { %8747 = vrot.lane.b32.xlu0 %v15833_v3, %s16415_s10 }
 0xcd5   : > { %8751 = vrot.lane.b32.xlu0 %v15833_v3, %s16415_s10 }
 0xd54   : > { %v10074_v8 = vpop.f32.mrb[36].mxu1 }
 0xd55   : > { %v10075_v9 = vpop.f32.mrb[37].mxu1 }
 0xd56   : > { %v10076_v21 = vadd.f32 %v10075_v9, %v10074_v8 }
 0xd58   : > { %v8502_v43 = vmul.f32 %v10076_v21, %v8485_v49  ;;  %v10077_v29 = vpop.f32.mrb[38].mxu1  ;;  %v15909_v49 = vpop.permute.xlu0 %8585 }
 0xd59   : > { %v10078_v50 = vpop.f32.mrb[39].mxu1 }
 0xd5a   : > { %v8530_v28 = vadd.f32 %v8513_v56, %v8502_v43  ;;  %v10079_v42 = vadd.f32 %v10078_v50, %v10077_v29  ;;  %v8933_v29 = vld [vmem:[%s16426_s13 + $0x8] sm:$0xff] }
 0xd5b   : > { %9044 = vmatprep.mubr.f32.mxu1 %v8933_v29 }
 0xd5c   : > { %8549 = vst.msk [vmem:[#allocation2 + $0x8] sm:$0xff] %vm8548_vm2, %v8530_v28  ;;  %8775 = vst.msk [vmem:[#allocation3 + $0x400] sm:$0xff] %vm8548_vm2, %v8530_v28  ;;  %v8503_v63 = vmul.f32 %v10079_v42, %v8490_v25  ;;  %v15917_v53 = vpop.permute.xlu0 %8589 }
 0xd5e   : > { %v8531_v18 = vadd.f32 %v8518_v32, %v8503_v63  ;;  %v9164_v32 = vld [vmem:[%s16421_s7 + $0x10] sm:$0xff] }
 0xd60   : > { %8550 = vst.msk [vmem:[#allocation2 + $0x58] sm:$0xff] %vm8548_vm2, %v8531_v18  ;;  %8776 = vst.msk [vmem:[#allocation3 + $0x440] sm:$0xff] %vm8548_vm2, %v8531_v18  ;;  %v10080_v26 = vpop.f32.mrb[40].mxu1 }
 0xd61   : > { %v10081_v1 = vpop.f32.mrb[41].mxu1 }
 0xd62   : > { %v10082_v48 = vadd.f32 %v10081_v1, %v10080_v26  ;;  %v9191_v1 = vld [vmem:[%s16424_s11 + $0x8] sm:$0xff] }
 0xd63   : > { %v8841_v11 = vld [vmem:[#allocation2 + $0x8] sm:$0xff]  ;;  %v8912_v7 = vld [vmem:[#allocation3 + $0x400] sm:$0xff] }
 0xd64   : > { %v8504_v4 = vmul.f32 %v10082_v48, %v8495_v17  ;;  %8849 = vrot.lane.b32.xlu0 %v8841_v11, %s16325_s3  ;;  %8632 = vrot.lane.b32.xlu1 %v8841_v11, %s16323_s0  ;;  %9224 = vst [vmem:[#allocation2 + $0x8] sm:$0xff] %v15655_v35  ;;  %v8817_v61 = vmul.f32 %v8841_v11, %v15848_v44  ;;  %v9165_v48 = vld [vmem:[%s16421_s7 + $0x18] sm:$0xff] }
 0xd65   : > { %v10083_v47 = vpop.f32.mrb[42].mxu1  ;;  %v8570_v51 = vmul.f32 %v8841_v11, %v15811_v62  ;;  %v8786_v37 = vmul.f32 %v8841_v11, %v15841_v10  ;;  %v8676_v20 = vmul.f32 %v8841_v11, %v15819_v27  ;;  %v8732_v23 = vmul.f32 %v8841_v11, %v15829_v58 }
 0xd66   : > { %v8532_v6 = vadd.f32 %v8523_v54, %v8504_v4  ;;  %v10084_v12 = vpop.f32.mrb[43].mxu1  ;;  %v8872_v31 = vmul.f32 %v8870_v40, %v8841_v11  ;;  %v9162_v54 = vld [vmem:[%s16421_s7] sm:$0xff]  ;;  %v9193_v4 = vld [vmem:[%s16424_s11 + $0x18] sm:$0xff] }
 0xd67   : > { %v10085_v39 = vadd.f32 %v10084_v12, %v10083_v47  ;;  %v8913_v13 = vld [vmem:[#allocation3 + $0x440] sm:$0xff]  ;;  %v15852_v5 = vld [vmem:[#allocation2 + $0x58] sm:$0xff]  ;;  %v15966_v47 = vpop.permute.xlu1 %11320 }
 0xd68   : > { %8551 = vst.msk [vmem:[#allocation2 + $0xa8] sm:$0xff] %vm8548_vm2, %v8532_v6  ;;  %8777 = vst.msk [vmem:[#allocation3 + $0x480] sm:$0xff] %vm8548_vm2, %v8532_v6  ;;  %8825 = vrot.lane.b32.xlu0 %v8817_v61, %s16321_s2  ;;  %8587 = vrot.lane.b32.xlu1 %v8570_v51, %s16327_s5  ;;  %v10886_v41 = vpack.c.bf16 %v8913_v13, %v8912_v7  ;;  %v8787_v33 = vmul.f32 %v15841_v10, %v15852_v5  ;;  %s16417_s2 = smov 7  }
 0xd69   : > { %9226 = vst [vmem:[#allocation2 + $0x58] sm:$0xff] %v15655_v35  ;;  %v8505_v16 = vmul.f32 %v10085_v39, %v8500_v45  ;;  %v8572_v38 = vmul.f32 %v15852_v5, %v15811_v62  ;;  %v8818_v46 = vmul.f32 %v15848_v44, %v15852_v5  ;;  %v8734_v34 = vmul.f32 %v15829_v58, %v15852_v5  ;;  %v9192_v45 = vld [vmem:[%s16424_s11 + $0x10] sm:$0xff] }
 0xd6a   : > { %10887 = vmatprep.subr.bf16.mxu1 %v10886_v41  ;;  %v8873_v50 = vmul.f32 %v8870_v40, %v15852_v5 }
 0xd6b   : > { %v8533_v60 = vadd.f32 %v8528_v52, %v8505_v16 }
 0xd6c   : > { %8636 = vrot.lane.b32.xlu0 %v15852_v5, %s16323_s0  ;;  %8794 = vrot.lane.b32.xlu1 %v8786_v37, %s16416_s4 }
 0xd6d   : > { %8552 = vst.msk [vmem:[#allocation2 + $0xf8] sm:$0xff] %vm8548_vm2, %v8533_v60  ;;  %8778 = vst.msk [vmem:[#allocation3 + $0x4c0] sm:$0xff] %vm8548_vm2, %v8533_v60 }
 0xd6f   : > { %v8619_v24 = vld [vmem:[#allocation2 + $0xa8] sm:$0xff] }
 0xd70   : > { %8796 = vrot.lane.b32.xlu0 %v8787_v33, %s16416_s4  ;;  %8693 = vrot.lane.b32.xlu1 %v8676_v20, %s16417_s2  ;;  %9228 = vst [vmem:[#allocation2 + $0xa8] sm:$0xff] %v15655_v35  ;;  %v8788_v15 = vmul.f32 %v15841_v10, %v8619_v24  ;;  %v8819_v30 = vmul.f32 %v15848_v44, %v8619_v24  ;;  %v11322_v20 = vunpack.i.l.bf16 %v15966_v47 }
 0xd71   : > { %v8574_v19 = vmul.f32 %v8619_v24, %v15811_v62  ;;  %v8874_v55 = vmul.f32 %v8870_v40, %v8619_v24  ;;  %v8680_v2 = vmul.f32 %v15819_v27, %v8619_v24  ;;  %v8736_v36 = vmul.f32 %v15829_v58, %v8619_v24 }
 0xd74   : > { %8640 = vrot.lane.b32.xlu0 %v8619_v24, %s16323_s0  ;;  %8749 = vrot.lane.b32.xlu1 %v8732_v23, %s16415_s10  ;;  %v15874_v0 = vld [vmem:[#allocation2 + $0xf8] sm:$0xff]  ;;  %s16418_s0 = smov 121  }
 0xd75   : > { %9230 = vst [vmem:[#allocation2 + $0xf8] sm:$0xff] %v15655_v35  ;;  %v8678_v35 = vmul.f32 %v15819_v27, %v15852_v5  ;;  %v8576_v17 = vmul.f32 %v15874_v0, %v15811_v62  ;;  %v8789_v25 = vmul.f32 %v15841_v10, %v15874_v0  ;;  %v15924_v62 = vpop.permute.xlu0 %8593  ;;  %v8682_v8 = vmul.f32 %v15819_v27, %v15874_v0  ;;  %v9163_v10 = vld [vmem:[%s16421_s7 + $0x8] sm:$0xff] }
 0xd76   : > { %v8820_v9 = vmul.f32 %v15848_v44, %v15874_v0  ;;  %v8738_v43 = vmul.f32 %v15829_v58, %v15874_v0  ;;  %v8875_v28 = vmul.f32 %v8870_v40, %v15874_v0 }
 0xd78   : > { %8798 = vrot.lane.b32.xlu0 %v8788_v15, %s16416_s4  ;;  %8851 = vrot.lane.b32.xlu1 %v15852_v5, %s16325_s3  ;;  %s16419_s3 = sld [smem:[#allocation20_spill]] }
 0xd79   : > { %v15933_v21 = vpop.permute.xlu0 %8597 }
 0xd7c   : > { %8755 = vrot.lane.b32.xlu0 %v15833_v3, %s16415_s10  ;;  %8591 = vrot.lane.b32.xlu1 %v8572_v38, %s16327_s5  ;;  %s16420_s5 = smov 120  }
 0xd7d   : > { %v11316_v27 = vpop.permute.xlu0 %11315 }
 0xd7e   : > { %v8944_v57 = vld [vmem:[%s16419_s3] sm:$0xff]  ;;  %v8946_v56 = vld [vmem:[%s16419_s3 + $0x10] sm:$0xff]  ;;  %v8945_v52 = vld [vmem:[%s16419_s3 + $0x8] sm:$0xff]  ;;  %v11317_v6 = vunpack.i.l.bf16 %v11316_v27  ;;  %v11318_v13 = vunpack.i.h.bf16 %v11316_v27  ;;  %v11323_v27 = vunpack.i.h.bf16 %v15966_v47 }
 0xd7f   : > { %v8947_v63 = vld [vmem:[%s16419_s3 + $0x18] sm:$0xff]  ;;  %s16427_s3 = sld [smem:[#allocation24_spill]] }
 0xd80   : > { %8829 = vrot.lane.b32.xlu0 %v8819_v30, %s16418_s0  ;;  %8697 = vrot.lane.b32.xlu1 %v8678_v35, %s16417_s2 }
 0xd81   : > { %v8692_v58 = vpop.permute.xlu0 %8691 }
 0xd84   : > { %8759 = vrot.lane.b32.xlu0 %v15833_v3, %s16415_s10  ;;  %8827 = vrot.lane.b32.xlu1 %v8818_v46, %s16418_s0  ;;  %v9190_v3 = vld [vmem:[%s16424_s11] sm:$0xff] }
 0xd85   : > { %v15952_v42 = vpop.permute.xlu0 %8695 }
 0xd88   : > { %8853 = vrot.lane.b32.xlu0 %v8619_v24, %s16420_s5  ;;  %8753 = vrot.lane.b32.xlu1 %v8734_v34, %s16415_s10 }
 0xd89   : > { %v15956_v18 = vpop.permute.xlu0 %8699 }
 0xd8c   : > { %8880 = vrot.lane.b32.xlu0 %v8872_v31, %s16422_s8  ;;  %8595 = vrot.lane.b32.xlu1 %v8574_v19, %s16423_s9 }
 0xd8d   : > { %v15959_v26 = vpop.permute.xlu0 %8703 }
 0xd90   : > { %8884 = vrot.lane.b32.xlu0 %v8874_v55, %s16422_s8  ;;  %8701 = vrot.lane.b32.xlu1 %v8680_v2, %s16417_s2  ;;  %v8915_v2 = vld [vmem:[#allocation3 + $0x4c0] sm:$0xff] }
 0xd91   : > { %v8748_v11 = vpop.permute.xlu0 %8747 }
 0xd94   : > { %8950 = vperm.xlu0 %11062, %v8944_v57   ;;  %8644 = vrot.lane.b32.xlu1 %v15874_v0, %s16425_s12 }
 0xd95   : > { %v15964_v44 = vpop.permute.xlu0 %8751 }
 0xd98   : > { %8960 = vperm.xlu0 %11062, %v8946_v56   ;;  %8599 = vrot.lane.b32.xlu1 %v8576_v17, %s16423_s9  ;;  %v8914_v17 = vld [vmem:[#allocation3 + $0x480] sm:$0xff] }
 0xd9c   : > { %9168 = vperm.xlu0 %11062, %v9162_v54   ;;  %8757 = vrot.lane.b32.xlu1 %v8736_v36, %s16415_s10  ;;  %v10890_v54 = vpack.c.bf16 %v8915_v2, %v8914_v17 }
 0xda0   : > { %9196 = vperm.xlu0 %11062, %v9190_v3   ;;  %8800 = vrot.lane.b32.xlu1 %v8789_v25, %s16416_s4 }
 0xda4   : > { %9178 = vperm.xlu0 %11062, %v9164_v32   ;;  %8705 = vrot.lane.b32.xlu1 %v8682_v8, %s16417_s2 }
 0xda8   : > { %9206 = vperm.xlu0 %11062, %v9192_v45   ;;  %8831 = vrot.lane.b32.xlu1 %v8820_v9, %s16418_s0 }
 0xdac   : > { %8761 = vrot.lane.b32.xlu1 %v8738_v43, %s16415_s10  ;;  %9249 = vrot.lane.b32.xlu0 %v15756_v22, %s16422_s8 }
 0xdb0   : > { %8855 = vrot.lane.b32.xlu1 %v15874_v0, %s16420_s5  ;;  %9353 = vrot.lane.b32.xlu0 %v15759_v59, %s16418_s0 }
 0xdb4   : > { %8882 = vrot.lane.b32.xlu1 %v8873_v50, %s16422_s8  ;;  %9408 = vrot.lane.b32.xlu0 %v15756_v22, %s16416_s4 }
 0xdb8   : > { %8886 = vrot.lane.b32.xlu1 %v8875_v28, %s16422_s8 }
 0xdbc   : > { %8955 = vperm.xlu1 %11063, %v8945_v52  }
 0xdc0   : > { %8965 = vperm.xlu1 %11063, %v8947_v63  }
 0xdc4   : > { %9173 = vperm.xlu1 %11063, %v9163_v10  }
 0xdc8   : > { %9201 = vperm.xlu1 %11063, %v9191_v1  }
 0xdcc   : > { %9183 = vperm.xlu1 %11063, %v9165_v48  }
 0xdd0   : > { %9211 = vperm.xlu1 %11063, %v9193_v4  }
 0xdd4   : > { %9463 = vrot.lane.b32.xlu1 %v15759_v59, %s16415_s10 }
 0xdd6   : > { %v8850_v12 = vpop.permute.xlu0 %8849  ;;  %v8633_v61 = vpop.permute.xlu1 %8632 }
 0xdd7   : > { %8861 = vst.msk [vmem:[#allocation3 + $0x700] sm:$0xff] %vm8548_vm2, %v8850_v12  ;;  %v8647_v51 = vsel %vm8646_vm0, %v11317_v6, %v8633_v61 }
 0xdd8   : > { %8655 = vst.msk [vmem:[#allocation3 + $0x100] sm:$0xff] %vm8548_vm2, %v8647_v51  ;;  %9494 = vrot.lane.b32.xlu1 %v15756_v22, %s16417_s2 }
 0xdda   : > { %v8826_v39 = vpop.permute.xlu0 %8825  ;;  %v8588_v7 = vpop.permute.xlu1 %8587 }
 0xddb   : > { %8837 = vst.msk [vmem:[#allocation3 + $0x600] sm:$0xff] %vm8548_vm2, %v8826_v39  ;;  %v8602_v5 = vsel %vm8601_vm8, %v15909_v49, %v8588_v7 }
 0xddc   : > { %8610 = vst.msk [vmem:[#allocation3] sm:$0xff] %vm8548_vm2, %v8602_v5  ;;  %9549 = vrot.lane.b32.xlu1 %v15759_v59, %s16423_s9 }
 0xdde   : > { %v8637_v41 = vpop.permute.xlu0 %8636  ;;  %v8795_v16 = vpop.permute.xlu1 %8794 }
 0xddf   : > { %v8648_v37 = vsel %vm8646_vm0, %v11318_v13, %v8637_v41  ;;  %8806 = vst.msk [vmem:[#allocation3 + $0x500] sm:$0xff] %vm8548_vm2, %v8795_v16  ;;  %v8900_v12 = vld [vmem:[#allocation3 + $0x100] sm:$0xff] }
 0xde0   : > { %8656 = vst.msk [vmem:[#allocation3 + $0x140] sm:$0xff] %vm8548_vm2, %v8648_v37 }
 0xde2   : > { %v8797_v22 = vpop.permute.xlu0 %8796  ;;  %v8694_v60 = vpop.permute.xlu1 %8693 }
 0xde3   : > { %8807 = vst.msk [vmem:[#allocation3 + $0x540] sm:$0xff] %vm8548_vm2, %v8797_v22  ;;  %v8708_v33 = vsel %vm8707_vm12, %v8692_v58, %v8694_v60  ;;  %v8896_v57 = vld [vmem:[#allocation3] sm:$0xff] }
 0xde4   : > { %8716 = vst.msk [vmem:[#allocation3 + $0x200] sm:$0xff] %vm8548_vm2, %v8708_v33  ;;  %v8920_v22 = vld [vmem:[#allocation3 + $0x600] sm:$0xff] }
 0xde6   : > { %v8641_v59 = vpop.permute.xlu0 %8640  ;;  %v8750_v24 = vpop.permute.xlu1 %8749 }
 0xde7   : > { %v8649_v23 = vsel %vm8646_vm0, %v11322_v20, %v8641_v59  ;;  %v8763_v0 = vsel %vm1531_vm3, %v8748_v11, %v8750_v24  ;;  %v8916_v11 = vld [vmem:[#allocation3 + $0x500] sm:$0xff] }
 0xde8   : > { %8657 = vst.msk [vmem:[#allocation3 + $0x180] sm:$0xff] %vm8548_vm2, %v8649_v23  ;;  %8771 = vst.msk [vmem:[#allocation3 + $0x300] sm:$0xff] %vm8548_vm2, %v8763_v0 }
 0xdea   : > { %v8799_v15 = vpop.permute.xlu0 %8798  ;;  %v8852_v38 = vpop.permute.xlu1 %8851  ;;  %v8917_v63 = vld [vmem:[#allocation3 + $0x540] sm:$0xff] }
 0xdeb   : > { %8808 = vst.msk [vmem:[#allocation3 + $0x580] sm:$0xff] %vm8548_vm2, %v8799_v15  ;;  %8862 = vst.msk [vmem:[#allocation3 + $0x740] sm:$0xff] %vm8548_vm2, %v8852_v38  ;;  %v10894_v4 = vpack.c.bf16 %v8917_v63, %v8916_v11  ;;  %v8904_v23 = vld [vmem:[#allocation3 + $0x200] sm:$0xff]  ;;  %v8942_v11 = vld [vmem:[%s16426_s13 + $0x50] sm:$0xff] }
 0xdee   : > { %v8756_v30 = vpop.permute.xlu0 %8755  ;;  %v8592_v35 = vpop.permute.xlu1 %8591 }
 0xdef   : > { %v8603_v46 = vsel %vm8601_vm8, %v15917_v53, %v8592_v35  ;;  %v8902_v37 = vld [vmem:[#allocation3 + $0x180] sm:$0xff] }
 0xdf0   : > { %8611 = vst.msk [vmem:[#allocation3 + $0x40] sm:$0xff] %vm8548_vm2, %v8603_v46  ;;  %v8908_v17 = vld [vmem:[#allocation3 + $0x300] sm:$0xff] }
 0xdf2   : > { %v8830_v34 = vpop.permute.xlu0 %8829  ;;  %v8698_v40 = vpop.permute.xlu1 %8697  ;;  %v8918_v7 = vld [vmem:[#allocation3 + $0x580] sm:$0xff] }
 0xdf3   : > { %8839 = vst.msk [vmem:[#allocation3 + $0x680] sm:$0xff] %vm8548_vm2, %v8830_v34  ;;  %v8709_v31 = vsel %vm8707_vm12, %v15952_v42, %v8698_v40  ;;  %v8925_v46 = vld [vmem:[#allocation3 + $0x740] sm:$0xff] }
 0xdf4   : > { %8717 = vst.msk [vmem:[#allocation3 + $0x240] sm:$0xff] %vm8548_vm2, %v8709_v31 }
 0xdf6   : > { %v16001_v19 = vpop.permute.xlu0 %8759  ;;  %v8828_v55 = vpop.permute.xlu1 %8827 }
 0xdf7   : > { %8838 = vst.msk [vmem:[#allocation3 + $0x640] sm:$0xff] %vm8548_vm2, %v8828_v55  ;;  %v8897_v49 = vld [vmem:[#allocation3 + $0x40] sm:$0xff] }
 0xdf8   : > { %v10888_v56 = vpack.c.bf16 %v8897_v49, %v8896_v57  ;;  %v8924_v55 = vld [vmem:[#allocation3 + $0x700] sm:$0xff] }
 0xdf9   : > { %v10910_v2 = vpack.c.bf16 %v8925_v46, %v8924_v55 }
 0xdfa   : > { %v8854_v36 = vpop.permute.xlu0 %8853  ;;  %10889 = vmatpush3.bf16.msra.mxu1 %v10888_v56  ;;  %v8754_v53 = vpop.permute.xlu1 %8753 }
 0xdfb   : > { %8863 = vst.msk [vmem:[#allocation3 + $0x780] sm:$0xff] %vm8548_vm2, %v8854_v36  ;;  %v8764_v3 = vsel %vm1531_vm3, %v15964_v44, %v8754_v53  ;;  %10891 = vmatprep.subr.bf16.mxu1 %v10890_v54  ;;  %v8901_v44 = vld [vmem:[#allocation3 + $0x140] sm:$0xff] }
 0xdfc   : > { %8772 = vst.msk [vmem:[#allocation3 + $0x340] sm:$0xff] %vm8548_vm2, %v8764_v3  ;;  %v10896_v61 = vpack.c.bf16 %v8901_v44, %v8900_v12  ;;  %v8905_v33 = vld [vmem:[#allocation3 + $0x240] sm:$0xff]  ;;  %v8934_v44 = vld [vmem:[%s16426_s13 + $0x10] sm:$0xff]  ;;  %v8943_v12 = vld [vmem:[%s16426_s13 + $0x58] sm:$0xff] }
 0xdfd   : > { %v10904_v0 = vpack.c.bf16 %v8905_v33, %v8904_v23 }
 0xdfe   : > { %v8881_v25 = vpop.permute.xlu0 %8880  ;;  %v8596_v32 = vpop.permute.xlu1 %8595  ;;  %v8921_v5 = vld [vmem:[#allocation3 + $0x640] sm:$0xff] }
 0xdff   : > { %8892 = vst.msk [vmem:[#allocation3 + $0x800] sm:$0xff] %vm8548_vm2, %v8881_v25  ;;  %v8604_v8 = vsel %vm8601_vm8, %v15924_v62, %v8596_v32  ;;  %v10902_v60 = vpack.c.bf16 %v8921_v5, %v8920_v22 }
 0xe00   : > { %8612 = vst.msk [vmem:[#allocation3 + $0x80] sm:$0xff] %vm8548_vm2, %v8604_v8 }
 0xe02   : > { %v8885_v45 = vpop.permute.xlu0 %8884  ;;  %v8702_v9 = vpop.permute.xlu1 %8701  ;;  %v8926_v3 = vld [vmem:[#allocation3 + $0x780] sm:$0xff] }
 0xe03   : > { %8894 = vst.msk [vmem:[#allocation3 + $0x880] sm:$0xff] %vm8548_vm2, %v8885_v45  ;;  %v8710_v43 = vsel %vm8707_vm12, %v15956_v18, %v8702_v9  ;;  %v8909_v57 = vld [vmem:[#allocation3 + $0x340] sm:$0xff] }
 0xe04   : > { %8718 = vst.msk [vmem:[#allocation3 + $0x280] sm:$0xff] %vm8548_vm2, %v8710_v43  ;;  %v10912_v54 = vpack.c.bf16 %v8909_v57, %v8908_v17  ;;  %v11340_v43 = vld [vmem:[#allocation2 + $0xc0] sm:$0xff] }
 0xe06   : > { %v8645_v29 = vpop.permute.xlu1 %8644 }
 0xe07   : > { %v8650_v50 = vsel %vm8646_vm0, %v11323_v27, %v8645_v29  ;;  %v8898_v10 = vld [vmem:[#allocation3 + $0x80] sm:$0xff] }
 0xe08   : > { %8658 = vst.msk [vmem:[#allocation3 + $0x1c0] sm:$0xff] %vm8548_vm2, %v8650_v50  ;;  %v8932_v29 = vld [vmem:[%s16426_s13] sm:$0xff] }
 0xe09   : > { %v8928_v50 = vld [vmem:[#allocation3 + $0x800] sm:$0xff] }
 0xe0a   : > { %v8600_v58 = vpop.permute.xlu1 %8599 }
 0xe0b   : > { %v8605_v62 = vsel %vm8601_vm8, %v15933_v21, %v8600_v58  ;;  %v8906_v31 = vld [vmem:[#allocation3 + $0x280] sm:$0xff] }
 0xe0c   : > { %8613 = vst.msk [vmem:[#allocation3 + $0xc0] sm:$0xff] %vm8548_vm2, %v8605_v62 }
 0xe0e   : > { %v8758_v28 = vpop.permute.xlu1 %8757 }
 0xe0f   : > { %v8765_v42 = vsel %vm1531_vm3, %v8756_v30, %v8758_v28  ;;  %v8903_v51 = vld [vmem:[#allocation3 + $0x1c0] sm:$0xff] }
 0xe10   : > { %8773 = vst.msk [vmem:[#allocation3 + $0x380] sm:$0xff] %vm8548_vm2, %v8765_v42  ;;  %v8922_v30 = vld [vmem:[#allocation3 + $0x680] sm:$0xff]  ;;  %v8935_v42 = vld [vmem:[%s16426_s13 + $0x18] sm:$0xff] }
 0xe11   : > { %v8936_v28 = vld [vmem:[%s16426_s13 + $0x20] sm:$0xff] }
 0xe12   : > { %v8801_v52 = vpop.permute.xlu1 %8800 }
 0xe13   : > { %8809 = vst.msk [vmem:[#allocation3 + $0x5c0] sm:$0xff] %vm8548_vm2, %v8801_v52  ;;  %v16025_v18 = vpop.permute.xlu0 %8950  ;;  %v8899_v1 = vld [vmem:[#allocation3 + $0xc0] sm:$0xff] }
 0xe14   : > { %v10892_v48 = vpack.c.bf16 %v8899_v1, %v8898_v10  ;;  %v8930_v52 = vld [vmem:[#allocation3 + $0x880] sm:$0xff]  ;;  %v8939_v1 = vld [vmem:[%s16426_s13 + $0x38] sm:$0xff] }
 0xe16   : > { %10893 = vmatpush3.bf16.msra.mxu1 %v10892_v48  ;;  %v8706_v21 = vpop.permute.xlu1 %8705  ;;  %v8938_v48 = vld [vmem:[%s16426_s13 + $0x30] sm:$0xff] }
 0xe17   : > { %v8711_v47 = vsel %vm8707_vm12, %v15959_v26, %v8706_v21  ;;  %v16029_v6 = vpop.permute.xlu0 %8960  ;;  %10895 = vmatprep.subr.bf16.mxu1 %v10894_v4  ;;  %v10900_v26 = vpack.c.bf16 %v8903_v51, %v8902_v37  ;;  %v8910_v8 = vld [vmem:[#allocation3 + $0x380] sm:$0xff]  ;;  %v8941_v4 = vld [vmem:[%s16426_s13 + $0x48] sm:$0xff] }
 0xe18   : > { %8719 = vst.msk [vmem:[#allocation3 + $0x2c0] sm:$0xff] %vm8548_vm2, %v8711_v47  ;;  %v8937_v21 = vld [vmem:[%s16426_s13 + $0x28] sm:$0xff]  ;;  %v8940_v47 = vld [vmem:[%s16426_s13 + $0x40] sm:$0xff] }
 0xe1a   : > { %10897 = vmatpush3.bf16.msra.mxu1 %v10896_v61  ;;  %v8832_v39 = vpop.permute.xlu1 %8831  ;;  %v8919_v13 = vld [vmem:[#allocation3 + $0x5c0] sm:$0xff] }
 0xe1b   : > { %8840 = vst.msk [vmem:[#allocation3 + $0x6c0] sm:$0xff] %vm8548_vm2, %v8832_v39  ;;  %v16033_v41 = vpop.permute.xlu0 %9168  ;;  %v10898_v16 = vpack.c.bf16 %v8919_v13, %v8918_v7  ;;  %v11329_v7 = vpack.i.bf16 %v11340_v43, %v11340_v43 }
 0xe1d   : > { %10899 = vmatprep.subr.bf16.mxu1 %v10898_v16  ;;  %11330 = vrot.lane.b32.xlu1 %v11329_v7, %s16425_s12 }
 0xe1e   : > { %10901 = vmatpush3.bf16.msra.mxu1 %v10900_v26  ;;  %v8762_v20 = vpop.permute.xlu1 %8761 }
 0xe1f   : > { %v8766_v59 = vsel %vm1531_vm3, %v16001_v19, %v8762_v20  ;;  %v16037_v24 = vpop.permute.xlu0 %9196  ;;  %10903 = vmatprep.subr.bf16.mxu1 %v10902_v60  ;;  %v8907_v15 = vld [vmem:[#allocation3 + $0x2c0] sm:$0xff] }
 0xe20   : > { %8774 = vst.msk [vmem:[#allocation3 + $0x3c0] sm:$0xff] %vm8548_vm2, %v8766_v59  ;;  %v10908_v19 = vpack.c.bf16 %v8907_v15, %v8906_v31 }
 0xe22   : > { %10905 = vmatpush3.bf16.msra.mxu1 %v10904_v0  ;;  %v8856_v38 = vpop.permute.xlu1 %8855  ;;  %v8923_v35 = vld [vmem:[#allocation3 + $0x6c0] sm:$0xff] }
 0xe23   : > { %8864 = vst.msk [vmem:[#allocation3 + $0x7c0] sm:$0xff] %vm8548_vm2, %v8856_v38  ;;  %v16041_v34 = vpop.permute.xlu0 %9178  ;;  %v10906_v40 = vpack.c.bf16 %v8923_v35, %v8922_v30 }
 0xe25   : > { %10907 = vmatprep.subr.bf16.mxu1 %v10906_v40 }
 0xe26   : > { %10909 = vmatpush3.bf16.msra.mxu1 %v10908_v19  ;;  %v8883_v49 = vpop.permute.xlu1 %8882 }
 0xe27   : > { %8893 = vst.msk [vmem:[#allocation3 + $0x840] sm:$0xff] %vm8548_vm2, %v8883_v49  ;;  %v16044_v56 = vpop.permute.xlu0 %9206  ;;  %10911 = vmatprep.subr.bf16.mxu1 %v10910_v2  ;;  %v8911_v36 = vld [vmem:[#allocation3 + $0x3c0] sm:$0xff] }
 0xe28   : > { %v10916_v9 = vpack.c.bf16 %v8911_v36, %v8910_v8 }
 0xe2a   : > { %10913 = vmatpush3.bf16.msra.mxu1 %v10912_v54  ;;  %v8887_v53 = vpop.permute.xlu1 %8886  ;;  %v8927_v25 = vld [vmem:[#allocation3 + $0x7c0] sm:$0xff] }
 0xe2b   : > { %8895 = vst.msk [vmem:[#allocation3 + $0x8c0] sm:$0xff] %vm8548_vm2, %v8887_v53  ;;  %v10914_v32 = vpack.c.bf16 %v8927_v25, %v8926_v3  ;;  %v16047_v45 = vpop.permute.xlu0 %9249 }
 0xe2c   : > { %v9252_v27 = vmul.f32 %v11340_v43, %v16047_v45 }
 0xe2d   : > { %10915 = vmatprep.subr.bf16.mxu1 %v10914_v32 }
 0xe2e   : > { %10917 = vmatpush3.bf16.msra.mxu1 %v10916_v9  ;;  %v8929_v58 = vld [vmem:[#allocation3 + $0x840] sm:$0xff]  ;;  %9268 = vrot.lane.b32.xlu0 %v9252_v27, %s16423_s9 }
 0xe2f   : > { %v10918_v62 = vpack.c.bf16 %v8929_v58, %v8928_v50  ;;  %v16071_v61 = vpop.permute.xlu0 %9353 }
 0xe30   : > { %v9356_v51 = vmul.f32 %v11340_v43, %v16071_v61 }
 0xe31   : > { %9045 = vmatmul.mubr.f32.vlgmr.msra.gmra.mrb[44].mxu1 %v8932_v29  ;;  %10919 = vmatprep.subr.bf16.mxu1 %v10918_v62 }
 0xe32   : > { %10921 = vmatpush3.bf16.msra.mxu1 %v10918_v62  ;;  %9049 = vmatprep.mubr.f32.mxu1 %v8936_v28  ;;  %v8931_v63 = vld [vmem:[#allocation3 + $0x8c0] sm:$0xff] }
 0xe33   : > { %v10922_v10 = vpack.c.bf16 %v8931_v63, %v8930_v52  ;;  %9272 = vrot.lane.b32.xlu0 %v9252_v27, %s16423_s9 }
 0xe35   : > { %9050 = vmatmul.mubr.f32.gmra.mrb[46].mxu1 %v8935_v42  ;;  %10923 = vmatprep.subr.bf16.mxu1 %v10922_v10 }
 0xe36   : > { %10925 = vmatpush3.bf16.msra.mxu1 %v10922_v10  ;;  %9054 = vmatprep.mubr.f32.mxu1 %v8939_v1 }
 0xe37   : > { %9276 = vrot.lane.b32.xlu0 %v9252_v27, %s16423_s9 }
 0xe39   : > { %9055 = vmatmul.mubr.f32.gmra.mrb[48].mxu1 %v8938_v48 }
 0xe3a   : > { %9059 = vmatprep.mubr.f32.mxu1 %v8942_v11 }
 0xe3b   : > { %9280 = vrot.lane.b32.xlu0 %v9252_v27, %s16423_s9  ;;  %v8956_v13 = vpop.permute.xlu1 %8955 }
 0xe3d   : > { %9060 = vmatmul.mubr.f32.gmra.mrb[50].mxu1 %v8941_v4 }
 0xe3e   : > { %10198 = vmatprep.mubr.msk.f32.mxu1 %vm1292_vm6, %v8934_v44 }
 0xe3f   : > { %11325 = vrot.lane.b32.xlu0 %v15775_v14, %s16425_s12  ;;  %v16078_v14 = vpop.permute.xlu0 %9408  ;;  %v8966_v26 = vpop.permute.xlu1 %8965 }
 0xe40   : > { %v16081_v39 = vmul.f32 %v11340_v43, %v16078_v14 }
 0xe41   : > { %10199 = vmatmul.mubr.msk.f32.vlgmr.msra.gmra.mrb[52].mxu1 %vm1292_vm6, %v8937_v21 }
 0xe42   : > { %10201 = vmatprep.mubr.msk.f32.mxu1 %vm1292_vm6, %v8940_v47 }
 0xe43   : > { %9372 = vrot.lane.b32.xlu0 %v9356_v51, %s16417_s2  ;;  %v9174_v59 = vpop.permute.xlu1 %9173 }
 0xe45   : > { %10202 = vmatmul.mubr.msk.f32.gmra.mrb[54].mxu1 %vm1292_vm6, %v8943_v12 }
 0xe47   : > { %9376 = vrot.lane.b32.xlu0 %v9356_v51, %s16417_s2  ;;  %v9202_v35 = vpop.permute.xlu1 %9201 }
 0xe4b   : > { %9380 = vrot.lane.b32.xlu0 %v9356_v51, %s16417_s2  ;;  %v9184_v53 = vpop.permute.xlu1 %9183 }
 0xe4f   : > { %9384 = vrot.lane.b32.xlu0 %v9356_v51, %s16417_s2  ;;  %v9212_v42 = vpop.permute.xlu1 %9211 }
 0xe53   : > { %9427 = vrot.lane.b32.xlu0 %v16081_v39, %s16415_s10  ;;  %v9464_v10 = vpop.permute.xlu1 %9463 }
 0xe57   : > { %9431 = vrot.lane.b32.xlu0 %v16081_v39, %s16415_s10  ;;  %v9495_v44 = vpop.permute.xlu1 %9494 }
 0xf04   : > { %v10118_v5 = vpop.f32.mrb[44].mxu1 }
 0xf05   : > { %v10119_v16 = vpop.f32.mrb[45].mxu1 }
 0xf06   : > { %v10120_v37 = vadd.f32 %v10119_v16, %v10118_v5 }
 0xf08   : > { %v10121_v22 = vpop.f32.mrb[46].mxu1  ;;  %v9047_v31 = vadd.f32 %v10120_v37, %v16025_v18 }
 0xf09   : > { %v10122_v60 = vpop.f32.mrb[47].mxu1 }
 0xf0a   : > { %v10123_v33 = vadd.f32 %v10122_v60, %v10121_v22  ;;  %v9550_v60 = vpop.permute.xlu1 %9549 }
 0xf0c   : > { %v10124_v20 = vpop.f32.mrb[48].mxu1  ;;  %v9052_v46 = vadd.f32 %v10123_v33, %v8956_v13 }
 0xf0d   : > { %v10125_v23 = vpop.f32.mrb[49].mxu1 }
 0xf0e   : > { %v10126_v0 = vadd.f32 %v10125_v23, %v10124_v20 }
 0xf10   : > { %v10127_v15 = vpop.f32.mrb[50].mxu1  ;;  %v9057_v36 = vadd.f32 %v10126_v0, %v16029_v6 }
 0xf11   : > { %v10128_v38 = vpop.f32.mrb[51].mxu1 }
 0xf12   : > { %v10129_v30 = vadd.f32 %v10128_v38, %v10127_v15  ;;  %v16143_v38 = vpop.permute.xlu0 %9268 }
 0xf14   : > { %v10200_v40 = vpop.f32.mrb[52].mxu1  ;;  %v9062_v49 = vadd.f32 %v10129_v30, %v8966_v26  ;;  %v9626_v30 = vld [vmem:[%s16427_s3 + $0x10] sm:$0xff] }
 0xf15   : > { %v9137_v19 = vadd.f32 %v10200_v40, %v9052_v46  ;;  %v9131_v55 = vpop.f32.mrb[53].mxu1 }
 0xf16   : > { %v9132_v2 = vadd.f32 %v9131_v55, %v9047_v31  ;;  %v9273_v46 = vpop.permute.xlu0 %9272 }
 0xf17   : > { %vm9151_vm9 = vcmp.ge.f32.partialorder %v9137_v19, 0.0  ;;  %v9155_v57 = vmul.f32 0.1, %v9137_v19 }
 0xf18   : > { %vm9150_vm7 = vcmp.ge.f32.partialorder %v9132_v2, 0.0  ;;  %v9154_v17 = vmul.f32 0.1, %v9132_v2  ;;  %v10203_v54 = vpop.f32.mrb[54].mxu1 }
 0xf19   : > { %v9159_v3 = vsel %vm9151_vm9, %v9137_v19, %v9155_v57  ;;  %v9147_v25 = vadd.f32 %v10203_v54, %v9062_v49  ;;  %v9141_v32 = vpop.f32.mrb[55].mxu1 }
 0xf1a   : > { %v9187_v8 = vmul.f32 %v9174_v59, %v9159_v3  ;;  %v9158_v9 = vsel %vm9150_vm7, %v9132_v2, %v9154_v17  ;;  %v9142_v43 = vadd.f32 %v9141_v32, %v9057_v36  ;;  %v16152_v31 = vpop.permute.xlu0 %9276  ;;  %v9627_v3 = vld [vmem:[%s16427_s3 + $0x18] sm:$0xff] }
 0xf1b   : > { %v9186_v18 = vmul.f32 %v16033_v41, %v9158_v9  ;;  %vm9153_vm14 = vcmp.ge.f32.partialorder %v9147_v25, 0.0  ;;  %v9157_v27 = vmul.f32 0.1, %v9147_v25  ;;  %v11331_v9 = vpop.permute.xlu1 %11330 }
 0xf1c   : > { %v9215_v29 = vadd.f32 %v9202_v35, %v9187_v8  ;;  %vm9152_vm15 = vcmp.ge.f32.partialorder %v9142_v43, 0.0  ;;  %v9156_v50 = vmul.f32 0.1, %v9142_v43 }
 0xf1d   : > { %v9214_v58 = vadd.f32 %v16037_v24, %v9186_v18  ;;  %v9161_v62 = vsel %vm9153_vm14, %v9147_v25, %v9157_v27 }
 0xf1e   : > { %9233 = vst.msk [vmem:[#allocation2 + $0x58] sm:$0xff] %vm8548_vm2, %v9215_v29  ;;  %9456 = vst.msk [vmem:[#allocation3 + $0x440] sm:$0xff] %vm8548_vm2, %v9215_v29  ;;  %v9189_v6 = vmul.f32 %v9184_v53, %v9161_v62  ;;  %v9160_v28 = vsel %vm9152_vm15, %v9142_v43, %v9156_v50  ;;  %v9625_v53 = vld [vmem:[%s16427_s3 + $0x8] sm:$0xff] }
 0xf1f   : > { %9232 = vst.msk [vmem:[#allocation2 + $0x8] sm:$0xff] %vm8548_vm2, %v9214_v58  ;;  %9455 = vst.msk [vmem:[#allocation3 + $0x400] sm:$0xff] %vm8548_vm2, %v9214_v58  ;;  %v9188_v41 = vmul.f32 %v16041_v34, %v9160_v28 }
 0xf20   : > { %v9217_v52 = vadd.f32 %v9212_v42, %v9189_v6 }
 0xf21   : > { %v9216_v63 = vadd.f32 %v16044_v56, %v9188_v41 }
 0xf22   : > { %9235 = vst.msk [vmem:[#allocation2 + $0xf8] sm:$0xff] %vm8548_vm2, %v9217_v52  ;;  %9458 = vst.msk [vmem:[#allocation3 + $0x4c0] sm:$0xff] %vm8548_vm2, %v9217_v52 }
 0xf23   : > { %9234 = vst.msk [vmem:[#allocation2 + $0xa8] sm:$0xff] %vm8548_vm2, %v9216_v63  ;;  %9457 = vst.msk [vmem:[#allocation3 + $0x480] sm:$0xff] %vm8548_vm2, %v9216_v63  ;;  %v11332_v63 = vunpack.i.l.bf16 %v11331_v9 }
 0xf25   : > { %v16102_v24 = vld [vmem:[#allocation2 + $0x58] sm:$0xff]  ;;  %v9593_v1 = vld [vmem:[#allocation3 + $0x440] sm:$0xff] }
 0xf26   : > { %v9459_v48 = vld [vmem:[#allocation2 + $0x8] sm:$0xff]  ;;  %9318 = vrot.lane.b32.xlu0 %v16102_v24, %s16425_s12  ;;  %v9592_v34 = vld [vmem:[#allocation3 + $0x400] sm:$0xff]  ;;  %v9467_v11 = vmul.f32 %v9464_v10, %v16102_v24  ;;  %v9255_v4 = vmul.f32 %v16102_v24, %v16047_v45  ;;  %v9359_v47 = vmul.f32 %v16102_v24, %v16071_v61  ;;  %v9498_v51 = vmul.f32 %v9495_v44, %v16102_v24 }
 0xf27   : > { %9314 = vrot.lane.b32.xlu1 %v9459_v48, %s16425_s12  ;;  %v10926_v56 = vpack.c.bf16 %v9593_v1, %v9592_v34  ;;  %v9497_v21 = vmul.f32 %v9495_v44, %v9459_v48  ;;  %v9253_v7 = vmul.f32 %v9459_v48, %v16047_v45  ;;  %v9466_v5 = vmul.f32 %v9464_v10, %v9459_v48 }
 0xf28   : > { %v9357_v16 = vmul.f32 %v9459_v48, %v16071_v61  ;;  %v9412_v26 = vmul.f32 %v9459_v48, %v16078_v14  ;;  %v9552_v20 = vmul.f32 %v9550_v60, %v9459_v48  ;;  %v9414_v40 = vmul.f32 %v16102_v24, %v16078_v14 }
 0xf29   : > { %10927 = vmatprep.subr.bf16.mxu1 %v10926_v56  ;;  %v9462_v22 = vld [vmem:[#allocation2 + $0xf8] sm:$0xff]  ;;  %v9553_v17 = vmul.f32 %v9550_v60, %v16102_v24 }
 0xf2a   : > { %9476 = vrot.lane.b32.xlu0 %v9467_v11, %s16416_s4  ;;  %v9461_v12 = vld [vmem:[#allocation2 + $0xa8] sm:$0xff]  ;;  %v9259_v33 = vmul.f32 %v9462_v22, %v16047_v45  ;;  %v9469_v59 = vmul.f32 %v9464_v10, %v9462_v22  ;;  %v9363_v0 = vmul.f32 %v9462_v22, %v16071_v61  ;;  %v9500_v15 = vmul.f32 %v9495_v44, %v9462_v22 }
 0xf2b   : > { %9274 = vrot.lane.b32.xlu1 %v9255_v4, %s16423_s9  ;;  %v9468_v13 = vmul.f32 %v9464_v10, %v9461_v12  ;;  %v9499_v37 = vmul.f32 %v9495_v44, %v9461_v12  ;;  %v9554_v23 = vmul.f32 %v9550_v60, %v9461_v12  ;;  %v9257_v35 = vmul.f32 %v9461_v12, %v16047_v45  ;;  %v16158_v45 = vpop.permute.xlu0 %9280 }
 0xf2c   : > { %v9361_v19 = vmul.f32 %v9461_v12, %v16071_v61  ;;  %v9418_v55 = vmul.f32 %v9462_v22, %v16078_v14  ;;  %v9416_v2 = vmul.f32 %v9461_v12, %v16078_v14  ;;  %v9555_v54 = vmul.f32 %v9550_v60, %v9462_v22 }
 0xf2d   : > { %v11333_v60 = vunpack.i.h.bf16 %v11331_v9 }
 0xf2e   : > { %9505 = vrot.lane.b32.xlu0 %v9497_v21, %s16418_s0 }
 0xf2f   : > { %9378 = vrot.lane.b32.xlu1 %v9359_v47, %s16417_s2  ;;  %v11326_v57 = vpop.permute.xlu0 %11325  ;;  %v9594_v47 = vld [vmem:[#allocation3 + $0x480] sm:$0xff] }
 0xf30   : > { %v11328_v43 = vunpack.i.h.bf16 %v11326_v57  ;;  %v11327_v18 = vunpack.i.l.bf16 %v11326_v57 }
 0xf32   : > { %9322 = vrot.lane.b32.xlu0 %v9461_v12, %s16425_s12 }
 0xf33   : > { %9507 = vrot.lane.b32.xlu1 %v9498_v51, %s16418_s0  ;;  %v9373_v61 = vpop.permute.xlu0 %9372 }
 0xf36   : > { %9529 = vrot.lane.b32.xlu0 %v9459_v48, %s16420_s5 }
 0xf37   : > { %9270 = vrot.lane.b32.xlu1 %v9253_v7, %s16423_s9  ;;  %v9377_v36 = vpop.permute.xlu0 %9376 }
 0xf3a   : > { %9478 = vrot.lane.b32.xlu0 %v9468_v13, %s16416_s4 }
 0xf3b   : > { %9474 = vrot.lane.b32.xlu1 %v9466_v5, %s16416_s4  ;;  %v16171_v14 = vpop.permute.xlu0 %9380 }
 0xf3e   : > { %9435 = vrot.lane.b32.xlu0 %v16081_v39, %s16415_s10 }
 0xf3f   : > { %9374 = vrot.lane.b32.xlu1 %v9357_v16, %s16417_s2  ;;  %v16173_v25 = vpop.permute.xlu0 %9384 }
 0xf42   : > { %9509 = vrot.lane.b32.xlu0 %v9499_v37, %s16418_s0 }
 0xf43   : > { %9429 = vrot.lane.b32.xlu1 %v9412_v26, %s16415_s10  ;;  %v9428_v32 = vpop.permute.xlu0 %9427 }
 0xf46   : > { %9439 = vrot.lane.b32.xlu0 %v16081_v39, %s16415_s10  ;;  %v9624_v39 = vld [vmem:[%s16427_s3] sm:$0xff] }
 0xf47   : > { %9326 = vrot.lane.b32.xlu1 %v9462_v22, %s16425_s12  ;;  %s16428_s12 = sld [smem:[#allocation23_spill]]  ;;  %v16175_v8 = vpop.permute.xlu0 %9431 }
 0xf4a   : > { %9533 = vrot.lane.b32.xlu0 %v9461_v12, %s16420_s5  ;;  %v9595_v12 = vld [vmem:[#allocation3 + $0x4c0] sm:$0xff] }
 0xf4b   : > { %9282 = vrot.lane.b32.xlu1 %v9259_v33, %s16423_s9  ;;  %v10930_v37 = vpack.c.bf16 %v9595_v12, %v9594_v47 }
 0xf4d   : > { %v9613_v49 = vld [vmem:[%s16428_s12 + $0x8] sm:$0xff] }
 0xf4e   : > { %9560 = vrot.lane.b32.xlu0 %v9552_v20, %s16422_s8  ;;  %9724 = vmatprep.mubr.f32.mxu1 %v9613_v49 }
 0xf4f   : > { %9480 = vrot.lane.b32.xlu1 %v9469_v59, %s16416_s4 }
 0xf52   : > { %9564 = vrot.lane.b32.xlu0 %v9554_v23, %s16422_s8 }
 0xf53   : > { %9386 = vrot.lane.b32.xlu1 %v9363_v0, %s16417_s2 }
 0xf56   : > { %9630 = vperm.xlu0 %11062, %v9624_v39  }
 0xf57   : > { %9511 = vrot.lane.b32.xlu1 %v9500_v15, %s16418_s0 }
 0xf5a   : > { %9640 = vperm.xlu0 %11062, %v9626_v30  }
 0xf5b   : > { %9278 = vrot.lane.b32.xlu1 %v9257_v35, %s16423_s9  ;;  %s9993_s9 = sshll.u32 %s16431_s1, 3 }
 0xf5f   : > { %9433 = vrot.lane.b32.xlu1 %v9414_v40, %s16415_s10 }
 0xf63   : > { %9531 = vrot.lane.b32.xlu1 %v16102_v24, %s16420_s5 }
 0xf67   : > { %9382 = vrot.lane.b32.xlu1 %v9361_v19, %s16417_s2 }
 0xf6b   : > { %9441 = vrot.lane.b32.xlu1 %v9418_v55, %s16415_s10 }
 0xf6f   : > { %9437 = vrot.lane.b32.xlu1 %v9416_v2, %s16415_s10 }
 0xf73   : > { %9535 = vrot.lane.b32.xlu1 %v9462_v22, %s16420_s5  ;;  %s16429_s5 = sld [smem:[#allocation29_spill]] }
 0xf77   : > { %9562 = vrot.lane.b32.xlu1 %v9553_v17, %s16422_s8 }
 0xf7b   : > { %9566 = vrot.lane.b32.xlu1 %v9555_v54, %s16422_s8  ;;  %s1098_s8 = scalar_lea.vmem %s11593_s27, %s9993_s9 }
 0xf7f   : > { %9635 = vperm.xlu1 %11063, %v9625_v53  }
 0xf83   : > { %9645 = vperm.xlu1 %11063, %v9627_v3  }
 0xf98   : > { %v9319_v27 = vpop.permute.xlu0 %9318 }
 0xf99   : > { %v9329_v29 = vsel %vm8646_vm0, %v11328_v43, %v9319_v27  ;;  %v9315_v50 = vpop.permute.xlu1 %9314 }
 0xf9a   : > { %9337 = vst.msk [vmem:[#allocation3 + $0x140] sm:$0xff] %vm8548_vm2, %v9329_v29  ;;  %v9328_v58 = vsel %vm8646_vm0, %v11327_v18, %v9315_v50 }
 0xf9b   : > { %9336 = vst.msk [vmem:[#allocation3 + $0x100] sm:$0xff] %vm8548_vm2, %v9328_v58 }
 0xf9c   : > { %v9477_v62 = vpop.permute.xlu0 %9476 }
 0xf9d   : > { %9487 = vst.msk [vmem:[#allocation3 + $0x540] sm:$0xff] %vm8548_vm2, %v9477_v62  ;;  %v9275_v6 = vpop.permute.xlu1 %9274 }
 0xf9e   : > { %v9285_v28 = vsel %vm8601_vm8, %v9273_v46, %v9275_v6 }
 0xf9f   : > { %9293 = vst.msk [vmem:[#allocation3 + $0x40] sm:$0xff] %vm8548_vm2, %v9285_v28 }
 0xfa0   : > { %v9506_v42 = vpop.permute.xlu0 %9505 }
 0xfa1   : > { %9517 = vst.msk [vmem:[#allocation3 + $0x600] sm:$0xff] %vm8548_vm2, %v9506_v42  ;;  %v9379_v41 = vpop.permute.xlu1 %9378 }
 0xfa2   : > { %v9389_v52 = vsel %vm8707_vm12, %v9377_v36, %v9379_v41  ;;  %v9580_v3 = vld [vmem:[#allocation3 + $0x100] sm:$0xff] }
 0xfa3   : > { %9397 = vst.msk [vmem:[#allocation3 + $0x240] sm:$0xff] %vm8548_vm2, %v9389_v52 }
 0xfa4   : > { %v9323_v24 = vpop.permute.xlu0 %9322  ;;  %v9597_v36 = vld [vmem:[#allocation3 + $0x540] sm:$0xff] }
 0xfa5   : > { %v9330_v10 = vsel %vm8646_vm0, %v11332_v63, %v9323_v24  ;;  %v9508_v1 = vpop.permute.xlu1 %9507 }
 0xfa6   : > { %9338 = vst.msk [vmem:[#allocation3 + $0x180] sm:$0xff] %vm8548_vm2, %v9330_v10  ;;  %9518 = vst.msk [vmem:[#allocation3 + $0x640] sm:$0xff] %vm8548_vm2, %v9508_v1  ;;  %v9577_v13 = vld [vmem:[#allocation3 + $0x40] sm:$0xff] }
 0xfa8   : > { %v9530_v48 = vpop.permute.xlu0 %9529  ;;  %v9600_v28 = vld [vmem:[#allocation3 + $0x600] sm:$0xff] }
 0xfa9   : > { %9541 = vst.msk [vmem:[#allocation3 + $0x700] sm:$0xff] %vm8548_vm2, %v9530_v48  ;;  %v9271_v34 = vpop.permute.xlu1 %9270 }
 0xfaa   : > { %v9284_v56 = vsel %vm8601_vm8, %v16143_v38, %v9271_v34  ;;  %v9585_v24 = vld [vmem:[#allocation3 + $0x240] sm:$0xff] }
 0xfab   : > { %9292 = vst.msk [vmem:[#allocation3] sm:$0xff] %vm8548_vm2, %v9284_v56 }
 0xfac   : > { %v9479_v11 = vpop.permute.xlu0 %9478 }
 0xfad   : > { %9488 = vst.msk [vmem:[#allocation3 + $0x580] sm:$0xff] %vm8548_vm2, %v9479_v11  ;;  %v9475_v4 = vpop.permute.xlu1 %9474  ;;  %v9601_v50 = vld [vmem:[#allocation3 + $0x640] sm:$0xff] }
 0xfae   : > { %9486 = vst.msk [vmem:[#allocation3 + $0x500] sm:$0xff] %vm8548_vm2, %v9475_v4  ;;  %v9582_v62 = vld [vmem:[#allocation3 + $0x180] sm:$0xff]  ;;  %v10942_v42 = vpack.c.bf16 %v9601_v50, %v9600_v28 }
 0xfb0   : > { %v16196_v44 = vpop.permute.xlu0 %9435  ;;  %v9604_v47 = vld [vmem:[#allocation3 + $0x700] sm:$0xff] }
 0xfb1   : > { %v9375_v21 = vpop.permute.xlu1 %9374 }
 0xfb2   : > { %v9388_v51 = vsel %vm8707_vm12, %v9373_v61, %v9375_v21  ;;  %v9576_v7 = vld [vmem:[#allocation3] sm:$0xff] }
 0xfb3   : > { %9396 = vst.msk [vmem:[#allocation3 + $0x200] sm:$0xff] %vm8548_vm2, %v9388_v51  ;;  %v10928_v5 = vpack.c.bf16 %v9577_v13, %v9576_v7 }
 0xfb4   : > { %v9510_v16 = vpop.permute.xlu0 %9509  ;;  %v9598_v43 = vld [vmem:[#allocation3 + $0x580] sm:$0xff] }
 0xfb5   : > { %9519 = vst.msk [vmem:[#allocation3 + $0x680] sm:$0xff] %vm8548_vm2, %v9510_v16  ;;  %10929 = vmatpush3.bf16.msra.mxu1 %v10928_v5  ;;  %v9430_v26 = vpop.permute.xlu1 %9429  ;;  %v9596_v49 = vld [vmem:[#allocation3 + $0x500] sm:$0xff] }
 0xfb6   : > { %v9443_v22 = vsel %vm1531_vm3, %v9428_v32, %v9430_v26  ;;  %10931 = vmatprep.subr.bf16.mxu1 %v10930_v37  ;;  %v10934_v53 = vpack.c.bf16 %v9597_v36, %v9596_v49  ;;  %v9623_v49 = vld [vmem:[%s16428_s12 + $0x58] sm:$0xff] }
 0xfb7   : > { %9451 = vst.msk [vmem:[#allocation3 + $0x300] sm:$0xff] %vm8548_vm2, %v9443_v22 }
 0xfb8   : > { %v9440_v33 = vpop.permute.xlu0 %9439 }
 0xfb9   : > { %v9327_v20 = vpop.permute.xlu1 %9326 }
 0xfba   : > { %v9331_v59 = vsel %vm8646_vm0, %v11333_v60, %v9327_v20  ;;  %v9612_v20 = vld [vmem:[%s16428_s12] sm:$0xff] }
 0xfbb   : > { %9339 = vst.msk [vmem:[#allocation3 + $0x1c0] sm:$0xff] %vm8548_vm2, %v9331_v59 }
 0xfbc   : > { %v9534_v23 = vpop.permute.xlu0 %9533  ;;  %v9602_v1 = vld [vmem:[#allocation3 + $0x680] sm:$0xff] }
 0xfbd   : > { %9543 = vst.msk [vmem:[#allocation3 + $0x780] sm:$0xff] %vm8548_vm2, %v9534_v23  ;;  %v9283_v0 = vpop.permute.xlu1 %9282 }
 0xfbe   : > { %v9287_v39 = vsel %vm8601_vm8, %v16158_v45, %v9283_v0  ;;  %v9588_v7 = vld [vmem:[#allocation3 + $0x300] sm:$0xff] }
 0xfbf   : > { %9295 = vst.msk [vmem:[#allocation3 + $0xc0] sm:$0xff] %vm8548_vm2, %v9287_v39  ;;  %v9616_v39 = vld [vmem:[%s16428_s12 + $0x20] sm:$0xff] }
 0xfc0   : > { %v9561_v15 = vpop.permute.xlu0 %9560 }
 0xfc1   : > { %9572 = vst.msk [vmem:[#allocation3 + $0x800] sm:$0xff] %vm8548_vm2, %v9561_v15  ;;  %v9481_v38 = vpop.permute.xlu1 %9480  ;;  %v9615_v15 = vld [vmem:[%s16428_s12 + $0x18] sm:$0xff] }
 0xfc2   : > { %9489 = vst.msk [vmem:[#allocation3 + $0x5c0] sm:$0xff] %vm8548_vm2, %v9481_v38  ;;  %v9583_v27 = vld [vmem:[#allocation3 + $0x1c0] sm:$0xff] }
 0xfc3   : > { %v10940_v6 = vpack.c.bf16 %v9583_v27, %v9582_v62 }
 0xfc4   : > { %v9565_v30 = vpop.permute.xlu0 %9564  ;;  %v9606_v37 = vld [vmem:[#allocation3 + $0x780] sm:$0xff] }
 0xfc5   : > { %9574 = vst.msk [vmem:[#allocation3 + $0x880] sm:$0xff] %vm8548_vm2, %v9565_v30  ;;  %v9387_v35 = vpop.permute.xlu1 %9386 }
 0xfc6   : > { %v9391_v46 = vsel %vm8707_vm12, %v16173_v25, %v9387_v35  ;;  %v9579_v17 = vld [vmem:[#allocation3 + $0xc0] sm:$0xff] }
 0xfc7   : > { %9399 = vst.msk [vmem:[#allocation3 + $0x2c0] sm:$0xff] %vm8548_vm2, %v9391_v46  ;;  %v9581_v25 = vld [vmem:[#allocation3 + $0x140] sm:$0xff]  ;;  %v9619_v46 = vld [vmem:[%s16428_s12 + $0x38] sm:$0xff] }
 0xfc8   : > { %v9608_v59 = vld [vmem:[#allocation3 + $0x800] sm:$0xff] }
 0xfc9   : > { %v9512_v40 = vpop.permute.xlu1 %9511  ;;  %v9599_v32 = vld [vmem:[#allocation3 + $0x5c0] sm:$0xff] }
 0xfca   : > { %9520 = vst.msk [vmem:[#allocation3 + $0x6c0] sm:$0xff] %vm8548_vm2, %v9512_v40  ;;  %v10938_v18 = vpack.c.bf16 %v9599_v32, %v9598_v43  ;;  %v9618_v40 = vld [vmem:[%s16428_s12 + $0x30] sm:$0xff] }
 0xfcc   : > { %v9610_v38 = vld [vmem:[#allocation3 + $0x880] sm:$0xff] }
 0xfcd   : > { %v9279_v19 = vpop.permute.xlu1 %9278 }
 0xfce   : > { %v9286_v45 = vsel %vm8601_vm8, %v16152_v31, %v9279_v19  ;;  %v9587_v4 = vld [vmem:[#allocation3 + $0x2c0] sm:$0xff]  ;;  %v9622_v19 = vld [vmem:[%s16428_s12 + $0x50] sm:$0xff] }
 0xfcf   : > { %9294 = vst.msk [vmem:[#allocation3 + $0x80] sm:$0xff] %vm8548_vm2, %v9286_v45  ;;  %v9621_v45 = vld [vmem:[%s16428_s12 + $0x48] sm:$0xff] }
 0xfd1   : > { %v9434_v55 = vpop.permute.xlu1 %9433  ;;  %v9603_v52 = vld [vmem:[#allocation3 + $0x6c0] sm:$0xff] }
 0xfd2   : > { %v9444_v2 = vsel %vm1531_vm3, %v16175_v8, %v9434_v55  ;;  %v10936_v8 = vpack.c.bf16 %v9581_v25, %v9580_v3  ;;  %v10946_v48 = vpack.c.bf16 %v9603_v52, %v9602_v1  ;;  %v9614_v55 = vld [vmem:[%s16428_s12 + $0x10] sm:$0xff] }
 0xfd3   : > { %9452 = vst.msk [vmem:[#allocation3 + $0x340] sm:$0xff] %vm8548_vm2, %v9444_v2  ;;  %v9617_v2 = vld [vmem:[%s16428_s12 + $0x28] sm:$0xff] }
 0xfd5   : > { %v9532_v57 = vpop.permute.xlu1 %9531  ;;  %v9631_v43 = vpop.permute.xlu0 %9630 }
 0xfd6   : > { %9542 = vst.msk [vmem:[#allocation3 + $0x740] sm:$0xff] %vm8548_vm2, %v9532_v57  ;;  %v9578_v61 = vld [vmem:[#allocation3 + $0x80] sm:$0xff] }
 0xfd7   : > { %v10932_v54 = vpack.c.bf16 %v9579_v17, %v9578_v61  ;;  %v9620_v57 = vld [vmem:[%s16428_s12 + $0x40] sm:$0xff] }
 0xfd9   : > { %10933 = vmatpush3.bf16.msra.mxu1 %v10932_v54  ;;  %v9383_v31 = vpop.permute.xlu1 %9382 }
 0xfda   : > { %v9390_v9 = vsel %vm8707_vm12, %v16171_v14, %v9383_v31  ;;  %10935 = vmatprep.subr.bf16.mxu1 %v10934_v53  ;;  %v9584_v14 = vld [vmem:[#allocation3 + $0x200] sm:$0xff] }
 0xfdb   : > { %9398 = vst.msk [vmem:[#allocation3 + $0x280] sm:$0xff] %vm8548_vm2, %v9390_v9  ;;  %v10944_v10 = vpack.c.bf16 %v9585_v24, %v9584_v14  ;;  %v9589_v51 = vld [vmem:[#allocation3 + $0x340] sm:$0xff]  ;;  %v9641_v14 = vpop.permute.xlu0 %9640 }
 0xfdc   : > { %v10952_v13 = vpack.c.bf16 %v9589_v51, %v9588_v7 }
 0xfdd   : > { %10937 = vmatpush3.bf16.msra.mxu1 %v10936_v8  ;;  %v9442_v29 = vpop.permute.xlu1 %9441  ;;  %v9605_v11 = vld [vmem:[#allocation3 + $0x740] sm:$0xff] }
 0xfde   : > { %v9446_v58 = vsel %vm1531_vm3, %v9440_v33, %v9442_v29  ;;  %10939 = vmatprep.subr.bf16.mxu1 %v10938_v18  ;;  %v10950_v12 = vpack.c.bf16 %v9605_v11, %v9604_v47 }
 0xfdf   : > { %9454 = vst.msk [vmem:[#allocation3 + $0x3c0] sm:$0xff] %vm8548_vm2, %v9446_v58 }
 0xfe1   : > { %v9438_v41 = vpop.permute.xlu1 %9437  ;;  %10941 = vmatpush3.bf16.msra.mxu1 %v10940_v6 }
 0xfe2   : > { %v9445_v63 = vsel %vm1531_vm3, %v16196_v44, %v9438_v41  ;;  %10943 = vmatprep.subr.bf16.mxu1 %v10942_v42  ;;  %v9586_v34 = vld [vmem:[#allocation3 + $0x280] sm:$0xff] }
 0xfe3   : > { %9453 = vst.msk [vmem:[#allocation3 + $0x380] sm:$0xff] %vm8548_vm2, %v9445_v63  ;;  %v10948_v21 = vpack.c.bf16 %v9587_v4, %v9586_v34 }
 0xfe5   : > { %v9536_v56 = vpop.permute.xlu1 %9535  ;;  %10945 = vmatpush3.bf16.msra.mxu1 %v10944_v10 }
 0xfe6   : > { %9544 = vst.msk [vmem:[#allocation3 + $0x7c0] sm:$0xff] %vm8548_vm2, %v9536_v56  ;;  %10947 = vmatprep.subr.bf16.mxu1 %v10946_v48  ;;  %v9591_v60 = vld [vmem:[#allocation3 + $0x3c0] sm:$0xff] }
 0xfe9   : > { %v9563_v44 = vpop.permute.xlu1 %9562  ;;  %10949 = vmatpush3.bf16.msra.mxu1 %v10948_v21 }
 0xfea   : > { %9573 = vst.msk [vmem:[#allocation3 + $0x840] sm:$0xff] %vm8548_vm2, %v9563_v44  ;;  %10951 = vmatprep.subr.bf16.mxu1 %v10950_v12  ;;  %v9590_v5 = vld [vmem:[#allocation3 + $0x380] sm:$0xff] }
 0xfeb   : > { %v10956_v33 = vpack.c.bf16 %v9591_v60, %v9590_v5 }
 0xfed   : > { %v9567_v16 = vpop.permute.xlu1 %9566  ;;  %10953 = vmatpush3.bf16.msra.mxu1 %v10952_v13  ;;  %v9607_v26 = vld [vmem:[#allocation3 + $0x7c0] sm:$0xff] }
 0xfee   : > { %9575 = vst.msk [vmem:[#allocation3 + $0x8c0] sm:$0xff] %vm8548_vm2, %v9567_v16  ;;  %v10954_v22 = vpack.c.bf16 %v9607_v26, %v9606_v37  ;;  %v9859_v16 = vld [vmem:[%s16429_s5 + $0x8] sm:$0xff]  ;;  %v9858_v26 = vld [vmem:[%s16429_s5] sm:$0xff] }
 0xff0   : > { %10955 = vmatprep.subr.bf16.mxu1 %v10954_v22 }
 0xff1   : > { %10957 = vmatpush3.bf16.msra.mxu1 %v10956_v33  ;;  %v9609_v23 = vld [vmem:[#allocation3 + $0x840] sm:$0xff] }
 0xff2   : > { %v10958_v0 = vpack.c.bf16 %v9609_v23, %v9608_v59  ;;  %v9860_v59 = vld [vmem:[%s16429_s5 + $0x10] sm:$0xff] }
 0xff4   : > { %9725 = vmatmul.mubr.f32.vlgmr.msra.gmra.mrb[56].mxu1 %v9612_v20  ;;  %10959 = vmatprep.subr.bf16.mxu1 %v10958_v0 }
 0xff5   : > { %10961 = vmatpush3.bf16.msra.mxu1 %v10958_v0  ;;  %9729 = vmatprep.mubr.f32.mxu1 %v9616_v39  ;;  %v9611_v30 = vld [vmem:[#allocation3 + $0x8c0] sm:$0xff] }
 0xff6   : > { %v10962_v35 = vpack.c.bf16 %v9611_v30, %v9610_v38  ;;  %v9861_v30 = vld [vmem:[%s16429_s5 + $0x18] sm:$0xff] }
 0xff8   : > { %9730 = vmatmul.mubr.f32.gmra.mrb[58].mxu1 %v9615_v15  ;;  %10963 = vmatprep.subr.bf16.mxu1 %v10962_v35 }
 0xff9   : > { %10965 = vmatpush3.bf16.msra.mxu1 %v10962_v35  ;;  %9734 = vmatprep.mubr.f32.mxu1 %v9619_v46 }
 0xffc   : > { %9735 = vmatmul.mubr.f32.gmra.mrb[60].mxu1 %v9618_v40 }
 0xffd   : > { %9739 = vmatprep.mubr.f32.mxu1 %v9622_v19 }
 0xffe   : > { %v9636_v9 = vpop.permute.xlu1 %9635 }
0x1000   : > { %9740 = vmatmul.mubr.f32.gmra.mrb[62].mxu1 %v9621_v45 }
0x1001   : > { %10212 = vmatprep.mubr.msk.f32.mxu1 %vm1292_vm6, %v9614_v55 }
0x1002   : > { %v9646_v28 = vpop.permute.xlu1 %9645 }
0x1004   : > { %10213 = vmatmul.mubr.msk.f32.vlgmr.msra.gmra.mrb[64].mxu1 %vm1292_vm6, %v9617_v2 }
0x1005   : > { %10215 = vmatprep.mubr.msk.f32.mxu1 %vm1292_vm6, %v9620_v57 }
0x1008   : > { %10216 = vmatmul.mubr.msk.f32.gmra.mrb[66].mxu1 %vm1292_vm6, %v9623_v49 }
0x10c7   : > { %v10170_v61 = vpop.f32.mrb[56].mxu1 }
0x10c8   : > { %v10171_v17 = vpop.f32.mrb[57].mxu1 }
0x10c9   : > { %v10172_v54 = vadd.f32 %v10171_v17, %v10170_v61 }
0x10cb   : > { %v10173_v36 = vpop.f32.mrb[58].mxu1  ;;  %v9727_v58 = vadd.f32 %v10172_v54, %v9631_v43 }
0x10cc   : > { %v10174_v53 = vpop.f32.mrb[59].mxu1 }
0x10cd   : > { %v10175_v3 = vadd.f32 %v10174_v53, %v10173_v36  ;;  %v9879_v53 = vld [vmem:[%s11580_s30] sm:$0x1] }
0x10cf   : > { %v10176_v25 = vpop.f32.mrb[60].mxu1  ;;  %v9732_v29 = vadd.f32 %v10175_v3, %v9636_v9 }
0x10d0   : > { %v10177_v31 = vpop.f32.mrb[61].mxu1 }
0x10d1   : > { %v10178_v32 = vadd.f32 %v10177_v31, %v10176_v25 }
0x10d3   : > { %v10179_v8 = vpop.f32.mrb[62].mxu1  ;;  %v9737_v10 = vadd.f32 %v10178_v32, %v9641_v14  ;;  %v9884_v32 = vld [vmem:[%s11585_s6] sm:$0x1] }
0x10d4   : > { %v10180_v18 = vpop.f32.mrb[63].mxu1 }
0x10d5   : > { %v10181_v27 = vadd.f32 %v10180_v18, %v10179_v8  ;;  %v9890_v18 = vld [vmem:[#allocation4] sm:$0x1] }
0x10d7   : > { %v10214_v50 = vpop.f32.mrb[64].mxu1  ;;  %v9742_v52 = vadd.f32 %v10181_v27, %v9646_v28 }
0x10d8   : > { %v9817_v62 = vadd.f32 %v10214_v50, %v9732_v29  ;;  %v9811_v6 = vpop.f32.mrb[65].mxu1 }
0x10d9   : > { %v9812_v42 = vadd.f32 %v9811_v6, %v9727_v58 }
0x10da   : > { %v9835_v41 = vmul.f32 0.1, %v9817_v62  ;;  %vm9831_vm3 = vcmp.ge.f32.partialorder %v9817_v62, 0.0 }
0x10db   : > { %v9834_v63 = vmul.f32 0.1, %v9812_v42  ;;  %v10217_v24 = vpop.f32.mrb[66].mxu1  ;;  %vm9830_vm6 = vcmp.ge.f32.partialorder %v9812_v42, 0.0 }
0x10dc   : > { %v9827_v1 = vadd.f32 %v10217_v24, %v9742_v52  ;;  %v9821_v48 = vpop.f32.mrb[67].mxu1  ;;  %v9839_v34 = vsel %vm9831_vm3, %v9817_v62, %v9835_v41 }
0x10dd   : > { %v9822_v56 = vadd.f32 %v9821_v48, %v9737_v10  ;;  %v9845_v11 = vsel %vm8548_vm2, %v9839_v34, 0.0  ;;  %v9838_v4 = vsel %vm9830_vm6, %v9812_v42, %v9834_v63 }
0x10de   : > { %9846 = vadd.xlane.f32.xlu1 %v9845_v11  ;;  %v9842_v21 = vsel %vm8548_vm2, %v9838_v4, 0.0  ;;  %v9837_v47 = vmul.f32 0.1, %v9827_v1  ;;  %vm9833_vm4 = vcmp.ge.f32.partialorder %v9827_v1, 0.0 }
0x10df   : > { %v9836_v12 = vmul.f32 0.1, %v9822_v56  ;;  %9843 = vadd.xlane.f32.xlu0 %v9842_v21  ;;  %vm9832_vm1 = vcmp.ge.f32.partialorder %v9822_v56, 0.0 }
0x10e0   : > { %v9841_v7 = vsel %vm9833_vm4, %v9827_v1, %v9837_v47 }
0x10e1   : > { %v9840_v51 = vsel %vm9832_vm1, %v9822_v56, %v9836_v12  ;;  %v9851_v13 = vsel %vm8548_vm2, %v9841_v7, 0.0 }
0x10e2   : > { %v9848_v44 = vsel %vm8548_vm2, %v9840_v51, 0.0 }
0x10e3   : > { %9849 = vadd.xlane.f32.xlu0 %v9848_v44 }
0x10e7   : > { %9852 = vadd.xlane.f32.xlu0 %v9851_v13 }
0x116b   : > { %v9847_v5 = vpop.xlane.xlu1 %9846 }
0x116c   : > { %v9855_v37 = vmul.f32 0.015625, %v9847_v5  ;;  %v9844_v22 = vpop.xlane.xlu0 %9843 }
0x116d   : > { %v9854_v60 = vmul.f32 0.015625, %v9844_v22 }
0x116e   : > { %v9863_v33 = vmul.f32 %v9859_v16, %v9855_v37 }
0x116f   : > { %v9862_v20 = vmul.f32 %v9858_v26, %v9854_v60 }
0x1170   : > { %v9850_v23 = vpop.xlane.xlu0 %9849  ;;  %v9867_v39 = vsel %vm5171_vm13, %v9863_v33, 0.0 }
0x1171   : > { %v9856_v0 = vmul.f32 0.015625, %v9850_v23  ;;  %v9866_v15 = vsel %vm5171_vm13, %v9862_v20, 0.0 }
0x1172   : > { %v9868_v19 = vadd.f32 %v9867_v39, %v9866_v15 }
0x1173   : > { %v9864_v38 = vmul.f32 %v9860_v59, %v9856_v0 }
0x1174   : > { %v9853_v35 = vpop.xlane.xlu0 %9852 }
0x1175   : > { %v9869_v46 = vsel %vm5171_vm13, %v9864_v38, 0.0  ;;  %v9857_v40 = vmul.f32 0.015625, %v9853_v35 }
0x1176   : > { %v9870_v55 = vadd.f32 %v9869_v46, %v9868_v19 }
0x1177   : > { %v9865_v45 = vmul.f32 %v9861_v30, %v9857_v40 }
0x1179   : > { %v9871_v2 = vsel %vm5171_vm13, %v9865_v45, 0.0 }
0x117a   : > { %v9872_v57 = vadd.f32 %v9871_v2, %v9870_v55 }
0x117c   : > { %v9873_v49 = vrot.slane %v9872_v57, 4 }
0x117e   : > { %v9874_v61 = vadd.f32 %v9873_v49, %v9872_v57 }
0x1180   : > { %v9875_v17 = vrot.slane %v9874_v61, 2 }
0x1182   : > { %v9876_v54 = vadd.f32 %v9875_v17, %v9874_v61 }
0x1184   : > { %v9877_v36 = vrot.slane %v9876_v54, 1 }
0x1186   : > { %v9878_v3 = vadd.f32 %v9877_v36, %v9876_v54 }
0x1188   : > { %v9880_v25 = vadd.f32 %v9879_v53, %v9878_v3 }
0x118a   : > { %vm9881_vm5 = vcmp.ge.f32.partialorder %v9880_v25, 0.0  ;;  %v9882_v31 = vmul.f32 0.1, %v9880_v25 }
0x118c   : > { %v9883_v9 = vsel %vm9881_vm5, %v9880_v25, %v9882_v31 }
0x118d   : > { %v9885_v8 = vmul.f32 %v9884_v32, %v9883_v9 }
0x118f   : > { %v9887_v43 = vsel %vm9886_vm10, %v9885_v8, 0.0 }
0x1190   : > { %9888 = vadd.xlane.f32.xlu1 %v9887_v43 }
0x121d   : > { %v9889_v27 = vpop.xlane.xlu1 %9888 }
0x121e   : > { %v9891_v29 = vadd.f32 %v9890_v18, %v9889_v27 }
0x1220   : > { %10994 = vpush %v9891_v29 }
0x1251   : > { %s10995_s4 = spop %10994 }
0x1252   : > { %v9894_v50 = vstv %s10995_s4 }
0x1253   : > { %9896 = vst [vmem:[%s1098_s8] sm:$0xff] %v9894_v50 }
0x1254 PF: > { %s85_s28 = sadd.s32 1, %s11347_s28  }
0x1255   : > { %p82_p4 = scmp.ge.s32.totalorder %s85_s28, 4  }
0x1257   :  { %84 = sbr.rel (!%p82_p4) target bundleno = 71 (0x47), region = 232 }

</bundles_post_ra>
